<compile_context>
chip_gen: v7x
topology: tpu7x:2x2x1
jax: 0.10.0
libtpu: 0.0.40
codegen_flags: <defaults>
</compile_context>

<pallas_src>
import math

import jax
import jax.numpy as jnp
import numpy as np
from jax import lax
from jax.experimental import pallas as pl
from jax.experimental.pallas import tpu as pltpu


# ------------------------------ Pallas kernel ------------------------------- #

def _angle1_kernel(x2_ref, y_ref, m1_ref, b1c_ref, m2_ref, b2c_ref,
                   w1a_ref, w1y_ref, b1f_ref, w2f_ref, b2f_ref,
                   w3f_ref, b3f_ref, w4f_ref, b4f_ref,
                   o_ref, acc1_ref, p1_ref):
    f32 = jnp.float32

    # ---- conv1 (5x5, 3->12) + ReLU: 5 Toeplitz matmuls over kh, VMEM accumulator.
    xv = x2_ref[0]                                                # (52, 156) = (h, w*3+cin)
    acc1_ref[...] = jnp.dot(xv[0:48, :], m1_ref[0], preferred_element_type=f32)
    for kh in range(1, 5):
        acc1_ref[...] += jnp.dot(xv[kh:kh + 48, :], m1_ref[kh],
                                 preferred_element_type=f32)
    c1 = jnp.maximum(acc1_ref[...] + b1c_ref[...], 0.0)          # (48, 576), cols=(j, wp, co)

    # ---- maxpool 3x3 stride 3: max over j (3 contiguous lane blocks), then row triples.
    cw1 = jnp.maximum(jnp.maximum(c1[:, 0:192], c1[:, 192:384]), c1[:, 384:576])  # (48,192)
    for hp in range(16):
        r = jnp.maximum(jnp.maximum(cw1[3 * hp:3 * hp + 1, :],
                                    cw1[3 * hp + 1:3 * hp + 2, :]),
                        cw1[3 * hp + 2:3 * hp + 3, :])
        p1_ref[hp:hp + 1, :] = r                                  # p1: (16, 192) = (hp, wp*12+c)

    # ---- conv2 (5x5, 12->24) + ReLU: same Toeplitz scheme on the pooled map.
    pv = p1_ref[...]                                              # (16, 192)
    acc2 = jnp.dot(pv[0:12, :], m2_ref[0], preferred_element_type=f32)
    for kh in range(1, 5):
        acc2 = acc2 + jnp.dot(pv[kh:kh + 12, :], m2_ref[kh], preferred_element_type=f32)
    c2 = jnp.maximum(acc2 + b2c_ref[...], 0.0)                    # (12, 288), cols=(j, wp, co)

    # ---- maxpool + fc1, flatten-free: one (1,96)x(96,512) matmul per pooled row
    #      (fc1 weight rows were pre-permuted to the (hp, wp, co) order), plus y's rows.
    cw2 = jnp.maximum(jnp.maximum(c2[:, 0:96], c2[:, 96:192]), c2[:, 192:288])    # (12, 96)
    h = jnp.dot(y_ref[0], w1y_ref[...], preferred_element_type=f32)               # (1, 512)
    for hp in range(4):
        r = jnp.maximum(jnp.maximum(cw2[3 * hp:3 * hp + 1, :],
                                    cw2[3 * hp + 1:3 * hp + 2, :]),
                        cw2[3 * hp + 2:3 * hp + 3, :])            # (1, 96)
        h = h + jnp.dot(r, w1a_ref[hp], preferred_element_type=f32)
    h = jnp.maximum(h + b1f_ref[...], 0.0)

    # ---- fc2..fc4 (ReLU between, none on the last).
    h = jnp.maximum(jnp.dot(h, w2f_ref[...], preferred_element_type=f32) + b2f_ref[...], 0.0)
    h = jnp.maximum(jnp.dot(h, w3f_ref[...], preferred_element_type=f32) + b3f_ref[...], 0.0)
    o_ref[0] = jnp.dot(h, w4f_ref[...], preferred_element_type=f32) + b4f_ref[...]


# ------------------------------ Pallas wrapper ------------------------------ #

def angle1_forward(x_nchw, y, pk):
    B = x_nchw.shape[0]
    assert x_nchw.shape[1:] == (3, 52, 52), "Angle1 requires 3x52x52 inputs (fc1 = 24*4*4+2)"
    assert y.shape == (B, 2)

    # NCHW -> NHWC, flatten (W, Cin) onto the lane axis:  (B, 52, 156)
    x2 = jnp.transpose(x_nchw, (0, 2, 3, 1)).astype(jnp.float32).reshape(B, 52, 52 * 3)
    # y padded to a full 128-lane row (zero rows in the packed fc1-y weight).
    y3 = jnp.pad(y.astype(jnp.float32).reshape(B, 1, 2), ((0, 0), (0, 0), (0, 126)))

    out = pl.pallas_call(
        _angle1_kernel,
        out_shape=jax.ShapeDtypeStruct((B, 1, 8), jnp.float32),
        grid_spec=pltpu.PrefetchScalarGridSpec(
            num_scalar_prefetch=0,
            grid=(B,),
            in_specs=[
                pl.BlockSpec((1, 52, 156), lambda b: (b, 0, 0)),    # x2
                pl.BlockSpec((1, 1, 128), lambda b: (b, 0, 0)),     # y (padded)
                pl.BlockSpec((5, 156, 576), lambda b: (0, 0, 0)),   # conv1 Toeplitz
                pl.BlockSpec((1, 576), lambda b: (0, 0)),           # conv1 bias (tiled)
                pl.BlockSpec((5, 192, 288), lambda b: (0, 0, 0)),   # conv2 Toeplitz
                pl.BlockSpec((1, 288), lambda b: (0, 0)),           # conv2 bias (tiled)
                pl.BlockSpec((4, 96, 512), lambda b: (0, 0, 0)),    # fc1 (conv features, grouped)
                pl.BlockSpec((128, 512), lambda b: (0, 0)),         # fc1 (y rows, zero-padded)
                pl.BlockSpec((1, 512), lambda b: (0, 0)),           # fc1 bias
                pl.BlockSpec((512, 256), lambda b: (0, 0)),         # fc2 w
                pl.BlockSpec((1, 256), lambda b: (0, 0)),           # fc2 b
                pl.BlockSpec((256, 128), lambda b: (0, 0)),         # fc3 w
                pl.BlockSpec((1, 128), lambda b: (0, 0)),           # fc3 b
                pl.BlockSpec((128, 8), lambda b: (0, 0)),           # fc4 w
                pl.BlockSpec((1, 8), lambda b: (0, 0)),             # fc4 b
            ],
            out_specs=pl.BlockSpec((1, 1, 8), lambda b: (b, 0, 0)),
            scratch_shapes=[
                pltpu.VMEM((48, 576), jnp.float32),   # conv1 accumulator
                pltpu.VMEM((16, 192), jnp.float32),   # pool1 feature map
            ],
        ),
        compiler_params=pltpu.CompilerParams(
            dimension_semantics=("parallel",),
            vmem_limit_bytes=32 * 1024 * 1024,
        ),
    )(x2, y3, pk["m1"], pk["b1c"], pk["m2"], pk["b2c"],
      pk["w1a"], pk["w1y"], pk["b1f"], pk["w2f"], pk["b2f"],
      pk["w3f"], pk["b3f"], pk["w4f"], pk["b4f"])
    return out.reshape(B, 8)


# --------------------------- weight prepacking ------------------------------ #

def _toeplitz(conv_w, w_in, w_out, n_pool):
    """conv weight (Co,Ci,KH,KW) -> (KH, w_in*Ci, w_out*Co) with output columns
    ordered (j, wp, co) where wout = 3*wp + j, so W-pooling is 3 contiguous blocks."""
    Co, Ci, KH, KW = conv_w.shape
    sel = np.zeros((w_out, KW, w_in), np.float32)
    for w in range(w_out):
        for k in range(KW):
            sel[w, k, w + k] = 1.0
    # M[kh, win, ci, wout, co] = conv_w[co, ci, kh, win - wout] (0 when out of window)
    m = jnp.einsum('wkv,oick->cviwo', jnp.asarray(sel), conv_w)
    order = np.array([3 * wp + j for j in range(3) for wp in range(n_pool)], np.int32)
    m = m[:, :, :, jnp.asarray(order), :]
    return m.reshape(KH, w_in * Ci, w_out * Co)


def pack_params(p):
    """One-time prepack of the torch-style parameters for the fused kernel."""
    m1 = _toeplitz(p["conv1_w"], 52, 48, 16)          # (5, 156, 576)
    b1c = jnp.tile(p["conv1_b"], 48).reshape(1, 576)
    m2 = _toeplitz(p["conv2_w"], 16, 12, 4)           # (5, 192, 288)
    b2c = jnp.tile(p["conv2_b"], 12).reshape(1, 288)

    # fc1: first 384 rows correspond to torch's NCHW flatten (co*16 + hp*4 + wp).
    # Regroup them per pooled row hp, inner order (wp, co) to match the kernel layout.
    fc1_w = p["fc1_w"]                                # (386, 512)
    idx = np.zeros((4, 96), np.int32)
    for hp in range(4):
        for wp in range(4):
            for co in range(24):
                idx[hp, wp * 24 + co] = co * 16 + hp * 4 + wp
    w1a = fc1_w[jnp.asarray(idx), :]                  # (4, 96, 512)
    w1y = jnp.pad(fc1_w[384:386, :], ((0, 126), (0, 0)))   # (128, 512), zero-padded rows

    return dict(
        m1=m1, b1c=b1c, m2=m2, b2c=b2c,
        w1a=w1a, w1y=w1y, b1f=p["fc1_b"].reshape(1, -1),
        w2f=p["fc2_w"], b2f=p["fc2_b"].reshape(1, -1),
        w3f=p["fc3_w"], b3f=p["fc3_b"].reshape(1, -1),
        w4f=p["fc4_w"], b4f=p["fc4_b"].reshape(1, -1),
    )


# ------------------------------- parameters --------------------------------- #

def init_params(key):
    def u(k, shape, fan_in):
        bound = 1.0 / math.sqrt(fan_in)
        return jax.random.uniform(k, shape, jnp.float32, -bound, bound)

    ks = jax.random.split(key, 16)
    p = {}
    p["conv1_w"] = u(ks[0], (12, 3, 5, 5), 3 * 25)     # OIHW, like torch
    p["conv1_b"] = u(ks[1], (12,), 3 * 25)
    p["conv2_w"] = u(ks[2], (24, 12, 5, 5), 12 * 25)
    p["conv2_b"] = u(ks[3], (24,), 12 * 25)
    # conv3 (24 -> 36, 5x5) exists in the torch __init__ but is never used in forward(); omitted.
    fc_dims = [(24 * 4 * 4 + 2, 512), (512, 256), (256, 128), (128, 8)]
    for n, (din, dout) in enumerate(fc_dims, start=1):
        p[f"fc{n}_w"] = u(ks[2 * n + 2], (din, dout), din)   # stored as (in, out)
        p[f"fc{n}_b"] = u(ks[2 * n + 3], (dout,), din)
    return p


# ------------------------------ pure-JAX ref --------------------------------- #

def angle1_reference(x_nchw, y, p):
    dn = ("NCHW", "OIHW", "NCHW")
    o = lax.conv_general_dilated(x_nchw, p["conv1_w"], (1, 1), "VALID", dimension_numbers=dn)
    o = jax.nn.relu(o + p["conv1_b"][None, :, None, None])
    o = lax.reduce_window(o, -jnp.inf, lax.max, (1, 1, 3, 3), (1, 1, 3, 3), "VALID")
    o = lax.conv_general_dilated(o, p["conv2_w"], (1, 1), "VALID", dimension_numbers=dn)
    o = jax.nn.relu(o + p["conv2_b"][None, :, None, None])
    o = lax.reduce_window(o, -jnp.inf, lax.max, (1, 1, 3, 3), (1, 1, 3, 3), "VALID")
    h = jnp.concatenate([o.reshape(o.shape[0], -1), y], axis=1)
    h = jax.nn.relu(h @ p["fc1_w"] + p["fc1_b"])
    h = jax.nn.relu(h @ p["fc2_w"] + p["fc2_b"])
    h = jax.nn.relu(h @ p["fc3_w"] + p["fc3_b"])
    return h @ p["fc4_w"] + p["fc4_b"]


# ---------------------------------- main ------------------------------------- #

if __name__ == "__main__":
    key = jax.random.PRNGKey(0)
    kx, ky = jax.random.split(key)
    B = 2
    # 52x52 input -> conv1(5) 48 -> pool3 16 -> conv2(5) 12 -> pool3 4  (== 24*4*4 flatten)
    x = jax.random.normal(kx, (B, 3, 52, 52), dtype=jnp.float32)   # NCHW like PyTorch
    y = jax.random.normal(ky, (B, 2), dtype=jnp.float32)

    params = init_params(jax.random.PRNGKey(42))
    packed = pack_params(params)          # one-time weight prepack (outside the forward)

    fwd = jax.jit(angle1_forward)
    out = fwd(x, y, packed)
    out = jax.block_until_ready(out)
    assert out.shape == (B, 8)

    ref = angle1_reference(x, y, params)
    np.testing.assert_allclose(np.asarray(out), np.asarray(ref), rtol=2e-2, atol=2e-2)

    print("KERNEL_OK")
</pallas_src>

<mosaic_0001>
module attributes {stable_mosaic.version = 11 : i64} {
  func.func @_angle1_kernel(%arg0: i32, %arg1: memref<1x52x156xf32, #tpu.memory_space<vmem>>, %arg2: memref<1x1x128xf32, #tpu.memory_space<vmem>>, %arg3: memref<5x156x576xf32, #tpu.memory_space<vmem>>, %arg4: memref<1x576xf32, #tpu.memory_space<vmem>>, %arg5: memref<5x192x288xf32, #tpu.memory_space<vmem>>, %arg6: memref<1x288xf32, #tpu.memory_space<vmem>>, %arg7: memref<4x96x512xf32, #tpu.memory_space<vmem>>, %arg8: memref<128x512xf32, #tpu.memory_space<vmem>>, %arg9: memref<1x512xf32, #tpu.memory_space<vmem>>, %arg10: memref<512x256xf32, #tpu.memory_space<vmem>>, %arg11: memref<1x256xf32, #tpu.memory_space<vmem>>, %arg12: memref<256x128xf32, #tpu.memory_space<vmem>>, %arg13: memref<1x128xf32, #tpu.memory_space<vmem>>, %arg14: memref<128x8xf32, #tpu.memory_space<vmem>>, %arg15: memref<1x8xf32, #tpu.memory_space<vmem>>, %arg16: memref<1x1x8xf32, #tpu.memory_space<vmem>>, %arg17: memref<48x576xf32, #tpu.memory_space<vmem>>, %arg18: memref<16x192xf32, #tpu.memory_space<vmem>>) attributes {dimension_semantics = [#tpu.dimension_semantics<parallel>], iteration_bounds = array<i64: 2>, scalar_prefetch = 0 : i64, scratch_operands = 2 : i64, tpu.core_type = #tpu.core_type<tc>, window_params = [{transform_indices = @transform_0, window_bounds = array<i64: 1, 52, 156>}, {transform_indices = @transform_1, window_bounds = array<i64: 1, 1, 128>}, {pipeline_mode = #tpu.pipeline_mode<synchronous>, transform_indices = @transform_2, window_bounds = array<i64: 5, 156, 576>}, {pipeline_mode = #tpu.pipeline_mode<synchronous>, transform_indices = @transform_3, window_bounds = array<i64: 1, 576>}, {pipeline_mode = #tpu.pipeline_mode<synchronous>, transform_indices = @transform_4, window_bounds = array<i64: 5, 192, 288>}, {pipeline_mode = #tpu.pipeline_mode<synchronous>, transform_indices = @transform_5, window_bounds = array<i64: 1, 288>}, {pipeline_mode = #tpu.pipeline_mode<synchronous>, transform_indices = @transform_6, window_bounds = array<i64: 4, 96, 512>}, {pipeline_mode = #tpu.pipeline_mode<synchronous>, transform_indices = @transform_7, window_bounds = array<i64: 128, 512>}, {pipeline_mode = #tpu.pipeline_mode<synchronous>, transform_indices = @transform_8, window_bounds = array<i64: 1, 512>}, {pipeline_mode = #tpu.pipeline_mode<synchronous>, transform_indices = @transform_9, window_bounds = array<i64: 512, 256>}, {pipeline_mode = #tpu.pipeline_mode<synchronous>, transform_indices = @transform_10, window_bounds = array<i64: 1, 256>}, {pipeline_mode = #tpu.pipeline_mode<synchronous>, transform_indices = @transform_11, window_bounds = array<i64: 256, 128>}, {pipeline_mode = #tpu.pipeline_mode<synchronous>, transform_indices = @transform_12, window_bounds = array<i64: 1, 128>}, {pipeline_mode = #tpu.pipeline_mode<synchronous>, transform_indices = @transform_13, window_bounds = array<i64: 128, 8>}, {pipeline_mode = #tpu.pipeline_mode<synchronous>, transform_indices = @transform_14, window_bounds = array<i64: 1, 8>}, {transform_indices = @transform_15, window_bounds = array<i64: 1, 1, 8>}]} {
    %c0 = arith.constant 0 : index
    %c0_0 = arith.constant 0 : index
    %c0_1 = arith.constant 0 : index
    %0 = vector.load %arg1[%c0, %c0_0, %c0_1] : memref<1x52x156xf32, #tpu.memory_space<vmem>>, vector<1x52x156xf32>
    %1 = vector.shape_cast %0 : vector<1x52x156xf32> to vector<52x156xf32>
    %2 = vector.extract_strided_slice %1 {offsets = [0, 0], sizes = [48, 156], strides = [1, 1]} : vector<52x156xf32> to vector<48x156xf32>
    %c0_2 = arith.constant 0 : index
    %c0_3 = arith.constant 0 : index
    %c0_4 = arith.constant 0 : index
    %3 = vector.load %arg3[%c0_2, %c0_3, %c0_4] : memref<5x156x576xf32, #tpu.memory_space<vmem>>, vector<1x156x576xf32>
    %4 = vector.shape_cast %3 : vector<1x156x576xf32> to vector<156x576xf32>
    %cst = arith.constant dense<0.000000e+00> : vector<48x576xf32>
    %5 = tpu.matmul %2, %4, %cst {dimension_numbers = #tpu.dot_dimension_numbers<[1], [0], [0], [1], [0, 0, 1, 1], [], []>} : vector<48x156xf32>, vector<156x576xf32>, vector<48x576xf32> -> vector<48x576xf32>
    %c0_5 = arith.constant 0 : index
    %c0_6 = arith.constant 0 : index
    %6 = vector.load %arg17[%c0_5, %c0_6] : memref<48x576xf32, #tpu.memory_space<vmem>>, vector<48x576xf32>
    tpu.vector_store %arg17[%c0_5, %c0_6], %5 {strides = array<i32>} : memref<48x576xf32, #tpu.memory_space<vmem>>, vector<48x576xf32>,
    %c0_7 = arith.constant 0 : index
    %c0_8 = arith.constant 0 : index
    %7 = vector.load %arg17[%c0_7, %c0_8] : memref<48x576xf32, #tpu.memory_space<vmem>>, vector<48x576xf32>
    %8 = vector.extract_strided_slice %1 {offsets = [1, 0], sizes = [48, 156], strides = [1, 1]} : vector<52x156xf32> to vector<48x156xf32>
    %c1 = arith.constant 1 : index
    %c0_9 = arith.constant 0 : index
    %c0_10 = arith.constant 0 : index
    %9 = vector.load %arg3[%c1, %c0_9, %c0_10] : memref<5x156x576xf32, #tpu.memory_space<vmem>>, vector<1x156x576xf32>
    %10 = vector.shape_cast %9 : vector<1x156x576xf32> to vector<156x576xf32>
    %cst_11 = arith.constant dense<0.000000e+00> : vector<48x576xf32>
    %11 = tpu.matmul %8, %10, %cst_11 {dimension_numbers = #tpu.dot_dimension_numbers<[1], [0], [0], [1], [0, 0, 1, 1], [], []>} : vector<48x156xf32>, vector<156x576xf32>, vector<48x576xf32> -> vector<48x576xf32>
    %12 = arith.addf %7, %11 : vector<48x576xf32>
    %c0_12 = arith.constant 0 : index
    %c0_13 = arith.constant 0 : index
    %13 = vector.load %arg17[%c0_12, %c0_13] : memref<48x576xf32, #tpu.memory_space<vmem>>, vector<48x576xf32>
    tpu.vector_store %arg17[%c0_12, %c0_13], %12 {strides = array<i32>} : memref<48x576xf32, #tpu.memory_space<vmem>>, vector<48x576xf32>,
    %c0_14 = arith.constant 0 : index
    %c0_15 = arith.constant 0 : index
    %14 = vector.load %arg17[%c0_14, %c0_15] : memref<48x576xf32, #tpu.memory_space<vmem>>, vector<48x576xf32>
    %15 = vector.extract_strided_slice %1 {offsets = [2, 0], sizes = [48, 156], strides = [1, 1]} : vector<52x156xf32> to vector<48x156xf32>
    %c2 = arith.constant 2 : index
    %c0_16 = arith.constant 0 : index
    %c0_17 = arith.constant 0 : index
    %16 = vector.load %arg3[%c2, %c0_16, %c0_17] : memref<5x156x576xf32, #tpu.memory_space<vmem>>, vector<1x156x576xf32>
    %17 = vector.shape_cast %16 : vector<1x156x576xf32> to vector<156x576xf32>
    %cst_18 = arith.constant dense<0.000000e+00> : vector<48x576xf32>
    %18 = tpu.matmul %15, %17, %cst_18 {dimension_numbers = #tpu.dot_dimension_numbers<[1], [0], [0], [1], [0, 0, 1, 1], [], []>} : vector<48x156xf32>, vector<156x576xf32>, vector<48x576xf32> -> vector<48x576xf32>
    %19 = arith.addf %14, %18 : vector<48x576xf32>
    %c0_19 = arith.constant 0 : index
    %c0_20 = arith.constant 0 : index
    %20 = vector.load %arg17[%c0_19, %c0_20] : memref<48x576xf32, #tpu.memory_space<vmem>>, vector<48x576xf32>
    tpu.vector_store %arg17[%c0_19, %c0_20], %19 {strides = array<i32>} : memref<48x576xf32, #tpu.memory_space<vmem>>, vector<48x576xf32>,
    %c0_21 = arith.constant 0 : index
    %c0_22 = arith.constant 0 : index
    %21 = vector.load %arg17[%c0_21, %c0_22] : memref<48x576xf32, #tpu.memory_space<vmem>>, vector<48x576xf32>
    %22 = vector.extract_strided_slice %1 {offsets = [3, 0], sizes = [48, 156], strides = [1, 1]} : vector<52x156xf32> to vector<48x156xf32>
    %c3 = arith.constant 3 : index
    %c0_23 = arith.constant 0 : index
    %c0_24 = arith.constant 0 : index
    %23 = vector.load %arg3[%c3, %c0_23, %c0_24] : memref<5x156x576xf32, #tpu.memory_space<vmem>>, vector<1x156x576xf32>
    %24 = vector.shape_cast %23 : vector<1x156x576xf32> to vector<156x576xf32>
    %cst_25 = arith.constant dense<0.000000e+00> : vector<48x576xf32>
    %25 = tpu.matmul %22, %24, %cst_25 {dimension_numbers = #tpu.dot_dimension_numbers<[1], [0], [0], [1], [0, 0, 1, 1], [], []>} : vector<48x156xf32>, vector<156x576xf32>, vector<48x576xf32> -> vector<48x576xf32>
    %26 = arith.addf %21, %25 : vector<48x576xf32>
    %c0_26 = arith.constant 0 : index
    %c0_27 = arith.constant 0 : index
    %27 = vector.load %arg17[%c0_26, %c0_27] : memref<48x576xf32, #tpu.memory_space<vmem>>, vector<48x576xf32>
    tpu.vector_store %arg17[%c0_26, %c0_27], %26 {strides = array<i32>} : memref<48x576xf32, #tpu.memory_space<vmem>>, vector<48x576xf32>,
    %c0_28 = arith.constant 0 : index
    %c0_29 = arith.constant 0 : index
    %28 = vector.load %arg17[%c0_28, %c0_29] : memref<48x576xf32, #tpu.memory_space<vmem>>, vector<48x576xf32>
    %29 = vector.extract_strided_slice %1 {offsets = [4, 0], sizes = [48, 156], strides = [1, 1]} : vector<52x156xf32> to vector<48x156xf32>
    %c4 = arith.constant 4 : index
    %c0_30 = arith.constant 0 : index
    %c0_31 = arith.constant 0 : index
    %30 = vector.load %arg3[%c4, %c0_30, %c0_31] : memref<5x156x576xf32, #tpu.memory_space<vmem>>, vector<1x156x576xf32>
    %31 = vector.shape_cast %30 : vector<1x156x576xf32> to vector<156x576xf32>
    %cst_32 = arith.constant dense<0.000000e+00> : vector<48x576xf32>
    %32 = tpu.matmul %29, %31, %cst_32 {dimension_numbers = #tpu.dot_dimension_numbers<[1], [0], [0], [1], [0, 0, 1, 1], [], []>} : vector<48x156xf32>, vector<156x576xf32>, vector<48x576xf32> -> vector<48x576xf32>
    %33 = arith.addf %28, %32 : vector<48x576xf32>
    %c0_33 = arith.constant 0 : index
    %c0_34 = arith.constant 0 : index
    %34 = vector.load %arg17[%c0_33, %c0_34] : memref<48x576xf32, #tpu.memory_space<vmem>>, vector<48x576xf32>
    tpu.vector_store %arg17[%c0_33, %c0_34], %33 {strides = array<i32>} : memref<48x576xf32, #tpu.memory_space<vmem>>, vector<48x576xf32>,
    %c0_35 = arith.constant 0 : index
    %c0_36 = arith.constant 0 : index
    %35 = vector.load %arg17[%c0_35, %c0_36] : memref<48x576xf32, #tpu.memory_space<vmem>>, vector<48x576xf32>
    %c0_37 = arith.constant 0 : index
    %c0_38 = arith.constant 0 : index
    %36 = vector.load %arg4[%c0_37, %c0_38] : memref<1x576xf32, #tpu.memory_space<vmem>>, vector<1x576xf32>
    %37 = vector.broadcast %36 : vector<1x576xf32> to vector<48x576xf32>
    %38 = arith.addf %35, %37 : vector<48x576xf32>
    %cst_39 = arith.constant 0.000000e+00 : f32
    %39 = vector.broadcast %cst_39 : f32 to vector<48x576xf32>
    %40 = arith.maximumf %38, %39 : vector<48x576xf32>
    %41 = vector.extract_strided_slice %40 {offsets = [0, 0], sizes = [48, 192], strides = [1, 1]} : vector<48x576xf32> to vector<48x192xf32>
    %42 = vector.extract_strided_slice %40 {offsets = [0, 192], sizes = [48, 192], strides = [1, 1]} : vector<48x576xf32> to vector<48x192xf32>
    %43 = arith.maximumf %41, %42 : vector<48x192xf32>
    %44 = vector.extract_strided_slice %40 {offsets = [0, 384], sizes = [48, 192], strides = [1, 1]} : vector<48x576xf32> to vector<48x192xf32>
    %45 = arith.maximumf %43, %44 : vector<48x192xf32>
    %46 = vector.extract_strided_slice %45 {offsets = [0, 0], sizes = [1, 192], strides = [1, 1]} : vector<48x192xf32> to vector<1x192xf32>
    %47 = vector.extract_strided_slice %45 {offsets = [1, 0], sizes = [1, 192], strides = [1, 1]} : vector<48x192xf32> to vector<1x192xf32>
    %48 = arith.maximumf %46, %47 : vector<1x192xf32>
    %49 = vector.extract_strided_slice %45 {offsets = [2, 0], sizes = [1, 192], strides = [1, 1]} : vector<48x192xf32> to vector<1x192xf32>
    %50 = arith.maximumf %48, %49 : vector<1x192xf32>
    %c0_40 = arith.constant 0 : index
    %c0_41 = arith.constant 0 : index
    %51 = vector.load %arg18[%c0_40, %c0_41] : memref<16x192xf32, #tpu.memory_space<vmem>>, vector<1x192xf32>
    tpu.vector_store %arg18[%c0_40, %c0_41], %50 {strides = array<i32>} : memref<16x192xf32, #tpu.memory_space<vmem>>, vector<1x192xf32>,
    %52 = vector.extract_strided_slice %45 {offsets = [3, 0], sizes = [1, 192], strides = [1, 1]} : vector<48x192xf32> to vector<1x192xf32>
    %53 = vector.extract_strided_slice %45 {offsets = [4, 0], sizes = [1, 192], strides = [1, 1]} : vector<48x192xf32> to vector<1x192xf32>
    %54 = arith.maximumf %52, %53 : vector<1x192xf32>
    %55 = vector.extract_strided_slice %45 {offsets = [5, 0], sizes = [1, 192], strides = [1, 1]} : vector<48x192xf32> to vector<1x192xf32>
    %56 = arith.maximumf %54, %55 : vector<1x192xf32>
    %c1_42 = arith.constant 1 : index
    %c0_43 = arith.constant 0 : index
    %57 = vector.load %arg18[%c1_42, %c0_43] : memref<16x192xf32, #tpu.memory_space<vmem>>, vector<1x192xf32>
    tpu.vector_store %arg18[%c1_42, %c0_43], %56 {strides = array<i32>} : memref<16x192xf32, #tpu.memory_space<vmem>>, vector<1x192xf32>,
    %58 = vector.extract_strided_slice %45 {offsets = [6, 0], sizes = [1, 192], strides = [1, 1]} : vector<48x192xf32> to vector<1x192xf32>
    %59 = vector.extract_strided_slice %45 {offsets = [7, 0], sizes = [1, 192], strides = [1, 1]} : vector<48x192xf32> to vector<1x192xf32>
    %60 = arith.maximumf %58, %59 : vector<1x192xf32>
    %61 = vector.extract_strided_slice %45 {offsets = [8, 0], sizes = [1, 192], strides = [1, 1]} : vector<48x192xf32> to vector<1x192xf32>
    %62 = arith.maximumf %60, %61 : vector<1x192xf32>
    %c2_44 = arith.constant 2 : index
    %c0_45 = arith.constant 0 : index
    %63 = vector.load %arg18[%c2_44, %c0_45] : memref<16x192xf32, #tpu.memory_space<vmem>>, vector<1x192xf32>
    tpu.vector_store %arg18[%c2_44, %c0_45], %62 {strides = array<i32>} : memref<16x192xf32, #tpu.memory_space<vmem>>, vector<1x192xf32>,
    %64 = vector.extract_strided_slice %45 {offsets = [9, 0], sizes = [1, 192], strides = [1, 1]} : vector<48x192xf32> to vector<1x192xf32>
    %65 = vector.extract_strided_slice %45 {offsets = [10, 0], sizes = [1, 192], strides = [1, 1]} : vector<48x192xf32> to vector<1x192xf32>
    %66 = arith.maximumf %64, %65 : vector<1x192xf32>
    %67 = vector.extract_strided_slice %45 {offsets = [11, 0], sizes = [1, 192], strides = [1, 1]} : vector<48x192xf32> to vector<1x192xf32>
    %68 = arith.maximumf %66, %67 : vector<1x192xf32>
    %c3_46 = arith.constant 3 : index
    %c0_47 = arith.constant 0 : index
    %69 = vector.load %arg18[%c3_46, %c0_47] : memref<16x192xf32, #tpu.memory_space<vmem>>, vector<1x192xf32>
    tpu.vector_store %arg18[%c3_46, %c0_47], %68 {strides = array<i32>} : memref<16x192xf32, #tpu.memory_space<vmem>>, vector<1x192xf32>,
    %70 = vector.extract_strided_slice %45 {offsets = [12, 0], sizes = [1, 192], strides = [1, 1]} : vector<48x192xf32> to vector<1x192xf32>
    %71 = vector.extract_strided_slice %45 {offsets = [13, 0], sizes = [1, 192], strides = [1, 1]} : vector<48x192xf32> to vector<1x192xf32>
    %72 = arith.maximumf %70, %71 : vector<1x192xf32>
    %73 = vector.extract_strided_slice %45 {offsets = [14, 0], sizes = [1, 192], strides = [1, 1]} : vector<48x192xf32> to vector<1x192xf32>
    %74 = arith.maximumf %72, %73 : vector<1x192xf32>
    %c4_48 = arith.constant 4 : index
    %c0_49 = arith.constant 0 : index
    %75 = vector.load %arg18[%c4_48, %c0_49] : memref<16x192xf32, #tpu.memory_space<vmem>>, vector<1x192xf32>
    tpu.vector_store %arg18[%c4_48, %c0_49], %74 {strides = array<i32>} : memref<16x192xf32, #tpu.memory_space<vmem>>, vector<1x192xf32>,
    %76 = vector.extract_strided_slice %45 {offsets = [15, 0], sizes = [1, 192], strides = [1, 1]} : vector<48x192xf32> to vector<1x192xf32>
    %77 = vector.extract_strided_slice %45 {offsets = [16, 0], sizes = [1, 192], strides = [1, 1]} : vector<48x192xf32> to vector<1x192xf32>
    %78 = arith.maximumf %76, %77 : vector<1x192xf32>
    %79 = vector.extract_strided_slice %45 {offsets = [17, 0], sizes = [1, 192], strides = [1, 1]} : vector<48x192xf32> to vector<1x192xf32>
    %80 = arith.maximumf %78, %79 : vector<1x192xf32>
    %c5 = arith.constant 5 : index
    %c0_50 = arith.constant 0 : index
    %81 = vector.load %arg18[%c5, %c0_50] : memref<16x192xf32, #tpu.memory_space<vmem>>, vector<1x192xf32>
    tpu.vector_store %arg18[%c5, %c0_50], %80 {strides = array<i32>} : memref<16x192xf32, #tpu.memory_space<vmem>>, vector<1x192xf32>,
    %82 = vector.extract_strided_slice %45 {offsets = [18, 0], sizes = [1, 192], strides = [1, 1]} : vector<48x192xf32> to vector<1x192xf32>
    %83 = vector.extract_strided_slice %45 {offsets = [19, 0], sizes = [1, 192], strides = [1, 1]} : vector<48x192xf32> to vector<1x192xf32>
    %84 = arith.maximumf %82, %83 : vector<1x192xf32>
    %85 = vector.extract_strided_slice %45 {offsets = [20, 0], sizes = [1, 192], strides = [1, 1]} : vector<48x192xf32> to vector<1x192xf32>
    %86 = arith.maximumf %84, %85 : vector<1x192xf32>
    %c6 = arith.constant 6 : index
    %c0_51 = arith.constant 0 : index
    %87 = vector.load %arg18[%c6, %c0_51] : memref<16x192xf32, #tpu.memory_space<vmem>>, vector<1x192xf32>
    tpu.vector_store %arg18[%c6, %c0_51], %86 {strides = array<i32>} : memref<16x192xf32, #tpu.memory_space<vmem>>, vector<1x192xf32>,
    %88 = vector.extract_strided_slice %45 {offsets = [21, 0], sizes = [1, 192], strides = [1, 1]} : vector<48x192xf32> to vector<1x192xf32>
    %89 = vector.extract_strided_slice %45 {offsets = [22, 0], sizes = [1, 192], strides = [1, 1]} : vector<48x192xf32> to vector<1x192xf32>
    %90 = arith.maximumf %88, %89 : vector<1x192xf32>
    %91 = vector.extract_strided_slice %45 {offsets = [23, 0], sizes = [1, 192], strides = [1, 1]} : vector<48x192xf32> to vector<1x192xf32>
    %92 = arith.maximumf %90, %91 : vector<1x192xf32>
    %c7 = arith.constant 7 : index
    %c0_52 = arith.constant 0 : index
    %93 = vector.load %arg18[%c7, %c0_52] : memref<16x192xf32, #tpu.memory_space<vmem>>, vector<1x192xf32>
    tpu.vector_store %arg18[%c7, %c0_52], %92 {strides = array<i32>} : memref<16x192xf32, #tpu.memory_space<vmem>>, vector<1x192xf32>,
    %94 = vector.extract_strided_slice %45 {offsets = [24, 0], sizes = [1, 192], strides = [1, 1]} : vector<48x192xf32> to vector<1x192xf32>
    %95 = vector.extract_strided_slice %45 {offsets = [25, 0], sizes = [1, 192], strides = [1, 1]} : vector<48x192xf32> to vector<1x192xf32>
    %96 = arith.maximumf %94, %95 : vector<1x192xf32>
    %97 = vector.extract_strided_slice %45 {offsets = [26, 0], sizes = [1, 192], strides = [1, 1]} : vector<48x192xf32> to vector<1x192xf32>
    %98 = arith.maximumf %96, %97 : vector<1x192xf32>
    %c8 = arith.constant 8 : index
    %c0_53 = arith.constant 0 : index
    %99 = vector.load %arg18[%c8, %c0_53] : memref<16x192xf32, #tpu.memory_space<vmem>>, vector<1x192xf32>
    tpu.vector_store %arg18[%c8, %c0_53], %98 {strides = array<i32>} : memref<16x192xf32, #tpu.memory_space<vmem>>, vector<1x192xf32>,
    %100 = vector.extract_strided_slice %45 {offsets = [27, 0], sizes = [1, 192], strides = [1, 1]} : vector<48x192xf32> to vector<1x192xf32>
    %101 = vector.extract_strided_slice %45 {offsets = [28, 0], sizes = [1, 192], strides = [1, 1]} : vector<48x192xf32> to vector<1x192xf32>
    %102 = arith.maximumf %100, %101 : vector<1x192xf32>
    %103 = vector.extract_strided_slice %45 {offsets = [29, 0], sizes = [1, 192], strides = [1, 1]} : vector<48x192xf32> to vector<1x192xf32>
    %104 = arith.maximumf %102, %103 : vector<1x192xf32>
    %c9 = arith.constant 9 : index
    %c0_54 = arith.constant 0 : index
    %105 = vector.load %arg18[%c9, %c0_54] : memref<16x192xf32, #tpu.memory_space<vmem>>, vector<1x192xf32>
    tpu.vector_store %arg18[%c9, %c0_54], %104 {strides = array<i32>} : memref<16x192xf32, #tpu.memory_space<vmem>>, vector<1x192xf32>,
    %106 = vector.extract_strided_slice %45 {offsets = [30, 0], sizes = [1, 192], strides = [1, 1]} : vector<48x192xf32> to vector<1x192xf32>
    %107 = vector.extract_strided_slice %45 {offsets = [31, 0], sizes = [1, 192], strides = [1, 1]} : vector<48x192xf32> to vector<1x192xf32>
    %108 = arith.maximumf %106, %107 : vector<1x192xf32>
    %109 = vector.extract_strided_slice %45 {offsets = [32, 0], sizes = [1, 192], strides = [1, 1]} : vector<48x192xf32> to vector<1x192xf32>
    %110 = arith.maximumf %108, %109 : vector<1x192xf32>
    %c10 = arith.constant 10 : index
    %c0_55 = arith.constant 0 : index
    %111 = vector.load %arg18[%c10, %c0_55] : memref<16x192xf32, #tpu.memory_space<vmem>>, vector<1x192xf32>
    tpu.vector_store %arg18[%c10, %c0_55], %110 {strides = array<i32>} : memref<16x192xf32, #tpu.memory_space<vmem>>, vector<1x192xf32>,
    %112 = vector.extract_strided_slice %45 {offsets = [33, 0], sizes = [1, 192], strides = [1, 1]} : vector<48x192xf32> to vector<1x192xf32>
    %113 = vector.extract_strided_slice %45 {offsets = [34, 0], sizes = [1, 192], strides = [1, 1]} : vector<48x192xf32> to vector<1x192xf32>
    %114 = arith.maximumf %112, %113 : vector<1x192xf32>
    %115 = vector.extract_strided_slice %45 {offsets = [35, 0], sizes = [1, 192], strides = [1, 1]} : vector<48x192xf32> to vector<1x192xf32>
    %116 = arith.maximumf %114, %115 : vector<1x192xf32>
    %c11 = arith.constant 11 : index
    %c0_56 = arith.constant 0 : index
    %117 = vector.load %arg18[%c11, %c0_56] : memref<16x192xf32, #tpu.memory_space<vmem>>, vector<1x192xf32>
    tpu.vector_store %arg18[%c11, %c0_56], %116 {strides = array<i32>} : memref<16x192xf32, #tpu.memory_space<vmem>>, vector<1x192xf32>,
    %118 = vector.extract_strided_slice %45 {offsets = [36, 0], sizes = [1, 192], strides = [1, 1]} : vector<48x192xf32> to vector<1x192xf32>
    %119 = vector.extract_strided_slice %45 {offsets = [37, 0], sizes = [1, 192], strides = [1, 1]} : vector<48x192xf32> to vector<1x192xf32>
    %120 = arith.maximumf %118, %119 : vector<1x192xf32>
    %121 = vector.extract_strided_slice %45 {offsets = [38, 0], sizes = [1, 192], strides = [1, 1]} : vector<48x192xf32> to vector<1x192xf32>
    %122 = arith.maximumf %120, %121 : vector<1x192xf32>
    %c12 = arith.constant 12 : index
    %c0_57 = arith.constant 0 : index
    %123 = vector.load %arg18[%c12, %c0_57] : memref<16x192xf32, #tpu.memory_space<vmem>>, vector<1x192xf32>
    tpu.vector_store %arg18[%c12, %c0_57], %122 {strides = array<i32>} : memref<16x192xf32, #tpu.memory_space<vmem>>, vector<1x192xf32>,
    %124 = vector.extract_strided_slice %45 {offsets = [39, 0], sizes = [1, 192], strides = [1, 1]} : vector<48x192xf32> to vector<1x192xf32>
    %125 = vector.extract_strided_slice %45 {offsets = [40, 0], sizes = [1, 192], strides = [1, 1]} : vector<48x192xf32> to vector<1x192xf32>
    %126 = arith.maximumf %124, %125 : vector<1x192xf32>
    %127 = vector.extract_strided_slice %45 {offsets = [41, 0], sizes = [1, 192], strides = [1, 1]} : vector<48x192xf32> to vector<1x192xf32>
    %128 = arith.maximumf %126, %127 : vector<1x192xf32>
    %c13 = arith.constant 13 : index
    %c0_58 = arith.constant 0 : index
    %129 = vector.load %arg18[%c13, %c0_58] : memref<16x192xf32, #tpu.memory_space<vmem>>, vector<1x192xf32>
    tpu.vector_store %arg18[%c13, %c0_58], %128 {strides = array<i32>} : memref<16x192xf32, #tpu.memory_space<vmem>>, vector<1x192xf32>,
    %130 = vector.extract_strided_slice %45 {offsets = [42, 0], sizes = [1, 192], strides = [1, 1]} : vector<48x192xf32> to vector<1x192xf32>
    %131 = vector.extract_strided_slice %45 {offsets = [43, 0], sizes = [1, 192], strides = [1, 1]} : vector<48x192xf32> to vector<1x192xf32>
    %132 = arith.maximumf %130, %131 : vector<1x192xf32>
    %133 = vector.extract_strided_slice %45 {offsets = [44, 0], sizes = [1, 192], strides = [1, 1]} : vector<48x192xf32> to vector<1x192xf32>
    %134 = arith.maximumf %132, %133 : vector<1x192xf32>
    %c14 = arith.constant 14 : index
    %c0_59 = arith.constant 0 : index
    %135 = vector.load %arg18[%c14, %c0_59] : memref<16x192xf32, #tpu.memory_space<vmem>>, vector<1x192xf32>
    tpu.vector_store %arg18[%c14, %c0_59], %134 {strides = array<i32>} : memref<16x192xf32, #tpu.memory_space<vmem>>, vector<1x192xf32>,
    %136 = vector.extract_strided_slice %45 {offsets = [45, 0], sizes = [1, 192], strides = [1, 1]} : vector<48x192xf32> to vector<1x192xf32>
    %137 = vector.extract_strided_slice %45 {offsets = [46, 0], sizes = [1, 192], strides = [1, 1]} : vector<48x192xf32> to vector<1x192xf32>
    %138 = arith.maximumf %136, %137 : vector<1x192xf32>
    %139 = vector.extract_strided_slice %45 {offsets = [47, 0], sizes = [1, 192], strides = [1, 1]} : vector<48x192xf32> to vector<1x192xf32>
    %140 = arith.maximumf %138, %139 : vector<1x192xf32>
    %c15 = arith.constant 15 : index
    %c0_60 = arith.constant 0 : index
    %141 = vector.load %arg18[%c15, %c0_60] : memref<16x192xf32, #tpu.memory_space<vmem>>, vector<1x192xf32>
    tpu.vector_store %arg18[%c15, %c0_60], %140 {strides = array<i32>} : memref<16x192xf32, #tpu.memory_space<vmem>>, vector<1x192xf32>,
    %c0_61 = arith.constant 0 : index
    %c0_62 = arith.constant 0 : index
    %142 = vector.load %arg18[%c0_61, %c0_62] : memref<16x192xf32, #tpu.memory_space<vmem>>, vector<16x192xf32>
    %143 = vector.extract_strided_slice %142 {offsets = [0, 0], sizes = [12, 192], strides = [1, 1]} : vector<16x192xf32> to vector<12x192xf32>
    %c0_63 = arith.constant 0 : index
    %c0_64 = arith.constant 0 : index
    %c0_65 = arith.constant 0 : index
    %144 = vector.load %arg5[%c0_63, %c0_64, %c0_65] : memref<5x192x288xf32, #tpu.memory_space<vmem>>, vector<1x192x288xf32>
    %145 = vector.shape_cast %144 : vector<1x192x288xf32> to vector<192x288xf32>
    %cst_66 = arith.constant dense<0.000000e+00> : vector<12x288xf32>
    %146 = tpu.matmul %143, %145, %cst_66 {dimension_numbers = #tpu.dot_dimension_numbers<[1], [0], [0], [1], [0, 0, 1, 1], [], []>} : vector<12x192xf32>, vector<192x288xf32>, vector<12x288xf32> -> vector<12x288xf32>
    %147 = vector.extract_strided_slice %142 {offsets = [1, 0], sizes = [12, 192], strides = [1, 1]} : vector<16x192xf32> to vector<12x192xf32>
    %c1_67 = arith.constant 1 : index
    %c0_68 = arith.constant 0 : index
    %c0_69 = arith.constant 0 : index
    %148 = vector.load %arg5[%c1_67, %c0_68, %c0_69] : memref<5x192x288xf32, #tpu.memory_space<vmem>>, vector<1x192x288xf32>
    %149 = vector.shape_cast %148 : vector<1x192x288xf32> to vector<192x288xf32>
    %cst_70 = arith.constant dense<0.000000e+00> : vector<12x288xf32>
    %150 = tpu.matmul %147, %149, %cst_70 {dimension_numbers = #tpu.dot_dimension_numbers<[1], [0], [0], [1], [0, 0, 1, 1], [], []>} : vector<12x192xf32>, vector<192x288xf32>, vector<12x288xf32> -> vector<12x288xf32>
    %151 = arith.addf %146, %150 : vector<12x288xf32>
    %152 = vector.extract_strided_slice %142 {offsets = [2, 0], sizes = [12, 192], strides = [1, 1]} : vector<16x192xf32> to vector<12x192xf32>
    %c2_71 = arith.constant 2 : index
    %c0_72 = arith.constant 0 : index
    %c0_73 = arith.constant 0 : index
    %153 = vector.load %arg5[%c2_71, %c0_72, %c0_73] : memref<5x192x288xf32, #tpu.memory_space<vmem>>, vector<1x192x288xf32>
    %154 = vector.shape_cast %153 : vector<1x192x288xf32> to vector<192x288xf32>
    %cst_74 = arith.constant dense<0.000000e+00> : vector<12x288xf32>
    %155 = tpu.matmul %152, %154, %cst_74 {dimension_numbers = #tpu.dot_dimension_numbers<[1], [0], [0], [1], [0, 0, 1, 1], [], []>} : vector<12x192xf32>, vector<192x288xf32>, vector<12x288xf32> -> vector<12x288xf32>
    %156 = arith.addf %151, %155 : vector<12x288xf32>
    %157 = vector.extract_strided_slice %142 {offsets = [3, 0], sizes = [12, 192], strides = [1, 1]} : vector<16x192xf32> to vector<12x192xf32>
    %c3_75 = arith.constant 3 : index
    %c0_76 = arith.constant 0 : index
    %c0_77 = arith.constant 0 : index
    %158 = vector.load %arg5[%c3_75, %c0_76, %c0_77] : memref<5x192x288xf32, #tpu.memory_space<vmem>>, vector<1x192x288xf32>
    %159 = vector.shape_cast %158 : vector<1x192x288xf32> to vector<192x288xf32>
    %cst_78 = arith.constant dense<0.000000e+00> : vector<12x288xf32>
    %160 = tpu.matmul %157, %159, %cst_78 {dimension_numbers = #tpu.dot_dimension_numbers<[1], [0], [0], [1], [0, 0, 1, 1], [], []>} : vector<12x192xf32>, vector<192x288xf32>, vector<12x288xf32> -> vector<12x288xf32>
    %161 = arith.addf %156, %160 : vector<12x288xf32>
    %162 = vector.extract_strided_slice %142 {offsets = [4, 0], sizes = [12, 192], strides = [1, 1]} : vector<16x192xf32> to vector<12x192xf32>
    %c4_79 = arith.constant 4 : index
    %c0_80 = arith.constant 0 : index
    %c0_81 = arith.constant 0 : index
    %163 = vector.load %arg5[%c4_79, %c0_80, %c0_81] : memref<5x192x288xf32, #tpu.memory_space<vmem>>, vector<1x192x288xf32>
    %164 = vector.shape_cast %163 : vector<1x192x288xf32> to vector<192x288xf32>
    %cst_82 = arith.constant dense<0.000000e+00> : vector<12x288xf32>
    %165 = tpu.matmul %162, %164, %cst_82 {dimension_numbers = #tpu.dot_dimension_numbers<[1], [0], [0], [1], [0, 0, 1, 1], [], []>} : vector<12x192xf32>, vector<192x288xf32>, vector<12x288xf32> -> vector<12x288xf32>
    %166 = arith.addf %161, %165 : vector<12x288xf32>
    %c0_83 = arith.constant 0 : index
    %c0_84 = arith.constant 0 : index
    %167 = vector.load %arg6[%c0_83, %c0_84] : memref<1x288xf32, #tpu.memory_space<vmem>>, vector<1x288xf32>
    %168 = vector.broadcast %167 : vector<1x288xf32> to vector<12x288xf32>
    %169 = arith.addf %166, %168 : vector<12x288xf32>
    %cst_85 = arith.constant 0.000000e+00 : f32
    %170 = vector.broadcast %cst_85 : f32 to vector<12x288xf32>
    %171 = arith.maximumf %169, %170 : vector<12x288xf32>
    %172 = vector.extract_strided_slice %171 {offsets = [0, 0], sizes = [12, 96], strides = [1, 1]} : vector<12x288xf32> to vector<12x96xf32>
    %173 = vector.extract_strided_slice %171 {offsets = [0, 96], sizes = [12, 96], strides = [1, 1]} : vector<12x288xf32> to vector<12x96xf32>
    %174 = arith.maximumf %172, %173 : vector<12x96xf32>
    %175 = vector.extract_strided_slice %171 {offsets = [0, 192], sizes = [12, 96], strides = [1, 1]} : vector<12x288xf32> to vector<12x96xf32>
    %176 = arith.maximumf %174, %175 : vector<12x96xf32>
    %c0_86 = arith.constant 0 : index
    %c0_87 = arith.constant 0 : index
    %c0_88 = arith.constant 0 : index
    %177 = vector.load %arg2[%c0_86, %c0_87, %c0_88] : memref<1x1x128xf32, #tpu.memory_space<vmem>>, vector<1x1x128xf32>
    %178 = vector.shape_cast %177 : vector<1x1x128xf32> to vector<1x128xf32>
    %c0_89 = arith.constant 0 : index
    %c0_90 = arith.constant 0 : index
    %179 = vector.load %arg8[%c0_89, %c0_90] : memref<128x512xf32, #tpu.memory_space<vmem>>, vector<128x512xf32>
    %cst_91 = arith.constant dense<0.000000e+00> : vector<1x512xf32>
    %180 = tpu.matmul %178, %179, %cst_91 {dimension_numbers = #tpu.dot_dimension_numbers<[1], [0], [0], [1], [0, 0, 1, 1], [], []>} : vector<1x128xf32>, vector<128x512xf32>, vector<1x512xf32> -> vector<1x512xf32>
    %181 = vector.extract_strided_slice %176 {offsets = [0, 0], sizes = [1, 96], strides = [1, 1]} : vector<12x96xf32> to vector<1x96xf32>
    %182 = vector.extract_strided_slice %176 {offsets = [1, 0], sizes = [1, 96], strides = [1, 1]} : vector<12x96xf32> to vector<1x96xf32>
    %183 = arith.maximumf %181, %182 : vector<1x96xf32>
    %184 = vector.extract_strided_slice %176 {offsets = [2, 0], sizes = [1, 96], strides = [1, 1]} : vector<12x96xf32> to vector<1x96xf32>
    %185 = arith.maximumf %183, %184 : vector<1x96xf32>
    %c0_92 = arith.constant 0 : index
    %c0_93 = arith.constant 0 : index
    %c0_94 = arith.constant 0 : index
    %186 = vector.load %arg7[%c0_92, %c0_93, %c0_94] : memref<4x96x512xf32, #tpu.memory_space<vmem>>, vector<1x96x512xf32>
    %187 = vector.shape_cast %186 : vector<1x96x512xf32> to vector<96x512xf32>
    %cst_95 = arith.constant dense<0.000000e+00> : vector<1x512xf32>
    %188 = tpu.matmul %185, %187, %cst_95 {dimension_numbers = #tpu.dot_dimension_numbers<[1], [0], [0], [1], [0, 0, 1, 1], [], []>} : vector<1x96xf32>, vector<96x512xf32>, vector<1x512xf32> -> vector<1x512xf32>
    %189 = arith.addf %180, %188 : vector<1x512xf32>
    %190 = vector.extract_strided_slice %176 {offsets = [3, 0], sizes = [1, 96], strides = [1, 1]} : vector<12x96xf32> to vector<1x96xf32>
    %191 = vector.extract_strided_slice %176 {offsets = [4, 0], sizes = [1, 96], strides = [1, 1]} : vector<12x96xf32> to vector<1x96xf32>
    %192 = arith.maximumf %190, %191 : vector<1x96xf32>
    %193 = vector.extract_strided_slice %176 {offsets = [5, 0], sizes = [1, 96], strides = [1, 1]} : vector<12x96xf32> to vector<1x96xf32>
    %194 = arith.maximumf %192, %193 : vector<1x96xf32>
    %c1_96 = arith.constant 1 : index
    %c0_97 = arith.constant 0 : index
    %c0_98 = arith.constant 0 : index
    %195 = vector.load %arg7[%c1_96, %c0_97, %c0_98] : memref<4x96x512xf32, #tpu.memory_space<vmem>>, vector<1x96x512xf32>
    %196 = vector.shape_cast %195 : vector<1x96x512xf32> to vector<96x512xf32>
    %cst_99 = arith.constant dense<0.000000e+00> : vector<1x512xf32>
    %197 = tpu.matmul %194, %196, %cst_99 {dimension_numbers = #tpu.dot_dimension_numbers<[1], [0], [0], [1], [0, 0, 1, 1], [], []>} : vector<1x96xf32>, vector<96x512xf32>, vector<1x512xf32> -> vector<1x512xf32>
    %198 = arith.addf %189, %197 : vector<1x512xf32>
    %199 = vector.extract_strided_slice %176 {offsets = [6, 0], sizes = [1, 96], strides = [1, 1]} : vector<12x96xf32> to vector<1x96xf32>
    %200 = vector.extract_strided_slice %176 {offsets = [7, 0], sizes = [1, 96], strides = [1, 1]} : vector<12x96xf32> to vector<1x96xf32>
    %201 = arith.maximumf %199, %200 : vector<1x96xf32>
    %202 = vector.extract_strided_slice %176 {offsets = [8, 0], sizes = [1, 96], strides = [1, 1]} : vector<12x96xf32> to vector<1x96xf32>
    %203 = arith.maximumf %201, %202 : vector<1x96xf32>
    %c2_100 = arith.constant 2 : index
    %c0_101 = arith.constant 0 : index
    %c0_102 = arith.constant 0 : index
    %204 = vector.load %arg7[%c2_100, %c0_101, %c0_102] : memref<4x96x512xf32, #tpu.memory_space<vmem>>, vector<1x96x512xf32>
    %205 = vector.shape_cast %204 : vector<1x96x512xf32> to vector<96x512xf32>
    %cst_103 = arith.constant dense<0.000000e+00> : vector<1x512xf32>
    %206 = tpu.matmul %203, %205, %cst_103 {dimension_numbers = #tpu.dot_dimension_numbers<[1], [0], [0], [1], [0, 0, 1, 1], [], []>} : vector<1x96xf32>, vector<96x512xf32>, vector<1x512xf32> -> vector<1x512xf32>
    %207 = arith.addf %198, %206 : vector<1x512xf32>
    %208 = vector.extract_strided_slice %176 {offsets = [9, 0], sizes = [1, 96], strides = [1, 1]} : vector<12x96xf32> to vector<1x96xf32>
    %209 = vector.extract_strided_slice %176 {offsets = [10, 0], sizes = [1, 96], strides = [1, 1]} : vector<12x96xf32> to vector<1x96xf32>
    %210 = arith.maximumf %208, %209 : vector<1x96xf32>
    %211 = vector.extract_strided_slice %176 {offsets = [11, 0], sizes = [1, 96], strides = [1, 1]} : vector<12x96xf32> to vector<1x96xf32>
    %212 = arith.maximumf %210, %211 : vector<1x96xf32>
    %c3_104 = arith.constant 3 : index
    %c0_105 = arith.constant 0 : index
    %c0_106 = arith.constant 0 : index
    %213 = vector.load %arg7[%c3_104, %c0_105, %c0_106] : memref<4x96x512xf32, #tpu.memory_space<vmem>>, vector<1x96x512xf32>
    %214 = vector.shape_cast %213 : vector<1x96x512xf32> to vector<96x512xf32>
    %cst_107 = arith.constant dense<0.000000e+00> : vector<1x512xf32>
    %215 = tpu.matmul %212, %214, %cst_107 {dimension_numbers = #tpu.dot_dimension_numbers<[1], [0], [0], [1], [0, 0, 1, 1], [], []>} : vector<1x96xf32>, vector<96x512xf32>, vector<1x512xf32> -> vector<1x512xf32>
    %216 = arith.addf %207, %215 : vector<1x512xf32>
    %c0_108 = arith.constant 0 : index
    %c0_109 = arith.constant 0 : index
    %217 = vector.load %arg9[%c0_108, %c0_109] : memref<1x512xf32, #tpu.memory_space<vmem>>, vector<1x512xf32>
    %218 = arith.addf %216, %217 : vector<1x512xf32>
    %cst_110 = arith.constant 0.000000e+00 : f32
    %219 = vector.broadcast %cst_110 : f32 to vector<1x512xf32>
    %220 = arith.maximumf %218, %219 : vector<1x512xf32>
    %c0_111 = arith.constant 0 : index
    %c0_112 = arith.constant 0 : index
    %221 = vector.load %arg10[%c0_111, %c0_112] : memref<512x256xf32, #tpu.memory_space<vmem>>, vector<512x256xf32>
    %cst_113 = arith.constant dense<0.000000e+00> : vector<1x256xf32>
    %222 = tpu.matmul %220, %221, %cst_113 {dimension_numbers = #tpu.dot_dimension_numbers<[1], [0], [0], [1], [0, 0, 1, 1], [], []>} : vector<1x512xf32>, vector<512x256xf32>, vector<1x256xf32> -> vector<1x256xf32>
    %c0_114 = arith.constant 0 : index
    %c0_115 = arith.constant 0 : index
    %223 = vector.load %arg11[%c0_114, %c0_115] : memref<1x256xf32, #tpu.memory_space<vmem>>, vector<1x256xf32>
    %224 = arith.addf %222, %223 : vector<1x256xf32>
    %cst_116 = arith.constant 0.000000e+00 : f32
    %225 = vector.broadcast %cst_116 : f32 to vector<1x256xf32>
    %226 = arith.maximumf %224, %225 : vector<1x256xf32>
    %c0_117 = arith.constant 0 : index
    %c0_118 = arith.constant 0 : index
    %227 = vector.load %arg12[%c0_117, %c0_118] : memref<256x128xf32, #tpu.memory_space<vmem>>, vector<256x128xf32>
    %cst_119 = arith.constant dense<0.000000e+00> : vector<1x128xf32>
    %228 = tpu.matmul %226, %227, %cst_119 {dimension_numbers = #tpu.dot_dimension_numbers<[1], [0], [0], [1], [0, 0, 1, 1], [], []>} : vector<1x256xf32>, vector<256x128xf32>, vector<1x128xf32> -> vector<1x128xf32>
    %c0_120 = arith.constant 0 : index
    %c0_121 = arith.constant 0 : index
    %229 = vector.load %arg13[%c0_120, %c0_121] : memref<1x128xf32, #tpu.memory_space<vmem>>, vector<1x128xf32>
    %230 = arith.addf %228, %229 : vector<1x128xf32>
    %cst_122 = arith.constant 0.000000e+00 : f32
    %231 = vector.broadcast %cst_122 : f32 to vector<1x128xf32>
    %232 = arith.maximumf %230, %231 : vector<1x128xf32>
    %c0_123 = arith.constant 0 : index
    %c0_124 = arith.constant 0 : index
    %233 = vector.load %arg14[%c0_123, %c0_124] : memref<128x8xf32, #tpu.memory_space<vmem>>, vector<128x8xf32>
    %cst_125 = arith.constant dense<0.000000e+00> : vector<1x8xf32>
    %234 = tpu.matmul %232, %233, %cst_125 {dimension_numbers = #tpu.dot_dimension_numbers<[1], [0], [0], [1], [0, 0, 1, 1], [], []>} : vector<1x128xf32>, vector<128x8xf32>, vector<1x8xf32> -> vector<1x8xf32>
    %c0_126 = arith.constant 0 : index
    %c0_127 = arith.constant 0 : index
    %235 = vector.load %arg15[%c0_126, %c0_127] : memref<1x8xf32, #tpu.memory_space<vmem>>, vector<1x8xf32>
    %236 = arith.addf %234, %235 : vector<1x8xf32>
    %c0_128 = arith.constant 0 : index
    %c0_129 = arith.constant 0 : index
    %c0_130 = arith.constant 0 : index
    %237 = vector.load %arg16[%c0_128, %c0_129, %c0_130] : memref<1x1x8xf32, #tpu.memory_space<vmem>>, vector<1x1x8xf32>
    %238 = vector.shape_cast %237 : vector<1x1x8xf32> to vector<1x8xf32>
    %239 = vector.shape_cast %236 : vector<1x8xf32> to vector<1x1x8xf32>
    tpu.vector_store %arg16[%c0_128, %c0_129, %c0_130], %239 {strides = array<i32>} : memref<1x1x8xf32, #tpu.memory_space<vmem>>, vector<1x1x8xf32>,
    return
  }
  func.func @transform_0(%arg0: i32) -> (i32, i32, i32) {
    %c0_i32 = arith.constant 0 : i32
    %c0_i32_0 = arith.constant 0 : i32
    %c0_i32_1 = arith.constant 0 : i32
    return %arg0, %c0_i32, %c0_i32_0 : i32, i32, i32
  }
  func.func @transform_1(%arg0: i32) -> (i32, i32, i32) {
    %c0_i32 = arith.constant 0 : i32
    %c0_i32_0 = arith.constant 0 : i32
    %c0_i32_1 = arith.constant 0 : i32
    return %arg0, %c0_i32, %c0_i32_0 : i32, i32, i32
  }
  func.func @transform_2(%arg0: i32) -> (i32, i32, i32) {
    %c0_i32 = arith.constant 0 : i32
    %c0_i32_0 = arith.constant 0 : i32
    %c0_i32_1 = arith.constant 0 : i32
    %c0_i32_2 = arith.constant 0 : i32
    return %c0_i32, %c0_i32_0, %c0_i32_1 : i32, i32, i32
  }
  func.func @transform_3(%arg0: i32) -> (i32, i32) {
    %c0_i32 = arith.constant 0 : i32
    %c0_i32_0 = arith.constant 0 : i32
    %c0_i32_1 = arith.constant 0 : i32
    return %c0_i32, %c0_i32_0 : i32, i32
  }
  func.func @transform_4(%arg0: i32) -> (i32, i32, i32) {
    %c0_i32 = arith.constant 0 : i32
    %c0_i32_0 = arith.constant 0 : i32
    %c0_i32_1 = arith.constant 0 : i32
    %c0_i32_2 = arith.constant 0 : i32
    return %c0_i32, %c0_i32_0, %c0_i32_1 : i32, i32, i32
  }
  func.func @transform_5(%arg0: i32) -> (i32, i32) {
    %c0_i32 = arith.constant 0 : i32
    %c0_i32_0 = arith.constant 0 : i32
    %c0_i32_1 = arith.constant 0 : i32
    return %c0_i32, %c0_i32_0 : i32, i32
  }
  func.func @transform_6(%arg0: i32) -> (i32, i32, i32) {
    %c0_i32 = arith.constant 0 : i32
    %c0_i32_0 = arith.constant 0 : i32
    %c0_i32_1 = arith.constant 0 : i32
    %c0_i32_2 = arith.constant 0 : i32
    return %c0_i32, %c0_i32_0, %c0_i32_1 : i32, i32, i32
  }
  func.func @transform_7(%arg0: i32) -> (i32, i32) {
    %c0_i32 = arith.constant 0 : i32
    %c0_i32_0 = arith.constant 0 : i32
    %c0_i32_1 = arith.constant 0 : i32
    return %c0_i32, %c0_i32_0 : i32, i32
  }
  func.func @transform_8(%arg0: i32) -> (i32, i32) {
    %c0_i32 = arith.constant 0 : i32
    %c0_i32_0 = arith.constant 0 : i32
    %c0_i32_1 = arith.constant 0 : i32
    return %c0_i32, %c0_i32_0 : i32, i32
  }
  func.func @transform_9(%arg0: i32) -> (i32, i32) {
    %c0_i32 = arith.constant 0 : i32
    %c0_i32_0 = arith.constant 0 : i32
    %c0_i32_1 = arith.constant 0 : i32
    return %c0_i32, %c0_i32_0 : i32, i32
  }
  func.func @transform_10(%arg0: i32) -> (i32, i32) {
    %c0_i32 = arith.constant 0 : i32
    %c0_i32_0 = arith.constant 0 : i32
    %c0_i32_1 = arith.constant 0 : i32
    return %c0_i32, %c0_i32_0 : i32, i32
  }
  func.func @transform_11(%arg0: i32) -> (i32, i32) {
    %c0_i32 = arith.constant 0 : i32
    %c0_i32_0 = arith.constant 0 : i32
    %c0_i32_1 = arith.constant 0 : i32
    return %c0_i32, %c0_i32_0 : i32, i32
  }
  func.func @transform_12(%arg0: i32) -> (i32, i32) {
    %c0_i32 = arith.constant 0 : i32
    %c0_i32_0 = arith.constant 0 : i32
    %c0_i32_1 = arith.constant 0 : i32
    return %c0_i32, %c0_i32_0 : i32, i32
  }
  func.func @transform_13(%arg0: i32) -> (i32, i32) {
    %c0_i32 = arith.constant 0 : i32
    %c0_i32_0 = arith.constant 0 : i32
    %c0_i32_1 = arith.constant 0 : i32
    return %c0_i32, %c0_i32_0 : i32, i32
  }
  func.func @transform_14(%arg0: i32) -> (i32, i32) {
    %c0_i32 = arith.constant 0 : i32
    %c0_i32_0 = arith.constant 0 : i32
    %c0_i32_1 = arith.constant 0 : i32
    return %c0_i32, %c0_i32_0 : i32, i32
  }
  func.func @transform_15(%arg0: i32) -> (i32, i32, i32) {
    %c0_i32 = arith.constant 0 : i32
    %c0_i32_0 = arith.constant 0 : i32
    %c0_i32_1 = arith.constant 0 : i32
    return %arg0, %c0_i32, %c0_i32_0 : i32, i32, i32
  }
}

</mosaic_0001>

<bundles_post_ra>
// kernel: angle1_forward.1
= control target key start
LH: loop header
LB: loop body
LE: loop exit
PB: predicated region body
PF: predicated region fallthrough
CT: control target
= control target key end

     0   :  { %s11236_s0 = inlined_call_operand.vmem [shape: f32[2,52,156], index: 0, kind: input, shape index: {}]   ;;  %s11237_s1 = inlined_call_operand.vmem [shape: f32[2,1,128], index: 1, kind: input, shape index: {}]   ;;  %s11238_s2 = inlined_call_operand.hbm [shape: f32[5,156,576], index: 2, kind: input, shape index: {}]   ;;  %s11239_s3 = inlined_call_operand.hbm [shape: f32[1,576], index: 3, kind: input, shape index: {}]   ;;  %s11240_s4 = inlined_call_operand.hbm [shape: f32[5,192,288], index: 4, kind: input, shape index: {}]   ;;  %s11241_s5 = inlined_call_operand.hbm [shape: f32[1,288], index: 5, kind: input, shape index: {}]   ;;  %s11242_s6 = inlined_call_operand.hbm [shape: f32[4,96,512], index: 6, kind: input, shape index: {}]   ;;  %s11243_s7 = inlined_call_operand.hbm [shape: f32[128,512], index: 7, kind: input, shape index: {}]   ;;  %s11244_s8 = inlined_call_operand.hbm [shape: f32[1,512], index: 8, kind: input, shape index: {}]   ;;  %s11245_s9 = inlined_call_operand.hbm [shape: f32[512,256], index: 9, kind: input, shape index: {}]   ;;  %s11246_s10 = inlined_call_operand.hbm [shape: f32[1,256], index: 10, kind: input, shape index: {}]   ;;  %s11247_s11 = inlined_call_operand.hbm [shape: f32[256,128], index: 11, kind: input, shape index: {}]   ;;  %s11248_s12 = inlined_call_operand.hbm [shape: f32[1,128], index: 12, kind: input, shape index: {}]   ;;  %s11249_s13 = inlined_call_operand.vmem [shape: f32[128,8], index: 13, kind: input, shape index: {}]   ;;  %s11250_s14 = inlined_call_operand.hbm [shape: f32[1,8], index: 14, kind: input, shape index: {}]   ;;  %s11251_s15 = inlined_call_operand.hbm [shape: f32[2,1,8], index: 15, kind: output, shape index: {}]  }
   0x1   :  { %11267 = sst [smem:[#allocation41_spill]] %s11238_s2 }
   0x2   :  { %11268 = sst [smem:[#allocation42_spill]] %s11239_s3 }
   0x3   :  { %11269 = sst [smem:[#allocation43_spill]] %s11241_s5 }
   0x4   :  { %11270 = sst [smem:[#allocation44_spill]] %s11243_s7 }
   0x5   :  { %11271 = sst [smem:[#allocation45_spill]] %s11251_s15 }
   0x6   :  { %20 = vsyncpa [#allocation5], 0 }
   0x7   :  { %21 = vsyncpa [#allocation8], 0 }
   0x8   :  { %22 = vsyncpa [#allocation11], 0 }
   0x9   :  { %23 = vsyncpa [#allocation14], 0 }
   0xa   :  { %24 = vsyncpa [#allocation17], 0 }
   0xb   :  { %25 = vsyncpa [#allocation20], 0 }
   0xc   :  { %26 = vsyncpa [#allocation23], 0 }
   0xd   :  { %27 = vsyncpa [#allocation6], 0 }
   0xe   :  { %29 = vsyncpa [#allocation6 + $0x1], 0  ;;  %s9408_s18 = smov 0   ;;  %s9410_s19 = smov 0  }
   0xf   :  { %s9412_s20 = smov 0   ;;  %s9414_s21 = smov 0  }
  0x10 LB: > { %11272 = sst [smem:[#allocation33_spill]] %s9284_s18  ;;  %s9429_s22 = sadd.s32 4294967295, %s9296_s21   ;;  %s9296_s21 = sphi %s9414_s21, %s11318_s21   ;;  %s9292_s20 = sphi %s9412_s20, %s11321_s20   ;;  %s9288_s19 = sphi %s9410_s19, %s11320_s19   ;;  %s9284_s18 = sphi %s9408_s18, %s11319_s18  }
  0x11   : > { %11273 = sst [smem:[#allocation34_spill]] %s9288_s19  ;;  %s6942_s23 = sadd.s32 4294967294, %s9296_s21  }
  0x12   : > { %11274 = sst [smem:[#allocation35_spill]] %s9292_s20  ;;  %s9433_s24 = sadd.s32 1, %s9296_s21  }
  0x13   : > { %11275 = sst [smem:[#allocation36_spill]] %s9296_s21  ;;  %s367_s25 = sadd.s32 1, %s9292_s20 }
  0x14   : > { %11276 = sst [smem:[#allocation37_spill]] %s9433_s24  ;;  %s364_s26 = ssub.s32 %s9296_s21, %s9433_s24 }
  0x15   : > { %p377_p0 = scmp.ne.s32.totalorder %s9292_s20, %s9288_s19  ;;  %p365_p1 = scmp.eq.s32.totalorder %s364_s26, 0 }
  0x16   : > { %p378_p2 = scmp.eq.s32.totalorder %s9429_s22, 1  ;;  %p383_p3 = scmp.ne.s32.totalorder %s9288_s19, %s9284_s18 }
  0x17   : > { %p384_p4 = scmp.eq.s32.totalorder %s6942_s23, 1  ;;  %p6943_p7 = scmp.ge.s32.totalorder %s9296_s21, 1 }
  0x18   : > { %s9444_s27 = scalar_select %p365_p1, %s9292_s20, %s367_s25  }
  0x19   : > { %p9446_p5 = por %p378_p2, %p377_p0  ;;  %p9450_p6 = por %p384_p4, %p383_p3 }
  0x1a   : > { %11277 = sst [smem:[#allocation38_spill]] %s9444_s27  ;;  %p391_p8 = scmp.lt.s32.totalorder %s9296_s21, 3 }
  0x1b   : > { %s11278_s28 = scalar_select %p9446_p5, 1, 0 }
  0x1c   : > { %s11280_s29 = scalar_select %p9450_p6, 1, 0 }
  0x1d   : > { %11279 = sst [smem:[#allocation39_spill]] %s11278_s28  ;;  %p11259_p9 = scmp.eq.s32.totalorder %s9429_s22, 0 }
  0x1e   : > { %11281 = sst [smem:[#allocation40_spill]] %s11280_s29  ;;  %p9457_p10 = pnand %p6943_p7, %p391_p8 }
  0x1f   : > { %s9298_s16 = smov [#allocation7]   ;;  %s9299_s23 = smov [#allocation10]  }
  0x20   : > { %s11282_s30 = scalar_select %p9457_p10, 1, 0 }
  0x21   : > { %s417_s17 = sshll.u32 %s9298_s16, 4  ;;  %p8726_p11 = pneg %p9457_p10  ;;  %s418_s17 = int_to_ptr.vmem [resolvable:$true] %s417_s17 }
  0x22   : > { %s441_s25 = sshll.u32 %s9299_s23, 4  ;;  %s9300_s27 = smov [#allocation13]   ;;  %s9469_s25 = int_to_ptr.vmem [resolvable:$true] %s441_s25 }
  0x23   : > { %p9465_p12 = pnand %p11259_p9, %p8726_p11  ;;  %s9471_s20 = sshll.u32 %s9300_s27, 4  ;;  %s465_s20 = int_to_ptr.vmem [resolvable:$true] %s9471_s20 }
  0x24   : > { %s11284_s3 = sld [smem:[#allocation42_spill]] }
  0x25   : > { %p9481_p0 = pneg %p9465_p12 }
  0x2a   : > { %s8870_s16 = scalar_lea.hbm %s11284_s3, 80 }
  0x2b   : > { %p8871_p13 = scmp.ne.s32.totalorder %s11284_s3, %s8870_s16  ;;  %p8877_p3 = scmp.lt.u32.totalorder %s8870_s16, %s11284_s3 }
  0x2d   : > { %p8873_p1 = pnand %p9481_p0, %p8871_p13 }
  0x2f   : > { %p8874_p2 = pneg %p8873_p1 }
  0x31   : > { %p8879_p4 = pnand %p8877_p3, %p8874_p2 }
  0x33   : > { %8882 = shalt.err (!%p8879_p4)
}
  0x34   : > { %s8883_s24 = scalar_lea.vmem %s418_s17, 80  ;;  %s8890_s18 = scalar_lea.vmem %s418_s17, 96 }
  0x35   : > { %p8884_p7 = scmp.ne.s32.totalorder %s418_s17, %s8883_s24  ;;  %p8891_p9 = scmp.lt.s32.totalorder %s418_s17, %s418_s17 }
  0x36   : > { %p8892_p6 = scmp.lt.s32.totalorder %s8890_s18, %s8883_s24 }
  0x37   : > { %p8886_p8 = pnand %p8884_p7, %p9481_p0 }
  0x38   : > { %p8893_p5 = por %p8892_p6, %p8891_p9 }
  0x39   : > { %p8887_p11 = pneg %p8886_p8 }
  0x3b   : > { %p8894_p10 = pnand %p8893_p5, %p8887_p11 }
  0x3d   : > { %8897 = shalt.err (!%p8894_p10)
}
  0x3e   : > { %8732 = dma.hbm_to_vmem [thread:$0]  (!%p9465_p12), %s11284_s3, 80, %s418_s17, [#allocation8]  }
  0x3f   : > { %s11286_s5 = sld [smem:[#allocation43_spill]] }
  0x45   : > { %s8898_s27 = scalar_lea.hbm %s11286_s5, 48 }
  0x46   : > { %p8899_p13 = scmp.ne.s32.totalorder %s11286_s5, %s8898_s27  ;;  %p8905_p5 = scmp.lt.u32.totalorder %s8898_s27, %s11286_s5 }
  0x48   : > { %p8901_p1 = pnand %p8899_p13, %p9481_p0 }
  0x4a   : > { %p8902_p6 = pneg %p8901_p1 }
  0x4c   : > { %p8907_p9 = pnand %p8905_p5, %p8902_p6 }
  0x4e   : > { %8910 = shalt.err (!%p8907_p9)
}
  0x4f   : > { %s8911_s17 = scalar_lea.vmem %s9469_s25, 48  ;;  %s8918_s19 = scalar_lea.vmem %s9469_s25, 64 }
  0x50   : > { %p8912_p10 = scmp.ne.s32.totalorder %s9469_s25, %s8911_s17  ;;  %p8919_p4 = scmp.lt.s32.totalorder %s9469_s25, %s9469_s25 }
  0x51   : > { %p8920_p7 = scmp.lt.s32.totalorder %s8918_s19, %s8911_s17 }
  0x52   : > { %p8914_p2 = pnand %p8912_p10, %p9481_p0 }
  0x53   : > { %p8921_p8 = por %p8920_p7, %p8919_p4 }
  0x54   : > { %p8915_p3 = pneg %p8914_p2 }
  0x56   : > { %p8922_p11 = pnand %p8921_p8, %p8915_p3 }
  0x58   : > { %8925 = shalt.err (!%p8922_p11)
}
  0x59   : > { %8738 = dma.hbm_to_vmem [thread:$0]  (!%p9465_p12), %s11286_s5, 48, %s9469_s25, [#allocation11]  }
  0x5a   : > { %s11287_s7 = sld [smem:[#allocation44_spill]] }
  0x60   : > { %s8926_s16 = scalar_lea.hbm %s11287_s7, 8192 }
  0x61   : > { %p8927_p13 = scmp.ne.s32.totalorder %s11287_s7, %s8926_s16  ;;  %p8933_p5 = scmp.lt.u32.totalorder %s8926_s16, %s11287_s7 }
  0x63   : > { %p8929_p1 = pnand %p8927_p13, %p9481_p0 }
  0x65   : > { %p8930_p6 = pneg %p8929_p1 }
  0x67   : > { %p8935_p9 = pnand %p8933_p5, %p8930_p6 }
  0x69   : > { %8938 = shalt.err (!%p8935_p9)
}
  0x6a   : > { %s8939_s19 = scalar_lea.vmem %s465_s20, 8192  ;;  %p8947_p4 = scmp.lt.s32.totalorder %s465_s20, %s465_s20 }
  0x6b   : > { %p8940_p10 = scmp.ne.s32.totalorder %s465_s20, %s8939_s19  ;;  %p8948_p7 = scmp.lt.s32.totalorder %s8939_s19, %s8939_s19 }
  0x6d   : > { %p8942_p2 = pnand %p8940_p10, %p9481_p0  ;;  %p8949_p8 = por %p8948_p7, %p8947_p4 }
  0x6f   : > { %p8943_p3 = pneg %p8942_p2 }
  0x71   : > { %p8950_p11 = pnand %p8949_p8, %p8943_p3 }
  0x73   : > { %8953 = shalt.err (!%p8950_p11)
}
  0x74   : > { %s11265_s25 = smov 512   ;;  %s11266_s28 = smov 32  }
  0x75   : > { %8744 = dma.hbm_to_vmem [thread:$0]  (!%p9465_p12), %s11287_s7, 8192, %s465_s20, [#allocation14], %s11265_s25, %s11265_s25, %s11266_s28  }
  0x76   : > { %s9303_s15 = smov [#allocation16]   ;;  %s8954_s18 = scalar_lea.hbm %s11245_s9, 16384 }
  0x77   : > { %s488_s16 = sshll.u32 %s9303_s15, 4  ;;  %p8955_p13 = scmp.ne.s32.totalorder %s11245_s9, %s8954_s18  ;;  %s489_s16 = int_to_ptr.vmem [resolvable:$true] %s488_s16 }
  0x78   : > { %p8961_p5 = scmp.lt.u32.totalorder %s8954_s18, %s11245_s9 }
  0x79   : > { %p8957_p1 = pnand %p8955_p13, %p9481_p0 }
  0x7b   : > { %p8958_p6 = pneg %p8957_p1 }
  0x7d   : > { %p8963_p9 = pnand %p8961_p5, %p8958_p6 }
  0x7f   : > { %8966 = shalt.err (!%p8963_p9)
}
  0x80   : > { %s8967_s20 = scalar_lea.vmem %s489_s16, 16384  ;;  %p8975_p4 = scmp.lt.s32.totalorder %s489_s16, %s489_s16 }
  0x81   : > { %p8968_p10 = scmp.ne.s32.totalorder %s489_s16, %s8967_s20  ;;  %p8976_p7 = scmp.lt.s32.totalorder %s8967_s20, %s8967_s20 }
  0x83   : > { %p8970_p2 = pnand %p8968_p10, %p9481_p0  ;;  %p8977_p8 = por %p8976_p7, %p8975_p4 }
  0x85   : > { %p8971_p3 = pneg %p8970_p2 }
  0x87   : > { %p8978_p11 = pnand %p8977_p8, %p8971_p3 }
  0x89   : > { %8981 = shalt.err (!%p8978_p11)
}
  0x8a   : > { %s9304_s21 = smov 256   ;;  %s9305_s29 = smov 16  }
  0x8b   : > { %8750 = dma.hbm_to_vmem [thread:$0]  (!%p9465_p12), %s11245_s9, 16384, %s489_s16, [#allocation17], %s9304_s21, %s9304_s21, %s9305_s29  }
  0x8c   : > { %s9306_s15 = smov [#allocation19]   ;;  %s8982_s17 = scalar_lea.hbm %s11247_s11, 4096 }
  0x8d   : > { %s512_s27 = sshll.u32 %s9306_s15, 4  ;;  %p8983_p13 = scmp.ne.s32.totalorder %s11247_s11, %s8982_s17  ;;  %s513_s27 = int_to_ptr.vmem [resolvable:$true] %s512_s27 }
  0x8e   : > { %p8989_p5 = scmp.lt.u32.totalorder %s8982_s17, %s11247_s11 }
  0x8f   : > { %p8985_p1 = pnand %p8983_p13, %p9481_p0 }
  0x91   : > { %p8986_p6 = pneg %p8985_p1 }
  0x93   : > { %p8991_p9 = pnand %p8989_p5, %p8986_p6 }
  0x95   : > { %8994 = shalt.err (!%p8991_p9)
}
  0x96   : > { %s8995_s16 = scalar_lea.vmem %s513_s27, 4096  ;;  %p9003_p4 = scmp.lt.s32.totalorder %s513_s27, %s513_s27 }
  0x97   : > { %p8996_p10 = scmp.ne.s32.totalorder %s513_s27, %s8995_s16  ;;  %p9004_p7 = scmp.lt.s32.totalorder %s8995_s16, %s8995_s16 }
  0x99   : > { %p8998_p2 = pnand %p8996_p10, %p9481_p0  ;;  %p9005_p8 = por %p9004_p7, %p9003_p4 }
  0x9b   : > { %p8999_p3 = pneg %p8998_p2 }
  0x9d   : > { %p9006_p11 = pnand %p9005_p8, %p8999_p3 }
  0x9f   : > { %9009 = shalt.err (!%p9006_p11)
}
  0xa0   : > { %s9307_s21 = smov 128   ;;  %s9308_s29 = smov 8  }
  0xa1   : > { %8756 = dma.hbm_to_vmem [thread:$0]  (!%p9465_p12), %s11247_s11, 4096, %s513_s27, [#allocation20], %s9307_s21, %s9307_s21, %s9308_s29  }
  0xa2   : > { %s9309_s3 = smov [#allocation4]   ;;  %s11288_s2 = sld [smem:[#allocation41_spill]] }
  0xa3   : > { %s403_s5 = sshll.u32 %s9309_s3, 4  ;;  %s404_s5 = int_to_ptr.vmem [resolvable:$true] %s403_s5 }
  0xa8   : > { %s9010_s18 = scalar_lea.hbm %s11288_s2, 64000 }
  0xa9   : > { %p9011_p13 = scmp.ne.s32.totalorder %s11288_s2, %s9010_s18  ;;  %p9017_p5 = scmp.lt.u32.totalorder %s9010_s18, %s11288_s2 }
  0xab   : > { %p9013_p1 = pnand %p9011_p13, %p9481_p0 }
  0xad   : > { %p9014_p6 = pneg %p9013_p1 }
  0xaf   : > { %p9019_p9 = pnand %p9017_p5, %p9014_p6 }
  0xb1   : > { %9022 = shalt.err (!%p9019_p9)
}
  0xb2   : > { %s9023_s27 = scalar_lea.vmem %s404_s5, 64000  ;;  %p9031_p4 = scmp.lt.s32.totalorder %s404_s5, %s404_s5 }
  0xb3   : > { %p9024_p10 = scmp.ne.s32.totalorder %s404_s5, %s9023_s27  ;;  %p9032_p7 = scmp.lt.s32.totalorder %s9023_s27, %s9023_s27 }
  0xb5   : > { %p9026_p2 = pnand %p9024_p10, %p9481_p0  ;;  %p9033_p8 = por %p9032_p7, %p9031_p4 }
  0xb7   : > { %p9027_p3 = pneg %p9026_p2 }
  0xb9   : > { %p9034_p11 = pnand %p9033_p8, %p9027_p3 }
  0xbb   : > { %9037 = shalt.err (!%p9034_p11)
}
  0xbc   : > { %s9310_s21 = smov 640   ;;  %s9311_s29 = smov 40  }
  0xbd   : > { %8729 = dma.hbm_to_vmem [thread:$0]  (!%p9465_p12), %s11288_s2, 64000, %s404_s5, [#allocation5], %s9310_s21, %s9310_s21, %s9311_s29  }
  0xbe   : > { %s9312_s3 = smov [#allocation9]   ;;  %s9038_s17 = scalar_lea.hbm %s11240_s4, 46080 }
  0xbf   : > { %s427_s15 = sshll.u32 %s9312_s3, 4  ;;  %p9039_p13 = scmp.ne.s32.totalorder %s11240_s4, %s9038_s17  ;;  %s428_s15 = int_to_ptr.vmem [resolvable:$true] %s427_s15 }
  0xc0   : > { %p9045_p5 = scmp.lt.u32.totalorder %s9038_s17, %s11240_s4 }
  0xc1   : > { %p9041_p1 = pnand %p9039_p13, %p9481_p0 }
  0xc3   : > { %p9042_p6 = pneg %p9041_p1 }
  0xc5   : > { %p9047_p9 = pnand %p9045_p5, %p9042_p6 }
  0xc7   : > { %9050 = shalt.err (!%p9047_p9)
}
  0xc8   : > { %s9051_s5 = scalar_lea.vmem %s428_s15, 46080  ;;  %p9059_p4 = scmp.lt.s32.totalorder %s428_s15, %s428_s15 }
  0xc9   : > { %p9052_p10 = scmp.ne.s32.totalorder %s428_s15, %s9051_s5  ;;  %p9060_p7 = scmp.lt.s32.totalorder %s9051_s5, %s9051_s5 }
  0xcb   : > { %p9054_p2 = pnand %p9052_p10, %p9481_p0  ;;  %p9061_p8 = por %p9060_p7, %p9059_p4 }
  0xcd   : > { %p9055_p3 = pneg %p9054_p2 }
  0xcf   : > { %p9062_p11 = pnand %p9061_p8, %p9055_p3 }
  0xd1   : > { %9065 = shalt.err (!%p9062_p11)
}
  0xd2   : > { %s9313_s21 = smov 384   ;;  %s9314_s29 = smov 24  }
  0xd3   : > { %8735 = dma.hbm_to_vmem [thread:$0]  (!%p9465_p12), %s11240_s4, 46080, %s428_s15, [#allocation8], %s9313_s21, %s9313_s21, %s9314_s29  }
  0xd4   : > { %s9315_s3 = smov [#allocation12]   ;;  %s9316_s18 = smov [#allocation15]  }
  0xd5   : > { %s451_s24 = sshll.u32 %s9315_s3, 4  ;;  %s478_s17 = sshll.u32 %s9316_s18, 4  ;;  %s452_s24 = int_to_ptr.vmem [resolvable:$true] %s451_s24  ;;  %s479_s17 = int_to_ptr.vmem [resolvable:$true] %s478_s17 }
  0xd6   : > { %s9066_s16 = scalar_lea.hbm %s11242_s6, 24576 }
  0xd7   : > { %p9067_p13 = scmp.ne.s32.totalorder %s11242_s6, %s9066_s16  ;;  %p9073_p5 = scmp.lt.u32.totalorder %s9066_s16, %s11242_s6 }
  0xd9   : > { %p9069_p1 = pnand %p9067_p13, %p9481_p0 }
  0xdb   : > { %p9070_p6 = pneg %p9069_p1 }
  0xdd   : > { %p9075_p9 = pnand %p9073_p5, %p9070_p6 }
  0xdf   : > { %9078 = shalt.err (!%p9075_p9)
}
  0xe0   : > { %s9079_s15 = scalar_lea.vmem %s452_s24, 24576  ;;  %p9087_p4 = scmp.lt.s32.totalorder %s452_s24, %s452_s24 }
  0xe1   : > { %p9080_p10 = scmp.ne.s32.totalorder %s452_s24, %s9079_s15  ;;  %p9088_p7 = scmp.lt.s32.totalorder %s9079_s15, %s9079_s15 }
  0xe3   : > { %p9082_p2 = pnand %p9080_p10, %p9481_p0  ;;  %p9089_p8 = por %p9088_p7, %p9087_p4 }
  0xe5   : > { %p9083_p3 = pneg %p9082_p2 }
  0xe7   : > { %p9090_p11 = pnand %p9089_p8, %p9083_p3 }
  0xe9   : > { %9093 = shalt.err (!%p9090_p11)
}
  0xea   : > { %s11289_s21 = smov 32   ;;  %s11290_s29 = smov 512  }
  0xeb   : > { %8741 = dma.hbm_to_vmem [thread:$0]  (!%p9465_p12), %s11242_s6, 24576, %s452_s24, [#allocation11], %s11290_s29, %s11290_s29, %s11289_s21  }
  0xec   : > { %s9094_s3 = scalar_lea.hbm %s11244_s8, 64 }
  0xed   : > { %p9095_p13 = scmp.ne.s32.totalorder %s11244_s8, %s9094_s3  ;;  %p9101_p5 = scmp.lt.u32.totalorder %s9094_s3, %s11244_s8 }
  0xef   : > { %p9097_p1 = pnand %p9095_p13, %p9481_p0 }
  0xf1   : > { %p9098_p6 = pneg %p9097_p1 }
  0xf3   : > { %p9103_p9 = pnand %p9101_p5, %p9098_p6 }
  0xf5   : > { %9106 = shalt.err (!%p9103_p9)
}
  0xf6   : > { %s9107_s27 = scalar_lea.vmem %s479_s17, 64  ;;  %p9115_p4 = scmp.lt.s32.totalorder %s479_s17, %s479_s17 }
  0xf7   : > { %p9108_p10 = scmp.ne.s32.totalorder %s479_s17, %s9107_s27  ;;  %p9116_p7 = scmp.lt.s32.totalorder %s9107_s27, %s9107_s27 }
  0xf9   : > { %p9110_p2 = pnand %p9108_p10, %p9481_p0  ;;  %p9117_p8 = por %p9116_p7, %p9115_p4 }
  0xfb   : > { %p9111_p3 = pneg %p9110_p2 }
  0xfd   : > { %p9118_p11 = pnand %p9117_p8, %p9111_p3 }
  0xff   : > { %9121 = shalt.err (!%p9118_p11)
}
 0x100   : > { %8747 = dma.hbm_to_vmem [thread:$0]  (!%p9465_p12), %s11244_s8, 64, %s479_s17, [#allocation14]  }
 0x101   : > { %s9317_s15 = smov [#allocation18]   ;;  %s9318_s29 = smov [#allocation21]  }
 0x102   : > { %s502_s21 = sshll.u32 %s9317_s15, 4  ;;  %s526_s2 = sshll.u32 %s9318_s29, 4  ;;  %s503_s21 = int_to_ptr.vmem [resolvable:$true] %s502_s21  ;;  %s527_s2 = int_to_ptr.vmem [resolvable:$true] %s526_s2 }
 0x103   : > { %s9122_s28 = scalar_lea.hbm %s11246_s10, 32 }
 0x104   : > { %p9123_p13 = scmp.ne.s32.totalorder %s11246_s10, %s9122_s28  ;;  %p9129_p5 = scmp.lt.u32.totalorder %s9122_s28, %s11246_s10 }
 0x106   : > { %p9125_p1 = pnand %p9123_p13, %p9481_p0 }
 0x108   : > { %p9126_p6 = pneg %p9125_p1 }
 0x10a   : > { %p9131_p9 = pnand %p9129_p5, %p9126_p6 }
 0x10c   : > { %9134 = shalt.err (!%p9131_p9)
}
 0x10d   : > { %s9135_s17 = scalar_lea.vmem %s503_s21, 32  ;;  %p9143_p4 = scmp.lt.s32.totalorder %s503_s21, %s503_s21 }
 0x10e   : > { %p9136_p10 = scmp.ne.s32.totalorder %s503_s21, %s9135_s17  ;;  %p9144_p7 = scmp.lt.s32.totalorder %s9135_s17, %s9135_s17 }
 0x110   : > { %p9138_p2 = pnand %p9136_p10, %p9481_p0  ;;  %p9145_p8 = por %p9144_p7, %p9143_p4 }
 0x112   : > { %p9139_p3 = pneg %p9138_p2 }
 0x114   : > { %p9146_p11 = pnand %p9145_p8, %p9139_p3 }
 0x116   : > { %9149 = shalt.err (!%p9146_p11)
}
 0x117   : > { %8753 = dma.hbm_to_vmem [thread:$0]  (!%p9465_p12), %s11246_s10, 32, %s503_s21, [#allocation17]  }
 0x118   : > { %s9150_s15 = scalar_lea.hbm %s11248_s12, 16 }
 0x119   : > { %p9151_p13 = scmp.ne.s32.totalorder %s11248_s12, %s9150_s15  ;;  %p9157_p5 = scmp.lt.u32.totalorder %s9150_s15, %s11248_s12 }
 0x11b   : > { %p9153_p1 = pnand %p9151_p13, %p9481_p0 }
 0x11d   : > { %p9154_p6 = pneg %p9153_p1 }
 0x11f   : > { %p9159_p9 = pnand %p9157_p5, %p9154_p6 }
 0x121   : > { %9162 = shalt.err (!%p9159_p9)
}
 0x122   : > { %s9163_s3 = scalar_lea.vmem %s527_s2, 16  ;;  %s9170_s21 = scalar_lea.vmem %s527_s2, 32 }
 0x123   : > { %p9164_p10 = scmp.ne.s32.totalorder %s527_s2, %s9163_s3  ;;  %p9171_p4 = scmp.lt.s32.totalorder %s527_s2, %s527_s2 }
 0x124   : > { %p9172_p7 = scmp.lt.s32.totalorder %s9170_s21, %s9163_s3 }
 0x125   : > { %p9166_p2 = pnand %p9164_p10, %p9481_p0 }
 0x126   : > { %p9173_p8 = por %p9172_p7, %p9171_p4 }
 0x127   : > { %p9167_p3 = pneg %p9166_p2 }
 0x129   : > { %p9174_p11 = pnand %p9173_p8, %p9167_p3 }
 0x12b   : > { %9177 = shalt.err (!%p9174_p11)
}
 0x12c   : > { %8759 = dma.hbm_to_vmem [thread:$0]  (!%p9465_p12), %s11248_s12, 16, %s527_s2, [#allocation20]  }
 0x12d   : > { %s9319_s20 = smov [#allocation22]   ;;  %s9178_s24 = scalar_lea.hbm %s11250_s14, 16 }
 0x12e   : > { %s540_s17 = sshll.u32 %s9319_s20, 4  ;;  %p9179_p13 = scmp.ne.s32.totalorder %s11250_s14, %s9178_s24  ;;  %s541_s17 = int_to_ptr.vmem [resolvable:$true] %s540_s17 }
 0x12f   : > { %p9185_p5 = scmp.lt.u32.totalorder %s9178_s24, %s11250_s14 }
 0x130   : > { %p9181_p1 = pnand %p9179_p13, %p9481_p0 }
 0x132   : > { %p9182_p6 = pneg %p9181_p1 }
 0x134   : > { %p9187_p9 = pnand %p9185_p5, %p9182_p6 }
 0x136   : > { %9190 = shalt.err (!%p9187_p9)
}
 0x137   : > { %s9191_s2 = scalar_lea.vmem %s541_s17, 16  ;;  %s9198_s25 = scalar_lea.vmem %s541_s17, 32 }
 0x138   : > { %p9192_p10 = scmp.ne.s32.totalorder %s541_s17, %s9191_s2  ;;  %p9199_p4 = scmp.lt.s32.totalorder %s541_s17, %s541_s17 }
 0x139   : > { %p9200_p7 = scmp.lt.s32.totalorder %s9198_s25, %s9191_s2 }
 0x13a   : > { %p9194_p2 = pnand %p9192_p10, %p9481_p0 }
 0x13b   : > { %p9201_p8 = por %p9200_p7, %p9199_p4 }
 0x13c   : > { %p9195_p3 = pneg %p9194_p2 }
 0x13e   : > { %p9202_p11 = pnand %p9201_p8, %p9195_p3 }
 0x140   : > { %9205 = shalt.err (!%p9202_p11)
}
 0x141   : > { %8762 = dma.hbm_to_vmem [thread:$0]  (!%p9465_p12), %s11250_s14, 16, %s541_s17, [#allocation23]  }
 0x142   : > { %p11291_p13 = scmp.ne.s32.totalorder %s11282_s30, 0 }
 0x143   : > { %p11292_p1 = scmp.eq.s32.totalorder (!%p11291_p13), %s9429_s22, 0 }
 0x144   : > { %567 = sbr.rel (%p11291_p13) target bundleno = 2728 (0xaa8), region = 80 }
 0x14b   : > { %9251 = dma.done.wait (%p11292_p1), [#allocation5], 64000   ;;  %p11293_p0 = pmov %p11292_p1 }
 0x14d   : > { %9253 = vsyncadd (%p11293_p0), [#allocation5], 4294903296  ;;  %p11294_p6 = pmov %p11293_p0 }
 0x14e   : > { %p11295_p5 = pmov %p11293_p0 }
 0x14f   : > { %9255 = dma.done.wait (%p11294_p6), [#allocation8], 46160  }
 0x150   : > { %9257 = vsyncadd (%p11295_p5), [#allocation8], 4294921136  ;;  %p11296_p9 = pmov %p11293_p0 }
 0x151   : > { %p11297_p12 = pmov %p11293_p0 }
 0x152   : > { %9259 = dma.done.wait (%p11296_p9), [#allocation11], 24624  }
 0x153   : > { %9261 = vsyncadd (%p11297_p12), [#allocation11], 4294942672  ;;  %p11298_p10 = pmov %p11293_p0 }
 0x154   : > { %p11299_p2 = pmov %p11293_p0 }
 0x155   : > { %9263 = dma.done.wait (%p11298_p10), [#allocation14], 8256  }
 0x156   : > { %9265 = vsyncadd (%p11299_p2), [#allocation14], 4294959040  ;;  %p11300_p3 = pmov %p11293_p0 }
 0x157   : > { %p11301_p4 = pmov %p11293_p0 }
 0x158   : > { %9267 = dma.done.wait (%p11300_p3), [#allocation17], 16416  }
 0x159   : > { %9269 = vsyncadd (%p11301_p4), [#allocation17], 4294950880  ;;  %p11302_p7 = pmov %p11293_p0 }
 0x15a   : > { %p11303_p8 = pmov %p11293_p0 }
 0x15b   : > { %9271 = dma.done.wait (%p11302_p7), [#allocation20], 4112  }
 0x15c   : > { %9273 = vsyncadd (%p11303_p8), [#allocation20], 4294963184  ;;  %p11304_p11 = pmov %p11293_p0 }
 0x15d   : > { %p11305_p13 = pmov %p11293_p0 }
 0x15e   : > { %9275 = dma.done.wait (%p11304_p11), [#allocation23], 16  }
 0x15f   : > { %9277 = vsyncadd (%p11305_p13), [#allocation23], 4294967280  ;;  %v684_v0 = vld [vmem:[#allocation4 + $0x8] sm:$0xff]  ;;  %v689_v1 = vld [vmem:[#allocation4 + $0x30] sm:$0xff]  ;;  %p661_p1 = scmp.lt.s32.totalorder %s9429_s22, 1  ;;  %vm783_vm0 = vcmask 228352  }
 0x160   : > { %v686_v2 = vld [vmem:[#allocation4 + $0x18] sm:$0xff]  ;;  %v7204_v3 = vpack.c.bf16 %v689_v1, %v684_v0  ;;  %v691_v4 = vld [vmem:[#allocation4 + $0x40] sm:$0xff]  ;;  %v688_v6 = vld [vmem:[#allocation4 + $0x28] sm:$0xff]  ;;  %vm802_vm1 = vcmask 1043456   ;;  %vm9320_vm2 = vmmov 1   ;;  %vm1285_vm4 = vcmask 1046528  }
 0x161   : > { %v683_v5 = vld [vmem:[#allocation4] sm:$0xff]  ;;  %v7246_v7 = vpack.c.bf16 %v691_v4, %v686_v2  ;;  %v685_v9 = vld [vmem:[#allocation4 + $0x10] sm:$0xff]  ;;  %v690_v10 = vld [vmem:[#allocation4 + $0x38] sm:$0xff]  ;;  %s9742_s30 = scalar_select %p661_p1, %s9429_s22, 1  ;;  %vm1833_vm5 = vcmask 1045504   ;;  %vm2381_vm6 = vcmask 1044480  }
 0x162   : > { %v7206_v8 = vpack.c.bf16 %v688_v6, %v683_v5  ;;  %v694_v11 = vld [vmem:[#allocation4 + $0x58] sm:$0xff]  ;;  %7205 = vmatprep.subr.bf16.mxu0 %v7204_v3  ;;  %v7248_v12 = vpack.c.bf16 %v690_v10, %v685_v9  ;;  %v699_v13 = vld [vmem:[#allocation4 + $0x80] sm:$0xff]  ;;  %v696_v14 = vld [vmem:[#allocation4 + $0x68] sm:$0xff]  ;;  %vm1119_vm7 = vcmask 523264   ;;  %s9322_s19 = smov 64   ;;  %s9324_s20 = smov 32  }
 0x163   : > { %v701_v15 = vld [vmem:[#allocation4 + $0x90] sm:$0xff]  ;;  %7247 = vmatprep.subr.bf16.mxu1 %v7246_v7  ;;  %v7208_v16 = vpack.c.bf16 %v699_v13, %v694_v11  ;;  %v698_v19 = vld [vmem:[#allocation4 + $0x78] sm:$0xff]  ;;  %v695_v20 = vld [vmem:[#allocation4 + $0x60] sm:$0xff]  ;;  %s8675_s26 = smul.u32 112, %s9742_s30  ;;  %vm5206_vm9 = vcmask 261120   ;;  %vm5349_vm10 = vcmask 785408   ;;  %s668_s27 = scalar_lea.vmem %s11237_s1, %s9742_s30 }
 0x164   : > { %7207 = vmatpush1.bf16.msra.mxu0 %v7206_v8  ;;  %v7250_v17 = vpack.c.bf16 %v701_v15, %v696_v14  ;;  %v693_v18 = vld [vmem:[#allocation4 + $0x50] sm:$0xff]  ;;  %7249 = vmatpush1.bf16.msra.mxu1 %v7248_v12  ;;  %v700_v22 = vld [vmem:[#allocation4 + $0x88] sm:$0xff]  ;;  %v706_v27 = vld [vmem:[#allocation4 + $0xb8] sm:$0xff]  ;;  %s11310_s30 = sld [smem:[#allocation34_spill]]  ;;  %vm9326_vm11 = vmmov 0   ;;  %s7114_s17 = sshll.u32 %s9429_s22, 4 }
 0x165   : > { %v7210_v21 = vpack.c.bf16 %v698_v19, %v693_v18  ;;  %v704_v23 = vld [vmem:[#allocation4 + $0xa8] sm:$0xff]  ;;  %v709_v24 = vld [vmem:[#allocation4 + $0xd0] sm:$0xff]  ;;  %7209 = vmatprep.subr.bf16.mxu0 %v7208_v16  ;;  %v7252_v25 = vpack.c.bf16 %v700_v22, %v695_v20  ;;  %v711_v28 = vld [vmem:[#allocation4 + $0xe0] sm:$0xff]  ;;  %s9748_s18 = scalar_lea.vmem %s11236_s0, %s8675_s26  ;;  %vm6746_vm12 = vcmask 57344   ;;  %s11312_s15 = sld [smem:[#allocation45_spill]] }
 0x166   : > { %7251 = vmatprep.subr.bf16.mxu1 %v7250_v17  ;;  %v7212_v26 = vpack.c.bf16 %v709_v24, %v704_v23  ;;  %v703_v29 = vld [vmem:[#allocation4 + $0xa0] sm:$0xff]  ;;  %v7254_v30 = vpack.c.bf16 %v711_v28, %v706_v27  ;;  %v708_v31 = vld [vmem:[#allocation4 + $0xc8] sm:$0xff]  ;;  %v705_v32 = vld [vmem:[#allocation4 + $0xb0] sm:$0xff]  ;;  %s9327_s22 = smov [#allocation24]  }
 0x167   : > { %v710_v33 = vld [vmem:[#allocation4 + $0xd8] sm:$0xff]  ;;  %v7214_v34 = vpack.c.bf16 %v708_v31, %v703_v29  ;;  %v719_v36 = vld [vmem:[#allocation4 + $0x120] sm:$0xff]  ;;  %v716_v37 = vld [vmem:[#allocation4 + $0x108] sm:$0xff]  ;;  %s9210_s25 = sshll.u32 %s9327_s22, 4  ;;  %s9211_s25 = int_to_ptr.vmem [resolvable:$false] %s9210_s25 }
 0x168   : > { %7211 = vmatpush1.bf16.msra.mxu0 %v7210_v21  ;;  %v714_v35 = vld [vmem:[#allocation4 + $0xf8] sm:$0xff]  ;;  %7253 = vmatpush1.bf16.msra.mxu1 %v7252_v25  ;;  %v7256_v38 = vpack.c.bf16 %v710_v33, %v705_v32  ;;  %v721_v40 = vld [vmem:[#allocation4 + $0x130] sm:$0xff]  ;;  %v715_v44 = vld [vmem:[#allocation4 + $0x100] sm:$0xff]  ;;  %s9212_s28 = scalar_lea.vmem %s9211_s25, 32 }
 0x169   : > { %7213 = vmatprep.subr.bf16.mxu0 %v7212_v26  ;;  %v7216_v39 = vpack.c.bf16 %v719_v36, %v714_v35  ;;  %v713_v41 = vld [vmem:[#allocation4 + $0xf0] sm:$0xff]  ;;  %v718_v42 = vld [vmem:[#allocation4 + $0x118] sm:$0xff]  ;;  %7255 = vmatprep.subr.bf16.mxu1 %v7254_v30  ;;  %v7258_v43 = vpack.c.bf16 %v721_v40, %v716_v37  ;;  %v720_v45 = vld [vmem:[#allocation4 + $0x128] sm:$0xff] }
 0x16a   : > { %v724_v46 = vld [vmem:[#allocation4 + $0x148] sm:$0xff]  ;;  %v729_v47 = vld [vmem:[#allocation4 + $0x170] sm:$0xff]  ;;  %v726_v48 = vld [vmem:[#allocation4 + $0x158] sm:$0xff]  ;;  %v7218_v50 = vpack.c.bf16 %v718_v42, %v713_v41  ;;  %v7260_v51 = vpack.c.bf16 %v720_v45, %v715_v44 }
 0x16b   : > { %v731_v49 = vld [vmem:[#allocation4 + $0x180] sm:$0xff]  ;;  %v7220_v52 = vpack.c.bf16 %v729_v47, %v724_v46  ;;  %v728_v54 = vld [vmem:[#allocation4 + $0x168] sm:$0xff]  ;;  %v725_v55 = vld [vmem:[#allocation4 + $0x150] sm:$0xff]  ;;  %s11194_s29 = scalar_lea.hbm %s11312_s15, %s7114_s17 }
 0x16c   : > { %7215 = vmatpush1.bf16.msra.mxu0 %v7214_v34  ;;  %7257 = vmatpush1.bf16.msra.mxu1 %v7256_v38  ;;  %v723_v53 = vld [vmem:[#allocation4 + $0x140] sm:$0xff]  ;;  %v7262_v56 = vpack.c.bf16 %v731_v49, %v726_v48  ;;  %v730_v57 = vld [vmem:[#allocation4 + $0x178] sm:$0xff]  ;;  %v736_v60 = vld [vmem:[#allocation4 + $0x1a8] sm:$0xff] }
 0x16d   : > { %7217 = vmatprep.subr.bf16.mxu0 %v7216_v39  ;;  %7259 = vmatprep.subr.bf16.mxu1 %v7258_v43  ;;  %v734_v58 = vld [vmem:[#allocation4 + $0x198] sm:$0xff]  ;;  %v739_v59 = vld [vmem:[#allocation4 + $0x1c0] sm:$0xff]  ;;  %v741_v61 = vld [vmem:[#allocation4 + $0x1d0] sm:$0xff]  ;;  %v7222_v62 = vpack.c.bf16 %v728_v54, %v723_v53  ;;  %v7264_v63 = vpack.c.bf16 %v730_v57, %v725_v55 }
 0x16e   : > { %v7224_v0 = vpack.c.bf16 %v739_v59, %v734_v58  ;;  %v733_v1 = vld [vmem:[#allocation4 + $0x190] sm:$0xff]  ;;  %v738_v2 = vld [vmem:[#allocation4 + $0x1b8] sm:$0xff]  ;;  %v735_v3 = vld [vmem:[#allocation4 + $0x1a0] sm:$0xff]  ;;  %v7266_v4 = vpack.c.bf16 %v741_v61, %v736_v60 }
 0x16f   : > { %v740_v5 = vld [vmem:[#allocation4 + $0x1c8] sm:$0xff]  ;;  %v749_v7 = vld [vmem:[#allocation4 + $0x210] sm:$0xff]  ;;  %v746_v8 = vld [vmem:[#allocation4 + $0x1f8] sm:$0xff]  ;;  %v7226_v10 = vpack.c.bf16 %v738_v2, %v733_v1 }
 0x170   : > { %7219 = vmatpush1.bf16.msra.mxu0 %v7218_v50  ;;  %7261 = vmatpush1.bf16.msra.mxu1 %v7260_v51  ;;  %v744_v6 = vld [vmem:[#allocation4 + $0x1e8] sm:$0xff]  ;;  %v751_v9 = vld [vmem:[#allocation4 + $0x220] sm:$0xff]  ;;  %v7268_v11 = vpack.c.bf16 %v740_v5, %v735_v3  ;;  %v745_v15 = vld [vmem:[#allocation4 + $0x1f0] sm:$0xff]  ;;  %v9321_v5 = vmov 0.0|0.0  }
 0x171   : > { %7221 = vmatprep.subr.bf16.mxu0 %v7220_v52  ;;  %7263 = vmatprep.subr.bf16.mxu1 %v7262_v56  ;;  %v7228_v12 = vpack.c.bf16 %v749_v7, %v744_v6  ;;  %v743_v13 = vld [vmem:[#allocation4 + $0x1e0] sm:$0xff]  ;;  %v748_v14 = vld [vmem:[#allocation4 + $0x208] sm:$0xff]  ;;  %v7270_v16 = vpack.c.bf16 %v751_v9, %v746_v8  ;;  %v750_v17 = vld [vmem:[#allocation4 + $0x218] sm:$0xff] }
 0x172   : > { %v754_v18 = vld [vmem:[#allocation4 + $0x238] sm:$0xff]  ;;  %v759_v19 = vld [vmem:[#allocation4 + $0x260] sm:$0xff]  ;;  %v756_v20 = vld [vmem:[#allocation4 + $0x248] sm:$0xff]  ;;  %v7230_v22 = vpack.c.bf16 %v748_v14, %v743_v13  ;;  %v7272_v24 = vpack.c.bf16 %v750_v17, %v745_v15 }
 0x173   : > { %v761_v21 = vld [vmem:[#allocation4 + $0x270] sm:$0xff]  ;;  %v7232_v25 = vpack.c.bf16 %v759_v19, %v754_v18  ;;  %v758_v26 = vld [vmem:[#allocation4 + $0x258] sm:$0xff]  ;;  %v755_v27 = vld [vmem:[#allocation4 + $0x240] sm:$0xff] }
 0x174   : > { %7223 = vmatpush1.bf16.msra.mxu0 %v7222_v62  ;;  %7265 = vmatpush1.bf16.msra.mxu1 %v7264_v63  ;;  %v753_v23 = vld [vmem:[#allocation4 + $0x230] sm:$0xff]  ;;  %v760_v28 = vld [vmem:[#allocation4 + $0x268] sm:$0xff]  ;;  %v7274_v29 = vpack.c.bf16 %v761_v21, %v756_v20  ;;  %v9751_v32 = vld [vmem:[%s9748_s18 + $0x8] sm:$0xff] }
 0x175   : > { %7225 = vmatprep.subr.bf16.mxu0 %v7224_v0  ;;  %7267 = vmatprep.subr.bf16.mxu1 %v7266_v4  ;;  %v764_v30 = vld [vmem:[#allocation4 + $0x288] sm:$0xff]  ;;  %v769_v31 = vld [vmem:[#allocation4 + $0x2b0] sm:$0xff]  ;;  %v766_v33 = vld [vmem:[#allocation4 + $0x298] sm:$0xff]  ;;  %v7234_v35 = vpack.c.bf16 %v758_v26, %v753_v23  ;;  %v7276_v36 = vpack.c.bf16 %v760_v28, %v755_v27 }
 0x176   : > { %v771_v34 = vld [vmem:[#allocation4 + $0x2c0] sm:$0xff]  ;;  %6973 = vmatprep.mubr.msk.f32.mxu0 %vm783_vm0, %v9751_v32  ;;  %6981 = vmatprep.mubr.msk.f32.mxu1 %vm783_vm0, %v9751_v32  ;;  %v7236_v37 = vpack.c.bf16 %v769_v31, %v764_v30  ;;  %v768_v39 = vld [vmem:[#allocation4 + $0x2a8] sm:$0xff]  ;;  %v765_v40 = vld [vmem:[#allocation4 + $0x290] sm:$0xff] }
 0x177   : > { %v763_v38 = vld [vmem:[#allocation4 + $0x280] sm:$0xff]  ;;  %v7278_v41 = vpack.c.bf16 %v771_v34, %v766_v33  ;;  %v770_v42 = vld [vmem:[#allocation4 + $0x2b8] sm:$0xff]  ;;  %v776_v45 = vld [vmem:[#allocation4 + $0x2e8] sm:$0xff] }
 0x178   : > { %7227 = vmatpush1.bf16.msra.mxu0 %v7226_v10  ;;  %7269 = vmatpush1.bf16.msra.mxu1 %v7268_v11  ;;  %v774_v43 = vld [vmem:[#allocation4 + $0x2d8] sm:$0xff]  ;;  %v779_v44 = vld [vmem:[#allocation4 + $0x300] sm:$0xf]  ;;  %v781_v46 = vld [vmem:[#allocation4 + $0x310] sm:$0xf]  ;;  %v7238_v47 = vpack.c.bf16 %v768_v39, %v763_v38  ;;  %v7280_v48 = vpack.c.bf16 %v770_v42, %v765_v40 }
 0x179   : > { %7229 = vmatprep.subr.bf16.mxu0 %v7228_v12  ;;  %7271 = vmatprep.subr.bf16.mxu1 %v7270_v16  ;;  %v7240_v49 = vpack.c.bf16 %v779_v44, %v774_v43  ;;  %v773_v50 = vld [vmem:[#allocation4 + $0x2d0] sm:$0xff]  ;;  %v778_v51 = vld [vmem:[#allocation4 + $0x2f8] sm:$0xf]  ;;  %vm9758_vm3 = vmpackc.low %vm802_vm1, %vm9320_vm2  ;;  %v7282_v53 = vpack.c.bf16 %v781_v46, %v776_v45 }
 0x17a   : > { %v775_v54 = vld [vmem:[#allocation4 + $0x2e0] sm:$0xff]  ;;  %v780_v55 = vld [vmem:[#allocation4 + $0x308] sm:$0xf]  ;;  %v1183_v57 = vld [vmem:[#allocation4 + $0x350] sm:$0xff]  ;;  %v7243_v58 = vpack.c.bf16 %v778_v51, %v773_v50 }
 0x17b   : > { %v1178_v56 = vld [vmem:[#allocation4 + $0x328] sm:$0xff]  ;;  %v7285_v59 = vpack.c.bf16 %v780_v55, %v775_v54  ;;  %v687_v60 = vld [vmem:[#allocation4 + $0x20] sm:$0xff]  ;;  %v1188_v1 = vld [vmem:[#allocation4 + $0x378] sm:$0xff] }
 0x17c   : > { %7231 = vmatpush1.bf16.msra.mxu0 %v7230_v22  ;;  %7273 = vmatpush1.bf16.msra.mxu1 %v7272_v24  ;;  %v692_v61 = vld [vmem:[#allocation4 + $0x48] sm:$0xff]  ;;  %v7319_v62 = vpack.c.bf16 %v1183_v57, %v1178_v56  ;;  %v1177_v63 = vld [vmem:[#allocation4 + $0x320] sm:$0xff]  ;;  %v9769_v3 = vld [vmem:[%s9748_s18] sm:$0xff] }
 0x17d   : > { %7233 = vmatprep.subr.bf16.mxu0 %v7232_v25  ;;  %7275 = vmatprep.subr.bf16.mxu1 %v7274_v29  ;;  %v1182_v0 = vld [vmem:[#allocation4 + $0x348] sm:$0xff]  ;;  %v1193_v2 = vld [vmem:[#allocation4 + $0x3a0] sm:$0xff]  ;;  %v7289_v4 = vpack.c.bf16 %v692_v61, %v687_v60  ;;  %v697_v7 = vld [vmem:[#allocation4 + $0x70] sm:$0xff] }
 0x17e   : > { %v7321_v6 = vpack.c.bf16 %v1182_v0, %v1177_v63  ;;  %v702_v8 = vld [vmem:[#allocation4 + $0x98] sm:$0xff]  ;;  %v7323_v9 = vpack.c.bf16 %v1193_v2, %v1188_v1  ;;  %v1187_v10 = vld [vmem:[#allocation4 + $0x370] sm:$0xff]  ;;  %v1198_v12 = vld [vmem:[#allocation4 + $0x3c8] sm:$0xff]  ;;  %v1289_v63 = vrot.slane %v9751_v32, 1 }
 0x17f   : > { %v1192_v11 = vld [vmem:[#allocation4 + $0x398] sm:$0xff]  ;;  %v1203_v13 = vld [vmem:[#allocation4 + $0x3f0] sm:$0xff]  ;;  %v9776_v14 = vld [vmem:[%s9748_s18 + $0x18] sm:$0xff]  ;;  %v7292_v15 = vpack.c.bf16 %v702_v8, %v697_v7 }
 0x180   : > { %7235 = vmatpush1.bf16.msra.mxu0 %v7234_v35  ;;  %7277 = vmatpush1.bf16.msra.mxu1 %v7276_v36  ;;  %v9780_v16 = vld [vmem:[%s9748_s18 + $0x10] sm:$0xff]  ;;  %v7325_v17 = vpack.c.bf16 %v1192_v11, %v1187_v10  ;;  %v712_v19 = vld [vmem:[#allocation4 + $0xe8] sm:$0xff]  ;;  %v7327_v20 = vpack.c.bf16 %v1203_v13, %v1198_v12  ;;  %v1208_v23 = vld [vmem:[#allocation4 + $0x418] sm:$0xff]  ;;  %v1290_v0 = vrot.slane %v9776_v14, 1 }
 0x181   : > { %7237 = vmatprep.subr.bf16.mxu0 %v7236_v37  ;;  %7279 = vmatprep.subr.bf16.mxu1 %v7278_v41  ;;  %v707_v18 = vld [vmem:[#allocation4 + $0xc0] sm:$0xff]  ;;  %v1202_v22 = vld [vmem:[#allocation4 + $0x3e8] sm:$0xff]  ;;  %v9789_v25 = vld [vmem:[%s9748_s18 + $0x28] sm:$0xff] }
 0x182   : > { %v1197_v21 = vld [vmem:[#allocation4 + $0x3c0] sm:$0xff]  ;;  %v7295_v26 = vpack.c.bf16 %v712_v19, %v707_v18  ;;  %v9793_v27 = vld [vmem:[%s9748_s18 + $0x20] sm:$0xff]  ;;  %v722_v30 = vld [vmem:[#allocation4 + $0x138] sm:$0xff]  ;;  %v9846_v12 = vsel %vm1285_vm4, %v1289_v63, %v1290_v0 }
 0x183   : > { %v1213_v24 = vld [vmem:[#allocation4 + $0x440] sm:$0xff]  ;;  %v7329_v28 = vpack.c.bf16 %v1202_v22, %v1197_v21  ;;  %v717_v29 = vld [vmem:[#allocation4 + $0x110] sm:$0xff]  ;;  %v1212_v34 = vld [vmem:[#allocation4 + $0x438] sm:$0xff] }
 0x184   : > { %7239 = vmatpush1.bf16.msra.mxu0 %v7238_v47  ;;  %7281 = vmatpush1.bf16.msra.mxu1 %v7280_v48  ;;  %v7331_v31 = vpack.c.bf16 %v1213_v24, %v1208_v23  ;;  %v1207_v33 = vld [vmem:[#allocation4 + $0x410] sm:$0xff]  ;;  %v1218_v35 = vld [vmem:[#allocation4 + $0x468] sm:$0xff]  ;;  %v7298_v38 = vpack.c.bf16 %v722_v30, %v717_v29  ;;  %v9806_v39 = vld [vmem:[%s9748_s18 + $0x30] sm:$0xff] }
 0x185   : > { %7242 = vmatprep.subr.msk.bf16.mxu0 %vm9758_vm3, %v7240_v49  ;;  %7284 = vmatprep.subr.msk.bf16.mxu1 %vm9758_vm3, %v7282_v53  ;;  %v1223_v36 = vld [vmem:[#allocation4 + $0x490] sm:$0xff]  ;;  %v9802_v37 = vld [vmem:[%s9748_s18 + $0x38] sm:$0xff]  ;;  %v7333_v40 = vpack.c.bf16 %v1212_v34, %v1207_v33  ;;  %v727_v41 = vld [vmem:[#allocation4 + $0x160] sm:$0xff] }
 0x186   : > { %v732_v42 = vld [vmem:[#allocation4 + $0x188] sm:$0xff]  ;;  %v7335_v43 = vpack.c.bf16 %v1223_v36, %v1218_v35  ;;  %v1217_v44 = vld [vmem:[#allocation4 + $0x460] sm:$0xff]  ;;  %v1228_v46 = vld [vmem:[#allocation4 + $0x4b8] sm:$0xff] }
 0x187   : > { %v1222_v45 = vld [vmem:[#allocation4 + $0x488] sm:$0xff]  ;;  %v1233_v47 = vld [vmem:[#allocation4 + $0x4e0] sm:$0xff]  ;;  %v9815_v48 = vld [vmem:[%s9748_s18 + $0x48] sm:$0xff]  ;;  %v7301_v49 = vpack.c.bf16 %v732_v42, %v727_v41 }
 0x188   : > { %7245 = vmatpush1.bf16.msk.msra.mxu0 %vm9758_vm3, %v7243_v58  ;;  %7287 = vmatpush1.bf16.msk.msra.mxu1 %vm9758_vm3, %v7285_v59  ;;  %v9819_v50 = vld [vmem:[%s9748_s18 + $0x40] sm:$0xff]  ;;  %v7337_v51 = vpack.c.bf16 %v1222_v45, %v1217_v44  ;;  %v742_v54 = vld [vmem:[#allocation4 + $0x1d8] sm:$0xff]  ;;  %v7339_v55 = vpack.c.bf16 %v1233_v47, %v1228_v46  ;;  %v1238_v58 = vld [vmem:[#allocation4 + $0x508] sm:$0xff] }
 0x189   : > { %7288 = vmatprep.subr.bf16.mxu0 %v9321_v5  ;;  %7320 = vmatprep.subr.bf16.mxu1 %v7319_v62  ;;  %v737_v53 = vld [vmem:[#allocation4 + $0x1b0] sm:$0xff]  ;;  %v1232_v57 = vld [vmem:[#allocation4 + $0x4d8] sm:$0xff]  ;;  %v9828_v60 = vld [vmem:[%s9748_s18 + $0x58] sm:$0xff] }
 0x18a   : > { %v1227_v56 = vld [vmem:[#allocation4 + $0x4b0] sm:$0xff]  ;;  %v7304_v61 = vpack.c.bf16 %v742_v54, %v737_v53  ;;  %v9832_v62 = vld [vmem:[%s9748_s18 + $0x50] sm:$0xff]  ;;  %v1242_v8 = vld [vmem:[#allocation4 + $0x528] sm:$0xff] }
 0x18b   : > { %883 = vmatmul.mubr.f32.vlgmr.msra.gmra.mrb[0].mxu0 %v9769_v3  ;;  %984 = vmatmul.mubr.f32.vlgmr.msra.gmra.mrb[0].mxu1 %v9769_v3  ;;  %v1243_v59 = vld [vmem:[#allocation4 + $0x530] sm:$0xff]  ;;  %v7341_v1 = vpack.c.bf16 %v1232_v57, %v1227_v56  ;;  %v747_v2 = vld [vmem:[#allocation4 + $0x200] sm:$0xff]  ;;  %v1258_v21 = vld [vmem:[#allocation4 + $0x5a8] sm:$0xff] }
 0x18c   : > { %7290 = vmatpush1.bf16.msra.mxu0 %v7289_v4  ;;  %7322 = vmatpush1.bf16.msra.mxu1 %v7321_v6  ;;  %v752_v4 = vld [vmem:[#allocation4 + $0x228] sm:$0xff]  ;;  %v7343_v6 = vpack.c.bf16 %v1243_v59, %v1238_v58  ;;  %v1237_v7 = vld [vmem:[#allocation4 + $0x500] sm:$0xff]  ;;  %v1247_v19 = vld [vmem:[#allocation4 + $0x550] sm:$0xff]  ;;  %v1294_v58 = vrot.slane %v9789_v25, 1 }
 0x18d   : > { %7291 = vmatprep.subr.bf16.mxu0 %v9321_v5  ;;  %7324 = vmatprep.subr.bf16.mxu1 %v7323_v9  ;;  %v1248_v9 = vld [vmem:[#allocation4 + $0x558] sm:$0xff]  ;;  %v1253_v10 = vld [vmem:[#allocation4 + $0x580] sm:$0xff]  ;;  %v7307_v11 = vpack.c.bf16 %v752_v4, %v747_v2  ;;  %v7345_v13 = vpack.c.bf16 %v1242_v8, %v1237_v7  ;;  %v1263_v22 = vld [vmem:[#allocation4 + $0x5d0] sm:$0xff]  ;;  %v1292_v4 = vrot.slane %v9793_v27, 1 }
 0x18e   : > { %6974 = vmatprep.mubr.msk.f32.mxu0 %vm783_vm0, %v9776_v14  ;;  %6982 = vmatprep.mubr.msk.f32.mxu1 %vm783_vm0, %v9776_v14  ;;  %v7347_v18 = vpack.c.bf16 %v1253_v10, %v1248_v9  ;;  %v7351_v29 = vpack.c.bf16 %v1263_v22, %v1258_v21  ;;  %v1257_v30 = vld [vmem:[#allocation4 + $0x5a0] sm:$0xff]  ;;  %v1268_v33 = vld [vmem:[#allocation4 + $0x5f8] sm:$0xff]  ;;  %v1267_v41 = vld [vmem:[#allocation4 + $0x5f0] sm:$0xff]  ;;  %v9873_v8 = vsel %vm1285_vm4, %v1290_v0, %v1294_v58 }
 0x18f   : > { %889 = vmatmul.mubr.f32.gmra.mrb[2].mxu0 %v9780_v16  ;;  %990 = vmatmul.mubr.f32.gmra.mrb[2].mxu1 %v9780_v16  ;;  %v1273_v34 = vld [vmem:[#allocation4 + $0x620] sm:$0xf]  ;;  %v1180_v44 = vld [vmem:[#allocation4 + $0x338] sm:$0xff]  ;;  %v1179_v54 = vld [vmem:[#allocation4 + $0x330] sm:$0xff] }
 0x190   : > { %7293 = vmatpush1.bf16.msra.mxu0 %v7292_v15  ;;  %7326 = vmatpush1.bf16.msra.mxu1 %v7325_v17  ;;  %v757_v15 = vld [vmem:[#allocation4 + $0x250] sm:$0xff]  ;;  %v762_v17 = vld [vmem:[#allocation4 + $0x278] sm:$0xff]  ;;  %v7355_v42 = vpack.c.bf16 %v1273_v34, %v1268_v33  ;;  %v1185_v45 = vld [vmem:[#allocation4 + $0x360] sm:$0xff] }
 0x191   : > { %7294 = vmatprep.subr.bf16.mxu0 %v9321_v5  ;;  %7328 = vmatprep.subr.bf16.mxu1 %v7327_v20  ;;  %v1252_v20 = vld [vmem:[#allocation4 + $0x578] sm:$0xff]  ;;  %v7310_v23 = vpack.c.bf16 %v762_v17, %v757_v15  ;;  %v7361_v53 = vpack.c.bf16 %v1185_v45, %v1180_v44  ;;  %v1181_v56 = vld [vmem:[#allocation4 + $0x340] sm:$0xff]  ;;  %v1186_v57 = vld [vmem:[#allocation4 + $0x368] sm:$0xff]  ;;  %v1306_v44 = vrot.slane %v9828_v60, 1 }
 0x192   : > { %6975 = vmatprep.mubr.msk.f32.mxu0 %vm783_vm0, %v9789_v25  ;;  %6983 = vmatprep.mubr.msk.f32.mxu1 %vm783_vm0, %v9789_v25  ;;  %v7349_v24 = vpack.c.bf16 %v1252_v20, %v1247_v19  ;;  %v1190_v59 = vld [vmem:[#allocation4 + $0x388] sm:$0xff]  ;;  %v7404_v2 = vpack.c.bf16 %v1186_v57, %v1181_v56  ;;  %v1191_v10 = vld [vmem:[#allocation4 + $0x390] sm:$0xff]  ;;  %v1200_v15 = vld [vmem:[#allocation4 + $0x3d8] sm:$0xff]  ;;  %v1296_v20 = vrot.slane %v9806_v39, 1 }
 0x193   : > { %895 = vmatmul.mubr.f32.gmra.mrb[4].mxu0 %v9793_v27  ;;  %996 = vmatmul.mubr.f32.gmra.mrb[4].mxu1 %v9793_v27  ;;  %v1194_v7 = vld [vmem:[#allocation4 + $0x3a8] sm:$0xff]  ;;  %v1205_v17 = vld [vmem:[#allocation4 + $0x400] sm:$0xff]  ;;  %v1199_v21 = vld [vmem:[#allocation4 + $0x3d0] sm:$0xff] }
 0x194   : > { %7296 = vmatpush1.bf16.msra.mxu0 %v7295_v26  ;;  %7330 = vmatpush1.bf16.msra.mxu1 %v7329_v28  ;;  %v767_v26 = vld [vmem:[#allocation4 + $0x2a0] sm:$0xff]  ;;  %v772_v28 = vld [vmem:[#allocation4 + $0x2c8] sm:$0xff]  ;;  %v1204_v22 = vld [vmem:[#allocation4 + $0x3f8] sm:$0xff]  ;;  %v9895_v33 = vsel %vm1285_vm4, %v1292_v4, %v1296_v20 }
 0x195   : > { %7297 = vmatprep.subr.bf16.mxu0 %v9321_v5  ;;  %7332 = vmatprep.subr.bf16.mxu1 %v7331_v31  ;;  %v1262_v31 = vld [vmem:[#allocation4 + $0x5c8] sm:$0xff]  ;;  %v7313_v35 = vpack.c.bf16 %v772_v28, %v767_v26  ;;  %v1302_v28 = vrot.slane %v9815_v48, 1  ;;  %v1220_v45 = vld [vmem:[#allocation4 + $0x478] sm:$0xff] }
 0x196   : > { %6976 = vmatprep.mubr.msk.f32.mxu0 %vm783_vm0, %v9802_v37  ;;  %6984 = vmatprep.mubr.msk.f32.mxu1 %vm783_vm0, %v9802_v37  ;;  %v7353_v36 = vpack.c.bf16 %v1262_v31, %v1257_v30  ;;  %v1206_v26 = vld [vmem:[#allocation4 + $0x408] sm:$0xff]  ;;  %v1215_v30 = vld [vmem:[#allocation4 + $0x450] sm:$0xff]  ;;  %v7371_v31 = vpack.c.bf16 %v1204_v22, %v1199_v21  ;;  %v1224_v56 = vld [vmem:[#allocation4 + $0x498] sm:$0xff] }
 0x197   : > { %901 = vmatmul.mubr.f32.gmra.mrb[6].mxu0 %v9806_v39  ;;  %1002 = vmatmul.mubr.f32.gmra.mrb[6].mxu1 %v9806_v39  ;;  %v9916_v57 = vsel %vm1285_vm4, %v1302_v28, %v1306_v44  ;;  %v1240_v21 = vld [vmem:[#allocation4 + $0x518] sm:$0xff]  ;;  %v1245_v22 = vld [vmem:[#allocation4 + $0x540] sm:$0xff] }
 0x198   : > { %7299 = vmatpush1.bf16.msra.mxu0 %v7298_v38  ;;  %7334 = vmatpush1.bf16.msra.mxu1 %v7333_v40  ;;  %v777_v38 = vld [vmem:[#allocation4 + $0x2f0] sm:$0xff]  ;;  %v782_v40 = vld [vmem:[#allocation4 + $0x318] sm:$0xf] }
 0x199   : > { %7300 = vmatprep.subr.bf16.mxu0 %v9321_v5  ;;  %7336 = vmatprep.subr.bf16.mxu1 %v7335_v43  ;;  %v1272_v43 = vld [vmem:[#allocation4 + $0x618] sm:$0xf]  ;;  %v7316_v46 = vpack.c.bf16 %v782_v40, %v777_v38  ;;  %v1214_v38 = vld [vmem:[#allocation4 + $0x448] sm:$0xff] }
 0x19a   : > { %6977 = vmatprep.mubr.msk.f32.mxu0 %vm783_vm0, %v9815_v48  ;;  %6985 = vmatprep.mubr.msk.f32.mxu1 %vm783_vm0, %v9815_v48  ;;  %v7358_v47 = vpack.c.bf16 %v1272_v43, %v1267_v41  ;;  %v1216_v43 = vld [vmem:[#allocation4 + $0x458] sm:$0xff] }
 0x19b   : > { %907 = vmatmul.mubr.f32.gmra.mrb[8].mxu0 %v9819_v50  ;;  %1008 = vmatmul.mubr.f32.gmra.mrb[8].mxu1 %v9819_v50 }
 0x19c   : > { %7302 = vmatpush1.bf16.msra.mxu0 %v7301_v49  ;;  %7338 = vmatpush1.bf16.msra.mxu1 %v7337_v51  ;;  %v1286_v49 = vrot.slane %v9769_v3, 1  ;;  %v1287_v51 = vrot.slane %v9780_v16, 1 }
 0x19d   : > { %7303 = vmatprep.subr.bf16.mxu0 %v9321_v5  ;;  %7340 = vmatprep.subr.bf16.mxu1 %v7339_v55  ;;  %v1184_v55 = vld [vmem:[#allocation4 + $0x358] sm:$0xff] }
 0x19e   : > { %6978 = vmatprep.mubr.msk.f32.mxu0 %vm783_vm0, %v9828_v60  ;;  %6986 = vmatprep.mubr.msk.f32.mxu1 %vm783_vm0, %v9828_v60  ;;  %v7363_v63 = vpack.c.bf16 %v1184_v55, %v1179_v54  ;;  %v9881_v0 = vsel %vm1285_vm4, %v1287_v51, %v1292_v4  ;;  %v1304_v54 = vrot.slane %v9832_v62, 1  ;;  %v1219_v55 = vld [vmem:[#allocation4 + $0x470] sm:$0xff]  ;;  %v1230_v4 = vld [vmem:[#allocation4 + $0x4c8] sm:$0xff] }
 0x19f   : > { %913 = vmatmul.mubr.f32.gmra.mrb[10].mxu0 %v9832_v62  ;;  %1014 = vmatmul.mubr.f32.gmra.mrb[10].mxu1 %v9832_v62 }
 0x1a0   : > { %7305 = vmatpush1.bf16.msra.mxu0 %v7304_v61  ;;  %7342 = vmatpush1.bf16.msra.mxu1 %v7341_v1  ;;  %v1195_v61 = vld [vmem:[#allocation4 + $0x3b0] sm:$0xff]  ;;  %v9866_v1 = vsel %vm1285_vm4, %v1286_v49, %v1287_v51 }
 0x1a1   : > { %7306 = vmatprep.subr.bf16.mxu0 %v9321_v5  ;;  %7344 = vmatprep.subr.bf16.mxu1 %v7343_v6  ;;  %v1189_v6 = vld [vmem:[#allocation4 + $0x380] sm:$0xff]  ;;  %v7365_v9 = vpack.c.bf16 %v1195_v61, %v1190_v59  ;;  %v1226_v61 = vld [vmem:[#allocation4 + $0x4a8] sm:$0xff] }
 0x1a2   : > { %6988 = vmatprep.mubr.msk.f32.mxu0 %vm783_vm0, %v9751_v32  ;;  %6996 = vmatprep.mubr.msk.f32.mxu1 %vm783_vm0, %v9846_v12  ;;  %v1221_v59 = vld [vmem:[#allocation4 + $0x480] sm:$0xff] }
 0x1a4   : > { %7308 = vmatpush1.bf16.msra.mxu0 %v7307_v11  ;;  %7346 = vmatpush1.bf16.msra.mxu1 %v7345_v13  ;;  %v1196_v11 = vld [vmem:[#allocation4 + $0x3b8] sm:$0xff]  ;;  %v1298_v13 = vrot.slane %v9802_v37, 1 }
 0x1a5   : > { %7309 = vmatprep.subr.bf16.mxu0 %v9321_v5  ;;  %7348 = vmatprep.subr.bf16.mxu1 %v7347_v18  ;;  %v7367_v18 = vpack.c.bf16 %v1194_v7, %v1189_v6  ;;  %v7407_v19 = vpack.c.bf16 %v1196_v11, %v1191_v10  ;;  %v1235_v6 = vld [vmem:[#allocation4 + $0x4f0] sm:$0xff]  ;;  %v7379_v7 = vpack.c.bf16 %v1224_v56, %v1219_v55 }
 0x1a6   : > { %v9900_v40 = vsel %vm1285_vm4, %v1298_v13, %v1302_v28  ;;  %v7416_v10 = vpack.c.bf16 %v1226_v61, %v1221_v59  ;;  %v7385_v28 = vpack.c.bf16 %v1245_v22, %v1240_v21  ;;  %v1264_v59 = vld [vmem:[#allocation4 + $0x5d8] sm:$0xff]  ;;  %v1261_v61 = vld [vmem:[#allocation4 + $0x5c0] sm:$0xff]  ;;  %v1739_v21 = vld [vmem:[#allocation4 + $0x670] sm:$0xff] }
 0x1a7   : > { %v1736_v22 = vld [vmem:[#allocation4 + $0x658] sm:$0xff] }
 0x1a8   : > { %7311 = vmatpush1.bf16.msra.mxu0 %v7310_v23  ;;  %7350 = vmatpush1.bf16.msra.mxu1 %v7349_v24  ;;  %v7369_v23 = vpack.c.bf16 %v1205_v17, %v1200_v15  ;;  %v1201_v24 = vld [vmem:[#allocation4 + $0x3e0] sm:$0xff]  ;;  %v1234_v15 = vld [vmem:[#allocation4 + $0x4e8] sm:$0xff]  ;;  %v1231_v17 = vld [vmem:[#allocation4 + $0x4d0] sm:$0xff] }
 0x1a9   : > { %7312 = vmatprep.subr.bf16.mxu0 %v9321_v5  ;;  %7352 = vmatprep.subr.bf16.mxu1 %v7351_v29  ;;  %v1210_v29 = vld [vmem:[#allocation4 + $0x428] sm:$0xff]  ;;  %v7410_v34 = vpack.c.bf16 %v1206_v26, %v1201_v24 }
 0x1aa   : > { %v7373_v41 = vpack.c.bf16 %v1215_v30, %v1210_v29  ;;  %v1239_v29 = vld [vmem:[#allocation4 + $0x510] sm:$0xff]  ;;  %v1244_v30 = vld [vmem:[#allocation4 + $0x538] sm:$0xff] }
 0x1ac   : > { %7314 = vmatpush1.bf16.msra.mxu0 %v7313_v35  ;;  %7354 = vmatpush1.bf16.msra.mxu1 %v7353_v36  ;;  %v1300_v35 = vrot.slane %v9819_v50, 1  ;;  %v1209_v36 = vld [vmem:[#allocation4 + $0x420] sm:$0xff] }
 0x1ad   : > { %7315 = vmatprep.subr.bf16.mxu0 %v9321_v5  ;;  %7357 = vmatprep.subr.msk.bf16.mxu1 %vm9758_vm3, %v7355_v42  ;;  %v1211_v42 = vld [vmem:[#allocation4 + $0x430] sm:$0xff]  ;;  %v7375_v49 = vpack.c.bf16 %v1214_v38, %v1209_v36  ;;  %v7387_v38 = vpack.c.bf16 %v1244_v30, %v1239_v29  ;;  %v1733_v30 = vld [vmem:[#allocation4 + $0x640] sm:$0xff] }
 0x1ae   : > { %v9911_v51 = vsel %vm1285_vm4, %v1296_v20, %v1300_v35  ;;  %v1236_v20 = vld [vmem:[#allocation4 + $0x4f8] sm:$0xff]  ;;  %v1255_v36 = vld [vmem:[#allocation4 + $0x590] sm:$0xff] }
 0x1af   : > { %v7419_v26 = vpack.c.bf16 %v1236_v20, %v1231_v17  ;;  %v1271_v17 = vld [vmem:[#allocation4 + $0x610] sm:$0xff]  ;;  %v1734_v20 = vld [vmem:[#allocation4 + $0x648] sm:$0xff] }
 0x1b0   : > { %7318 = vmatpush1.bf16.msk.msra.mxu0 %vm9758_vm3, %v7316_v46  ;;  %7360 = vmatpush1.bf16.msk.msra.mxu1 %vm9758_vm3, %v7358_v47  ;;  %v1225_v46 = vld [vmem:[#allocation4 + $0x4a0] sm:$0xff]  ;;  %v9904_v47 = vld [vmem:[%s9748_s18 + $0x68] sm:$0xf]  ;;  %v7434_v29 = vpack.c.bf16 %v1739_v21, %v1734_v20  ;;  %v1766_v20 = vld [vmem:[#allocation4 + $0x748] sm:$0xff] }
 0x1b1   : > { %7362 = vmatprep.subr.bf16.mxu0 %v7361_v53  ;;  %7403 = vmatprep.subr.bf16.mxu1 %v9321_v5  ;;  %v7413_v53 = vpack.c.bf16 %v1216_v43, %v1211_v42  ;;  %v1249_v43 = vld [vmem:[#allocation4 + $0x560] sm:$0xff]  ;;  %v1771_v21 = vld [vmem:[#allocation4 + $0x770] sm:$0xff] }
 0x1b3   : > { %1085 = vmatmul.mubr.f32.vlgmr.msra.gmra.mrb[12].mxu0 %v9769_v3  ;;  %1410 = vmatmul.mubr.f32.vlgmr.msra.gmra.mrb[12].mxu1 %v9866_v1  ;;  %v9886_v3 = vsel %vm1285_vm4, %v1294_v58, %v1298_v13  ;;  %v7377_v58 = vpack.c.bf16 %v1225_v46, %v1220_v45  ;;  %v1229_v13 = vld [vmem:[#allocation4 + $0x4c0] sm:$0xff]  ;;  %v1251_v45 = vld [vmem:[#allocation4 + $0x570] sm:$0xff]  ;;  %v1256_v46 = vld [vmem:[#allocation4 + $0x598] sm:$0xff] }
 0x1b4   : > { %7364 = vmatpush1.bf16.msra.mxu0 %v7363_v63  ;;  %7405 = vmatpush1.bf16.msra.mxu1 %v7404_v2  ;;  %v1310_v63 = vrot.slane %v9904_v47, 1  ;;  %v9920_v2 = vld [vmem:[%s9748_s18 + $0x60] sm:$0xf]  ;;  %v7425_v55 = vpack.c.bf16 %v1256_v46, %v1251_v45  ;;  %v1748_v46 = vld [vmem:[#allocation4 + $0x6b8] sm:$0xff] }
 0x1b5   : > { %6997 = vmatprep.mubr.msk.f32.mxu1 %vm783_vm0, %v9873_v8  ;;  %7366 = vmatprep.subr.bf16.mxu0 %v7365_v9  ;;  %v9928_v9 = vsel %vm1285_vm4, %v1300_v35, %v1304_v54  ;;  %v1308_v11 = vrot.slane %v9920_v2, 1  ;;  %v1250_v35 = vld [vmem:[#allocation4 + $0x568] sm:$0xff]  ;;  %v1743_v45 = vld [vmem:[#allocation4 + $0x690] sm:$0xff] }
 0x1b6   : > { %7406 = vmatprep.subr.bf16.mxu1 %v9321_v5  ;;  %6989 = vmatprep.mubr.msk.f32.mxu0 %vm783_vm0, %v9776_v14  ;;  %v7389_v42 = vpack.c.bf16 %v1255_v36, %v1250_v35  ;;  %v1735_v35 = vld [vmem:[#allocation4 + $0x650] sm:$0xff]  ;;  %v1740_v36 = vld [vmem:[#allocation4 + $0x678] sm:$0xff] }
 0x1b7   : > { %1416 = vmatmul.mubr.f32.gmra.mrb[14].mxu1 %v9881_v0  ;;  %1090 = vmatmul.mubr.f32.gmra.mrb[14].mxu0 %v9780_v16  ;;  %v9940_v24 = vsel %vm1285_vm4, %v1304_v54, %v1308_v11 }
 0x1b8   : > { %7368 = vmatpush1.bf16.msra.mxu0 %v7367_v18  ;;  %7408 = vmatpush1.bf16.msra.mxu1 %v7407_v19  ;;  %v9933_v18 = vsel %vm1285_vm4, %v1306_v44, %v1310_v63  ;;  %v7381_v19 = vpack.c.bf16 %v1235_v6, %v1230_v4  ;;  %v1254_v44 = vld [vmem:[#allocation4 + $0x588] sm:$0xff]  ;;  %v1275_v6 = vld [vmem:[#allocation4 + $0x630] sm:$0xf] }
 0x1b9   : > { %6998 = vmatprep.mubr.msk.f32.mxu1 %vm783_vm0, %v9886_v3  ;;  %7370 = vmatprep.subr.bf16.mxu0 %v7369_v23  ;;  %v7383_v23 = vpack.c.bf16 %v1234_v15, %v1229_v13  ;;  %v7391_v54 = vpack.c.bf16 %v1254_v44, %v1249_v43  ;;  %v1266_v63 = vld [vmem:[#allocation4 + $0x5e8] sm:$0xff]  ;;  %v1269_v13 = vld [vmem:[#allocation4 + $0x600] sm:$0xff]  ;;  %v1751_v43 = vld [vmem:[#allocation4 + $0x6d0] sm:$0xff]  ;;  %v7478_v44 = vpack.c.bf16 %v1740_v36, %v1735_v35 }
 0x1ba   : > { %7409 = vmatprep.subr.bf16.mxu1 %v9321_v5  ;;  %6990 = vmatprep.mubr.msk.f32.mxu0 %vm783_vm0, %v9789_v25  ;;  %v1270_v4 = vld [vmem:[#allocation4 + $0x608] sm:$0xff]  ;;  %v1776_v35 = vld [vmem:[#allocation4 + $0x798] sm:$0xff]  ;;  %v1781_v36 = vld [vmem:[#allocation4 + $0x7c0] sm:$0xff] }
 0x1bb   : > { %1422 = vmatmul.mubr.f32.gmra.mrb[16].mxu1 %v9895_v33  ;;  %1095 = vmatmul.mubr.f32.gmra.mrb[16].mxu0 %v9793_v27  ;;  %v7397_v11 = vpack.c.bf16 %v1275_v6, %v1270_v4  ;;  %v1274_v15 = vld [vmem:[#allocation4 + $0x628] sm:$0xf]  ;;  %v1753_v6 = vld [vmem:[#allocation4 + $0x6e0] sm:$0xff] }
 0x1bc   : > { %7372 = vmatpush1.bf16.msra.mxu0 %v7371_v31  ;;  %7411 = vmatpush1.bf16.msra.mxu1 %v7410_v34  ;;  %v1241_v31 = vld [vmem:[#allocation4 + $0x520] sm:$0xff]  ;;  %v1246_v34 = vld [vmem:[#allocation4 + $0x548] sm:$0xff] }
 0x1bd   : > { %6999 = vmatprep.mubr.msk.f32.mxu1 %vm783_vm0, %v9900_v40  ;;  %7374 = vmatprep.subr.bf16.mxu0 %v7373_v41  ;;  %v7422_v41 = vpack.c.bf16 %v1246_v34, %v1241_v31  ;;  %v1738_v31 = vld [vmem:[#allocation4 + $0x668] sm:$0xff] }
 0x1be   : > { %7412 = vmatprep.subr.bf16.mxu1 %v9321_v5  ;;  %6991 = vmatprep.mubr.msk.f32.mxu0 %vm783_vm0, %v9802_v37 }
 0x1bf   : > { %1428 = vmatmul.mubr.f32.gmra.mrb[18].mxu1 %v9911_v51  ;;  %1100 = vmatmul.mubr.f32.gmra.mrb[18].mxu0 %v9806_v39 }
 0x1c0   : > { %7376 = vmatpush1.bf16.msra.mxu0 %v7375_v49  ;;  %7414 = vmatpush1.bf16.msra.mxu1 %v7413_v53  ;;  %v1260_v49 = vld [vmem:[#allocation4 + $0x5b8] sm:$0xff]  ;;  %v1265_v53 = vld [vmem:[#allocation4 + $0x5e0] sm:$0xff] }
 0x1c1   : > { %7000 = vmatprep.mubr.msk.f32.mxu1 %vm783_vm0, %v9916_v57  ;;  %7378 = vmatprep.subr.bf16.mxu0 %v7377_v58  ;;  %v7393_v56 = vpack.c.bf16 %v1265_v53, %v1260_v49  ;;  %v1259_v58 = vld [vmem:[#allocation4 + $0x5b0] sm:$0xff]  ;;  %v1745_v53 = vld [vmem:[#allocation4 + $0x6a0] sm:$0xff] }
 0x1c2   : > { %7415 = vmatprep.subr.bf16.mxu1 %v9321_v5  ;;  %6992 = vmatprep.mubr.msk.f32.mxu0 %vm783_vm0, %v9815_v48 }
 0x1c3   : > { %1434 = vmatmul.mubr.f32.gmra.mrb[20].mxu1 %v9928_v9  ;;  %1105 = vmatmul.mubr.f32.gmra.mrb[20].mxu0 %v9819_v50 }
 0x1c4   : > { %7380 = vmatpush1.bf16.msra.mxu0 %v7379_v7  ;;  %7417 = vmatpush1.bf16.msra.mxu1 %v7416_v10  ;;  %v7395_v7 = vpack.c.bf16 %v1264_v59, %v1259_v58  ;;  %v7428_v10 = vpack.c.bf16 %v1266_v63, %v1261_v61  ;;  %v1759_v58 = vld [vmem:[#allocation4 + $0x710] sm:$0xff]  ;;  %v7440_v59 = vpack.c.bf16 %v1748_v46, %v1743_v45  ;;  %v1756_v61 = vld [vmem:[#allocation4 + $0x6f8] sm:$0xff]  ;;  %v1761_v63 = vld [vmem:[#allocation4 + $0x720] sm:$0xff] }
 0x1c5   : > { %7001 = vmatprep.mubr.msk.f32.mxu1 %vm783_vm0, %v9933_v18  ;;  %7382 = vmatprep.subr.bf16.mxu0 %v7381_v19  ;;  %v1276_v19 = vld [vmem:[#allocation4 + $0x638] sm:$0xf]  ;;  %v1789_v45 = vld [vmem:[#allocation4 + $0x800] sm:$0xff] }
 0x1c6   : > { %7418 = vmatprep.subr.bf16.mxu1 %v9321_v5  ;;  %6993 = vmatprep.mubr.msk.f32.mxu0 %vm783_vm0, %v9828_v60 }
 0x1c7   : > { %1440 = vmatmul.mubr.f32.gmra.mrb[22].mxu1 %v9940_v24  ;;  %1110 = vmatmul.mubr.f32.gmra.mrb[22].mxu0 %v9832_v62 }
 0x1c8   : > { %7384 = vmatpush1.bf16.msra.mxu0 %v7383_v23  ;;  %7420 = vmatpush1.bf16.msra.mxu1 %v7419_v26  ;;  %v1741_v23 = vld [vmem:[#allocation4 + $0x680] sm:$0xff]  ;;  %v7400_v26 = vpack.c.bf16 %v1274_v15, %v1269_v13  ;;  %v1760_v13 = vld [vmem:[#allocation4 + $0x718] sm:$0xff] }
 0x1c9   : > { %7386 = vmatprep.subr.bf16.mxu0 %v7385_v28  ;;  %7421 = vmatprep.subr.bf16.mxu1 %v9321_v5  ;;  %v7431_v28 = vpack.c.bf16 %v1276_v19, %v1271_v17  ;;  %v7476_v34 = vpack.c.bf16 %v1741_v23, %v1736_v22  ;;  %v1764_v15 = vld [vmem:[#allocation4 + $0x738] sm:$0xff]  ;;  %v1769_v17 = vld [vmem:[#allocation4 + $0x760] sm:$0xff]  ;;  %v1763_v22 = vld [vmem:[#allocation4 + $0x730] sm:$0xff] }
 0x1ca   : > { %7011 = vmatprep.mubr.msk.f32.mxu1 %vm783_vm0, %v9846_v12  ;;  %7004 = vmatprep.mubr.msk.f32.mxu0 %vm783_vm0, %v9846_v12  ;;  %v7436_v12 = vpack.c.bf16 %v1738_v31, %v1733_v30  ;;  %v1768_v23 = vld [vmem:[#allocation4 + $0x758] sm:$0xff]  ;;  %v1774_v30 = vld [vmem:[#allocation4 + $0x788] sm:$0xff]  ;;  %v1779_v31 = vld [vmem:[#allocation4 + $0x7b0] sm:$0xff] }
 0x1cc   : > { %7388 = vmatpush1.bf16.msra.mxu0 %v7387_v38  ;;  %7423 = vmatpush1.bf16.msra.mxu1 %v7422_v41  ;;  %v1744_v38 = vld [vmem:[#allocation4 + $0x698] sm:$0xff]  ;;  %v1749_v41 = vld [vmem:[#allocation4 + $0x6c0] sm:$0xff] }
 0x1cd   : > { %7390 = vmatprep.subr.bf16.mxu0 %v7389_v42  ;;  %7424 = vmatprep.subr.bf16.mxu1 %v9321_v5  ;;  %v1746_v42 = vld [vmem:[#allocation4 + $0x6a8] sm:$0xff]  ;;  %v7438_v49 = vpack.c.bf16 %v1749_v41, %v1744_v38  ;;  %v1773_v38 = vld [vmem:[#allocation4 + $0x780] sm:$0xff] }
 0x1ce   : > { %v1778_v41 = vld [vmem:[#allocation4 + $0x7a8] sm:$0xff] }
 0x1cf   : > { %v7452_v46 = vpack.c.bf16 %v1778_v41, %v1773_v38 }
 0x1d0   : > { %7392 = vmatpush1.bf16.msra.mxu0 %v7391_v54  ;;  %7426 = vmatpush1.bf16.msra.mxu1 %v7425_v55  ;;  %v1750_v54 = vld [vmem:[#allocation4 + $0x6c8] sm:$0xff]  ;;  %v7480_v55 = vpack.c.bf16 %v1751_v43, %v1746_v42  ;;  %v1775_v42 = vld [vmem:[#allocation4 + $0x790] sm:$0xff]  ;;  %v1780_v43 = vld [vmem:[#allocation4 + $0x7b8] sm:$0xff] }
 0x1d1   : > { %7394 = vmatprep.subr.bf16.mxu0 %v7393_v56  ;;  %7427 = vmatprep.subr.bf16.mxu1 %v9321_v5  ;;  %v1754_v56 = vld [vmem:[#allocation4 + $0x6e8] sm:$0xff]  ;;  %v7482_v4 = vpack.c.bf16 %v1750_v54, %v1745_v53  ;;  %v1791_v53 = vld [vmem:[#allocation4 + $0x810] sm:$0xff] }
 0x1d2   : > { %v1783_v54 = vld [vmem:[#allocation4 + $0x7d0] sm:$0xff] }
 0x1d4   : > { %7396 = vmatpush1.bf16.msra.mxu0 %v7395_v7  ;;  %7429 = vmatpush1.bf16.msra.mxu1 %v7428_v10  ;;  %v1758_v7 = vld [vmem:[#allocation4 + $0x708] sm:$0xff]  ;;  %v7442_v10 = vpack.c.bf16 %v1759_v58, %v1754_v56  ;;  %v1785_v56 = vld [vmem:[#allocation4 + $0x7e0] sm:$0xff] }
 0x1d5   : > { %7399 = vmatprep.subr.msk.bf16.mxu0 %vm9758_vm3, %v7397_v11  ;;  %7430 = vmatprep.subr.bf16.mxu1 %v9321_v5  ;;  %v1755_v11 = vld [vmem:[#allocation4 + $0x6f0] sm:$0xff]  ;;  %v7444_v19 = vpack.c.bf16 %v1758_v7, %v1753_v6  ;;  %v1801_v6 = vld [vmem:[#allocation4 + $0x860] sm:$0xff]  ;;  %v1837_v7 = vrot.slane %v9751_v32, 2 }
 0x1d8   : > { %7402 = vmatpush1.bf16.msk.msra.mxu0 %vm9758_vm3, %v7400_v26  ;;  %7433 = vmatpush1.bf16.msk.msra.mxu1 %vm9758_vm3, %v7431_v28  ;;  %v7446_v26 = vpack.c.bf16 %v1769_v17, %v1764_v15  ;;  %v1765_v28 = vld [vmem:[#allocation4 + $0x740] sm:$0xff]  ;;  %v1798_v15 = vld [vmem:[#allocation4 + $0x848] sm:$0xff]  ;;  %v1795_v17 = vld [vmem:[#allocation4 + $0x830] sm:$0xff] }
 0x1d9   : > { %7435 = vmatprep.subr.bf16.mxu0 %v7434_v29  ;;  %7477 = vmatprep.subr.bf16.mxu1 %v7476_v34  ;;  %v1770_v29 = vld [vmem:[#allocation4 + $0x768] sm:$0xff]  ;;  %v7448_v34 = vpack.c.bf16 %v1768_v23, %v1763_v22 }
 0x1db   : > { %1511 = vmatmul.mubr.f32.vlgmr.msra.gmra.mrb[24].mxu0 %v9866_v1  ;;  %1612 = vmatmul.mubr.f32.vlgmr.msra.gmra.mrb[24].mxu1 %v9866_v1  ;;  %v7484_v1 = vpack.c.bf16 %v1761_v63, %v1756_v61  ;;  %v1794_v61 = vld [vmem:[#allocation4 + $0x828] sm:$0xff] }
 0x1dc   : > { %7437 = vmatpush1.bf16.msra.mxu0 %v7436_v12  ;;  %7479 = vmatpush1.bf16.msra.mxu1 %v7478_v44  ;;  %v7450_v12 = vpack.c.bf16 %v1779_v31, %v1774_v30  ;;  %v1784_v44 = vld [vmem:[#allocation4 + $0x7d8] sm:$0xff]  ;;  %v1810_v31 = vld [vmem:[#allocation4 + $0x8a8] sm:$0xff] }
 0x1dd   : > { %7005 = vmatprep.mubr.msk.f32.mxu0 %vm783_vm0, %v9873_v8  ;;  %7012 = vmatprep.mubr.msk.f32.mxu1 %vm783_vm0, %v9873_v8  ;;  %v7486_v8 = vpack.c.bf16 %v1760_v13, %v1755_v11  ;;  %v7454_v58 = vpack.c.bf16 %v1789_v45, %v1784_v44  ;;  %v1820_v44 = vld [vmem:[#allocation4 + $0x8f8] sm:$0xff] }
 0x1de   : > { %7439 = vmatprep.subr.bf16.mxu0 %v7438_v49  ;;  %7481 = vmatprep.subr.bf16.mxu1 %v7480_v55  ;;  %v1786_v49 = vld [vmem:[#allocation4 + $0x7e8] sm:$0xff]  ;;  %v1788_v55 = vld [vmem:[#allocation4 + $0x7f8] sm:$0xff] }
 0x1df   : > { %1517 = vmatmul.mubr.f32.gmra.mrb[26].mxu0 %v9881_v0  ;;  %1617 = vmatmul.mubr.f32.gmra.mrb[26].mxu1 %v9881_v0  ;;  %v7488_v0 = vpack.c.bf16 %v1771_v21, %v1766_v20  ;;  %v7496_v63 = vpack.c.bf16 %v1791_v53, %v1786_v49  ;;  %v7456_v11 = vpack.c.bf16 %v1788_v55, %v1783_v54  ;;  %v1804_v20 = vld [vmem:[#allocation4 + $0x878] sm:$0xff]  ;;  %v1806_v21 = vld [vmem:[#allocation4 + $0x888] sm:$0xff]  ;;  %v1831_v53 = vld [vmem:[#allocation4 + $0x950] sm:$0xf] }
 0x1e0   : > { %7441 = vmatpush1.bf16.msra.mxu0 %v7440_v59  ;;  %7483 = vmatpush1.bf16.msra.mxu1 %v7482_v4  ;;  %v1790_v59 = vld [vmem:[#allocation4 + $0x808] sm:$0xff]  ;;  %v1796_v4 = vld [vmem:[#allocation4 + $0x838] sm:$0xff] }
 0x1e1   : > { %7006 = vmatprep.mubr.msk.f32.mxu0 %vm783_vm0, %v9886_v3  ;;  %7013 = vmatprep.mubr.msk.f32.mxu1 %vm783_vm0, %v9886_v3  ;;  %v7490_v3 = vpack.c.bf16 %v1770_v29, %v1765_v28  ;;  %v7500_v32 = vpack.c.bf16 %v1801_v6, %v1796_v4  ;;  %v1803_v28 = vld [vmem:[#allocation4 + $0x870] sm:$0xff]  ;;  %v1808_v29 = vld [vmem:[#allocation4 + $0x898] sm:$0xff]  ;;  %v1826_v49 = vld [vmem:[#allocation4 + $0x928] sm:$0xff] }
 0x1e2   : > { %7443 = vmatprep.subr.bf16.mxu0 %v7442_v10  ;;  %7485 = vmatprep.subr.bf16.mxu1 %v7484_v1  ;;  %v1838_v10 = vrot.slane %v9776_v14, 2  ;;  %v1793_v1 = vld [vmem:[#allocation4 + $0x820] sm:$0xff]  ;;  %v1824_v45 = vld [vmem:[#allocation4 + $0x918] sm:$0xff]  ;;  %v2287_v4 = vld [vmem:[#allocation4 + $0x990] sm:$0xff] }
 0x1e3   : > { %1523 = vmatmul.mubr.f32.gmra.mrb[28].mxu0 %v9895_v33  ;;  %1622 = vmatmul.mubr.f32.gmra.mrb[28].mxu1 %v9895_v33  ;;  %v7492_v33 = vpack.c.bf16 %v1781_v36, %v1776_v35  ;;  %v7460_v23 = vpack.c.bf16 %v1798_v15, %v1793_v1  ;;  %v1819_v35 = vld [vmem:[#allocation4 + $0x8f0] sm:$0xff]  ;;  %v1816_v36 = vld [vmem:[#allocation4 + $0x8d8] sm:$0xff]  ;;  %v1737_v1 = vld [vmem:[#allocation4 + $0x660] sm:$0xff] }
 0x1e4   : > { %7445 = vmatpush1.bf16.msra.mxu0 %v7444_v19  ;;  %7487 = vmatpush1.bf16.msra.mxu1 %v7486_v8  ;;  %v1800_v19 = vld [vmem:[#allocation4 + $0x858] sm:$0xff]  ;;  %v1811_v8 = vld [vmem:[#allocation4 + $0x8b0] sm:$0xff]  ;;  %v10003_v22 = vsel %vm1833_vm5, %v1837_v7, %v1838_v10  ;;  %v1742_v15 = vld [vmem:[#allocation4 + $0x688] sm:$0xff] }
 0x1e5   : > { %7007 = vmatprep.mubr.msk.f32.mxu0 %vm783_vm0, %v9900_v40  ;;  %7014 = vmatprep.mubr.msk.f32.mxu1 %vm783_vm0, %v9900_v40  ;;  %v7494_v40 = vpack.c.bf16 %v1780_v43, %v1775_v42  ;;  %v7504_v30 = vpack.c.bf16 %v1811_v8, %v1806_v21  ;;  %v1818_v42 = vld [vmem:[#allocation4 + $0x8e8] sm:$0xff]  ;;  %v1815_v43 = vld [vmem:[#allocation4 + $0x8d0] sm:$0xff]  ;;  %v1840_v21 = vrot.slane %v9793_v27, 2  ;;  %v2292_v8 = vld [vmem:[#allocation4 + $0x9b8] sm:$0xff]  ;;  %v1846_v27 = vrot.slane %v9802_v37, 2 }
 0x1e6   : > { %7447 = vmatprep.subr.bf16.mxu0 %v7446_v26  ;;  %7489 = vmatprep.subr.bf16.mxu1 %v7488_v0  ;;  %v1805_v0 = vld [vmem:[#allocation4 + $0x880] sm:$0xff]  ;;  %v7510_v54 = vpack.c.bf16 %v1820_v44, %v1815_v43  ;;  %v10011_v7 = vld [vmem:[%s9748_s18] sm:$0xff]  ;;  %v2302_v14 = vld [vmem:[#allocation4 + $0xa08] sm:$0xff] }
 0x1e7   : > { %1529 = vmatmul.mubr.f32.gmra.mrb[30].mxu0 %v9911_v51  ;;  %1627 = vmatmul.mubr.f32.gmra.mrb[30].mxu1 %v9911_v51  ;;  %v1799_v51 = vld [vmem:[#allocation4 + $0x850] sm:$0xff]  ;;  %v7506_v38 = vpack.c.bf16 %v1810_v31, %v1805_v0  ;;  %v2296_v0 = vld [vmem:[#allocation4 + $0x9d8] sm:$0xff]  ;;  %v1757_v37 = vld [vmem:[#allocation4 + $0x700] sm:$0xff] }
 0x1e8   : > { %7449 = vmatpush1.bf16.msra.mxu0 %v7448_v34  ;;  %7491 = vmatpush1.bf16.msra.mxu1 %v7490_v3  ;;  %v7458_v13 = vpack.c.bf16 %v1799_v51, %v1794_v61  ;;  %v1814_v34 = vld [vmem:[#allocation4 + $0x8c8] sm:$0xff]  ;;  %v1821_v3 = vld [vmem:[#allocation4 + $0x900] sm:$0xff]  ;;  %v2312_v44 = vld [vmem:[#allocation4 + $0xa58] sm:$0xff] }
 0x1e9   : > { %7008 = vmatprep.mubr.msk.f32.mxu0 %vm783_vm0, %v9916_v57  ;;  %7015 = vmatprep.mubr.msk.f32.mxu1 %vm783_vm0, %v9916_v57  ;;  %v7498_v57 = vpack.c.bf16 %v1790_v59, %v1785_v56  ;;  %v7466_v41 = vpack.c.bf16 %v1819_v35, %v1814_v34  ;;  %v1823_v56 = vld [vmem:[#allocation4 + $0x910] sm:$0xff]  ;;  %v7512_v59 = vpack.c.bf16 %v1831_v53, %v1826_v49  ;;  %v1825_v61 = vld [vmem:[#allocation4 + $0x920] sm:$0xff]  ;;  %v1830_v51 = vld [vmem:[#allocation4 + $0x948] sm:$0xf]  ;;  %v1844_v35 = vrot.slane %v9806_v39, 2 }
 0x1ea   : > { %7451 = vmatprep.subr.bf16.mxu0 %v7450_v12  ;;  %7493 = vmatprep.subr.bf16.mxu1 %v7492_v33  ;;  %v1813_v12 = vld [vmem:[#allocation4 + $0x8c0] sm:$0xff]  ;;  %v7508_v33 = vpack.c.bf16 %v1821_v3, %v1816_v36  ;;  %v2307_v36 = vld [vmem:[#allocation4 + $0xa30] sm:$0xff]  ;;  %v1762_v3 = vld [vmem:[#allocation4 + $0x728] sm:$0xff]  ;;  %v1850_v39 = vrot.slane %v9815_v48, 2 }
 0x1eb   : > { %1535 = vmatmul.mubr.f32.gmra.mrb[32].mxu0 %v9928_v9  ;;  %1632 = vmatmul.mubr.f32.gmra.mrb[32].mxu1 %v9928_v9  ;;  %v1809_v9 = vld [vmem:[#allocation4 + $0x8a0] sm:$0xff]  ;;  %v7525_v43 = vpack.c.bf16 %v1762_v3, %v1757_v37  ;;  %v1772_v49 = vld [vmem:[#allocation4 + $0x778] sm:$0xff]  ;;  %v2346_v3 = vld [vmem:[#allocation4 + $0xb68] sm:$0xff] }
 0x1ec   : > { %7453 = vmatpush1.bf16.msra.mxu0 %v7452_v46  ;;  %7495 = vmatpush1.bf16.msra.mxu1 %v7494_v40  ;;  %v7462_v26 = vpack.c.bf16 %v1809_v9, %v1804_v20  ;;  %v1829_v46 = vld [vmem:[#allocation4 + $0x940] sm:$0xf]  ;;  %v7468_v40 = vpack.c.bf16 %v1818_v42, %v1813_v12  ;;  %v1842_v20 = vrot.slane %v9789_v25, 2  ;;  %v7519_v9 = vpack.c.bf16 %v1742_v15, %v1737_v1 }
 0x1ed   : > { %7009 = vmatprep.mubr.msk.f32.mxu0 %vm783_vm0, %v9933_v18  ;;  %7016 = vmatprep.mubr.msk.f32.mxu1 %vm783_vm0, %v9933_v18  ;;  %v7502_v18 = vpack.c.bf16 %v1800_v19, %v1795_v17  ;;  %v7470_v55 = vpack.c.bf16 %v1829_v46, %v1824_v45  ;;  %v2286_v19 = vld [vmem:[#allocation4 + $0x988] sm:$0xff]  ;;  %v7557_v12 = vpack.c.bf16 %v2307_v36, %v2302_v14  ;;  %v2317_v45 = vld [vmem:[#allocation4 + $0xa80] sm:$0xff]  ;;  %v1767_v46 = vld [vmem:[#allocation4 + $0x750] sm:$0xff] }
 0x1ee   : > { %7455 = vmatprep.subr.bf16.mxu0 %v7454_v58  ;;  %7497 = vmatprep.subr.bf16.mxu1 %v7496_v63  ;;  %v1828_v58 = vld [vmem:[#allocation4 + $0x938] sm:$0xf]  ;;  %v2282_v63 = vld [vmem:[#allocation4 + $0x968] sm:$0xff]  ;;  %v10032_v25 = vsel %vm1833_vm5, %v1838_v10, %v1842_v20  ;;  %v10053_v42 = vsel %vm1833_vm5, %v1840_v21, %v1844_v35  ;;  %v10062_v53 = vsel %vm1833_vm5, %v1846_v27, %v1850_v39  ;;  %v1797_v14 = vld [vmem:[#allocation4 + $0x840] sm:$0xff] }
 0x1ef   : > { %1541 = vmatmul.mubr.f32.gmra.mrb[34].mxu0 %v9940_v24  ;;  %1637 = vmatmul.mubr.f32.gmra.mrb[34].mxu1 %v9940_v24  ;;  %v7464_v24 = vpack.c.bf16 %v1808_v29, %v1803_v28  ;;  %v7473_v6 = vpack.c.bf16 %v1828_v58, %v1823_v56  ;;  %v7549_v17 = vpack.c.bf16 %v2287_v4, %v2282_v63  ;;  %v1752_v28 = vld [vmem:[#allocation4 + $0x6d8] sm:$0xff]  ;;  %v2291_v29 = vld [vmem:[#allocation4 + $0x9b0] sm:$0xff]  ;;  %v1777_v63 = vld [vmem:[#allocation4 + $0x7a0] sm:$0xff] }
 0x1f0   : > { %7457 = vmatpush1.bf16.msra.mxu0 %v7456_v11  ;;  %7499 = vmatpush1.bf16.msra.mxu1 %v7498_v57  ;;  %v1834_v11 = vrot.slane %v10011_v7, 2  ;;  %v1835_v57 = vrot.slane %v9780_v16, 2  ;;  %v7555_v10 = vpack.c.bf16 %v2296_v0, %v2291_v29  ;;  %v7528_v58 = vpack.c.bf16 %v1772_v49, %v1767_v46  ;;  %v1782_v4 = vld [vmem:[#allocation4 + $0x7c8] sm:$0xff]  ;;  %v10100_v0 = vld [vmem:[%s9748_s18 + $0x8] sm:$0xff]  ;;  %v2341_v37 = vld [vmem:[#allocation4 + $0xb40] sm:$0xff] }
 0x1f1   : > { %7459 = vmatprep.subr.bf16.mxu0 %v7458_v13  ;;  %7501 = vmatprep.subr.bf16.mxu1 %v7500_v32  ;;  %v7515_v13 = vpack.c.bf16 %v1830_v51, %v1825_v61  ;;  %v2281_v32 = vld [vmem:[#allocation4 + $0x960] sm:$0xff]  ;;  %v2322_v61 = vld [vmem:[#allocation4 + $0xaa8] sm:$0xff]  ;;  %v2327_v51 = vld [vmem:[#allocation4 + $0xad0] sm:$0xff]  ;;  %v7531_v15 = vpack.c.bf16 %v1782_v4, %v1777_v63 }
 0x1f2   : > { %7019 = vmatprep.mubr.msk.f32.mxu0 %vm783_vm0, %v10003_v22  ;;  %7027 = vmatprep.mubr.msk.f32.mxu1 %vm783_vm0, %v10003_v22  ;;  %v10023_v16 = vsel %vm1833_vm5, %v1834_v11, %v1835_v57  ;;  %v10038_v31 = vsel %vm1833_vm5, %v1835_v57, %v1840_v21  ;;  %v2321_v11 = vld [vmem:[#allocation4 + $0xaa0] sm:$0xff]  ;;  %v2326_v57 = vld [vmem:[#allocation4 + $0xac8] sm:$0xff]  ;;  %v2356_v46 = vld [vmem:[#allocation4 + $0xbb8] sm:$0xff] }
 0x1f3   : > { %v1802_v36 = vld [vmem:[#allocation4 + $0x868] sm:$0xff]  ;;  %v2377_v63 = vld [vmem:[#allocation4 + $0xc60] sm:$0xf] }
 0x1f4   : > { %7461 = vmatpush1.bf16.msra.mxu0 %v7460_v23  ;;  %7503 = vmatpush1.bf16.msra.mxu1 %v7502_v18  ;;  %v2297_v23 = vld [vmem:[#allocation4 + $0x9e0] sm:$0xff]  ;;  %v7551_v18 = vpack.c.bf16 %v2286_v19, %v2281_v32  ;;  %v2332_v32 = vld [vmem:[#allocation4 + $0xaf8] sm:$0xff]  ;;  %v2362_v49 = vld [vmem:[#allocation4 + $0xbe8] sm:$0xff] }
 0x1f5   : > { %7463 = vmatprep.subr.bf16.mxu0 %v7462_v26  ;;  %7505 = vmatprep.subr.bf16.mxu1 %v7504_v30  ;;  %v1747_v26 = vld [vmem:[#allocation4 + $0x6b0] sm:$0xff]  ;;  %v7553_v30 = vpack.c.bf16 %v2297_v23, %v2292_v8  ;;  %v2337_v19 = vld [vmem:[#allocation4 + $0xb20] sm:$0xff]  ;;  %v2336_v8 = vld [vmem:[#allocation4 + $0xb18] sm:$0xff] }
 0x1f6   : > { %v7522_v34 = vpack.c.bf16 %v1752_v28, %v1747_v26  ;;  %v7569_v23 = vpack.c.bf16 %v2337_v19, %v2332_v32  ;;  %v2347_v26 = vld [vmem:[#allocation4 + $0xb70] sm:$0xff]  ;;  %v2289_v32 = vld [vmem:[#allocation4 + $0x9a0] sm:$0xff] }
 0x1f8   : > { %7465 = vmatpush1.bf16.msra.mxu0 %v7464_v24  ;;  %7507 = vmatpush1.bf16.msra.mxu1 %v7506_v38  ;;  %v10047_v24 = vsel %vm1833_vm5, %v1842_v20, %v1846_v27  ;;  %v2301_v38 = vld [vmem:[#allocation4 + $0xa00] sm:$0xff]  ;;  %v1787_v20 = vld [vmem:[#allocation4 + $0x7f0] sm:$0xff]  ;;  %v2385_v27 = vrot.slane %v10100_v0, 3 }
 0x1f9   : > { %7467 = vmatprep.subr.bf16.mxu0 %v7466_v41  ;;  %7509 = vmatprep.subr.bf16.mxu1 %v7508_v33  ;;  %v2306_v41 = vld [vmem:[#allocation4 + $0xa28] sm:$0xff]  ;;  %v1848_v33 = vrot.slane %v9819_v50, 2  ;;  %v1854_v50 = vrot.slane %v9828_v60, 2 }
 0x1fa   : > { %v7559_v48 = vpack.c.bf16 %v2306_v41, %v2301_v38  ;;  %v2352_v38 = vld [vmem:[#allocation4 + $0xb98] sm:$0xff]  ;;  %v2357_v41 = vld [vmem:[#allocation4 + $0xbc0] sm:$0xff] }
 0x1fb   : > { %v10068_v56 = vsel %vm1833_vm5, %v1844_v35, %v1848_v33 }
 0x1fc   : > { %7469 = vmatpush1.bf16.msra.mxu0 %v7468_v40  ;;  %7511 = vmatpush1.bf16.msra.mxu1 %v7510_v54  ;;  %v2311_v40 = vld [vmem:[#allocation4 + $0xa50] sm:$0xff]  ;;  %v2316_v54 = vld [vmem:[#allocation4 + $0xa78] sm:$0xff] }
 0x1fd   : > { %7472 = vmatprep.subr.msk.bf16.mxu0 %vm9758_vm3, %v7470_v55  ;;  %7514 = vmatprep.subr.msk.bf16.mxu1 %vm9758_vm3, %v7512_v59  ;;  %v7561_v55 = vpack.c.bf16 %v2317_v45, %v2312_v44  ;;  %v1852_v59 = vrot.slane %v9832_v62, 2  ;;  %v7563_v60 = vpack.c.bf16 %v2316_v54, %v2311_v40  ;;  %v1858_v62 = vrot.slane %v9904_v47, 2  ;;  %v1812_v44 = vld [vmem:[#allocation4 + $0x8b8] sm:$0xff]  ;;  %v2367_v40 = vld [vmem:[#allocation4 + $0xc10] sm:$0xff] }
 0x1fe   : > { %v7567_v47 = vpack.c.bf16 %v2326_v57, %v2321_v11  ;;  %v7577_v45 = vpack.c.bf16 %v2357_v41, %v2352_v38  ;;  %v1827_v11 = vld [vmem:[#allocation4 + $0x930] sm:$0xff]  ;;  %v1832_v57 = vld [vmem:[#allocation4 + $0x958] sm:$0xf]  ;;  %v2293_v41 = vld [vmem:[#allocation4 + $0x9c0] sm:$0xff] }
 0x1ff   : > { %v10083_v1 = vsel %vm1833_vm5, %v1848_v33, %v1852_v59  ;;  %v10092_v21 = vsel %vm1833_vm5, %v1854_v50, %v1858_v62  ;;  %v1807_v33 = vld [vmem:[#allocation4 + $0x890] sm:$0xff]  ;;  %v7546_v19 = vpack.c.bf16 %v1832_v57, %v1827_v11 }
 0x200   : > { %7475 = vmatpush1.bf16.msk.msra.mxu0 %vm9758_vm3, %v7473_v6  ;;  %7517 = vmatpush1.bf16.msk.msra.mxu1 %vm9758_vm3, %v7515_v13  ;;  %v10077_v6 = vsel %vm1833_vm5, %v1850_v39, %v1854_v50  ;;  %v7565_v13 = vpack.c.bf16 %v2327_v51, %v2322_v61  ;;  %v7537_v39 = vpack.c.bf16 %v1802_v36, %v1797_v14  ;;  %v2361_v61 = vld [vmem:[#allocation4 + $0xbe0] sm:$0xff]  ;;  %v2366_v51 = vld [vmem:[#allocation4 + $0xc08] sm:$0xff]  ;;  %v2371_v62 = vld [vmem:[#allocation4 + $0xc30] sm:$0xff] }
 0x201   : > { %7518 = vmatprep.subr.bf16.mxu0 %v9321_v5  ;;  %7550 = vmatprep.subr.bf16.mxu1 %v7549_v17  ;;  %v1856_v17 = vrot.slane %v9920_v2, 2  ;;  %v2331_v2 = vld [vmem:[#allocation4 + $0xaf0] sm:$0xff]  ;;  %v7540_v54 = vpack.c.bf16 %v1812_v44, %v1807_v33  ;;  %v7583_v4 = vpack.c.bf16 %v2366_v51, %v2361_v61  ;;  %v2294_v14 = vld [vmem:[#allocation4 + $0x9c8] sm:$0xff]  ;;  %v2300_v44 = vld [vmem:[#allocation4 + $0x9f8] sm:$0xff] }
 0x202   : > { %v7571_v35 = vpack.c.bf16 %v2336_v8, %v2331_v2  ;;  %v2299_v36 = vld [vmem:[#allocation4 + $0x9f0] sm:$0xff]  ;;  %v2305_v51 = vld [vmem:[#allocation4 + $0xa20] sm:$0xff] }
 0x203   : > { %1958 = vmatmul.mubr.f32.vlgmr.msra.gmra.mrb[36].mxu0 %v10023_v16  ;;  %2059 = vmatmul.mubr.f32.vlgmr.msra.gmra.mrb[36].mxu1 %v10023_v16  ;;  %v10097_v28 = vsel %vm1833_vm5, %v1852_v59, %v1856_v17  ;;  %v7581_v59 = vpack.c.bf16 %v2367_v40, %v2362_v49  ;;  %v2284_v17 = vld [vmem:[#allocation4 + $0x978] sm:$0xff]  ;;  %v2295_v33 = vld [vmem:[#allocation4 + $0x9d0] sm:$0xff]  ;;  %v2309_v40 = vld [vmem:[#allocation4 + $0xa40] sm:$0xff] }
 0x204   : > { %7520 = vmatpush1.bf16.msra.mxu0 %v7519_v9  ;;  %7552 = vmatpush1.bf16.msra.mxu1 %v7551_v18  ;;  %v1792_v9 = vld [vmem:[#allocation4 + $0x818] sm:$0xff]  ;;  %v2342_v18 = vld [vmem:[#allocation4 + $0xb48] sm:$0xff]  ;;  %v7591_v8 = vpack.c.bf16 %v2289_v32, %v2284_v17  ;;  %v2319_v11 = vld [vmem:[#allocation4 + $0xa90] sm:$0xff] }
 0x205   : > { %7020 = vmatprep.mubr.msk.f32.mxu0 %vm783_vm0, %v10032_v25  ;;  %7028 = vmatprep.mubr.msk.f32.mxu1 %vm783_vm0, %v10032_v25  ;;  %v7534_v29 = vpack.c.bf16 %v1792_v9, %v1787_v20  ;;  %v2382_v20 = vrot.slane %v10011_v7, 3  ;;  %v10129_v9 = vld [vmem:[%s9748_s18 + $0x10] sm:$0xff]  ;;  %v2304_v49 = vld [vmem:[#allocation4 + $0xa18] sm:$0xff]  ;;  %v2318_v32 = vld [vmem:[#allocation4 + $0xa88] sm:$0xff] }
 0x206   : > { %7521 = vmatprep.subr.bf16.mxu0 %v9321_v5  ;;  %7554 = vmatprep.subr.bf16.mxu1 %v7553_v30  ;;  %v10104_v30 = vld [vmem:[%s9748_s18 + $0x18] sm:$0xff]  ;;  %v2383_v2 = vrot.slane %v10129_v9, 3  ;;  %v7599_v61 = vpack.c.bf16 %v2309_v40, %v2304_v49  ;;  %v2313_v17 = vld [vmem:[#allocation4 + $0xa60] sm:$0xff]  ;;  %v10230_v40 = vld [vmem:[%s9748_s18 + $0x60] sm:$0xf] }
 0x207   : > { %1964 = vmatmul.mubr.f32.gmra.mrb[38].mxu0 %v10038_v31  ;;  %2065 = vmatmul.mubr.f32.gmra.mrb[38].mxu1 %v10038_v31 }
 0x208   : > { %7523 = vmatpush1.bf16.msra.mxu0 %v7522_v34  ;;  %7556 = vmatpush1.bf16.msra.mxu1 %v7555_v10  ;;  %v2386_v34 = vrot.slane %v10104_v30, 3  ;;  %v7573_v10 = vpack.c.bf16 %v2347_v26, %v2342_v18  ;;  %v2288_v18 = vld [vmem:[#allocation4 + $0x998] sm:$0xff]  ;;  %v2285_v26 = vld [vmem:[#allocation4 + $0x980] sm:$0xff] }
 0x209   : > { %7021 = vmatprep.mubr.msk.f32.mxu0 %vm783_vm0, %v10047_v24  ;;  %7029 = vmatprep.mubr.msk.f32.mxu1 %vm783_vm0, %v10047_v24 }
 0x20a   : > { %7524 = vmatprep.subr.bf16.mxu0 %v9321_v5  ;;  %7558 = vmatprep.subr.bf16.mxu1 %v7557_v12  ;;  %v10117_v12 = vsel %vm2381_vm6, %v2385_v27, %v2386_v34  ;;  %v10135_v27 = vld [vmem:[%s9748_s18 + $0x28] sm:$0xff] }
 0x20b   : > { %1970 = vmatmul.mubr.f32.gmra.mrb[40].mxu0 %v10053_v42  ;;  %2071 = vmatmul.mubr.f32.gmra.mrb[40].mxu1 %v10053_v42 }
 0x20c   : > { %7526 = vmatpush1.bf16.msra.mxu0 %v7525_v43  ;;  %7560 = vmatpush1.bf16.msra.mxu1 %v7559_v48  ;;  %v7575_v43 = vpack.c.bf16 %v2346_v3, %v2341_v37  ;;  %v2351_v48 = vld [vmem:[#allocation4 + $0xb90] sm:$0xff] }
 0x20d   : > { %7022 = vmatprep.mubr.msk.f32.mxu0 %vm783_vm0, %v10062_v53  ;;  %7030 = vmatprep.mubr.msk.f32.mxu1 %vm783_vm0, %v10062_v53  ;;  %v7579_v50 = vpack.c.bf16 %v2356_v46, %v2351_v48  ;;  %v10146_v3 = vld [vmem:[%s9748_s18 + $0x20] sm:$0xff]  ;;  %v10157_v48 = vld [vmem:[%s9748_s18 + $0x38] sm:$0xff] }
 0x20e   : > { %7527 = vmatprep.subr.bf16.mxu0 %v9321_v5  ;;  %7562 = vmatprep.subr.bf16.mxu1 %v7561_v55  ;;  %v1817_v55 = vld [vmem:[#allocation4 + $0x8e0] sm:$0xff]  ;;  %v2388_v38 = vrot.slane %v10146_v3, 3  ;;  %v2394_v46 = vrot.slane %v10157_v48, 3 }
 0x20f   : > { %1976 = vmatmul.mubr.f32.gmra.mrb[42].mxu0 %v10068_v56  ;;  %2077 = vmatmul.mubr.f32.gmra.mrb[42].mxu1 %v10068_v56 }
 0x210   : > { %7529 = vmatpush1.bf16.msra.mxu0 %v7528_v58  ;;  %7564 = vmatpush1.bf16.msra.mxu1 %v7563_v60  ;;  %v1822_v58 = vld [vmem:[#allocation4 + $0x908] sm:$0xff]  ;;  %v2372_v60 = vld [vmem:[#allocation4 + $0xc38] sm:$0xff] }
 0x211   : > { %7023 = vmatprep.mubr.msk.f32.mxu0 %vm783_vm0, %v10077_v6  ;;  %7031 = vmatprep.mubr.msk.f32.mxu1 %vm783_vm0, %v10077_v6 }
 0x212   : > { %7530 = vmatprep.subr.bf16.mxu0 %v9321_v5  ;;  %7566 = vmatprep.subr.bf16.mxu1 %v7565_v13  ;;  %v7585_v13 = vpack.c.bf16 %v2377_v63, %v2372_v60  ;;  %v2310_v60 = vld [vmem:[#allocation4 + $0xa48] sm:$0xff]  ;;  %v10178_v63 = vld [vmem:[%s9748_s18 + $0x48] sm:$0xff] }
 0x213   : > { %1982 = vmatmul.mubr.f32.gmra.mrb[44].mxu0 %v10083_v1  ;;  %2083 = vmatmul.mubr.f32.gmra.mrb[44].mxu1 %v10083_v1 }
 0x214   : > { %7532 = vmatpush1.bf16.msra.mxu0 %v7531_v15  ;;  %7568 = vmatpush1.bf16.msra.mxu1 %v7567_v47  ;;  %v2376_v15 = vld [vmem:[#allocation4 + $0xc58] sm:$0xf] }
 0x215   : > { %7024 = vmatprep.mubr.msk.f32.mxu0 %vm783_vm0, %v10092_v21  ;;  %7032 = vmatprep.mubr.msk.f32.mxu1 %vm783_vm0, %v10092_v21  ;;  %v7588_v47 = vpack.c.bf16 %v2376_v15, %v2371_v62  ;;  %v7640_v62 = vpack.c.bf16 %v2310_v60, %v2305_v51  ;;  %v2344_v51 = vld [vmem:[#allocation4 + $0xb58] sm:$0xff]  ;;  %v2349_v60 = vld [vmem:[#allocation4 + $0xb80] sm:$0xff] }
 0x216   : > { %7533 = vmatprep.subr.bf16.mxu0 %v9321_v5  ;;  %7570 = vmatprep.subr.bf16.mxu1 %v7569_v23  ;;  %v2283_v23 = vld [vmem:[#allocation4 + $0x970] sm:$0xff] }
 0x217   : > { %1988 = vmatmul.mubr.f32.gmra.mrb[46].mxu0 %v10097_v28  ;;  %2089 = vmatmul.mubr.f32.gmra.mrb[46].mxu1 %v10097_v28  ;;  %v7593_v7 = vpack.c.bf16 %v2288_v18, %v2283_v23  ;;  %v2324_v23 = vld [vmem:[#allocation4 + $0xab8] sm:$0xff]  ;;  %v2329_v18 = vld [vmem:[#allocation4 + $0xae0] sm:$0xff] }
 0x218   : > { %7535 = vmatpush1.bf16.msra.mxu0 %v7534_v29  ;;  %7572 = vmatpush1.bf16.msra.mxu1 %v7571_v35  ;;  %v2290_v29 = vld [vmem:[#allocation4 + $0x9a8] sm:$0xff]  ;;  %v2390_v35 = vrot.slane %v10135_v27, 3 }
 0x219   : > { %7536 = vmatprep.subr.bf16.mxu0 %v9321_v5  ;;  %7574 = vmatprep.subr.bf16.mxu1 %v7573_v10  ;;  %v10143_v10 = vsel %vm2381_vm6, %v2382_v20, %v2383_v2  ;;  %v7634_v37 = vpack.c.bf16 %v2290_v29, %v2285_v26  ;;  %v2320_v20 = vld [vmem:[#allocation4 + $0xa98] sm:$0xff]  ;;  %v7605_v26 = vpack.c.bf16 %v2318_v32, %v2313_v17  ;;  %v2350_v17 = vld [vmem:[#allocation4 + $0xb88] sm:$0xff] }
 0x21a   : > { %7034 = vmatprep.mubr.msk.f32.mxu0 %vm783_vm0, %v10003_v22  ;;  %7042 = vmatprep.mubr.msk.f32.mxu1 %vm783_vm0, %v10117_v12  ;;  %v7543_v22 = vpack.c.bf16 %v1822_v58, %v1817_v55  ;;  %v2303_v58 = vld [vmem:[#allocation4 + $0xa10] sm:$0xff]  ;;  %v2354_v32 = vld [vmem:[#allocation4 + $0xba8] sm:$0xff] }
 0x21c   : > { %7538 = vmatpush1.bf16.msra.mxu0 %v7537_v39  ;;  %7576 = vmatpush1.bf16.msra.mxu1 %v7575_v43  ;;  %v2298_v39 = vld [vmem:[#allocation4 + $0x9e8] sm:$0xff]  ;;  %v7595_v43 = vpack.c.bf16 %v2299_v36, %v2294_v14  ;;  %v2323_v36 = vld [vmem:[#allocation4 + $0xab0] sm:$0xff] }
 0x21d   : > { %7539 = vmatprep.subr.bf16.mxu0 %v9321_v5  ;;  %7578 = vmatprep.subr.bf16.mxu1 %v7577_v45  ;;  %v10154_v45 = vsel %vm2381_vm6, %v2386_v34, %v2390_v35  ;;  %v7637_v34 = vpack.c.bf16 %v2300_v44, %v2295_v33  ;;  %v2334_v33 = vld [vmem:[#allocation4 + $0xb08] sm:$0xff]  ;;  %v2339_v44 = vld [vmem:[#allocation4 + $0xb30] sm:$0xff] }
 0x220   : > { %7541 = vmatpush1.bf16.msra.mxu0 %v7540_v54  ;;  %7580 = vmatpush1.bf16.msra.mxu1 %v7579_v50  ;;  %v7597_v54 = vpack.c.bf16 %v2298_v39, %v2293_v41  ;;  %v10167_v50 = vld [vmem:[%s9748_s18 + $0x30] sm:$0xff]  ;;  %v2330_v41 = vld [vmem:[#allocation4 + $0xae8] sm:$0xff]  ;;  %v10220_v39 = vld [vmem:[%s9748_s18 + $0x68] sm:$0xf] }
 0x221   : > { %7542 = vmatprep.subr.bf16.mxu0 %v9321_v5  ;;  %7582 = vmatprep.subr.bf16.mxu1 %v7581_v59  ;;  %v2392_v55 = vrot.slane %v10167_v50, 3  ;;  %v2308_v59 = vld [vmem:[#allocation4 + $0xa38] sm:$0xff] }
 0x222   : > { %v7601_v57 = vpack.c.bf16 %v2308_v59, %v2303_v58  ;;  %v2335_v58 = vld [vmem:[#allocation4 + $0xb10] sm:$0xff]  ;;  %v7611_v59 = vpack.c.bf16 %v2339_v44, %v2334_v33  ;;  %v2374_v33 = vld [vmem:[#allocation4 + $0xc48] sm:$0xff] }
 0x223   : > { %v2379_v44 = vld [vmem:[#allocation4 + $0xc70] sm:$0xf] }
 0x224   : > { %7544 = vmatpush1.bf16.msra.mxu0 %v7543_v22  ;;  %7584 = vmatpush1.bf16.msra.mxu1 %v7583_v4  ;;  %v2398_v22 = vrot.slane %v10178_v63, 3  ;;  %v2314_v4 = vld [vmem:[#allocation4 + $0xa68] sm:$0xff] }
 0x225   : > { %7545 = vmatprep.subr.bf16.mxu0 %v9321_v5  ;;  %7587 = vmatprep.subr.msk.bf16.mxu1 %vm9758_vm3, %v7585_v13  ;;  %v10188_v13 = vld [vmem:[%s9748_s18 + $0x40] sm:$0xff] }
 0x226   : > { %v2396_v15 = vrot.slane %v10188_v13, 3 }
 0x228   : > { %7548 = vmatpush1.bf16.msk.msra.mxu0 %vm9758_vm3, %v7546_v19  ;;  %7590 = vmatpush1.bf16.msk.msra.mxu1 %vm9758_vm3, %v7588_v47  ;;  %v7603_v19 = vpack.c.bf16 %v2319_v11, %v2314_v4  ;;  %v2315_v47 = vld [vmem:[#allocation4 + $0xa70] sm:$0xff] }
 0x229   : > { %7592 = vmatprep.subr.bf16.mxu0 %v7591_v8  ;;  %7633 = vmatprep.subr.bf16.mxu1 %v9321_v5  ;;  %v7643_v29 = vpack.c.bf16 %v2320_v20, %v2315_v47 }
 0x22b   : > { %2160 = vmatmul.mubr.f32.vlgmr.msra.gmra.mrb[48].mxu0 %v10023_v16  ;;  %2506 = vmatmul.mubr.f32.vlgmr.msra.gmra.mrb[48].mxu1 %v10143_v10  ;;  %v10164_v16 = vsel %vm2381_vm6, %v2383_v2, %v2388_v38  ;;  %v10199_v2 = vld [vmem:[%s9748_s18 + $0x58] sm:$0xff] }
 0x22c   : > { %7594 = vmatpush1.bf16.msra.mxu0 %v7593_v7  ;;  %7635 = vmatpush1.bf16.msra.mxu1 %v7634_v37  ;;  %v2402_v8 = vrot.slane %v10199_v2, 3  ;;  %v2328_v7 = vld [vmem:[#allocation4 + $0xad8] sm:$0xff]  ;;  %v7607_v37 = vpack.c.bf16 %v2329_v18, %v2324_v23  ;;  %v2358_v23 = vld [vmem:[#allocation4 + $0xbc8] sm:$0xff]  ;;  %v2355_v18 = vld [vmem:[#allocation4 + $0xbb0] sm:$0xff] }
 0x22d   : > { %7035 = vmatprep.mubr.msk.f32.mxu0 %vm783_vm0, %v10032_v25  ;;  %7043 = vmatprep.mubr.msk.f32.mxu1 %vm783_vm0, %v10154_v45  ;;  %v10175_v25 = vsel %vm2381_vm6, %v2390_v35, %v2394_v46  ;;  %v10209_v35 = vld [vmem:[%s9748_s18 + $0x50] sm:$0xff] }
 0x22e   : > { %7596 = vmatprep.subr.bf16.mxu0 %v7595_v43  ;;  %7636 = vmatprep.subr.bf16.mxu1 %v9321_v5  ;;  %v2400_v14 = vrot.slane %v10209_v35, 3  ;;  %v2406_v43 = vrot.slane %v10220_v39, 3 }
 0x22f   : > { %2165 = vmatmul.mubr.f32.gmra.mrb[50].mxu0 %v10038_v31  ;;  %2512 = vmatmul.mubr.f32.gmra.mrb[50].mxu1 %v10164_v16  ;;  %v10185_v31 = vsel %vm2381_vm6, %v2388_v38, %v2392_v55  ;;  %v2325_v38 = vld [vmem:[#allocation4 + $0xac0] sm:$0xff] }
 0x230   : > { %7598 = vmatpush1.bf16.msra.mxu0 %v7597_v54  ;;  %7638 = vmatpush1.bf16.msra.mxu1 %v7637_v34  ;;  %v7646_v49 = vpack.c.bf16 %v2330_v41, %v2325_v38  ;;  %v2404_v54 = vrot.slane %v10230_v40, 3  ;;  %v2333_v34 = vld [vmem:[#allocation4 + $0xb00] sm:$0xff]  ;;  %v2368_v38 = vld [vmem:[#allocation4 + $0xc18] sm:$0xff] }
 0x231   : > { %7036 = vmatprep.mubr.msk.f32.mxu0 %vm783_vm0, %v10047_v24  ;;  %7044 = vmatprep.mubr.msk.f32.mxu1 %vm783_vm0, %v10175_v25  ;;  %v10196_v24 = vsel %vm2381_vm6, %v2394_v46, %v2398_v22  ;;  %v7609_v46 = vpack.c.bf16 %v2328_v7, %v2323_v36  ;;  %v2365_v41 = vld [vmem:[#allocation4 + $0xc00] sm:$0xff] }
 0x232   : > { %7600 = vmatprep.subr.bf16.mxu0 %v7599_v61  ;;  %7639 = vmatprep.subr.bf16.mxu1 %v9321_v5  ;;  %v2340_v61 = vld [vmem:[#allocation4 + $0xb38] sm:$0xff]  ;;  %v10244_v4 = vsel %vm2381_vm6, %v2400_v14, %v2404_v54  ;;  %v2373_v54 = vld [vmem:[#allocation4 + $0xc40] sm:$0xff] }
 0x233   : > { %2170 = vmatmul.mubr.f32.gmra.mrb[52].mxu0 %v10053_v42  ;;  %2518 = vmatmul.mubr.f32.gmra.mrb[52].mxu1 %v10185_v31  ;;  %v10206_v42 = vsel %vm2381_vm6, %v2392_v55, %v2396_v15  ;;  %v2338_v55 = vld [vmem:[#allocation4 + $0xb28] sm:$0xff]  ;;  %v7649_v11 = vpack.c.bf16 %v2340_v61, %v2335_v58  ;;  %v2380_v58 = vld [vmem:[#allocation4 + $0xc78] sm:$0xf]  ;;  %v2835_v61 = vld [vmem:[#allocation4 + $0xcb0] sm:$0xff] }
 0x234   : > { %7602 = vmatpush1.bf16.msra.mxu0 %v7601_v57  ;;  %7641 = vmatpush1.bf16.msra.mxu1 %v7640_v62  ;;  %v7615_v57 = vpack.c.bf16 %v2349_v60, %v2344_v51  ;;  %v2343_v62 = vld [vmem:[#allocation4 + $0xb50] sm:$0xff]  ;;  %v2832_v51 = vld [vmem:[#allocation4 + $0xc98] sm:$0xff]  ;;  %v2837_v60 = vld [vmem:[#allocation4 + $0xcc0] sm:$0xff] }
 0x235   : > { %7037 = vmatprep.mubr.msk.f32.mxu0 %vm783_vm0, %v10062_v53  ;;  %7045 = vmatprep.mubr.msk.f32.mxu1 %vm783_vm0, %v10196_v24  ;;  %v10217_v53 = vsel %vm2381_vm6, %v2398_v22, %v2402_v8  ;;  %v7613_v22 = vpack.c.bf16 %v2338_v55, %v2333_v34  ;;  %v2378_v34 = vld [vmem:[#allocation4 + $0xc68] sm:$0xf]  ;;  %v2375_v55 = vld [vmem:[#allocation4 + $0xc50] sm:$0xff] }
 0x236   : > { %7604 = vmatprep.subr.bf16.mxu0 %v7603_v19  ;;  %7642 = vmatprep.subr.bf16.mxu1 %v9321_v5  ;;  %v2359_v19 = vld [vmem:[#allocation4 + $0xbd0] sm:$0xff] }
 0x237   : > { %2175 = vmatmul.mubr.f32.gmra.mrb[54].mxu0 %v10068_v56  ;;  %2524 = vmatmul.mubr.f32.gmra.mrb[54].mxu1 %v10206_v42  ;;  %v10227_v56 = vsel %vm2381_vm6, %v2396_v15, %v2400_v14  ;;  %v2345_v15 = vld [vmem:[#allocation4 + $0xb60] sm:$0xff]  ;;  %v7619_v20 = vpack.c.bf16 %v2359_v19, %v2354_v32  ;;  %v2836_v32 = vld [vmem:[#allocation4 + $0xcb8] sm:$0xff] }
 0x238   : > { %7606 = vmatpush1.bf16.msra.mxu0 %v7605_v26  ;;  %7644 = vmatpush1.bf16.msra.mxu1 %v7643_v29  ;;  %v7652_v47 = vpack.c.bf16 %v2350_v17, %v2345_v15  ;;  %v2360_v26 = vld [vmem:[#allocation4 + $0xbd8] sm:$0xff]  ;;  %v2369_v14 = vld [vmem:[#allocation4 + $0xc20] sm:$0xff]  ;;  %v7706_v15 = vpack.c.bf16 %v2837_v60, %v2832_v51  ;;  %v2831_v17 = vld [vmem:[#allocation4 + $0xc90] sm:$0xff] }
 0x239   : > { %7038 = vmatprep.mubr.msk.f32.mxu0 %vm783_vm0, %v10077_v6  ;;  %7046 = vmatprep.mubr.msk.f32.mxu1 %vm783_vm0, %v10217_v53  ;;  %v10238_v6 = vsel %vm2381_vm6, %v2402_v8, %v2406_v43  ;;  %v2353_v8 = vld [vmem:[#allocation4 + $0xba0] sm:$0xff]  ;;  %v2364_v29 = vld [vmem:[#allocation4 + $0xbf8] sm:$0xff]  ;;  %v7655_v36 = vpack.c.bf16 %v2360_v26, %v2355_v18  ;;  %v2370_v43 = vld [vmem:[#allocation4 + $0xc28] sm:$0xff] }
 0x23a   : > { %7608 = vmatprep.subr.bf16.mxu0 %v7607_v37  ;;  %7645 = vmatprep.subr.bf16.mxu1 %v9321_v5  ;;  %v7623_v7 = vpack.c.bf16 %v2369_v14, %v2364_v29  ;;  %v2363_v37 = vld [vmem:[#allocation4 + $0xbf0] sm:$0xff]  ;;  %v2840_v19 = vld [vmem:[#allocation4 + $0xcd8] sm:$0xff]  ;;  %v2841_v14 = vld [vmem:[#allocation4 + $0xce0] sm:$0xff] }
 0x23b   : > { %2180 = vmatmul.mubr.f32.gmra.mrb[56].mxu0 %v10083_v1  ;;  %2530 = vmatmul.mubr.f32.gmra.mrb[56].mxu1 %v10227_v56  ;;  %v2348_v1 = vld [vmem:[#allocation4 + $0xb78] sm:$0xff]  ;;  %v2839_v18 = vld [vmem:[#allocation4 + $0xcd0] sm:$0xff] }
 0x23c   : > { %7610 = vmatpush1.bf16.msra.mxu0 %v7609_v46  ;;  %7647 = vmatpush1.bf16.msra.mxu1 %v7646_v49  ;;  %v7625_v46 = vpack.c.bf16 %v2368_v38, %v2363_v37  ;;  %v7658_v49 = vpack.c.bf16 %v2370_v43, %v2365_v41  ;;  %v2844_v26 = vld [vmem:[#allocation4 + $0xcf8] sm:$0xff]  ;;  %v2855_v37 = vld [vmem:[#allocation4 + $0xd50] sm:$0xff]  ;;  %v2857_v43 = vld [vmem:[#allocation4 + $0xd60] sm:$0xff] }
 0x23d   : > { %7039 = vmatprep.mubr.msk.f32.mxu0 %vm783_vm0, %v10092_v21  ;;  %7047 = vmatprep.mubr.msk.f32.mxu1 %vm783_vm0, %v10238_v6  ;;  %v7617_v21 = vpack.c.bf16 %v2348_v1, %v2343_v62  ;;  %v2829_v62 = vld [vmem:[#allocation4 + $0xc80] sm:$0xff]  ;;  %v2834_v1 = vld [vmem:[#allocation4 + $0xca8] sm:$0xff]  ;;  %v7670_v38 = vpack.c.bf16 %v2844_v26, %v2839_v18  ;;  %v2852_v41 = vld [vmem:[#allocation4 + $0xd38] sm:$0xff] }
 0x23e   : > { %7612 = vmatprep.subr.bf16.mxu0 %v7611_v59  ;;  %7648 = vmatprep.subr.bf16.mxu1 %v9321_v5  ;;  %v2830_v59 = vld [vmem:[#allocation4 + $0xc88] sm:$0xff]  ;;  %v2859_v51 = vld [vmem:[#allocation4 + $0xd70] sm:$0xff]  ;;  %v2864_v60 = vld [vmem:[#allocation4 + $0xd98] sm:$0xff] }
 0x23f   : > { %2185 = vmatmul.mubr.f32.gmra.mrb[58].mxu0 %v10097_v28  ;;  %2536 = vmatmul.mubr.f32.gmra.mrb[58].mxu1 %v10244_v4  ;;  %v7621_v28 = vpack.c.bf16 %v2358_v23, %v2353_v8  ;;  %v2847_v8 = vld [vmem:[#allocation4 + $0xd10] sm:$0xff]  ;;  %v7708_v23 = vpack.c.bf16 %v2836_v32, %v2831_v17  ;;  %v2872_v17 = vld [vmem:[#allocation4 + $0xdd8] sm:$0xff]  ;;  %v2877_v32 = vld [vmem:[#allocation4 + $0xe00] sm:$0xff] }
 0x240   : > { %7614 = vmatpush1.bf16.msra.mxu0 %v7613_v22  ;;  %7650 = vmatpush1.bf16.msra.mxu1 %v7649_v11  ;;  %v7630_v22 = vpack.c.bf16 %v2378_v34, %v2373_v54  ;;  %v7661_v11 = vpack.c.bf16 %v2380_v58, %v2375_v55  ;;  %v2856_v54 = vld [vmem:[#allocation4 + $0xd58] sm:$0xff]  ;;  %v2865_v55 = vld [vmem:[#allocation4 + $0xda0] sm:$0xff]  ;;  %v7722_v26 = vpack.c.bf16 %v2877_v32, %v2872_v17 }
 0x241   : > { %7616 = vmatprep.subr.bf16.mxu0 %v7615_v57  ;;  %7651 = vmatprep.subr.bf16.mxu1 %v9321_v5  ;;  %v7664_v57 = vpack.c.bf16 %v2835_v61, %v2830_v59  ;;  %v2860_v34 = vld [vmem:[#allocation4 + $0xd78] sm:$0xff]  ;;  %v2862_v59 = vld [vmem:[#allocation4 + $0xd88] sm:$0xff]  ;;  %v2867_v61 = vld [vmem:[#allocation4 + $0xdb0] sm:$0xff] }
 0x242   : > { %7050 = vmatprep.mubr.msk.f32.mxu0 %vm783_vm0, %v10117_v12  ;;  %7057 = vmatprep.mubr.msk.f32.mxu1 %vm783_vm0, %v10117_v12  ;;  %v7627_v12 = vpack.c.bf16 %v2379_v44, %v2374_v33  ;;  %v2849_v44 = vld [vmem:[#allocation4 + $0xd20] sm:$0xff] }
 0x244   : > { %7618 = vmatpush1.bf16.msra.mxu0 %v7617_v21  ;;  %7653 = vmatpush1.bf16.msra.mxu1 %v7652_v47  ;;  %v2845_v21 = vld [vmem:[#allocation4 + $0xd00] sm:$0xff]  ;;  %v7666_v47 = vpack.c.bf16 %v2834_v1, %v2829_v62  ;;  %v2870_v62 = vld [vmem:[#allocation4 + $0xdc8] sm:$0xff]  ;;  %v2875_v1 = vld [vmem:[#allocation4 + $0xdf0] sm:$0xff] }
 0x245   : > { %7620 = vmatprep.subr.bf16.mxu0 %v7619_v20  ;;  %7654 = vmatprep.subr.bf16.mxu1 %v9321_v5  ;;  %v2842_v20 = vld [vmem:[#allocation4 + $0xce8] sm:$0xff]  ;;  %v7668_v29 = vpack.c.bf16 %v2845_v21, %v2840_v19  ;;  %v2869_v19 = vld [vmem:[#allocation4 + $0xdc0] sm:$0xff] }
 0x246   : > { %v2874_v21 = vld [vmem:[#allocation4 + $0xde8] sm:$0xff] }
 0x248   : > { %7622 = vmatpush1.bf16.msra.mxu0 %v7621_v28  ;;  %7656 = vmatpush1.bf16.msra.mxu1 %v7655_v36  ;;  %v2846_v28 = vld [vmem:[#allocation4 + $0xd08] sm:$0xff]  ;;  %v7710_v36 = vpack.c.bf16 %v2847_v8, %v2842_v20  ;;  %v7680_v20 = vpack.c.bf16 %v2875_v1, %v2870_v62  ;;  %v2871_v8 = vld [vmem:[#allocation4 + $0xdd0] sm:$0xff] }
 0x249   : > { %7624 = vmatprep.subr.bf16.mxu0 %v7623_v7  ;;  %7657 = vmatprep.subr.bf16.mxu1 %v9321_v5  ;;  %v2850_v7 = vld [vmem:[#allocation4 + $0xd28] sm:$0xff]  ;;  %v7712_v33 = vpack.c.bf16 %v2846_v28, %v2841_v14  ;;  %v2885_v14 = vld [vmem:[#allocation4 + $0xe40] sm:$0xff] }
 0x24a   : > { %v2902_v1 = vld [vmem:[#allocation4 + $0xec8] sm:$0xff] }
 0x24c   : > { %7626 = vmatpush1.bf16.msra.mxu0 %v7625_v46  ;;  %7659 = vmatpush1.bf16.msra.mxu1 %v7658_v49  ;;  %v2854_v46 = vld [vmem:[#allocation4 + $0xd48] sm:$0xff]  ;;  %v7672_v49 = vpack.c.bf16 %v2855_v37, %v2850_v7  ;;  %v2887_v7 = vld [vmem:[#allocation4 + $0xe50] sm:$0xff] }
 0x24d   : > { %7629 = vmatprep.subr.msk.bf16.mxu0 %vm9758_vm3, %v7627_v12  ;;  %7660 = vmatprep.subr.bf16.mxu1 %v9321_v5  ;;  %v2851_v12 = vld [vmem:[#allocation4 + $0xd30] sm:$0xff]  ;;  %v7674_v58 = vpack.c.bf16 %v2854_v46, %v2849_v44  ;;  %v2890_v44 = vld [vmem:[#allocation4 + $0xe68] sm:$0xff] }
 0x24e   : > { %v2895_v46 = vld [vmem:[#allocation4 + $0xe90] sm:$0xff] }
 0x250   : > { %7632 = vmatpush1.bf16.msk.msra.mxu0 %vm9758_vm3, %v7630_v22  ;;  %7663 = vmatpush1.bf16.msk.msra.mxu1 %vm9758_vm3, %v7661_v11  ;;  %v7676_v22 = vpack.c.bf16 %v2865_v55, %v2860_v34  ;;  %v2861_v11 = vld [vmem:[#allocation4 + $0xd80] sm:$0xff] }
 0x251   : > { %7665 = vmatprep.subr.bf16.mxu0 %v7664_v57  ;;  %7707 = vmatprep.subr.bf16.mxu1 %v7706_v15  ;;  %v2866_v57 = vld [vmem:[#allocation4 + $0xda8] sm:$0xff]  ;;  %v7678_v15 = vpack.c.bf16 %v2864_v60, %v2859_v51  ;;  %v7688_v51 = vpack.c.bf16 %v2895_v46, %v2890_v44  ;;  %v2889_v60 = vld [vmem:[#allocation4 + $0xe60] sm:$0xff] }
 0x252   : > { %v2909_v46 = vld [vmem:[#allocation4 + $0xf00] sm:$0xff] }
 0x253   : > { %2607 = vmatmul.mubr.f32.vlgmr.msra.gmra.mrb[60].mxu0 %v10143_v10  ;;  %2708 = vmatmul.mubr.f32.vlgmr.msra.gmra.mrb[60].mxu1 %v10143_v10  ;;  %v7714_v10 = vpack.c.bf16 %v2857_v43, %v2852_v41  ;;  %v2884_v41 = vld [vmem:[#allocation4 + $0xe38] sm:$0xff]  ;;  %v2881_v43 = vld [vmem:[#allocation4 + $0xe20] sm:$0xff] }
 0x254   : > { %7667 = vmatpush1.bf16.msra.mxu0 %v7666_v47  ;;  %7709 = vmatpush1.bf16.msra.mxu1 %v7708_v23 }
 0x255   : > { %7051 = vmatprep.mubr.msk.f32.mxu0 %vm783_vm0, %v10154_v45  ;;  %7058 = vmatprep.mubr.msk.f32.mxu1 %vm783_vm0, %v10154_v45  ;;  %v7716_v45 = vpack.c.bf16 %v2856_v54, %v2851_v12  ;;  %v2892_v54 = vld [vmem:[#allocation4 + $0xe78] sm:$0xff] }
 0x256   : > { %7669 = vmatprep.subr.bf16.mxu0 %v7668_v29  ;;  %7711 = vmatprep.subr.bf16.mxu1 %v7710_v36  ;;  %v2880_v29 = vld [vmem:[#allocation4 + $0xe18] sm:$0xff]  ;;  %v2882_v36 = vld [vmem:[#allocation4 + $0xe28] sm:$0xff] }
 0x257   : > { %2613 = vmatmul.mubr.f32.gmra.mrb[62].mxu0 %v10164_v16  ;;  %2713 = vmatmul.mubr.f32.gmra.mrb[62].mxu1 %v10164_v16  ;;  %v7718_v16 = vpack.c.bf16 %v2867_v61, %v2862_v59  ;;  %v7726_v12 = vpack.c.bf16 %v2887_v7, %v2882_v36  ;;  %v2915_v36 = vld [vmem:[#allocation4 + $0xf30] sm:$0xff] }
 0x258   : > { %7671 = vmatpush1.bf16.msra.mxu0 %v7670_v38  ;;  %7713 = vmatpush1.bf16.msra.mxu1 %v7712_v33  ;;  %v2879_v38 = vld [vmem:[#allocation4 + $0xe10] sm:$0xff]  ;;  %v7684_v33 = vpack.c.bf16 %v2885_v14, %v2880_v29  ;;  %v2906_v14 = vld [vmem:[#allocation4 + $0xee8] sm:$0xff] }
 0x259   : > { %7052 = vmatprep.mubr.msk.f32.mxu0 %vm783_vm0, %v10175_v25  ;;  %7059 = vmatprep.mubr.msk.f32.mxu1 %vm783_vm0, %v10175_v25  ;;  %v7720_v25 = vpack.c.bf16 %v2866_v57, %v2861_v11  ;;  %v7686_v59 = vpack.c.bf16 %v2884_v41, %v2879_v38  ;;  %v2891_v11 = vld [vmem:[#allocation4 + $0xe70] sm:$0xff]  ;;  %v2896_v57 = vld [vmem:[#allocation4 + $0xe98] sm:$0xff] }
 0x25a   : > { %7673 = vmatprep.subr.bf16.mxu0 %v7672_v49  ;;  %7715 = vmatprep.subr.bf16.mxu1 %v7714_v10  ;;  %v2897_v10 = vld [vmem:[#allocation4 + $0xea0] sm:$0xff] }
 0x25b   : > { %2619 = vmatmul.mubr.f32.gmra.mrb[64].mxu0 %v10185_v31  ;;  %2718 = vmatmul.mubr.f32.gmra.mrb[64].mxu1 %v10185_v31  ;;  %v2876_v31 = vld [vmem:[#allocation4 + $0xdf8] sm:$0xff] }
 0x25c   : > { %7675 = vmatpush1.bf16.msra.mxu0 %v7674_v58  ;;  %7717 = vmatpush1.bf16.msra.mxu1 %v7716_v45  ;;  %v7724_v37 = vpack.c.bf16 %v2876_v31, %v2871_v8  ;;  %v2932_v58 = vrot.slane %v10100_v0, 4  ;;  %v7730_v0 = vpack.c.bf16 %v2897_v10, %v2892_v54  ;;  %v2899_v8 = vld [vmem:[#allocation4 + $0xeb0] sm:$0xff]  ;;  %v2904_v31 = vld [vmem:[#allocation4 + $0xed8] sm:$0xff] }
 0x25d   : > { %7053 = vmatprep.mubr.msk.f32.mxu0 %vm783_vm0, %v10196_v24  ;;  %7060 = vmatprep.mubr.msk.f32.mxu1 %vm783_vm0, %v10196_v24  ;;  %v7682_v24 = vpack.c.bf16 %v2874_v21, %v2869_v19  ;;  %v7732_v21 = vpack.c.bf16 %v2896_v57, %v2891_v11  ;;  %v2911_v54 = vld [vmem:[#allocation4 + $0xf10] sm:$0xff] }
 0x25e   : > { %v10281_v47 = vpop.f32.mrb[0].mxu0  ;;  %7677 = vmatprep.subr.bf16.mxu0 %v7676_v22  ;;  %v10287_v18 = vpop.f32.mrb[0].mxu1  ;;  %7719 = vmatprep.subr.bf16.mxu1 %v7718_v16  ;;  %v2894_v22 = vld [vmem:[#allocation4 + $0xe88] sm:$0xff]  ;;  %v2905_v16 = vld [vmem:[#allocation4 + $0xee0] sm:$0xff] }
 0x25f   : > { %v10285_v23 = vpop.f32.mrb[1].mxu0  ;;  %2625 = vmatmul.mubr.f32.gmra.mrb[66].mxu0 %v10206_v42  ;;  %2723 = vmatmul.mubr.f32.gmra.mrb[66].mxu1 %v10206_v42  ;;  %v10291_v28 = vpop.f32.mrb[1].mxu1  ;;  %v2886_v42 = vld [vmem:[#allocation4 + $0xe48] sm:$0xff] }
 0x260   : > { %7679 = vmatpush1.bf16.msra.mxu0 %v7678_v15  ;;  %7721 = vmatpush1.bf16.msra.mxu1 %v7720_v25  ;;  %v7728_v45 = vpack.c.bf16 %v2886_v42, %v2881_v43  ;;  %v2907_v15 = vld [vmem:[#allocation4 + $0xef0] sm:$0xff]  ;;  %v7690_v25 = vpack.c.bf16 %v2894_v22, %v2889_v60  ;;  %v7694_v43 = vpack.c.bf16 %v2904_v31, %v2899_v8  ;;  %v2922_v60 = vld [vmem:[#allocation4 + $0xf68] sm:$0xff] }
 0x261   : > { %7054 = vmatprep.mubr.msk.f32.mxu0 %vm783_vm0, %v10217_v53  ;;  %7061 = vmatprep.mubr.msk.f32.mxu1 %vm783_vm0, %v10217_v53  ;;  %v2933_v53 = vrot.slane %v10104_v30, 4  ;;  %v7734_v29 = vpack.c.bf16 %v2907_v15, %v2902_v1  ;;  %v2927_v22 = vld [vmem:[#allocation4 + $0xf90] sm:$0xf]  ;;  %v2926_v8 = vld [vmem:[#allocation4 + $0xf88] sm:$0xf]  ;;  %v2853_v30 = vld [vmem:[#allocation4 + $0xd40] sm:$0xff] }
 0x262   : > { %7681 = vmatprep.subr.bf16.mxu0 %v7680_v20  ;;  %v10297_v49 = vpop.f32.mrb[2].mxu0  ;;  %7723 = vmatprep.subr.bf16.mxu1 %v7722_v26  ;;  %v10302_v55 = vpop.f32.mrb[2].mxu1  ;;  %v2901_v26 = vld [vmem:[#allocation4 + $0xec0] sm:$0xff]  ;;  %v2919_v15 = vld [vmem:[#allocation4 + $0xf50] sm:$0xff] }
 0x263   : > { %2631 = vmatmul.mubr.f32.gmra.mrb[68].mxu0 %v10227_v56  ;;  %v10300_v34 = vpop.f32.mrb[3].mxu0  ;;  %2728 = vmatmul.mubr.f32.gmra.mrb[68].mxu1 %v10227_v56  ;;  %v10307_v61 = vpop.f32.mrb[3].mxu1  ;;  %v2900_v56 = vld [vmem:[#allocation4 + $0xeb8] sm:$0xff]  ;;  %v7736_v42 = vpack.c.bf16 %v2906_v14, %v2901_v26 }
 0x264   : > { %7683 = vmatpush1.bf16.msra.mxu0 %v7682_v24  ;;  %7725 = vmatpush1.bf16.msra.mxu1 %v7724_v37  ;;  %v7692_v20 = vpack.c.bf16 %v2905_v16, %v2900_v56  ;;  %v2910_v24 = vld [vmem:[#allocation4 + $0xf08] sm:$0xff]  ;;  %v2917_v37 = vld [vmem:[#allocation4 + $0xf40] sm:$0xff] }
 0x265   : > { %7055 = vmatprep.mubr.msk.f32.mxu0 %vm783_vm0, %v10238_v6  ;;  %7062 = vmatprep.mubr.msk.f32.mxu1 %vm783_vm0, %v10238_v6  ;;  %v10323_v6 = vsel %vm802_vm1, %v2932_v58, %v2933_v53  ;;  %v7696_v44 = vpack.c.bf16 %v2915_v36, %v2910_v24  ;;  %v2916_v58 = vld [vmem:[#allocation4 + $0xf38] sm:$0xff]  ;;  %v8867_v24 = vld [vmem:[%s9748_s18] sm:$0xff] }
 0x266   : > { %7685 = vmatprep.subr.bf16.mxu0 %v7684_v33  ;;  %v10313_v62 = vpop.f32.mrb[4].mxu0  ;;  %7727 = vmatprep.subr.bf16.mxu1 %v7726_v12  ;;  %v10318_v32 = vpop.f32.mrb[4].mxu1  ;;  %v2914_v12 = vld [vmem:[#allocation4 + $0xf28] sm:$0xff]  ;;  %v7740_v16 = vpack.c.bf16 %v2916_v58, %v2911_v54  ;;  %v2929_v36 = vrot.slane %v8867_v24, 4  ;;  %v2935_v54 = vrot.slane %v10146_v3, 4  ;;  %v2848_v58 = vld [vmem:[#allocation4 + $0xd18] sm:$0xff] }
 0x267   : > { %2637 = vmatmul.mubr.f32.gmra.mrb[70].mxu0 %v10244_v4  ;;  %v10316_v17 = vpop.f32.mrb[5].mxu0  ;;  %2733 = vmatmul.mubr.f32.gmra.mrb[70].mxu1 %v10244_v4  ;;  %v10326_v19 = vpop.f32.mrb[5].mxu1  ;;  %v2912_v4 = vld [vmem:[#allocation4 + $0xf18] sm:$0xff]  ;;  %v7698_v57 = vpack.c.bf16 %v2914_v12, %v2909_v46  ;;  %v2937_v46 = vrot.slane %v10135_v27, 4 }
 0x268   : > { %7687 = vmatpush1.bf16.msra.mxu0 %v7686_v59  ;;  %7729 = vmatpush1.bf16.msra.mxu1 %v7728_v45  ;;  %v7738_v10 = vpack.c.bf16 %v2917_v37, %v2912_v4  ;;  %v2920_v59 = vld [vmem:[#allocation4 + $0xf58] sm:$0xff]  ;;  %v2925_v45 = vld [vmem:[#allocation4 + $0xf80] sm:$0xf]  ;;  %v2930_v4 = vrot.slane %v10129_v9, 4 }
 0x269   : > { %7689 = vmatprep.subr.bf16.mxu0 %v7688_v51  ;;  %7731 = vmatprep.subr.bf16.mxu1 %v7730_v0  ;;  %v7700_v1 = vpack.c.bf16 %v2925_v45, %v2920_v59  ;;  %v10375_v27 = vsel %vm802_vm1, %v2933_v53, %v2937_v46  ;;  %v2941_v59 = vrot.slane %v10157_v48, 4  ;;  %v2858_v53 = vld [vmem:[#allocation4 + $0xd68] sm:$0xff] }
 0x26a   : > { %v10328_v7 = vpop.f32.mrb[6].mxu0  ;;  %7065 = vmatprep.mubr.msk.f32.mxu0 %vm783_vm0, %v10323_v6  ;;  %7073 = vmatprep.mubr.msk.f32.mxu1 %vm783_vm0, %v10323_v6  ;;  %v10336_v41 = vpop.f32.mrb[6].mxu1  ;;  %v10366_v12 = vsel %vm802_vm1, %v2929_v36, %v2930_v4  ;;  %v10381_v3 = vsel %vm802_vm1, %v2930_v4, %v2935_v54  ;;  %v2953_v36 = vrot.slane %v10220_v39, 4 }
 0x26b   : > { %v10334_v38 = vpop.f32.mrb[7].mxu0  ;;  %v10338_v33 = vpop.f32.mrb[7].mxu1  ;;  %v10390_v48 = vsel %vm802_vm1, %v2937_v46, %v2941_v59 }
 0x26c   : > { %7691 = vmatpush1.bf16.msra.mxu0 %v7690_v25  ;;  %7733 = vmatpush1.bf16.msra.mxu1 %v7732_v21  ;;  %v2924_v25 = vld [vmem:[#allocation4 + $0xf78] sm:$0xf]  ;;  %v7742_v21 = vpack.c.bf16 %v2927_v22, %v2922_v60  ;;  %v2939_v60 = vrot.slane %v10167_v50, 4  ;;  %v2945_v22 = vrot.slane %v10178_v63, 4 }
 0x26d   : > { %7693 = vmatprep.subr.bf16.mxu0 %v7692_v20  ;;  %7735 = vmatprep.subr.bf16.mxu1 %v7734_v29  ;;  %v2921_v20 = vld [vmem:[#allocation4 + $0xf60] sm:$0xff]  ;;  %v7703_v14 = vpack.c.bf16 %v2924_v25, %v2919_v15  ;;  %v2868_v15 = vld [vmem:[#allocation4 + $0xdb8] sm:$0xff]  ;;  %v2949_v25 = vrot.slane %v10199_v2, 4  ;;  %v2878_v2 = vld [vmem:[#allocation4 + $0xe08] sm:$0xff] }
 0x26e   : > { %v10340_v51 = vpop.f32.mrb[8].mxu0  ;;  %v10344_v0 = vpop.f32.mrb[8].mxu1  ;;  %v10396_v50 = vsel %vm802_vm1, %v2935_v54, %v2939_v60  ;;  %v10405_v63 = vsel %vm802_vm1, %v2941_v59, %v2945_v22  ;;  %v2888_v54 = vld [vmem:[#allocation4 + $0xe58] sm:$0xff] }
 0x26f   : > { %v10342_v11 = vpop.f32.mrb[9].mxu0  ;;  %v10346_v56 = vpop.f32.mrb[9].mxu1  ;;  %v10420_v24 = vsel %vm802_vm1, %v2945_v22, %v2949_v25 }
 0x270   : > { %7695 = vmatpush1.bf16.msra.mxu0 %v7694_v43  ;;  %7737 = vmatpush1.bf16.msra.mxu1 %v7736_v42  ;;  %v7745_v43 = vpack.c.bf16 %v2926_v8, %v2921_v20  ;;  %v2833_v42 = vld [vmem:[#allocation4 + $0xca0] sm:$0xff]  ;;  %v2947_v20 = vrot.slane %v10209_v35, 4 }
 0x271   : > { %7697 = vmatprep.subr.bf16.mxu0 %v7696_v44  ;;  %7739 = vmatprep.subr.bf16.mxu1 %v7738_v10  ;;  %v2838_v44 = vld [vmem:[#allocation4 + $0xcc8] sm:$0xff]  ;;  %v2843_v10 = vld [vmem:[#allocation4 + $0xcf0] sm:$0xff]  ;;  %v2873_v8 = vld [vmem:[#allocation4 + $0xde0] sm:$0xff] }
 0x272   : > { %v10348_v31 = vpop.f32.mrb[10].mxu0  ;;  %v10352_v29 = vpop.f32.mrb[10].mxu1  ;;  %v7749_v9 = vpack.c.bf16 %v2838_v44, %v2833_v42  ;;  %v7752_v45 = vpack.c.bf16 %v2848_v58, %v2843_v10  ;;  %v7761_v46 = vpack.c.bf16 %v2878_v2, %v2873_v8  ;;  %v10442_v10 = vsel %vm802_vm1, %v2949_v25, %v2953_v36  ;;  %v2903_v25 = vld [vmem:[#allocation4 + $0xed0] sm:$0xff]  ;;  %v2918_v36 = vld [vmem:[#allocation4 + $0xf48] sm:$0xff] }
 0x273   : > { %v10350_v26 = vpop.f32.mrb[11].mxu0  ;;  %v10356_v37 = vpop.f32.mrb[11].mxu1 }
 0x274   : > { %7699 = vmatpush1.bf16.msra.mxu0 %v7698_v57  ;;  %7741 = vmatpush1.bf16.msra.mxu1 %v7740_v16  ;;  %v7755_v57 = vpack.c.bf16 %v2858_v53, %v2853_v30  ;;  %v2943_v16 = vrot.slane %v10188_v13, 4  ;;  %v2893_v30 = vld [vmem:[#allocation4 + $0xe80] sm:$0xff] }
 0x275   : > { %7702 = vmatprep.subr.msk.bf16.mxu0 %vm9758_vm3, %v7700_v1  ;;  %7744 = vmatprep.subr.msk.bf16.mxu1 %vm9758_vm3, %v7742_v21  ;;  %v2863_v1 = vld [vmem:[#allocation4 + $0xd90] sm:$0xff] }
 0x276   : > { %v10411_v13 = vsel %vm802_vm1, %v2939_v60, %v2943_v16  ;;  %v7758_v21 = vpack.c.bf16 %v2868_v15, %v2863_v1  ;;  %v10430_v44 = vsel %vm802_vm1, %v2943_v16, %v2947_v20 }
 0x278   : > { %7705 = vmatpush1.bf16.msk.msra.mxu0 %vm9758_vm3, %v7703_v14  ;;  %7747 = vmatpush1.bf16.msk.msra.mxu1 %vm9758_vm3, %v7745_v43 }
 0x279   : > { %7748 = vmatprep.subr.bf16.mxu0 %v9321_v5 }
 0x27b   : > { %3053 = vmatmul.mubr.f32.vlgmr.msra.gmra.mrb[72].mxu0 %v10366_v12  ;;  %3154 = vmatmul.mubr.f32.vlgmr.msra.gmra.mrb[72].mxu1 %v10366_v12 }
 0x27c   : > { %7750 = vmatpush1.bf16.msra.mxu0 %v7749_v9  ;;  %7066 = vmatprep.mubr.msk.f32.mxu0 %vm783_vm0, %v10375_v27  ;;  %v2951_v9 = vrot.slane %v10230_v40, 4 }
 0x27d   : > { %7074 = vmatprep.mubr.msk.f32.mxu1 %vm783_vm0, %v10375_v27  ;;  %7751 = vmatprep.subr.bf16.mxu0 %v9321_v5 }
 0x27e   : > { %v10450_v59 = vsel %vm802_vm1, %v2947_v20, %v2951_v9 }
 0x27f   : > { %3059 = vmatmul.mubr.f32.gmra.mrb[74].mxu0 %v10381_v3  ;;  %3160 = vmatmul.mubr.f32.gmra.mrb[74].mxu1 %v10381_v3 }
 0x280   : > { %7753 = vmatpush1.bf16.msra.mxu0 %v7752_v45  ;;  %7067 = vmatprep.mubr.msk.f32.mxu0 %vm783_vm0, %v10390_v48 }
 0x281   : > { %7075 = vmatprep.mubr.msk.f32.mxu1 %vm783_vm0, %v10390_v48  ;;  %7754 = vmatprep.subr.bf16.mxu0 %v9321_v5 }
 0x283   : > { %3065 = vmatmul.mubr.f32.gmra.mrb[76].mxu0 %v10396_v50  ;;  %3166 = vmatmul.mubr.f32.gmra.mrb[76].mxu1 %v10396_v50 }
 0x284   : > { %7756 = vmatpush1.bf16.msra.mxu0 %v7755_v57  ;;  %7068 = vmatprep.mubr.msk.f32.mxu0 %vm783_vm0, %v10405_v63 }
 0x285   : > { %7076 = vmatprep.mubr.msk.f32.mxu1 %vm783_vm0, %v10405_v63  ;;  %7757 = vmatprep.subr.bf16.mxu0 %v9321_v5 }
 0x286   : > { %v1086_v14 = vpop.f32.mrb[12].mxu0  ;;  %v1411_v4 = vpop.f32.mrb[12].mxu1 }
 0x287   : > { %1120 = vst.msk [vmem:[#allocation2 + $0x20] sm:$0xff] %vm1119_vm7, %v1086_v14  ;;  %v1088_v35 = vpop.f32.mrb[13].mxu0  ;;  %3071 = vmatmul.mubr.f32.gmra.mrb[78].mxu0 %v10411_v13  ;;  %v10426_v43 = vadd.f32 %v1411_v4, %v10281_v47  ;;  %v1413_v42 = vpop.f32.mrb[13].mxu1  ;;  %3172 = vmatmul.mubr.f32.gmra.mrb[78].mxu1 %v10411_v13  ;;  %v2883_v47 = vld [vmem:[#allocation4 + $0xe30] sm:$0xff] }
 0x288   : > { %7759 = vmatpush1.bf16.msra.mxu0 %v7758_v21  ;;  %v10434_v39 = vadd.f32 %v1413_v42, %v10285_v23  ;;  %7069 = vmatprep.mubr.msk.f32.mxu0 %vm783_vm0, %v10420_v24  ;;  %v7764_v45 = vpack.c.bf16 %v2888_v54, %v2883_v47  ;;  %v2908_v21 = vld [vmem:[#allocation4 + $0xef8] sm:$0xff] }
 0x289   : > { %7077 = vmatprep.mubr.msk.f32.mxu1 %vm783_vm0, %v10420_v24  ;;  %7760 = vmatprep.subr.bf16.mxu0 %v9321_v5  ;;  %v7770_v2 = vpack.c.bf16 %v2908_v21, %v2903_v25  ;;  %v2928_v47 = vld [vmem:[#allocation4 + $0xf98] sm:$0xf] }
 0x28a   : > { %v1417_v58 = vpop.f32.mrb[14].mxu1  ;;  %v1091_v53 = vpop.f32.mrb[14].mxu0 }
 0x28b   : > { %3077 = vmatmul.mubr.f32.gmra.mrb[80].mxu0 %v10430_v44  ;;  %v10446_v40 = vadd.f32 %v1417_v58, %v10297_v49  ;;  %v1419_v23 = vpop.f32.mrb[15].mxu1  ;;  %3178 = vmatmul.mubr.f32.gmra.mrb[80].mxu1 %v10430_v44  ;;  %v2898_v49 = vld [vmem:[#allocation4 + $0xea8] sm:$0xff]  ;;  %1125 = vst.msk [vmem:[#allocation2 + $0x48] sm:$0xff] %vm1119_vm7, %v1091_v53  ;;  %v1093_v57 = vpop.f32.mrb[15].mxu0 }
 0x28c   : > { %7762 = vmatpush1.bf16.msra.mxu0 %v7761_v46  ;;  %v10453_v60 = vadd.f32 %v1419_v23, %v10300_v34  ;;  %7070 = vmatprep.mubr.msk.f32.mxu0 %vm783_vm0, %v10442_v10  ;;  %v7767_v1 = vpack.c.bf16 %v2898_v49, %v2893_v30 }
 0x28d   : > { %7078 = vmatprep.mubr.msk.f32.mxu1 %vm783_vm0, %v10442_v10  ;;  %7763 = vmatprep.subr.bf16.mxu0 %v9321_v5 }
 0x28e   : > { %v1423_v22 = vpop.f32.mrb[16].mxu1  ;;  %v1096_v4 = vpop.f32.mrb[16].mxu0 }
 0x28f   : > { %3083 = vmatmul.mubr.f32.gmra.mrb[82].mxu0 %v10450_v59  ;;  %v10463_v34 = vadd.f32 %v1423_v22, %v10313_v62  ;;  %v1425_v16 = vpop.f32.mrb[17].mxu1  ;;  %3184 = vmatmul.mubr.f32.gmra.mrb[82].mxu1 %v10450_v59  ;;  %1130 = vst.msk [vmem:[#allocation2 + $0x70] sm:$0xff] %vm1119_vm7, %v1096_v4  ;;  %v1098_v42 = vpop.f32.mrb[17].mxu0  ;;  %v1150_v22 = vld [vmem:[#allocation2 + $0x20] sm:$0xff] }
 0x290   : > { %7765 = vmatpush1.bf16.msra.mxu0 %v7764_v45  ;;  %v10467_v15 = vadd.f32 %v1425_v16, %v10316_v17  ;;  %7080 = vmatprep.mubr.msk.f32.mxu0 %vm783_vm0, %v10323_v6  ;;  %v2913_v17 = vld [vmem:[#allocation4 + $0xf20] sm:$0xff] }
 0x291   : > { %7766 = vmatprep.subr.bf16.mxu0 %v9321_v5  ;;  %v7773_v46 = vpack.c.bf16 %v2918_v36, %v2913_v17 }
 0x292   : > { %v1429_v20 = vpop.f32.mrb[18].mxu1  ;;  %v1101_v30 = vpop.f32.mrb[18].mxu0 }
 0x293   : > { %v10473_v8 = vadd.f32 %v1429_v20, %v10328_v7  ;;  %v1431_v62 = vpop.f32.mrb[19].mxu1  ;;  %1135 = vst.msk [vmem:[#allocation2 + $0x98] sm:$0xff] %vm1119_vm7, %v1101_v30 }
 0x294   : > { %7768 = vmatpush1.bf16.msra.mxu0 %v7767_v1  ;;  %v10476_v14 = vadd.f32 %v1431_v62, %v10334_v38  ;;  %v2923_v38 = vld [vmem:[#allocation4 + $0xf70] sm:$0xff] }
 0x295   : > { %7769 = vmatprep.subr.bf16.mxu0 %v9321_v5  ;;  %v7776_v45 = vpack.c.bf16 %v2928_v47, %v2923_v38 }
 0x296   : > { %v1435_v35 = vpop.f32.mrb[20].mxu1  ;;  %v1160_v62 = vld [vmem:[#allocation2 + $0x70] sm:$0xff] }
 0x297   : > { %v10481_v6 = vadd.f32 %v1435_v35, %v10340_v51  ;;  %v1437_v7 = vpop.f32.mrb[21].mxu1 }
 0x298   : > { %7771 = vmatpush1.bf16.msra.mxu0 %v7770_v2  ;;  %v10484_v9 = vadd.f32 %v1437_v7, %v10342_v11  ;;  %v1103_v11 = vpop.f32.mrb[19].mxu0 }
 0x299   : > { %7772 = vmatprep.subr.bf16.mxu0 %v9321_v5  ;;  %v1106_v49 = vpop.f32.mrb[20].mxu0 }
 0x29a   : > { %v1441_v54 = vpop.f32.mrb[22].mxu1  ;;  %1140 = vst.msk [vmem:[#allocation2 + $0xc0] sm:$0xff] %vm1119_vm7, %v1106_v49 }
 0x29b   : > { %v10488_v58 = vadd.f32 %v1441_v54, %v10348_v31  ;;  %v1443_v23 = vpop.f32.mrb[23].mxu1  ;;  %v1108_v31 = vpop.f32.mrb[21].mxu0 }
 0x29c   : > { %7774 = vmatpush1.bf16.msra.mxu0 %v7773_v46  ;;  %v10491_v51 = vadd.f32 %v1443_v23, %v10350_v26  ;;  %v1111_v26 = vpop.f32.mrb[22].mxu0 }
 0x29d   : > { %7775 = vmatprep.subr.bf16.mxu0 %v9321_v5  ;;  %1145 = vst.msk [vmem:[#allocation2 + $0xe8] sm:$0xff] %vm1119_vm7, %v1111_v26  ;;  %v1113_v53 = vpop.f32.mrb[23].mxu0 }
 0x2a0   : > { %7778 = vmatpush1.bf16.msk.msra.mxu0 %vm9758_vm3, %v7776_v45 }
 0x2a1   : > { %7827 = vmatprep.subr.bf16.mxu0 %v9321_v5  ;;  %v1170_v47 = vld [vmem:[#allocation2 + $0xc0] sm:$0xff] }
 0x2a3   : > { %3255 = vmatmul.mubr.f32.vlgmr.msra.gmra.mrb[84].mxu0 %v10366_v12 }
 0x2a4   : > { %7081 = vmatprep.mubr.msk.f32.mxu0 %vm783_vm0, %v10375_v27  ;;  %v1175_v49 = vld [vmem:[#allocation2 + $0xe8] sm:$0xff] }
 0x2a7   : > { %3260 = vmatmul.mubr.f32.gmra.mrb[86].mxu0 %v10381_v3 }
 0x2a8   : > { %7082 = vmatprep.mubr.msk.f32.mxu0 %vm783_vm0, %v10390_v48 }
 0x2ab   : > { %3265 = vmatmul.mubr.f32.gmra.mrb[88].mxu0 %v10396_v50 }
 0x2ac   : > { %7083 = vmatprep.mubr.msk.f32.mxu0 %vm783_vm0, %v10405_v63  ;;  %v1155_v63 = vld [vmem:[#allocation2 + $0x48] sm:$0xff] }
 0x2ae   : > { %v1512_v52 = vpop.f32.mrb[24].mxu0  ;;  %v1613_v57 = vpop.f32.mrb[24].mxu1 }
 0x2af   : > { %v1644_v12 = vadd.f32 %v1512_v52, %v10287_v18  ;;  %v1514_v27 = vpop.f32.mrb[25].mxu0  ;;  %3270 = vmatmul.mubr.f32.gmra.mrb[90].mxu0 %v10411_v13  ;;  %v1646_v16 = vadd.f32 %v1613_v57, %v1150_v22  ;;  %v1615_v3 = vpop.f32.mrb[25].mxu1 }
 0x2b0   : > { %v1645_v1 = vadd.f32 %v1514_v27, %v10291_v28  ;;  %7084 = vmatprep.mubr.msk.f32.mxu0 %vm783_vm0, %v10420_v24 }
 0x2b1   : > { %1676 = vst.msk [vmem:[#allocation2 + $0x20] sm:$0xff] %vm1119_vm7, %v1646_v16 }
 0x2b2   : > { %v1518_v48 = vpop.f32.mrb[26].mxu0  ;;  %v1618_v25 = vpop.f32.mrb[26].mxu1 }
 0x2b3   : > { %v1649_v50 = vadd.f32 %v1518_v48, %v10302_v55  ;;  %v1520_v18 = vpop.f32.mrb[27].mxu0  ;;  %3275 = vmatmul.mubr.f32.gmra.mrb[92].mxu0 %v10430_v44  ;;  %v1651_v21 = vadd.f32 %v1618_v25, %v1155_v63  ;;  %v1620_v20 = vpop.f32.mrb[27].mxu1 }
 0x2b4   : > { %v1650_v13 = vadd.f32 %v1520_v18, %v10307_v61  ;;  %7085 = vmatprep.mubr.msk.f32.mxu0 %vm783_vm0, %v10442_v10  ;;  %v1165_v10 = vld [vmem:[#allocation2 + $0x98] sm:$0xff] }
 0x2b5   : > { %1681 = vst.msk [vmem:[#allocation2 + $0x48] sm:$0xff] %vm1119_vm7, %v1651_v21 }
 0x2b6   : > { %v1524_v28 = vpop.f32.mrb[28].mxu0  ;;  %v1623_v2 = vpop.f32.mrb[28].mxu1 }
 0x2b7   : > { %v1654_v24 = vadd.f32 %v1524_v28, %v10318_v32  ;;  %v1526_v55 = vpop.f32.mrb[29].mxu0  ;;  %3280 = vmatmul.mubr.f32.gmra.mrb[94].mxu0 %v10450_v59  ;;  %v1656_v17 = vadd.f32 %v1623_v2, %v1160_v62  ;;  %v1625_v36 = vpop.f32.mrb[29].mxu1 }
 0x2b8   : > { %v1655_v44 = vadd.f32 %v1526_v55, %v10326_v19 }
 0x2b9   : > { %1686 = vst.msk [vmem:[#allocation2 + $0x70] sm:$0xff] %vm1119_vm7, %v1656_v17 }
 0x2ba   : > { %v1530_v61 = vpop.f32.mrb[30].mxu0  ;;  %v1628_v35 = vpop.f32.mrb[30].mxu1 }
 0x2bb   : > { %v1659_v4 = vadd.f32 %v1530_v61, %v10336_v41  ;;  %v1532_v42 = vpop.f32.mrb[31].mxu0  ;;  %v1661_v7 = vadd.f32 %v1628_v35, %v1165_v10  ;;  %v1630_v46 = vpop.f32.mrb[31].mxu1 }
 0x2bc   : > { %v1660_v32 = vadd.f32 %v1532_v42, %v10338_v33 }
 0x2bd   : > { %1691 = vst.msk [vmem:[#allocation2 + $0x98] sm:$0xff] %vm1119_vm7, %v1661_v7 }
 0x2be   : > { %v1536_v38 = vpop.f32.mrb[32].mxu0  ;;  %v1633_v19 = vpop.f32.mrb[32].mxu1 }
 0x2bf   : > { %v1664_v59 = vadd.f32 %v1536_v38, %v10344_v0  ;;  %v1538_v54 = vpop.f32.mrb[33].mxu0  ;;  %v1666_v23 = vadd.f32 %v1633_v19, %v1170_v47  ;;  %v1635_v30 = vpop.f32.mrb[33].mxu1 }
 0x2c0   : > { %v1665_v45 = vadd.f32 %v1538_v54, %v10346_v56 }
 0x2c1   : > { %1696 = vst.msk [vmem:[#allocation2 + $0xc0] sm:$0xff] %vm1119_vm7, %v1666_v23  ;;  %v3377_v23 = vlaneseq }
 0x2c2   : > { %v1542_v41 = vpop.f32.mrb[34].mxu0  ;;  %v1638_v33 = vpop.f32.mrb[34].mxu1 }
 0x2c3   : > { %v1669_v11 = vadd.f32 %v1542_v41, %v10352_v29  ;;  %v1544_v31 = vpop.f32.mrb[35].mxu0  ;;  %v1671_v26 = vadd.f32 %v1638_v33, %v1175_v49  ;;  %v1640_v52 = vpop.f32.mrb[35].mxu1  ;;  %v10574_v33 = vld [vmem:[#allocation7] sm:$0x1f]  ;;  %vm10841_vm8 = vcmp.lt.s32.totalorder %v3377_v23, 192 }
 0x2c4   : > { %v1670_v53 = vadd.f32 %v1544_v31, %v10356_v37 }
 0x2c5   : > { %1701 = vst.msk [vmem:[#allocation2 + $0xe8] sm:$0xff] %vm1119_vm7, %v1671_v26 }
 0x2d6   : > { %v1959_v0 = vpop.f32.mrb[36].mxu0  ;;  %v2060_v57 = vpop.f32.mrb[36].mxu1 }
 0x2d7   : > { %v2190_v22 = vadd.f32 %v1959_v0, %v10426_v43  ;;  %v1961_v56 = vpop.f32.mrb[37].mxu0  ;;  %v10535_v27 = vadd.f32 %v2060_v57, %v1644_v12  ;;  %v2062_v3 = vpop.f32.mrb[37].mxu1 }
 0x2d8   : > { %v2191_v16 = vadd.f32 %v1961_v56, %v10434_v39  ;;  %v10538_v29 = vadd.f32 %v2062_v3, %v1645_v1 }
 0x2da   : > { %v1965_v48 = vpop.f32.mrb[38].mxu0  ;;  %v2066_v25 = vpop.f32.mrb[38].mxu1 }
 0x2db   : > { %v2195_v63 = vadd.f32 %v1965_v48, %v10446_v40  ;;  %v1967_v37 = vpop.f32.mrb[39].mxu0  ;;  %v10541_v18 = vadd.f32 %v2066_v25, %v1649_v50  ;;  %v2068_v20 = vpop.f32.mrb[39].mxu1  ;;  %v1716_v25 = vld [vmem:[#allocation2 + $0x70] sm:$0xff] }
 0x2dc   : > { %v2196_v21 = vadd.f32 %v1967_v37, %v10453_v60  ;;  %v10544_v43 = vadd.f32 %v2068_v20, %v1650_v13 }
 0x2de   : > { %v1971_v28 = vpop.f32.mrb[40].mxu0  ;;  %v2072_v62 = vpop.f32.mrb[40].mxu1 }
 0x2df   : > { %v2200_v12 = vadd.f32 %v1971_v28, %v10463_v34  ;;  %v1973_v39 = vpop.f32.mrb[41].mxu0  ;;  %v10547_v2 = vadd.f32 %v2072_v62, %v1654_v24  ;;  %v2074_v55 = vpop.f32.mrb[41].mxu1 }
 0x2e0   : > { %v2201_v1 = vadd.f32 %v1973_v39, %v10467_v15  ;;  %v10550_v40 = vadd.f32 %v2074_v55, %v1655_v44 }
 0x2e2   : > { %v1977_v17 = vpop.f32.mrb[42].mxu0  ;;  %v2078_v36 = vpop.f32.mrb[42].mxu1 }
 0x2e3   : > { %v2205_v50 = vadd.f32 %v1977_v17, %v10473_v8  ;;  %v1979_v60 = vpop.f32.mrb[43].mxu0  ;;  %v10553_v61 = vadd.f32 %v2078_v36, %v1659_v4  ;;  %v2080_v10 = vpop.f32.mrb[43].mxu1  ;;  %v1721_v17 = vld [vmem:[#allocation2 + $0x98] sm:$0xff] }
 0x2e4   : > { %v2206_v13 = vadd.f32 %v1979_v60, %v10476_v14  ;;  %v10556_v34 = vadd.f32 %v2080_v10, %v1660_v32 }
 0x2e6   : > { %v1983_v35 = vpop.f32.mrb[44].mxu0  ;;  %v2084_v42 = vpop.f32.mrb[44].mxu1 }
 0x2e7   : > { %v2210_v24 = vadd.f32 %v1983_v35, %v10481_v6  ;;  %v1985_v15 = vpop.f32.mrb[45].mxu0  ;;  %v10559_v7 = vadd.f32 %v2084_v42, %v1664_v59  ;;  %v2086_v46 = vpop.f32.mrb[45].mxu1  ;;  %v10571_v59 = vshrl.u32 %v3377_v23, 7 }
 0x2e8   : > { %v2211_v44 = vadd.f32 %v1985_v15, %v10484_v9  ;;  %v10562_v8 = vadd.f32 %v2086_v46, %v1665_v45  ;;  %v1706_v9 = vld [vmem:[#allocation2 + $0x20] sm:$0xff] }
 0x2e9   : > { %v3395_v45 = vsub.s32 4, %v10571_v59  ;;  %v1726_v15 = vld [vmem:[#allocation2 + $0xc0] sm:$0xff] }
 0x2ea   : > { %v1989_v38 = vpop.f32.mrb[46].mxu0  ;;  %v2090_v47 = vpop.f32.mrb[46].mxu1 }
 0x2eb   : > { %v2215_v4 = vadd.f32 %v1989_v38, %v10488_v58  ;;  %v1991_v14 = vpop.f32.mrb[47].mxu0  ;;  %v10565_v19 = vadd.f32 %v2090_v47, %v1669_v11  ;;  %v2092_v54 = vpop.f32.mrb[47].mxu1 }
 0x2ec   : > { %v2216_v32 = vadd.f32 %v1991_v14, %v10491_v51  ;;  %v10568_v6 = vadd.f32 %v2092_v54, %v1670_v53  ;;  %v10579_v51 = vrot.slane %v10574_v33, %v3395_v45  ;;  %v1711_v53 = vld [vmem:[#allocation2 + $0x48] sm:$0xff] }
 0x2fe   : > { %v2161_v30 = vpop.f32.mrb[48].mxu0  ;;  %v2507_v49 = vpop.f32.mrb[48].mxu1 }
 0x2ff   : > { %v2194_v41 = vadd.f32 %v2161_v30, %v1706_v9  ;;  %v2163_v58 = vpop.f32.mrb[49].mxu0  ;;  %v10576_v11 = vadd.f32 %v2507_v49, %v2190_v22  ;;  %v2509_v31 = vpop.f32.mrb[49].mxu1  ;;  %v1731_v9 = vld [vmem:[#allocation2 + $0xe8] sm:$0xff] }
 0x300   : > { %v10582_v26 = vadd.f32 %v2509_v31, %v2191_v16 }
 0x301   : > { %2224 = vst.msk [vmem:[#allocation2 + $0x20] sm:$0xff] %vm1119_vm7, %v2194_v41 }
 0x302   : > { %v2166_v52 = vpop.f32.mrb[50].mxu0  ;;  %v2513_v57 = vpop.f32.mrb[50].mxu1 }
 0x303   : > { %v2199_v0 = vadd.f32 %v2166_v52, %v1711_v53  ;;  %v2168_v56 = vpop.f32.mrb[51].mxu0  ;;  %v10584_v3 = vadd.f32 %v2513_v57, %v2195_v63  ;;  %v2515_v48 = vpop.f32.mrb[51].mxu1 }
 0x304   : > { %v10587_v22 = vadd.f32 %v2515_v48, %v2196_v21 }
 0x305   : > { %2229 = vst.msk [vmem:[#allocation2 + $0x48] sm:$0xff] %vm1119_vm7, %v2199_v0 }
 0x306   : > { %v2171_v37 = vpop.f32.mrb[52].mxu0  ;;  %v2519_v28 = vpop.f32.mrb[52].mxu1 }
 0x307   : > { %v2204_v20 = vadd.f32 %v2171_v37, %v1716_v25  ;;  %v2173_v62 = vpop.f32.mrb[53].mxu0  ;;  %v10589_v39 = vadd.f32 %v2519_v28, %v2200_v12  ;;  %v2521_v16 = vpop.f32.mrb[53].mxu1 }
 0x308   : > { %v10592_v55 = vadd.f32 %v2521_v16, %v2201_v1  ;;  %v2254_v53 = vld [vmem:[#allocation2 + $0x20] sm:$0xff] }
 0x309   : > { %2234 = vst.msk [vmem:[#allocation2 + $0x70] sm:$0xff] %vm1119_vm7, %v2204_v20 }
 0x30a   : > { %v2176_v63 = vpop.f32.mrb[54].mxu0  ;;  %v2525_v60 = vpop.f32.mrb[54].mxu1 }
 0x30b   : > { %v2209_v36 = vadd.f32 %v2176_v63, %v1721_v17  ;;  %v2178_v10 = vpop.f32.mrb[55].mxu0  ;;  %v10594_v35 = vadd.f32 %v2525_v60, %v2205_v50  ;;  %v2527_v21 = vpop.f32.mrb[55].mxu1 }
 0x30c   : > { %v10597_v42 = vadd.f32 %v2527_v21, %v2206_v13 }
 0x30d   : > { %2239 = vst.msk [vmem:[#allocation2 + $0x98] sm:$0xff] %vm1119_vm7, %v2209_v36 }
 0x30e   : > { %v2181_v12 = vpop.f32.mrb[56].mxu0  ;;  %v2531_v38 = vpop.f32.mrb[56].mxu1 }
 0x30f   : > { %v2214_v46 = vadd.f32 %v2181_v12, %v1726_v15  ;;  %v2183_v47 = vpop.f32.mrb[57].mxu0  ;;  %v10599_v14 = vadd.f32 %v2531_v38, %v2210_v24  ;;  %v2533_v1 = vpop.f32.mrb[57].mxu1 }
 0x310   : > { %v10602_v54 = vadd.f32 %v2533_v1, %v2211_v44  ;;  %v2264_v16 = vld [vmem:[#allocation2 + $0x70] sm:$0xff] }
 0x311   : > { %2244 = vst.msk [vmem:[#allocation2 + $0xc0] sm:$0xff] %vm1119_vm7, %v2214_v46 }
 0x312   : > { %v2186_v50 = vpop.f32.mrb[58].mxu0  ;;  %v2537_v45 = vpop.f32.mrb[58].mxu1 }
 0x313   : > { %v2219_v30 = vadd.f32 %v2186_v50, %v1731_v9  ;;  %v2188_v41 = vpop.f32.mrb[59].mxu0  ;;  %v10604_v49 = vadd.f32 %v2537_v45, %v2215_v4  ;;  %v2539_v13 = vpop.f32.mrb[59].mxu1 }
 0x314   : > { %v10607_v58 = vadd.f32 %v2539_v13, %v2216_v32  ;;  %v2259_v32 = vld [vmem:[#allocation2 + $0x48] sm:$0xff]  ;;  %v2269_v21 = vld [vmem:[#allocation2 + $0x98] sm:$0xff] }
 0x315   : > { %2249 = vst.msk [vmem:[#allocation2 + $0xe8] sm:$0xff] %vm1119_vm7, %v2219_v30 }
 0x318   : > { %v2274_v1 = vld [vmem:[#allocation2 + $0xc0] sm:$0xff] }
 0x31c   : > { %v2279_v13 = vld [vmem:[#allocation2 + $0xe8] sm:$0xff] }
 0x326   : > { %v2608_v31 = vpop.f32.mrb[60].mxu0  ;;  %v2709_v52 = vpop.f32.mrb[60].mxu1 }
 0x327   : > { %v10610_v24 = vadd.f32 %v2608_v31, %v10535_v27  ;;  %v2610_v44 = vpop.f32.mrb[61].mxu0  ;;  %v2742_v0 = vadd.f32 %v2709_v52, %v2254_v53  ;;  %v2711_v56 = vpop.f32.mrb[61].mxu1 }
 0x328   : > { %v10613_v57 = vadd.f32 %v2610_v44, %v10538_v29  ;;  %v10658_v56 = vsub.s32 1, %v10571_v59 }
 0x329   : > { %2772 = vst.msk [vmem:[#allocation2 + $0x20] sm:$0xff] %vm1119_vm7, %v2742_v0  ;;  %v10655_v0 = vsub.s32 2, %v10571_v59 }
 0x32a   : > { %v2614_v4 = vpop.f32.mrb[62].mxu0  ;;  %v2714_v25 = vpop.f32.mrb[62].mxu1 }
 0x32b   : > { %v10617_v48 = vadd.f32 %v2614_v4, %v10541_v18  ;;  %v2616_v37 = vpop.f32.mrb[63].mxu0  ;;  %v2747_v20 = vadd.f32 %v2714_v25, %v2259_v32  ;;  %v2716_v28 = vpop.f32.mrb[63].mxu1  ;;  %v4044_v32 = vld [vmem:[#allocation9 + $0x260] sm:$0xff] }
 0x32c   : > { %v10620_v27 = vadd.f32 %v2616_v37, %v10544_v43  ;;  %v10667_v37 = vrot.slane %v10574_v33, %v10655_v0 }
 0x32d   : > { %2777 = vst.msk [vmem:[#allocation2 + $0x48] sm:$0xff] %vm1119_vm7, %v2747_v20 }
 0x32e   : > { %v2620_v62 = vpop.f32.mrb[64].mxu0  ;;  %v2719_v17 = vpop.f32.mrb[64].mxu1 }
 0x32f   : > { %v10624_v29 = vadd.f32 %v2620_v62, %v10547_v2  ;;  %v2622_v63 = vpop.f32.mrb[65].mxu0  ;;  %v2752_v36 = vadd.f32 %v2719_v17, %v2264_v16  ;;  %v2721_v60 = vpop.f32.mrb[65].mxu1  ;;  %v10672_v17 = vrot.slane %v10574_v33, %v10658_v56 }
 0x330   : > { %v10627_v18 = vadd.f32 %v2622_v63, %v10550_v40  ;;  %v4043_v60 = vld [vmem:[#allocation9 + $0x258] sm:$0xff] }
 0x331   : > { %2782 = vst.msk [vmem:[#allocation2 + $0x70] sm:$0xff] %vm1119_vm7, %v2752_v36  ;;  %v4040_v36 = vld [vmem:[#allocation9 + $0x240] sm:$0xff] }
 0x332   : > { %v2626_v10 = vpop.f32.mrb[66].mxu0  ;;  %v2724_v15 = vpop.f32.mrb[66].mxu1 }
 0x333   : > { %v10631_v43 = vadd.f32 %v2626_v10, %v10553_v61  ;;  %v2628_v12 = vpop.f32.mrb[67].mxu0  ;;  %v2757_v46 = vadd.f32 %v2724_v15, %v2269_v21  ;;  %v2726_v38 = vpop.f32.mrb[67].mxu1  ;;  %v4042_v10 = vld [vmem:[#allocation9 + $0x250] sm:$0xff] }
 0x334   : > { %v10634_v2 = vadd.f32 %v2628_v12, %v10556_v34 }
 0x335   : > { %2787 = vst.msk [vmem:[#allocation2 + $0x98] sm:$0xff] %vm1119_vm7, %v2757_v46  ;;  %v4045_v46 = vld [vmem:[#allocation9 + $0x268] sm:$0xff] }
 0x336   : > { %v2632_v47 = vpop.f32.mrb[68].mxu0  ;;  %v2729_v9 = vpop.f32.mrb[68].mxu1 }
 0x337   : > { %v10638_v40 = vadd.f32 %v2632_v47, %v10559_v7  ;;  %v2634_v50 = vpop.f32.mrb[69].mxu0  ;;  %v2762_v30 = vadd.f32 %v2729_v9, %v2274_v1  ;;  %v2731_v45 = vpop.f32.mrb[69].mxu1  ;;  %v7828_v1 = vpack.c.bf16 %v4045_v46, %v4042_v10 }
 0x338   : > { %v10641_v61 = vadd.f32 %v2634_v50, %v10562_v8  ;;  %v10652_v8 = vsub.s32 0, %v10571_v59  ;;  %v4047_v50 = vld [vmem:[#allocation9 + $0x278] sm:$0xff] }
 0x339   : > { %2792 = vst.msk [vmem:[#allocation2 + $0xc0] sm:$0xff] %vm1119_vm7, %v2762_v30  ;;  %v4050_v30 = vld [vmem:[#allocation9 + $0x290] sm:$0xff]  ;;  %7829 = vmatpush1.bf16.msra.mxu0 %v7828_v1 }
 0x33a   : > { %v2638_v41 = vpop.f32.mrb[70].mxu0  ;;  %v2734_v31 = vpop.f32.mrb[70].mxu1  ;;  %v10663_v4 = vrot.slane %v10574_v33, %v10652_v8  ;;  %7830 = vmatprep.subr.bf16.mxu0 %v9321_v5 }
 0x33b   : > { %v10645_v34 = vadd.f32 %v2638_v41, %v10565_v19  ;;  %v2640_v53 = vpop.f32.mrb[71].mxu0  ;;  %v2767_v52 = vadd.f32 %v2734_v31, %v2279_v13  ;;  %v2736_v44 = vpop.f32.mrb[71].mxu1  ;;  %v3391_v19 = vsub.s32 3, %v10571_v59 }
 0x33c   : > { %v10648_v7 = vadd.f32 %v2640_v53, %v10568_v6  ;;  %v4041_v6 = vld [vmem:[#allocation9 + $0x248] sm:$0xff] }
 0x33d   : > { %2797 = vst.msk [vmem:[#allocation2 + $0xe8] sm:$0xff] %vm1119_vm7, %v2767_v52  ;;  %v7779_v20 = vpack.c.bf16 %v4044_v32, %v4041_v6  ;;  %v10677_v63 = vrot.slane %v10574_v33, %v3391_v19  ;;  %v4046_v6 = vld [vmem:[#allocation9 + $0x270] sm:$0xff]  ;;  %v4048_v32 = vld [vmem:[#allocation9 + $0x280] sm:$0xff] }
 0x33f   : > { %7780 = vmatprep.subr.bf16.mxu1 %v7779_v20 }
 0x34e   : > { %v3054_v25 = vpop.f32.mrb[72].mxu0  ;;  %v3155_v62 = vpop.f32.mrb[72].mxu1 }
 0x34f   : > { %v3285_v28 = vadd.f32 %v3054_v25, %v10576_v11  ;;  %v3056_v16 = vpop.f32.mrb[73].mxu0  ;;  %v3287_v21 = vadd.f32 %v3155_v62, %v10610_v24  ;;  %v3157_v12 = vpop.f32.mrb[73].mxu1  ;;  %v7781_v11 = vpack.c.bf16 %v4043_v60, %v4040_v36  ;;  %v4051_v62 = vld [vmem:[#allocation9 + $0x298] sm:$0xff] }
 0x350   : > { %v3286_v15 = vadd.f32 %v3056_v16, %v10582_v26  ;;  %v3288_v38 = vadd.f32 %v3157_v12, %v10613_v57  ;;  %v7783_v57 = vpack.c.bf16 %v4050_v30, %v4047_v50  ;;  %v4056_v12 = vld [vmem:[#allocation9 + $0x2c0] sm:$0xff] }
 0x351   : > { %v10683_v47 = vadd.f32 %v10663_v4, %v3285_v28  ;;  %v3404_v33 = vadd.f32 %v10667_v37, %v3287_v21  ;;  %7782 = vmatpush1.bf16.msra.mxu1 %v7781_v11 }
 0x352   : > { %v3060_v9 = vpop.f32.mrb[74].mxu0  ;;  %v3161_v45 = vpop.f32.mrb[74].mxu1  ;;  %v10688_v41 = vadd.f32 %v10672_v17, %v3286_v15  ;;  %v10691_v13 = vadd.f32 %v10677_v63, %v3288_v38  ;;  %7784 = vmatprep.subr.bf16.mxu1 %v7783_v57  ;;  %v4053_v15 = vld [vmem:[#allocation9 + $0x2a8] sm:$0xff] }
 0x353   : > { %v3290_v24 = vadd.f32 %v3060_v9, %v10584_v3  ;;  %v3062_v26 = vpop.f32.mrb[75].mxu0  ;;  %v3292_v31 = vadd.f32 %v3161_v45, %v10617_v48  ;;  %v3163_v52 = vpop.f32.mrb[75].mxu1  ;;  %v3434_v44 = vmax.f32 %v3404_v33, 0.0  ;;  %v4049_v3 = vld [vmem:[#allocation9 + $0x288] sm:$0xff]  ;;  %v7831_v48 = vpack.c.bf16 %v4051_v62, %v4048_v32 }
 0x354   : > { %v3291_v53 = vadd.f32 %v3062_v26, %v10587_v22  ;;  %v3293_v25 = vadd.f32 %v3163_v52, %v10620_v27  ;;  %v7785_v28 = vpack.c.bf16 %v4049_v3, %v4046_v6  ;;  %v3433_v21 = vmax.f32 %v10688_v41, 0.0  ;;  %v4052_v6 = vld [vmem:[#allocation9 + $0x2a0] sm:$0xff]  ;;  %v4055_v3 = vld [vmem:[#allocation9 + $0x2b8] sm:$0xff]  ;;  %v4057_v62 = vld [vmem:[#allocation9 + $0x2c8] sm:$0xff] }
 0x355   : > { %v10698_v20 = vadd.f32 %v10663_v4, %v3290_v24  ;;  %3476 = vrot.lane.b32.xlu0 %v3434_v44, %s9322_s19  ;;  %v3409_v22 = vadd.f32 %v10667_v37, %v3292_v31  ;;  %7832 = vmatpush1.bf16.msra.mxu0 %v7831_v48  ;;  %v7787_v50 = vpack.c.bf16 %v4056_v12, %v4053_v15  ;;  %v4062_v15 = vld [vmem:[#allocation9 + $0x2f0] sm:$0xff] }
 0x356   : > { %v3066_v16 = vpop.f32.mrb[76].mxu0  ;;  %v3167_v60 = vpop.f32.mrb[76].mxu1  ;;  %v10705_v27 = vadd.f32 %v10677_v63, %v3293_v25  ;;  %7786 = vmatpush1.bf16.msra.mxu1 %v7785_v28  ;;  %v10710_v9 = vadd.f32 %v10672_v17, %v3291_v53  ;;  %7833 = vmatprep.subr.bf16.mxu0 %v9321_v5  ;;  %v7789_v28 = vpack.c.bf16 %v4055_v3, %v4052_v6 }
 0x357   : > { %v3295_v36 = vadd.f32 %v3066_v16, %v10589_v39  ;;  %v3068_v10 = vpop.f32.mrb[77].mxu0  ;;  %v3297_v11 = vadd.f32 %v3167_v60, %v10624_v29  ;;  %v3169_v38 = vpop.f32.mrb[77].mxu1  ;;  %v3439_v1 = vmax.f32 %v3409_v22, 0.0  ;;  %7788 = vmatprep.subr.bf16.mxu1 %v7787_v50  ;;  %v4060_v50 = vld [vmem:[#allocation9 + $0x2e0] sm:$0xff] }
 0x358   : > { %v3296_v46 = vadd.f32 %v3068_v10, %v10592_v55  ;;  %v3298_v39 = vadd.f32 %v3169_v38, %v10627_v18  ;;  %v3438_v44 = vmax.f32 %v10710_v9, 0.0  ;;  %v4059_v10 = vld [vmem:[#allocation9 + $0x2d8] sm:$0xff] }
 0x359   : > { %v10714_v33 = vadd.f32 %v10663_v4, %v3295_v36  ;;  %3480 = vrot.lane.b32.xlu1 %v3439_v1, %s9322_s19  ;;  %3474 = vrot.lane.b32.xlu0 %v3433_v21, %s9322_s19  ;;  %v3414_v55 = vadd.f32 %v10667_v37, %v3297_v11 }
 0x35a   : > { %v3072_v30 = vpop.f32.mrb[78].mxu0  ;;  %v3173_v24 = vpop.f32.mrb[78].mxu1  ;;  %v10724_v18 = vadd.f32 %v10672_v17, %v3296_v46  ;;  %v10727_v26 = vadd.f32 %v10677_v63, %v3298_v39  ;;  %7790 = vmatpush1.bf16.msra.mxu1 %v7789_v28  ;;  %v4061_v39 = vld [vmem:[#allocation9 + $0x2e8] sm:$0xff] }
 0x35b   : > { %v3300_v29 = vadd.f32 %v3072_v30, %v10594_v35  ;;  %v3074_v45 = vpop.f32.mrb[79].mxu0  ;;  %v3302_v57 = vadd.f32 %v3173_v24, %v10631_v43  ;;  %v3175_v53 = vpop.f32.mrb[79].mxu1  ;;  %v3444_v52 = vmax.f32 %v3414_v55, 0.0  ;;  %v4054_v35 = vld [vmem:[#allocation9 + $0x2b0] sm:$0xff]  ;;  %v7791_v55 = vpack.c.bf16 %v4062_v15, %v4059_v10  ;;  %v4063_v24 = vld [vmem:[#allocation9 + $0x2f8] sm:$0xff]  ;;  %v4069_v10 = vld [vmem:[#allocation9 + $0x328] sm:$0xff] }
 0x35c   : > { %v3301_v31 = vadd.f32 %v3074_v45, %v10597_v42  ;;  %v3303_v32 = vadd.f32 %v3175_v53, %v10634_v2  ;;  %v7834_v43 = vpack.c.bf16 %v4057_v62, %v4054_v35  ;;  %v3443_v36 = vmax.f32 %v10724_v18, 0.0  ;;  %v4068_v53 = vld [vmem:[#allocation9 + $0x320] sm:$0xff]  ;;  %v4067_v62 = vld [vmem:[#allocation9 + $0x318] sm:$0xff] }
 0x35d   : > { %v10734_v25 = vadd.f32 %v10663_v4, %v3300_v29  ;;  %3484 = vrot.lane.b32.xlu1 %v3444_v52, %s9322_s19  ;;  %3478 = vrot.lane.b32.xlu0 %v3438_v44, %s9322_s19  ;;  %v3419_v1 = vadd.f32 %v10667_v37, %v3302_v57 }
 0x35e   : > { %v3078_v16 = vpop.f32.mrb[80].mxu0  ;;  %v10741_v42 = vadd.f32 %v10672_v17, %v3301_v31  ;;  %v3179_v48 = vpop.f32.mrb[80].mxu1  ;;  %v10746_v60 = vadd.f32 %v10677_v63, %v3303_v32  ;;  %7835 = vmatpush1.bf16.msra.mxu0 %v7834_v43  ;;  %7792 = vmatprep.subr.bf16.mxu1 %v7791_v55 }
 0x35f   : > { %v3305_v22 = vadd.f32 %v3078_v16, %v10599_v14  ;;  %v3080_v2 = vpop.f32.mrb[81].mxu0  ;;  %v3307_v12 = vadd.f32 %v3179_v48, %v10638_v40  ;;  %v3181_v46 = vpop.f32.mrb[81].mxu1  ;;  %v4058_v14 = vld [vmem:[#allocation9 + $0x2d0] sm:$0xff]  ;;  %7836 = vmatprep.subr.bf16.mxu0 %v9321_v5  ;;  %v3449_v28 = vmax.f32 %v3419_v1, 0.0 }
 0x360   : > { %v3306_v11 = vadd.f32 %v3080_v2, %v10602_v54  ;;  %v3448_v38 = vmax.f32 %v10741_v42, 0.0  ;;  %v3308_v30 = vadd.f32 %v3181_v46, %v10641_v61  ;;  %v7793_v29 = vpack.c.bf16 %v4061_v39, %v4058_v14  ;;  %v4065_v61 = vld [vmem:[#allocation9 + $0x308] sm:$0xff]  ;;  %v4066_v16 = vld [vmem:[#allocation9 + $0x310] sm:$0xff] }
 0x361   : > { %3482 = vrot.lane.b32.xlu1 %v3443_v36, %s9322_s19  ;;  %v7837_v54 = vpack.c.bf16 %v4063_v24, %v4060_v50  ;;  %v10762_v52 = vadd.f32 %v10663_v4, %v3305_v22  ;;  %v7795_v22 = vpack.c.bf16 %v4068_v53, %v4065_v61  ;;  %v7840_v15 = vpack.c.bf16 %v4069_v10, %v4066_v16  ;;  %v4071_v50 = vld [vmem:[#allocation9 + $0x338] sm:$0xff]  ;;  %v4078_v61 = vld [vmem:[#allocation9 + $0x370] sm:$0xff]  ;;  %v4085_v16 = vld [vmem:[#allocation9 + $0x3a8] sm:$0xff] }
 0x362   : > { %v3084_v45 = vpop.f32.mrb[82].mxu0  ;;  %3486 = vrot.lane.b32.xlu0 %v3448_v38, %s9322_s19  ;;  %v3185_v57 = vpop.f32.mrb[82].mxu1  ;;  %v10765_v6 = vadd.f32 %v10677_v63, %v3308_v30  ;;  %7794 = vmatpush1.bf16.msra.mxu1 %v7793_v29  ;;  %v3424_v1 = vadd.f32 %v10667_v37, %v3307_v12  ;;  %v10785_v14 = vadd.f32 %v10672_v17, %v3306_v11  ;;  %v4074_v30 = vld [vmem:[#allocation9 + $0x350] sm:$0xff]  ;;  %v4073_v12 = vld [vmem:[#allocation9 + $0x348] sm:$0xff]  ;;  %v4075_v29 = vld [vmem:[#allocation9 + $0x358] sm:$0xff] }
 0x363   : > { %v3310_v40 = vadd.f32 %v3084_v45, %v10604_v49  ;;  %v3086_v31 = vpop.f32.mrb[83].mxu0  ;;  %v3312_v3 = vadd.f32 %v3185_v57, %v10645_v34  ;;  %v3187_v32 = vpop.f32.mrb[83].mxu1  ;;  %7838 = vmatpush1.bf16.msra.mxu0 %v7837_v54  ;;  %v4064_v49 = vld [vmem:[#allocation9 + $0x300] sm:$0xff]  ;;  %7796 = vmatprep.subr.bf16.mxu1 %v7795_v22  ;;  %v7799_v55 = vpack.c.bf16 %v4074_v30, %v4071_v50  ;;  %v4077_v45 = vld [vmem:[#allocation9 + $0x368] sm:$0xff] }
 0x364   : > { %v3311_v35 = vadd.f32 %v3086_v31, %v10607_v58  ;;  %v3313_v43 = vadd.f32 %v3187_v32, %v10648_v7  ;;  %7839 = vmatprep.subr.bf16.mxu0 %v9321_v5  ;;  %v7797_v2 = vpack.c.bf16 %v4067_v62, %v4064_v49  ;;  %v3453_v39 = vmax.f32 %v10785_v14, 0.0  ;;  %v4080_v54 = vld [vmem:[#allocation9 + $0x380] sm:$0xff]  ;;  %v4079_v31 = vld [vmem:[#allocation9 + $0x378] sm:$0xff]  ;;  %v4082_v62 = vld [vmem:[#allocation9 + $0x390] sm:$0xff] }
 0x365   : > { %v10771_v48 = vadd.f32 %v10663_v4, %v3310_v40  ;;  %3488 = vrot.lane.b32.xlu1 %v3449_v28, %s9322_s19  ;;  %v3429_v58 = vadd.f32 %v10667_v37, %v3312_v3  ;;  %v4070_v37 = vld [vmem:[#allocation9 + $0x330] sm:$0xff]  ;;  %v7803_v40 = vpack.c.bf16 %v4080_v54, %v4077_v45  ;;  %v4076_v57 = vld [vmem:[#allocation9 + $0x360] sm:$0xff]  ;;  %v4081_v3 = vld [vmem:[#allocation9 + $0x388] sm:$0xff]  ;;  %v7809_v10 = vpack.c.bf16 %v4085_v16, %v4082_v62 }
 0x366   : > { %v10777_v34 = vadd.f32 %v10672_v17, %v3311_v35  ;;  %v10780_v46 = vadd.f32 %v10677_v63, %v3313_v43  ;;  %7798 = vmatpush1.bf16.msra.mxu1 %v7797_v2  ;;  %v3454_v63 = vmax.f32 %v3424_v1, 0.0  ;;  %v4072_v17 = vld [vmem:[#allocation9 + $0x340] sm:$0xff]  ;;  %v7801_v11 = vpack.c.bf16 %v4073_v12, %v4070_v37  ;;  %v4083_v32 = vld [vmem:[#allocation9 + $0x398] sm:$0xff]  ;;  %v4086_v28 = vld [vmem:[#allocation9 + $0x3b0] sm:$0xff] }
 0x367   : > { %v3459_v7 = vmax.f32 %v3429_v58, 0.0  ;;  %7841 = vmatpush1.bf16.msra.mxu0 %v7840_v15  ;;  %7800 = vmatprep.subr.bf16.mxu1 %v7799_v55  ;;  %v7843_v24 = vpack.c.bf16 %v4075_v29, %v4072_v17  ;;  %v7805_v53 = vpack.c.bf16 %v4079_v31, %v4076_v57  ;;  %v7846_v35 = vpack.c.bf16 %v4081_v3, %v4078_v61  ;;  %v4084_v43 = vld [vmem:[#allocation9 + $0x3a0] sm:$0xff]  ;;  %v2802_v22 = vld [vmem:[#allocation2 + $0x20] sm:$0xff]  ;;  %v4087_v58 = vld [vmem:[#allocation9 + $0x3b8] sm:$0xff] }
 0x368   : > { %v3458_v4 = vmax.f32 %v10777_v34, 0.0  ;;  %7842 = vmatprep.subr.bf16.mxu0 %v9321_v5  ;;  %v7807_v49 = vpack.c.bf16 %v4086_v28, %v4083_v32  ;;  %v7849_v1 = vpack.c.bf16 %v4087_v58, %v4084_v43  ;;  %v4092_v50 = vld [vmem:[#allocation9 + $0x3e0] sm:$0xff]  ;;  %v4091_v37 = vld [vmem:[#allocation9 + $0x3d8] sm:$0xff]  ;;  %v4090_v12 = vld [vmem:[#allocation9 + $0x3d0] sm:$0xff] }
 0x369   : > { %3496 = vrot.lane.b32.xlu1 %v3459_v7, %s9322_s19  ;;  %v4088_v55 = vld [vmem:[#allocation9 + $0x3c0] sm:$0xff]  ;;  %v2807_v17 = vld [vmem:[#allocation2 + $0x48] sm:$0xff]  ;;  %v4097_v3 = vld [vmem:[#allocation9 + $0x408] sm:$0xff] }
 0x36a   : > { %3494 = vrot.lane.b32.xlu0 %v3458_v4, %s9322_s19  ;;  %7802 = vmatpush1.bf16.msra.mxu1 %v7801_v11  ;;  %v7813_v29 = vpack.c.bf16 %v4091_v37, %v4088_v55  ;;  %v4095_v57 = vld [vmem:[#allocation9 + $0x3f8] sm:$0xff]  ;;  %v4098_v31 = vld [vmem:[#allocation9 + $0x410] sm:$0xff]  ;;  %v4104_v58 = vld [vmem:[#allocation9 + $0x440] sm:$0xff] }
 0x36b   : > { %7844 = vmatpush1.bf16.msra.mxu0 %v7843_v24  ;;  %7804 = vmatprep.subr.bf16.mxu1 %v7803_v40  ;;  %v4093_v24 = vld [vmem:[#allocation9 + $0x3e8] sm:$0xff]  ;;  %v7815_v61 = vpack.c.bf16 %v4098_v31, %v4095_v57  ;;  %v2812_v32 = vld [vmem:[#allocation2 + $0x70] sm:$0xff] }
 0x36c   : > { %7845 = vmatprep.subr.bf16.mxu0 %v9321_v5  ;;  %v7852_v40 = vpack.c.bf16 %v4093_v24, %v4090_v12  ;;  %v4099_v62 = vld [vmem:[#allocation9 + $0x418] sm:$0xff]  ;;  %v4105_v55 = vld [vmem:[#allocation9 + $0x448] sm:$0xff]  ;;  %v4110_v12 = vld [vmem:[#allocation9 + $0x470] sm:$0xff] }
 0x36d   : > { %3492 = vrot.lane.b32.xlu1 %v3454_v63, %s9322_s19  ;;  %v4089_v63 = vld [vmem:[#allocation9 + $0x3c8] sm:$0xff]  ;;  %v4107_v37 = vld [vmem:[#allocation9 + $0x458] sm:$0xff] }
 0x36e   : > { %3490 = vrot.lane.b32.xlu0 %v3453_v39, %s9322_s19  ;;  %7806 = vmatpush1.bf16.msra.mxu1 %v7805_v53  ;;  %v7811_v30 = vpack.c.bf16 %v4092_v50, %v4089_v63  ;;  %v4094_v53 = vld [vmem:[#allocation9 + $0x3f0] sm:$0xff]  ;;  %v7823_v24 = vpack.c.bf16 %v4110_v12, %v4107_v37  ;;  %v4111_v31 = vld [vmem:[#allocation9 + $0x478] sm:$0xff] }
 0x36f   : > { %7847 = vmatpush1.bf16.msra.mxu0 %v7846_v35  ;;  %7808 = vmatprep.subr.bf16.mxu1 %v7807_v49  ;;  %v4096_v35 = vld [vmem:[#allocation9 + $0x400] sm:$0xff]  ;;  %v7817_v49 = vpack.c.bf16 %v4097_v3, %v4094_v53  ;;  %v4102_v63 = vld [vmem:[#allocation9 + $0x430] sm:$0xff] }
 0x370   : > { %7848 = vmatprep.subr.bf16.mxu0 %v9321_v5  ;;  %v2822_v53 = vld [vmem:[#allocation2 + $0xc0] sm:$0xff] }
 0x372   : > { %7810 = vmatpush1.bf16.msra.mxu1 %v7809_v10  ;;  %v4101_v10 = vld [vmem:[#allocation9 + $0x428] sm:$0xff] }
 0x373   : > { %7850 = vmatpush1.bf16.msra.mxu0 %v7849_v1  ;;  %7812 = vmatprep.subr.bf16.mxu1 %v7811_v30  ;;  %v4103_v1 = vld [vmem:[#allocation9 + $0x438] sm:$0xff] }
 0x374   : > { %7851 = vmatprep.subr.bf16.mxu0 %v9321_v5 }
 0x376   : > { %v3256_v2 = vpop.f32.mrb[84].mxu0  ;;  %7814 = vmatpush1.bf16.msra.mxu1 %v7813_v29  ;;  %v7858_v29 = vpack.c.bf16 %v4105_v55, %v4102_v63 }
 0x377   : > { %v3289_v15 = vadd.f32 %v3256_v2, %v2802_v22  ;;  %v3258_v7 = vpop.f32.mrb[85].mxu0  ;;  %7853 = vmatpush1.bf16.msra.mxu0 %v7852_v40  ;;  %7816 = vmatprep.subr.bf16.mxu1 %v7815_v61  ;;  %v7855_v22 = vpack.c.bf16 %v4099_v62, %v4096_v35  ;;  %v2817_v2 = vld [vmem:[#allocation2 + $0x98] sm:$0xff] }
 0x378   : > { %7854 = vmatprep.subr.bf16.mxu0 %v9321_v5  ;;  %v4100_v7 = vld [vmem:[#allocation9 + $0x420] sm:$0xff] }
 0x379   : > { %3319 = vst.msk [vmem:[#allocation2 + $0x20] sm:$0xff] %vm1119_vm7, %v3289_v15  ;;  %v7819_v15 = vpack.c.bf16 %v4104_v58, %v4101_v10  ;;  %v7821_v30 = vpack.c.bf16 %v4103_v1, %v4100_v7  ;;  %v4108_v40 = vld [vmem:[#allocation9 + $0x460] sm:$0xff]  ;;  %v9323_v58 = vmov 1966171168  }
 0x37a   : > { %v3261_v11 = vpop.f32.mrb[86].mxu0  ;;  %7818 = vmatpush1.bf16.msra.mxu1 %v7817_v49  ;;  %v7861_v61 = vpack.c.bf16 %v4111_v31, %v4108_v40  ;;  %v3971_v49 = vld [vmem:[#allocation9 + $0x20] sm:$0xff] }
 0x37b   : > { %v3294_v45 = vadd.f32 %v3261_v11, %v2807_v17  ;;  %v3263_v54 = vpop.f32.mrb[87].mxu0  ;;  %7856 = vmatpush1.bf16.msra.mxu0 %v7855_v22  ;;  %7820 = vmatprep.subr.bf16.mxu1 %v7819_v15  ;;  %v3558_v15 = vunpack.c.l.s4 %v9323_v58 }
 0x37c   : > { %7857 = vmatprep.subr.bf16.mxu0 %v9321_v5  ;;  %v4109_v54 = vld [vmem:[#allocation9 + $0x468] sm:$0xff] }
 0x37d   : > { %3324 = vst.msk [vmem:[#allocation2 + $0x48] sm:$0xff] %vm1119_vm7, %v3294_v45  ;;  %v4106_v45 = vld [vmem:[#allocation9 + $0x450] sm:$0xff]  ;;  %v3559_v63 = vunpack.c.0.s8 %v3558_v15 }
 0x37e   : > { %v3266_v28 = vpop.f32.mrb[88].mxu0  ;;  %7822 = vmatpush1.bf16.msra.mxu1 %v7821_v30  ;;  %v7825_v57 = vpack.c.bf16 %v4109_v54, %v4106_v45  ;;  %v3435_v45 = vmax.f32 %v10691_v13, 0.0  ;;  %v3442_v13 = vmax.f32 %v10714_v33, 0.0 }
 0x37f   : > { %v3299_v16 = vadd.f32 %v3266_v28, %v2812_v32  ;;  %v3268_v43 = vpop.f32.mrb[89].mxu0  ;;  %7859 = vmatpush1.bf16.msra.mxu0 %v7858_v29  ;;  %7824 = vmatprep.subr.bf16.mxu1 %v7823_v24  ;;  %v3968_v28 = vld [vmem:[#allocation9 + $0x8] sm:$0xff]  ;;  %v3432_v24 = vmax.f32 %v10683_v47, 0.0 }
 0x380   : > { %7860 = vmatprep.subr.bf16.mxu0 %v9321_v5  ;;  %v7863_v62 = vpack.c.bf16 %v3971_v49, %v3968_v28  ;;  %v3349_v10 = vld [vmem:[#allocation2 + $0x20] sm:$0xff]  ;;  %v3445_v28 = vmax.f32 %v10727_v26, 0.0 }
 0x381   : > { %3329 = vst.msk [vmem:[#allocation2 + $0x70] sm:$0xff] %vm1119_vm7, %v3299_v16  ;;  %v2827_v16 = vld [vmem:[#allocation2 + $0xe8] sm:$0xff]  ;;  %v3406_v7 = vadd.f32 %v10579_v51, %v3349_v10 }
 0x382   : > { %v3271_v50 = vpop.f32.mrb[90].mxu0  ;;  %7826 = vmatpush1.bf16.msra.mxu1 %v7825_v57 }
 0x383   : > { %v3304_v17 = vadd.f32 %v3271_v50, %v2817_v2  ;;  %v3273_v11 = vpop.f32.mrb[91].mxu0  ;;  %7862 = vmatpush1.bf16.msra.mxu0 %v7861_v61  ;;  %7864 = vmatprep.subr.bf16.mxu1 %v7863_v62  ;;  %v3436_v30 = vmax.f32 %v3406_v7, 0.0  ;;  %v3460_v7 = vmax.f32 %v10780_v46, 0.0 }
 0x384   : > { %7911 = vmatprep.subr.bf16.mxu0 %v9321_v5  ;;  %v3354_v1 = vld [vmem:[#allocation2 + $0x48] sm:$0xff]  ;;  %v10815_v11 = vsub.s32 %v3559_v63, %v10571_v59 }
 0x385   : > { %3334 = vst.msk [vmem:[#allocation2 + $0x98] sm:$0xff] %vm1119_vm7, %v3304_v17  ;;  %v3411_v37 = vadd.f32 %v10579_v51, %v3354_v1 }
 0x386   : > { %v3276_v3 = vpop.f32.mrb[92].mxu0 }
 0x387   : > { %v3309_v35 = vadd.f32 %v3276_v3, %v2822_v53  ;;  %v3278_v32 = vpop.f32.mrb[93].mxu0  ;;  %v3441_v57 = vmax.f32 %v3411_v37, 0.0  ;;  %v3437_v3 = vmax.f32 %v10698_v20, 0.0  ;;  %v3457_v20 = vmax.f32 %v10771_v48, 0.0 }
 0x388   : > { %v3359_v12 = vld [vmem:[#allocation2 + $0x70] sm:$0xff] }
 0x389   : > { %3339 = vst.msk [vmem:[#allocation2 + $0xc0] sm:$0xff] %vm1119_vm7, %v3309_v35  ;;  %v3440_v35 = vmax.f32 %v10705_v27, 0.0 }
 0x38a   : > { %v3281_v43 = vpop.f32.mrb[94].mxu0 }
 0x38b   : > { %v3314_v22 = vadd.f32 %v3281_v43, %v2827_v16  ;;  %v3283_v2 = vpop.f32.mrb[95].mxu0  ;;  %v3450_v16 = vmax.f32 %v10746_v60, 0.0  ;;  %v3447_v43 = vmax.f32 %v10734_v25, 0.0 }
 0x38c   : > { %v3364_v40 = vld [vmem:[#allocation2 + $0x98] sm:$0xff] }
 0x38d   : > { %3344 = vst.msk [vmem:[#allocation2 + $0xe8] sm:$0xff] %vm1119_vm7, %v3314_v22  ;;  %v10828_v49 = vadd.f32 %v10579_v51, %v3364_v40 }
 0x38f   : > { %v3451_v63 = vmax.f32 %v10828_v49, 0.0 }
 0x390   : > { %v3369_v32 = vld [vmem:[#allocation2 + $0xc0] sm:$0xff] }
 0x391   : > { %v10836_v26 = vadd.f32 %v10579_v51, %v3369_v32 }
 0x393   : > { %v3456_v23 = vmax.f32 %v10836_v26, 0.0 }
 0x394   : > { %v3374_v22 = vld [vmem:[#allocation2 + $0xe8] sm:$0xff] }
 0x395   : > { %v10847_v18 = vadd.f32 %v10579_v51, %v3374_v22 }
 0x397   : > { %v3461_v32 = vmax.f32 %v10847_v18, 0.0 }
 0x3c7   : > { %v3477_v50 = vpop.permute.xlu0 %3476 }
 0x3c8   : > { %v3517_v55 = vmax.f32 %v3433_v21, %v3477_v50  ;;  %v3416_v21 = vadd.f32 %v10579_v51, %v3359_v12 }
 0x3ca   : > { %v3529_v17 = vmax.f32 %v3517_v55, %v3436_v30  ;;  %v3446_v2 = vmax.f32 %v3416_v21, 0.0 }
 0x3cb   : > { %v3481_v29 = vpop.permute.xlu1 %3480  ;;  %v3475_v54 = vpop.permute.xlu0 %3474 }
 0x3cc   : > { %v3519_v31 = vmax.f32 %v3438_v44, %v3481_v29  ;;  %v3498_v41 = vsel %vm1119_vm7, %v3475_v54, %v3477_v50  ;;  %v3543_v61 = vrot.slane %v3529_v17, 1 }
 0x3cd   : > { %v3516_v53 = vmax.f32 %v3432_v24, %v3498_v41 }
 0x3ce   : > { %v3531_v47 = vmax.f32 %v3519_v31, %v3441_v57  ;;  %v3547_v10 = vmax.f32 %v3529_v17, %v3543_v61 }
 0x3cf   : > { %v3528_v9 = vmax.f32 %v3516_v53, %v3435_v45  ;;  %v3485_v44 = vpop.permute.xlu1 %3484  ;;  %v3479_v62 = vpop.permute.xlu0 %3478 }
 0x3d0   : > { %v3622_v27 = vrot.slane %v3531_v47, 1  ;;  %v3521_v33 = vmax.f32 %v3443_v36, %v3485_v44  ;;  %v3499_v15 = vsel %vm1119_vm7, %v3479_v62, %v3481_v29  ;;  %v3549_v36 = vrot.slane %v3529_v17, 2 }
 0x3d1   : > { %v3542_v58 = vrot.slane %v3528_v9, 1  ;;  %v3518_v1 = vmax.f32 %v3437_v3, %v3499_v15  ;;  %v3594_v50 = vrot.slane %v3531_v47, 2  ;;  %v3548_v55 = vrot.slane %v3528_v9, 2 }
 0x3d2   : > { %v3533_v60 = vmax.f32 %v3521_v33, %v3446_v2  ;;  %v3626_v12 = vmax.f32 %v3531_v47, %v3622_v27  ;;  %v3553_v45 = vmax.f32 %v3547_v10, %v3549_v36 }
 0x3d3   : > { %v3546_v30 = vmax.f32 %v3528_v9, %v3542_v58  ;;  %v3483_v37 = vpop.permute.xlu1 %3482  ;;  %v3530_v24 = vmax.f32 %v3518_v1, %v3440_v35  ;;  %v3598_v61 = vmax.f32 %v3547_v10, %v3594_v50 }
 0x3d4   : > { %v3673_v29 = vrot.slane %v3533_v60, 1  ;;  %v3679_v40 = vrot.slane %v3533_v60, 2  ;;  %v3500_v57 = vsel %vm1119_vm7, %v3483_v37, %v3485_v44  ;;  %v3628_v49 = vmax.f32 %v3626_v12, %v3594_v50  ;;  %v3487_v22 = vpop.permute.xlu0 %3486 }
 0x3d5   : > { %v3552_v54 = vmax.f32 %v3546_v30, %v3548_v55  ;;  %v3593_v21 = vrot.slane %v3530_v24, 2  ;;  %v3621_v51 = vrot.slane %v3530_v24, 1  ;;  %v3520_v53 = vmax.f32 %v3442_v13, %v3500_v57 }
 0x3d6   : > { %v3677_v31 = vmax.f32 %v3531_v47, %v3673_v29  ;;  %v3708_v41 = vmax.f32 %v3533_v60, %v3673_v29 }
 0x3d7   : > { %v3556_v17 = vcombine.low %v3552_v54, %v3553_v45  ;;  %v3489_v3 = vpop.permute.xlu1 %3488  ;;  %v3597_v35 = vmax.f32 %v3546_v30, %v3593_v21  ;;  %v3625_v62 = vmax.f32 %v3530_v24, %v3621_v51  ;;  %v3532_v2 = vmax.f32 %v3520_v53, %v3445_v28 }
 0x3d8   : > { %v3683_v9 = vmax.f32 %v3677_v31, %v3679_v40  ;;  %v3501_v44 = vsel %vm1119_vm7, %v3487_v22, %v3489_v3  ;;  %v3523_v47 = vmax.f32 %v3448_v38, %v3489_v3  ;;  %v3710_v33 = vmax.f32 %v3708_v41, %v3679_v40 }
 0x3d9   : > { %v3563_v27 = vrot.slane %v3556_v17, %v10815_v11  ;;  %v3601_v10 = vcombine.high %v3597_v35, %v3598_v61  ;;  %v3627_v58 = vmax.f32 %v3625_v62, %v3593_v21  ;;  %v3522_v13 = vmax.f32 %v3447_v43, %v3501_v44 }
 0x3da   : > { %v3672_v1 = vrot.slane %v3532_v2, 1  ;;  %v3678_v18 = vrot.slane %v3532_v2, 2  ;;  %v3535_v12 = vmax.f32 %v3523_v47, %v3451_v63 }
 0x3db   : > { %v3570_v15 = vrot.slane %v3563_v27, %v10815_v11  ;;  %v3578_v60 = vcombine.high %v3563_v27, %v3563_v27  ;;  %v3608_v36 = vrot.slane %v3601_v10, %v10815_v11  ;;  %v3631_v50 = vcombine.low %v3627_v58, %v3628_v49  ;;  %v3497_v28 = vpop.permute.xlu1 %3496 }
 0x3dc   : > { %v3651_v30 = vcombine.high %v3627_v58, %v3628_v49  ;;  %v3534_v55 = vmax.f32 %v3522_v13, %v3450_v16  ;;  %v3676_v38 = vmax.f32 %v3530_v24, %v3672_v1  ;;  %v3707_v37 = vmax.f32 %v3532_v2, %v3672_v1  ;;  %v3495_v24 = vpop.permute.xlu0 %3494 }
 0x3dd   : > { %3576 = vst.msk [vmem:[#allocation3] ss:$8 sm:$0x3] %vm10841_vm8, %v3570_v15  ;;  %v3585_v42 = vrot.slane %v3578_v60, %v10815_v11  ;;  %v3615_v43 = vrot.slane %v3608_v36, %v10815_v11  ;;  %v3638_v29 = vrot.slane %v3631_v50, %v10815_v11  ;;  %v3756_v16 = vrot.slane %v3535_v12, 1 }
 0x3de   : > { %v3658_v45 = vrot.slane %v3651_v30, %v10815_v11  ;;  %v3755_v54 = vrot.slane %v3534_v55, 1  ;;  %v3682_v57 = vmax.f32 %v3676_v38, %v3678_v18  ;;  %v3709_v31 = vmax.f32 %v3707_v37, %v3678_v18 }
 0x3df   : > { %v3586_v40 = vcombine.high %v3585_v42, %v3585_v42  ;;  %v3616_v41 = vcombine.high %v3615_v43, %v3615_v43  ;;  %v3639_v21 = vcombine.high %v3638_v29, %v3638_v29  ;;  %v3760_v3 = vmax.f32 %v3535_v12, %v3756_v16  ;;  %v3493_v27 = vpop.permute.xlu1 %3492 }
 0x3e0   : > { %v3665_v51 = vrot.slane %v3658_v45, %v10815_v11  ;;  %v10865_v61 = vmax.f32 %v3534_v55, %v3755_v54  ;;  %v3686_v63 = vcombine.high %v3682_v57, %v3683_v9  ;;  %v3713_v17 = vcombine.low %v3709_v31, %v3710_v33  ;;  %v3491_v42 = vpop.permute.xlu0 %3490 }
 0x3e1   : > { %3589 = vst.msk [vmem:[#allocation3 + $0x1] ss:$8 sm:$0x3] %vm10841_vm8, %v3586_v40  ;;  %v3733_v53 = vcombine.high %v3709_v31, %v3710_v33  ;;  %3619 = vst.msk [vmem:[#allocation3 + $0x2] ss:$8 sm:$0x3] %vm10841_vm8, %v3616_v41  ;;  %v3646_v49 = vrot.slane %v3639_v21, %v10815_v11  ;;  %v3527_v22 = vmax.f32 %v3458_v4, %v3497_v28 }
 0x3e2   : > { %3668 = vst.msk [vmem:[#allocation3 + $0x4] ss:$8 sm:$0x3] %vm10841_vm8, %v3665_v51  ;;  %v3761_v35 = vrot.slane %v3534_v55, 2  ;;  %v3762_v62 = vrot.slane %v3535_v12, 2  ;;  %v3693_v2 = vrot.slane %v3686_v63, %v10815_v11  ;;  %v3720_v9 = vrot.slane %v3713_v17, %v10815_v11 }
 0x3e3   : > { %v3740_v44 = vrot.slane %v3733_v53, %v10815_v11  ;;  %v3503_v47 = vsel %vm1119_vm7, %v3495_v24, %v3497_v28  ;;  %3649 = vst.msk [vmem:[#allocation3 + $0x3] ss:$8 sm:$0x3] %vm10841_vm8, %v3646_v49  ;;  %v3539_v58 = vmax.f32 %v3527_v22, %v3461_v32  ;;  %v3525_v60 = vmax.f32 %v3453_v39, %v3493_v27 }
 0x3e4   : > { %v3765_v33 = vmax.f32 %v10865_v61, %v3761_v35  ;;  %v3766_v10 = vmax.f32 %v3760_v3, %v3762_v62  ;;  %v3526_v34 = vmax.f32 %v3457_v20, %v3503_v47  ;;  %v3694_v4 = vcombine.high %v3693_v2, %v3693_v2 }
 0x3e5   : > { %v3727_v13 = vrot.slane %v3720_v9, %v10815_v11  ;;  %v3741_v15 = vcombine.high %v3740_v44, %v3740_v44  ;;  %v3883_v18 = vrot.slane %v3539_v58, 1  ;;  %v3537_v48 = vmax.f32 %v3525_v60, %v3456_v23 }
 0x3e6   : > { %v3769_v1 = vcombine.low %v3765_v33, %v3766_v10  ;;  %v3538_v36 = vmax.f32 %v3526_v34, %v3460_v7  ;;  %v3701_v50 = vrot.slane %v3694_v4, %v10815_v11  ;;  %v3889_v46 = vrot.slane %v3539_v58, 2 }
 0x3e7   : > { %v3728_v30 = vcombine.high %v3727_v13, %v3727_v13  ;;  %v3748_v32 = vrot.slane %v3741_v15, %v10815_v11  ;;  %v3918_v55 = vmax.f32 %v3539_v58, %v3883_v18  ;;  %v3452_v39 = vmax.f32 %v10762_v52, 0.0 }
 0x3e8   : > { %v3776_v20 = vrot.slane %v3769_v1, %v10815_v11  ;;  %v3882_v28 = vrot.slane %v3538_v36, 1  ;;  %v3702_v14 = vcombine.high %v3701_v50, %v3701_v50  ;;  %v3888_v26 = vrot.slane %v3538_v36, 2 }
 0x3e9   : > { %3731 = vst.msk [vmem:[#allocation3 + $0x6] ss:$8 sm:$0x3] %vm10841_vm8, %v3728_v30  ;;  %3751 = vst.msk [vmem:[#allocation3 + $0x7] ss:$8 sm:$0x3] %vm10841_vm8, %v3748_v32  ;;  %v3502_v43 = vsel %vm1119_vm7, %v3491_v42, %v3493_v27  ;;  %v3920_v45 = vmax.f32 %v3918_v55, %v3889_v46  ;;  %v3887_v51 = vmax.f32 %v3537_v48, %v3883_v18 }
 0x3ea   : > { %v3783_v7 = vrot.slane %v3776_v20, %v10815_v11  ;;  %v3788_v38 = vcombine.high %v3776_v20, %v3776_v20  ;;  %v3917_v23 = vmax.f32 %v3538_v36, %v3882_v28  ;;  %3705 = vst.msk [vmem:[#allocation3 + $0x5] ss:$8 sm:$0x3] %vm10841_vm8, %v3702_v14  ;;  %v3832_v37 = vrot.slane %v3537_v48, 1  ;;  %v3967_v55 = vld [vmem:[#allocation9] sm:$0xff] }
 0x3eb   : > { %v3455_v12 = vmax.f32 %v10765_v6, 0.0  ;;  %v3524_v54 = vmax.f32 %v3452_v39, %v3502_v43  ;;  %v3804_v40 = vrot.slane %v3537_v48, 2  ;;  %v3893_v9 = vmax.f32 %v3887_v51, %v3889_v46  ;;  %v3969_v46 = vld [vmem:[#allocation9 + $0x10] sm:$0xff]  ;;  %v3972_v39 = vld [vmem:[#allocation9 + $0x28] sm:$0xff] }
 0x3ec   : > { %3786 = vst.msk [vmem:[#allocation3 + $0x10] ss:$8 sm:$0x3] %vm10841_vm8, %v3783_v7  ;;  %v3795_v29 = vrot.slane %v3788_v38, %v10815_v11  ;;  %v3919_v52 = vmax.f32 %v3917_v23, %v3888_v26  ;;  %v3836_v21 = vmax.f32 %v3537_v48, %v3832_v37  ;;  %v3977_v43 = vld [vmem:[#allocation9 + $0x50] sm:$0xff] }
 0x3ed   : > { %v3536_v41 = vmax.f32 %v3524_v54, %v3455_v12  ;;  %v3808_v53 = vmax.f32 %v3760_v3, %v3804_v40  ;;  %v3974_v12 = vld [vmem:[#allocation9 + $0x38] sm:$0xff] }
 0x3ee   : > { %v3796_v57 = vcombine.high %v3795_v29, %v3795_v29  ;;  %v3923_v31 = vcombine.low %v3919_v52, %v3920_v45  ;;  %v3943_v16 = vcombine.high %v3919_v52, %v3920_v45  ;;  %v3838_v2 = vmax.f32 %v3836_v21, %v3804_v40  ;;  %v3973_v45 = vld [vmem:[#allocation9 + $0x30] sm:$0xff]  ;;  %v3978_v21 = vld [vmem:[#allocation9 + $0x58] sm:$0xff] }
 0x3ef   : > { %v3803_v63 = vrot.slane %v3536_v41, 2  ;;  %v3831_v17 = vrot.slane %v3536_v41, 1  ;;  %v3886_v49 = vmax.f32 %v3536_v41, %v3882_v28  ;;  %v3970_v28 = vld [vmem:[#allocation9 + $0x18] sm:$0xff]  ;;  %v7912_v29 = vpack.c.bf16 %v3972_v39, %v3969_v46  ;;  %v3997_v46 = vld [vmem:[#allocation9 + $0xf0] sm:$0xff] }
 0x3f0   : > { %3799 = vst.msk [vmem:[#allocation3 + $0x11] ss:$8 sm:$0x3] %vm10841_vm8, %v3796_v57  ;;  %v3930_v6 = vrot.slane %v3923_v31, %v10815_v11  ;;  %v3950_v24 = vrot.slane %v3943_v16, %v10815_v11  ;;  %v7865_v38 = vpack.c.bf16 %v3970_v28, %v3967_v55  ;;  %v3976_v16 = vld [vmem:[#allocation9 + $0x48] sm:$0xff] }
 0x3f1   : > { %v3807_v22 = vmax.f32 %v10865_v61, %v3803_v63  ;;  %v3835_v27 = vmax.f32 %v3536_v41, %v3831_v17  ;;  %v3892_v44 = vmax.f32 %v3886_v49, %v3888_v26  ;;  %v10935_v42 = vld [vmem:[#allocation3 + $0x8] sm:$0xff]  ;;  %v10937_v14 = vld [vmem:[#allocation3] sm:$0xff]  ;;  %v7869_v49 = vpack.c.bf16 %v3976_v16, %v3973_v45 }
 0x3f2   : > { %v3937_v35 = vrot.slane %v3930_v6, %v10815_v11  ;;  %v3951_v62 = vcombine.high %v3950_v24, %v3950_v24  ;;  %v4119_v26 = vrot.slane %v10935_v42, 1  ;;  %v4116_v25 = vrot.slane %v10937_v14, 1  ;;  %v3975_v41 = vld [vmem:[#allocation9 + $0x40] sm:$0xff]  ;;  %v4010_v16 = vld [vmem:[#allocation9 + $0x158] sm:$0xff] }
 0x3f3   : > { %v3811_v10 = vcombine.high %v3807_v22, %v3808_v53  ;;  %v3837_v58 = vmax.f32 %v3835_v27, %v3803_v63  ;;  %v3896_v34 = vcombine.high %v3892_v44, %v3893_v9  ;;  %v4755_v52 = vrot.slane %v10935_v42, 3  ;;  %v3980_v63 = vld [vmem:[#allocation9 + $0x68] sm:$0xff]  ;;  %v3983_v17 = vld [vmem:[#allocation9 + $0x80] sm:$0xff]  ;;  %v3982_v22 = vld [vmem:[#allocation9 + $0x78] sm:$0xff] }
 0x3f4   : > { %v3938_v47 = vcombine.high %v3937_v35, %v3937_v35  ;;  %v3958_v33 = vrot.slane %v3951_v62, %v10815_v11  ;;  %v4998_v51 = vrot.slane %v10935_v42, 4  ;;  %v7867_v6 = vpack.c.bf16 %v3977_v43, %v3974_v12  ;;  %v3979_v62 = vld [vmem:[#allocation9 + $0x60] sm:$0xff]  ;;  %v3981_v27 = vld [vmem:[#allocation9 + $0x70] sm:$0xff]  ;;  %v3986_v44 = vld [vmem:[#allocation9 + $0x98] sm:$0xff] }
 0x3f5   : > { %v3818_v3 = vrot.slane %v3811_v10, %v10815_v11  ;;  %v3841_v4 = vcombine.low %v3837_v58, %v3838_v2  ;;  %v3861_v61 = vcombine.high %v3837_v58, %v3838_v2  ;;  %v3903_v13 = vrot.slane %v3896_v34, %v10815_v11  ;;  %v3984_v2 = vld [vmem:[#allocation9 + $0x88] sm:$0xff]  ;;  %v3985_v58 = vld [vmem:[#allocation9 + $0x90] sm:$0xff] }
 0x3f6   : > { %3941 = vst.msk [vmem:[#allocation3 + $0x16] ss:$8 sm:$0x3] %vm10841_vm8, %v3938_v47  ;;  %3961 = vst.msk [vmem:[#allocation3 + $0x17] ss:$8 sm:$0x3] %vm10841_vm8, %v3958_v33  ;;  %v7915_v35 = vpack.c.bf16 %v3978_v21, %v3975_v41  ;;  %v7871_v9 = vpack.c.bf16 %v3983_v17, %v3980_v63  ;;  %v7873_v33 = vpack.c.bf16 %v3982_v22, %v3979_v62 }
 0x3f7   : > { %v3825_v15 = vrot.slane %v3818_v3, %v10815_v11  ;;  %v3848_v60 = vrot.slane %v3841_v4, %v10815_v11  ;;  %v3868_v1 = vrot.slane %v3861_v61, %v10815_v11  ;;  %v3904_v18 = vcombine.high %v3903_v13, %v3903_v13  ;;  %v3989_v47 = vld [vmem:[#allocation9 + $0xb0] sm:$0xff]  ;;  %v3988_v3 = vld [vmem:[#allocation9 + $0xa8] sm:$0xff]  ;;  %v3987_v4 = vld [vmem:[#allocation9 + $0xa0] sm:$0xff] }
 0x3f8   : > { %v7918_v10 = vpack.c.bf16 %v3984_v2, %v3981_v27  ;;  %v7875_v34 = vpack.c.bf16 %v3989_v47, %v3986_v44  ;;  %v3990_v61 = vld [vmem:[#allocation9 + $0xb8] sm:$0xff]  ;;  %v3992_v13 = vld [vmem:[#allocation9 + $0xc8] sm:$0xff]  ;;  %v4013_v41 = vld [vmem:[#allocation9 + $0x170] sm:$0xff] }
 0x3f9   : > { %v3826_v36 = vcombine.high %v3825_v15, %v3825_v15  ;;  %v3849_v50 = vcombine.high %v3848_v60, %v3848_v60  ;;  %v3875_v30 = vrot.slane %v3868_v1, %v10815_v11  ;;  %v3911_v32 = vrot.slane %v3904_v18, %v10815_v11  ;;  %v3995_v15 = vld [vmem:[#allocation9 + $0xe0] sm:$0xff]  ;;  %v4012_v17 = vld [vmem:[#allocation9 + $0x168] sm:$0xff]  ;;  %v4018_v47 = vld [vmem:[#allocation9 + $0x198] sm:$0xff] }
 0x3fa   : > { %v7877_v60 = vpack.c.bf16 %v3988_v3, %v3985_v58  ;;  %v7921_v1 = vpack.c.bf16 %v3990_v61, %v3987_v4  ;;  %v3991_v18 = vld [vmem:[#allocation9 + $0xc0] sm:$0xff]  ;;  %v7891_v63 = vpack.c.bf16 %v4013_v41, %v4010_v16  ;;  %v4016_v62 = vld [vmem:[#allocation9 + $0x188] sm:$0xff]  ;;  %v4022_v58 = vld [vmem:[#allocation9 + $0x1b8] sm:$0xff] }
 0x3fb   : > { %3829 = vst.msk [vmem:[#allocation3 + $0x12] ss:$8 sm:$0x3] %vm10841_vm8, %v3826_v36  ;;  %v3856_v48 = vrot.slane %v3849_v50, %v10815_v11  ;;  %3878 = vst.msk [vmem:[#allocation3 + $0x14] ss:$8 sm:$0x3] %vm10841_vm8, %v3875_v30  ;;  %v3912_v20 = vcombine.high %v3911_v32, %v3911_v32  ;;  %v7879_v36 = vpack.c.bf16 %v3995_v15, %v3992_v13 }
 0x3fc   : > { %v3994_v50 = vld [vmem:[#allocation9 + $0xd8] sm:$0xff]  ;;  %v3993_v30 = vld [vmem:[#allocation9 + $0xd0] sm:$0xff]  ;;  %v3996_v32 = vld [vmem:[#allocation9 + $0xe8] sm:$0xff] }
 0x3fd   : > { %3859 = vst.msk [vmem:[#allocation3 + $0x13] ss:$8 sm:$0x3] %vm10841_vm8, %v3856_v48  ;;  %3915 = vst.msk [vmem:[#allocation3 + $0x15] ss:$8 sm:$0x3] %vm10841_vm8, %v3912_v20  ;;  %v7881_v55 = vpack.c.bf16 %v3994_v50, %v3991_v18  ;;  %v7924_v28 = vpack.c.bf16 %v3996_v32, %v3993_v30 }
 0x3fe   : > { %v3998_v48 = vld [vmem:[#allocation9 + $0xf8] sm:$0xff]  ;;  %v4001_v20 = vld [vmem:[#allocation9 + $0x110] sm:$0xff]  ;;  %v4019_v22 = vld [vmem:[#allocation9 + $0x1a0] sm:$0xff] }
 0x3ff   : > { %v7883_v39 = vpack.c.bf16 %v4001_v20, %v3998_v48  ;;  %v7895_v44 = vpack.c.bf16 %v4019_v22, %v4016_v62  ;;  %v4021_v61 = vld [vmem:[#allocation9 + $0x1b0] sm:$0xff]  ;;  %v4024_v15 = vld [vmem:[#allocation9 + $0x1c8] sm:$0xff]  ;;  %v4027_v32 = vld [vmem:[#allocation9 + $0x1e0] sm:$0xff] }
 0x400   : > { %v4028_v18 = vld [vmem:[#allocation9 + $0x1e8] sm:$0xff]  ;;  %v7901_v50 = vpack.c.bf16 %v4024_v15, %v4021_v61  ;;  %v4030_v20 = vld [vmem:[#allocation9 + $0x1f8] sm:$0xff]  ;;  %v4437_v16 = vld [vmem:[#allocation9 + $0x480] sm:$0xff] }
 0x401   : > { %v4440_v41 = vld [vmem:[#allocation9 + $0x498] sm:$0xff]  ;;  %v4446_v22 = vld [vmem:[#allocation9 + $0x4c8] sm:$0xff]  ;;  %v4451_v61 = vld [vmem:[#allocation9 + $0x4f0] sm:$0xff] }
 0x402   : > { %v4456_v15 = vld [vmem:[#allocation9 + $0x518] sm:$0xff] }
 0x404   : > { %v10939_v7 = vld [vmem:[#allocation3 + $0x18] sm:$0xff]  ;;  %v10941_v11 = vld [vmem:[#allocation3 + $0x10] sm:$0xff] }
 0x405   : > { %v4120_v23 = vrot.slane %v10939_v7, 1  ;;  %v4117_v37 = vrot.slane %v10941_v11, 1  ;;  %v10949_v54 = vrot.slane %v10939_v7, 3  ;;  %v10952_v40 = vrot.slane %v10939_v7, 4 }
 0x407   : > { %v4121_v57 = vsel %vm1285_vm4, %v4119_v26, %v4120_v23  ;;  %v4118_v31 = vsel %vm1285_vm4, %v4116_v25, %v4117_v37  ;;  %v10961_v24 = vsel %vm2381_vm6, %v4755_v52, %v10949_v54  ;;  %v10965_v53 = vsel %vm802_vm1, %v4998_v51, %v10952_v40  ;;  %v3999_v26 = vld [vmem:[#allocation9 + $0x100] sm:$0xff]  ;;  %v4004_v25 = vld [vmem:[#allocation9 + $0x128] sm:$0xff]  ;;  %v4006_v52 = vld [vmem:[#allocation9 + $0x138] sm:$0xff] }
 0x408   : > { %7086 = vmatprep.mubr.msk.f32.mxu1 %vm1119_vm7, %v4121_v57  ;;  %7088 = vmatprep.mubr.msk.f32.mxu0 %vm1119_vm7, %v4121_v57  ;;  %v4005_v57 = vld [vmem:[#allocation9 + $0x130] sm:$0xff] }
 0x409   : > { %4193 = vmatmul.mubr.f32.vlgmr.msra.gmra.mrb[84].mxu1 %v4118_v31  ;;  %4270 = vmatmul.mubr.f32.vlgmr.msra.gmra.mrb[96].mxu0 %v4118_v31  ;;  %v4008_v31 = vld [vmem:[#allocation9 + $0x148] sm:$0xff] }
 0x40a   : > { %7866 = vmatpush1.bf16.msra.mxu1 %v7865_v38  ;;  %7913 = vmatpush1.bf16.msra.mxu0 %v7912_v29  ;;  %v4000_v38 = vld [vmem:[#allocation9 + $0x108] sm:$0xff]  ;;  %v4003_v29 = vld [vmem:[#allocation9 + $0x120] sm:$0xff]  ;;  %v7930_v51 = vpack.c.bf16 %v4008_v31, %v4005_v57 }
 0x40b   : > { %7087 = vmatprep.mubr.msk.f32.mxu1 %vm1119_vm7, %v4120_v23  ;;  %7089 = vmatprep.mubr.msk.f32.mxu0 %vm1119_vm7, %v4120_v23  ;;  %v4002_v23 = vld [vmem:[#allocation9 + $0x118] sm:$0xff]  ;;  %v7885_v12 = vpack.c.bf16 %v4000_v38, %v3997_v46  ;;  %v7889_v21 = vpack.c.bf16 %v4006_v52, %v4003_v29  ;;  %v7905_v38 = vpack.c.bf16 %v4030_v20, %v4027_v32  ;;  %v4438_v29 = vld [vmem:[#allocation9 + $0x488] sm:$0xff]  ;;  %v4465_v20 = vld [vmem:[#allocation9 + $0x560] sm:$0xff] }
 0x40c   : > { %7868 = vmatprep.subr.bf16.mxu1 %v7867_v6  ;;  %7914 = vmatprep.subr.bf16.mxu0 %v9321_v5  ;;  %v7927_v43 = vpack.c.bf16 %v4002_v23, %v3999_v26  ;;  %v4009_v6 = vld [vmem:[#allocation9 + $0x150] sm:$0xff]  ;;  %v4034_v46 = vld [vmem:[#allocation9 + $0x218] sm:$0xff] }
 0x40d   : > { %4199 = vmatmul.mubr.f32.gmra.mrb[86].mxu1 %v4117_v37  ;;  %4275 = vmatmul.mubr.f32.gmra.mrb[98].mxu0 %v4117_v37  ;;  %v4007_v37 = vld [vmem:[#allocation9 + $0x140] sm:$0xff]  ;;  %v7893_v27 = vpack.c.bf16 %v4012_v17, %v4009_v6  ;;  %v4033_v23 = vld [vmem:[#allocation9 + $0x210] sm:$0xff]  ;;  %v4444_v6 = vld [vmem:[#allocation9 + $0x4b8] sm:$0xff]  ;;  %v7949_v17 = vpack.c.bf16 %v4440_v41, %v4437_v16 }
 0x40e   : > { %7870 = vmatpush1.bf16.msra.mxu1 %v7869_v49  ;;  %7916 = vmatpush1.bf16.msra.mxu0 %v7915_v35  ;;  %v7887_v45 = vpack.c.bf16 %v4007_v37, %v4004_v25  ;;  %v4011_v49 = vld [vmem:[#allocation9 + $0x160] sm:$0xff]  ;;  %v4014_v35 = vld [vmem:[#allocation9 + $0x178] sm:$0xff]  ;;  %v4036_v37 = vld [vmem:[#allocation9 + $0x228] sm:$0xff] }
 0x40f   : > { %7090 = vmatprep.mubr.msk.f32.mxu1 %vm1119_vm7, %v10935_v42  ;;  %7092 = vmatprep.mubr.msk.f32.mxu0 %vm1119_vm7, %v10935_v42  ;;  %v7933_v2 = vpack.c.bf16 %v4014_v35, %v4011_v49  ;;  %v7909_v52 = vpack.c.bf16 %v4036_v37, %v4033_v23  ;;  %v4443_v35 = vld [vmem:[#allocation9 + $0x4b0] sm:$0xff]  ;;  %v4460_v32 = vld [vmem:[#allocation9 + $0x538] sm:$0xff]  ;;  %v4466_v23 = vld [vmem:[#allocation9 + $0x568] sm:$0xff] }
 0x410   : > { %7872 = vmatprep.subr.bf16.mxu1 %v7871_v9  ;;  %7917 = vmatprep.subr.bf16.mxu0 %v9321_v5  ;;  %v4015_v9 = vld [vmem:[#allocation9 + $0x180] sm:$0xff]  ;;  %v4471_v37 = vld [vmem:[#allocation9 + $0x590] sm:$0xff]  ;;  %v4474_v16 = vld [vmem:[#allocation9 + $0x5a8] sm:$0xff] }
 0x411   : > { %v7897_v3 = vpack.c.bf16 %v4018_v47, %v4015_v9  ;;  %v10988_v9 = vrot.slane %v10939_v7, 2  ;;  %v4453_v47 = vld [vmem:[#allocation9 + $0x500] sm:$0xff] }
 0x412   : > { %7874 = vmatpush1.bf16.msra.mxu1 %v7873_v33  ;;  %7919 = vmatpush1.bf16.msra.mxu0 %v7918_v10  ;;  %v4017_v33 = vld [vmem:[#allocation9 + $0x190] sm:$0xff]  ;;  %v4020_v10 = vld [vmem:[#allocation9 + $0x1a8] sm:$0xff]  ;;  %v4477_v41 = vld [vmem:[#allocation9 + $0x5c0] sm:$0xff] }
 0x413   : > { %7876 = vmatprep.subr.bf16.mxu1 %v7875_v34  ;;  %7920 = vmatprep.subr.bf16.mxu0 %v9321_v5  ;;  %v4025_v34 = vld [vmem:[#allocation9 + $0x1d0] sm:$0xff]  ;;  %v7936_v4 = vpack.c.bf16 %v4020_v10, %v4017_v33  ;;  %v7953_v33 = vpack.c.bf16 %v4446_v22, %v4443_v35  ;;  %v4512_v10 = vrot.slane %v10935_v42, 2  ;;  %v4478_v35 = vld [vmem:[#allocation9 + $0x5c8] sm:$0xff] }
 0x414   : > { %v7899_v13 = vpack.c.bf16 %v4025_v34, %v4022_v58  ;;  %v4449_v34 = vld [vmem:[#allocation9 + $0x4e0] sm:$0xff]  ;;  %v4483_v22 = vld [vmem:[#allocation9 + $0x5f0] sm:$0xff] }
 0x416   : > { %7878 = vmatpush1.bf16.msra.mxu1 %v7877_v60  ;;  %7922 = vmatpush1.bf16.msra.mxu0 %v7921_v1  ;;  %v4023_v60 = vld [vmem:[#allocation9 + $0x1c0] sm:$0xff]  ;;  %v4026_v1 = vld [vmem:[#allocation9 + $0x1d8] sm:$0xff] }
 0x417   : > { %7880 = vmatprep.subr.bf16.mxu1 %v7879_v36  ;;  %7923 = vmatprep.subr.bf16.mxu0 %v9321_v5  ;;  %v4031_v36 = vld [vmem:[#allocation9 + $0x200] sm:$0xff]  ;;  %v7939_v30 = vpack.c.bf16 %v4026_v1, %v4023_v60  ;;  %v4459_v60 = vld [vmem:[#allocation9 + $0x530] sm:$0xff] }
 0x418   : > { %v7903_v48 = vpack.c.bf16 %v4031_v36, %v4028_v18  ;;  %v4455_v18 = vld [vmem:[#allocation9 + $0x510] sm:$0xff]  ;;  %v7959_v36 = vpack.c.bf16 %v4459_v60, %v4456_v15  ;;  %v4488_v15 = vld [vmem:[#allocation9 + $0x618] sm:$0xff] }
 0x419   : > { %v4487_v60 = vld [vmem:[#allocation9 + $0x610] sm:$0xff] }
 0x41a   : > { %7882 = vmatpush1.bf16.msra.mxu1 %v7881_v55  ;;  %7925 = vmatpush1.bf16.msra.mxu0 %v7924_v28  ;;  %v4029_v55 = vld [vmem:[#allocation9 + $0x1f0] sm:$0xff]  ;;  %v4032_v28 = vld [vmem:[#allocation9 + $0x208] sm:$0xff] }
 0x41b   : > { %7884 = vmatprep.subr.bf16.mxu1 %v7883_v39  ;;  %7926 = vmatprep.subr.bf16.mxu0 %v9321_v5  ;;  %v4037_v39 = vld [vmem:[#allocation9 + $0x230] sm:$0xff]  ;;  %v7942_v26 = vpack.c.bf16 %v4032_v28, %v4029_v55 }
 0x41c   : > { %v7907_v25 = vpack.c.bf16 %v4037_v39, %v4034_v46  ;;  %v4461_v46 = vld [vmem:[#allocation9 + $0x540] sm:$0xff] }
 0x41e   : > { %7886 = vmatpush1.bf16.msra.mxu1 %v7885_v12  ;;  %7928 = vmatpush1.bf16.msra.mxu0 %v7927_v43  ;;  %v4035_v12 = vld [vmem:[#allocation9 + $0x220] sm:$0xff]  ;;  %v4038_v43 = vld [vmem:[#allocation9 + $0x238] sm:$0xff] }
 0x41f   : > { %7888 = vmatprep.subr.bf16.mxu1 %v7887_v45  ;;  %7929 = vmatprep.subr.bf16.mxu0 %v9321_v5  ;;  %v4441_v45 = vld [vmem:[#allocation9 + $0x4a0] sm:$0xff]  ;;  %v7945_v57 = vpack.c.bf16 %v4038_v43, %v4035_v12 }
 0x420   : > { %v7947_v31 = vpack.c.bf16 %v4441_v45, %v4438_v29  ;;  %v4467_v29 = vld [vmem:[#allocation9 + $0x570] sm:$0xff] }
 0x422   : > { %7890 = vmatpush1.bf16.msra.mxu1 %v7889_v21  ;;  %7931 = vmatpush1.bf16.msra.mxu0 %v7930_v51  ;;  %v4439_v21 = vld [vmem:[#allocation9 + $0x490] sm:$0xff]  ;;  %v4442_v51 = vld [vmem:[#allocation9 + $0x4a8] sm:$0xff] }
 0x423   : > { %7892 = vmatprep.subr.bf16.mxu1 %v7891_v63  ;;  %7932 = vmatprep.subr.bf16.mxu0 %v9321_v5  ;;  %v4447_v63 = vld [vmem:[#allocation9 + $0x4d0] sm:$0xff]  ;;  %v7996_v49 = vpack.c.bf16 %v4442_v51, %v4439_v21 }
 0x424   : > { %v7951_v62 = vpack.c.bf16 %v4447_v63, %v4444_v6  ;;  %v4473_v6 = vld [vmem:[#allocation9 + $0x5a0] sm:$0xff]  ;;  %v7971_v63 = vpack.c.bf16 %v4477_v41, %v4474_v16  ;;  %v4506_v16 = vld [vmem:[#allocation9 + $0x6a8] sm:$0xff] }
 0x425   : > { %v4505_v41 = vld [vmem:[#allocation9 + $0x6a0] sm:$0xff] }
 0x426   : > { %7894 = vmatpush1.bf16.msra.mxu1 %v7893_v27  ;;  %7934 = vmatpush1.bf16.msra.mxu0 %v7933_v2  ;;  %v4445_v27 = vld [vmem:[#allocation9 + $0x4c0] sm:$0xff]  ;;  %v4448_v2 = vld [vmem:[#allocation9 + $0x4d8] sm:$0xff] }
 0x427   : > { %7896 = vmatprep.subr.bf16.mxu1 %v7895_v44  ;;  %7935 = vmatprep.subr.bf16.mxu0 %v9321_v5  ;;  %v4450_v44 = vld [vmem:[#allocation9 + $0x4e8] sm:$0xff]  ;;  %v7999_v58 = vpack.c.bf16 %v4448_v2, %v4445_v27 }
 0x42a   : > { %7898 = vmatpush1.bf16.msra.mxu1 %v7897_v3  ;;  %7937 = vmatpush1.bf16.msra.mxu0 %v7936_v4  ;;  %v7955_v3 = vpack.c.bf16 %v4453_v47, %v4450_v44  ;;  %v4452_v4 = vld [vmem:[#allocation9 + $0x4f8] sm:$0xff]  ;;  %v4479_v44 = vld [vmem:[#allocation9 + $0x5d0] sm:$0xff] }
 0x42b   : > { %7900 = vmatprep.subr.bf16.mxu1 %v7899_v13  ;;  %7938 = vmatprep.subr.bf16.mxu0 %v9321_v5  ;;  %v4454_v13 = vld [vmem:[#allocation9 + $0x508] sm:$0xff]  ;;  %v7957_v42 = vpack.c.bf16 %v4452_v4, %v4449_v34 }
 0x42c   : > { %v8002_v1 = vpack.c.bf16 %v4454_v13, %v4451_v61  ;;  %v4486_v34 = vld [vmem:[#allocation9 + $0x608] sm:$0xff]  ;;  %v4485_v13 = vld [vmem:[#allocation9 + $0x600] sm:$0xff] }
 0x42e   : > { %7902 = vmatpush1.bf16.msra.mxu1 %v7901_v50  ;;  %7940 = vmatpush1.bf16.msra.mxu0 %v7939_v30  ;;  %v4458_v50 = vld [vmem:[#allocation9 + $0x528] sm:$0xff]  ;;  %v4457_v30 = vld [vmem:[#allocation9 + $0x520] sm:$0xff] }
 0x42f   : > { %7904 = vmatprep.subr.bf16.mxu1 %v7903_v48  ;;  %7941 = vmatprep.subr.bf16.mxu0 %v9321_v5  ;;  %v4462_v48 = vld [vmem:[#allocation9 + $0x548] sm:$0xff]  ;;  %v7961_v55 = vpack.c.bf16 %v4458_v50, %v4455_v18  ;;  %v8005_v28 = vpack.c.bf16 %v4460_v32, %v4457_v30  ;;  %v4495_v18 = vld [vmem:[#allocation9 + $0x650] sm:$0xff] }
 0x430   : > { %v7963_v39 = vpack.c.bf16 %v4465_v20, %v4462_v48  ;;  %v4491_v30 = vld [vmem:[#allocation9 + $0x630] sm:$0xff]  ;;  %v4494_v48 = vld [vmem:[#allocation9 + $0x648] sm:$0xff]  ;;  %v4493_v20 = vld [vmem:[#allocation9 + $0x640] sm:$0xff] }
 0x432   : > { %7906 = vmatpush1.bf16.msra.mxu1 %v7905_v38  ;;  %7943 = vmatpush1.bf16.msra.mxu0 %v7942_v26  ;;  %v4464_v38 = vld [vmem:[#allocation9 + $0x558] sm:$0xff]  ;;  %v4463_v26 = vld [vmem:[#allocation9 + $0x550] sm:$0xff] }
 0x433   : > { %7908 = vmatprep.subr.bf16.mxu1 %v7907_v25  ;;  %7944 = vmatprep.subr.bf16.mxu0 %v9321_v5  ;;  %v4468_v25 = vld [vmem:[#allocation9 + $0x578] sm:$0xff]  ;;  %v7965_v12 = vpack.c.bf16 %v4464_v38, %v4461_v46  ;;  %v8008_v43 = vpack.c.bf16 %v4466_v23, %v4463_v26  ;;  %v4501_v46 = vld [vmem:[#allocation9 + $0x680] sm:$0xff] }
 0x434   : > { %v7967_v45 = vpack.c.bf16 %v4471_v37, %v4468_v25  ;;  %v4497_v26 = vld [vmem:[#allocation9 + $0x660] sm:$0xff]  ;;  %v4500_v25 = vld [vmem:[#allocation9 + $0x678] sm:$0xff]  ;;  %v4499_v37 = vld [vmem:[#allocation9 + $0x670] sm:$0xff] }
 0x436   : > { %7910 = vmatpush1.bf16.msra.mxu1 %v7909_v52  ;;  %7946 = vmatpush1.bf16.msra.mxu0 %v7945_v57  ;;  %v4470_v52 = vld [vmem:[#allocation9 + $0x588] sm:$0xff]  ;;  %v4469_v57 = vld [vmem:[#allocation9 + $0x580] sm:$0xff] }
 0x437   : > { %7948 = vmatprep.subr.bf16.mxu1 %v7947_v31  ;;  %7995 = vmatprep.subr.bf16.mxu0 %v9321_v5  ;;  %v4472_v31 = vld [vmem:[#allocation9 + $0x598] sm:$0xff]  ;;  %v7969_v21 = vpack.c.bf16 %v4470_v52, %v4467_v29  ;;  %v4507_v29 = vld [vmem:[#allocation9 + $0x6b0] sm:$0xff] }
 0x438   : > { %v8011_v51 = vpack.c.bf16 %v4472_v31, %v4469_v57  ;;  %v4503_v57 = vld [vmem:[#allocation9 + $0x690] sm:$0xff] }
 0x439   : > { %4349 = vmatmul.mubr.f32.vlgmr.msra.gmra.mrb[84].mxu1 %v10937_v14  ;;  %4426 = vmatmul.mubr.f32.vlgmr.msra.gmra.mrb[100].mxu0 %v10937_v14 }
 0x43a   : > { %7091 = vmatprep.mubr.msk.f32.mxu1 %vm1119_vm7, %v10939_v7  ;;  %7093 = vmatprep.mubr.msk.f32.mxu0 %vm1119_vm7, %v10939_v7  ;;  %v4514_v7 = vsel %vm1833_vm5, %v4512_v10, %v10988_v9  ;;  %v4481_v10 = vld [vmem:[#allocation9 + $0x5e0] sm:$0xff] }
 0x43b   : > { %7950 = vmatpush1.bf16.msra.mxu1 %v7949_v17  ;;  %7997 = vmatpush1.bf16.msra.mxu0 %v7996_v49  ;;  %v4476_v17 = vld [vmem:[#allocation9 + $0x5b8] sm:$0xff]  ;;  %v4475_v49 = vld [vmem:[#allocation9 + $0x5b0] sm:$0xff] }
 0x43c   : > { %7952 = vmatprep.subr.bf16.mxu1 %v7951_v62  ;;  %7998 = vmatprep.subr.bf16.mxu0 %v9321_v5  ;;  %v4480_v62 = vld [vmem:[#allocation9 + $0x5d8] sm:$0xff]  ;;  %v7973_v27 = vpack.c.bf16 %v4476_v17, %v4473_v6  ;;  %v8014_v2 = vpack.c.bf16 %v4478_v35, %v4475_v49  ;;  %v4684_v6 = vld [vmem:[#allocation9 + $0x6e0] sm:$0xff] }
 0x43d   : > { %4355 = vmatmul.mubr.f32.gmra.mrb[86].mxu1 %v10941_v11  ;;  %4431 = vmatmul.mubr.f32.gmra.mrb[102].mxu0 %v10941_v11  ;;  %v7975_v47 = vpack.c.bf16 %v4483_v22, %v4480_v62  ;;  %v4680_v35 = vld [vmem:[#allocation9 + $0x6c0] sm:$0xff]  ;;  %v4510_v62 = vrot.slane %v10941_v11, 2  ;;  %v4683_v22 = vld [vmem:[#allocation9 + $0x6d8] sm:$0xff] }
 0x43e   : > { %7094 = vmatprep.mubr.msk.f32.mxu1 %vm1119_vm7, %v4514_v7  ;;  %7096 = vmatprep.mubr.msk.f32.mxu0 %vm1119_vm7, %v4514_v7 }
 0x43f   : > { %7954 = vmatpush1.bf16.msra.mxu1 %v7953_v33  ;;  %8000 = vmatpush1.bf16.msra.mxu0 %v7999_v58  ;;  %v4482_v33 = vld [vmem:[#allocation9 + $0x5e8] sm:$0xff]  ;;  %v4484_v58 = vld [vmem:[#allocation9 + $0x5f8] sm:$0xff] }
 0x440   : > { %7956 = vmatprep.subr.bf16.mxu1 %v7955_v3  ;;  %8001 = vmatprep.subr.bf16.mxu0 %v9321_v5  ;;  %v4489_v3 = vld [vmem:[#allocation9 + $0x620] sm:$0xff]  ;;  %v7977_v4 = vpack.c.bf16 %v4482_v33, %v4479_v44  ;;  %v8017_v61 = vpack.c.bf16 %v4484_v58, %v4481_v10  ;;  %v4687_v44 = vld [vmem:[#allocation9 + $0x6f8] sm:$0xff]  ;;  %v4509_v33 = vrot.slane %v10937_v14, 2  ;;  %v8033_v10 = vpack.c.bf16 %v4683_v22, %v4680_v35 }
 0x441   : > { %v7979_v7 = vpack.c.bf16 %v4489_v3, %v4486_v34  ;;  %v4686_v34 = vld [vmem:[#allocation9 + $0x6f0] sm:$0xff]  ;;  %v4716_v22 = vld [vmem:[#allocation9 + $0x7e0] sm:$0xff] }
 0x442   : > { %v4511_v3 = vsel %vm1833_vm5, %v4509_v33, %v4510_v62  ;;  %v4723_v33 = vld [vmem:[#allocation9 + $0x818] sm:$0xff] }
 0x443   : > { %7958 = vmatpush1.bf16.msra.mxu1 %v7957_v42  ;;  %8003 = vmatpush1.bf16.msra.mxu0 %v8002_v1  ;;  %v4490_v42 = vld [vmem:[#allocation9 + $0x628] sm:$0xff]  ;;  %v4492_v1 = vld [vmem:[#allocation9 + $0x638] sm:$0xff] }
 0x444   : > { %7960 = vmatprep.subr.bf16.mxu1 %v7959_v36  ;;  %8004 = vmatprep.subr.bf16.mxu0 %v9321_v5  ;;  %v7981_v36 = vpack.c.bf16 %v4488_v15, %v4485_v13  ;;  %v8020_v50 = vpack.c.bf16 %v4490_v42, %v4487_v60  ;;  %v7983_v32 = vpack.c.bf16 %v4495_v18, %v4492_v1  ;;  %v4688_v13 = vld [vmem:[#allocation9 + $0x700] sm:$0xff]  ;;  %v4693_v15 = vld [vmem:[#allocation9 + $0x728] sm:$0xff] }
 0x445   : > { %v4696_v60 = vld [vmem:[#allocation9 + $0x740] sm:$0xff] }
 0x446   : > { %v4692_v1 = vld [vmem:[#allocation9 + $0x720] sm:$0xff]  ;;  %v8039_v18 = vpack.c.bf16 %v4696_v60, %v4693_v15  ;;  %v4729_v15 = vld [vmem:[#allocation9 + $0x848] sm:$0xff] }
 0x447   : > { %7962 = vmatpush1.bf16.msra.mxu1 %v7961_v55  ;;  %8006 = vmatpush1.bf16.msra.mxu0 %v8005_v28  ;;  %v4496_v55 = vld [vmem:[#allocation9 + $0x658] sm:$0xff]  ;;  %v4498_v28 = vld [vmem:[#allocation9 + $0x668] sm:$0xff]  ;;  %v4732_v60 = vld [vmem:[#allocation9 + $0x860] sm:$0xff] }
 0x448   : > { %7964 = vmatprep.subr.bf16.mxu1 %v7963_v39  ;;  %8007 = vmatprep.subr.bf16.mxu0 %v9321_v5  ;;  %v7985_v39 = vpack.c.bf16 %v4494_v48, %v4491_v30  ;;  %v8023_v38 = vpack.c.bf16 %v4496_v55, %v4493_v20  ;;  %v7987_v23 = vpack.c.bf16 %v4501_v46, %v4498_v28  ;;  %v4697_v30 = vld [vmem:[#allocation9 + $0x748] sm:$0xff]  ;;  %v4702_v48 = vld [vmem:[#allocation9 + $0x770] sm:$0xff] }
 0x449   : > { %v4698_v55 = vld [vmem:[#allocation9 + $0x750] sm:$0xff]  ;;  %v4701_v46 = vld [vmem:[#allocation9 + $0x768] sm:$0xff] }
 0x44b   : > { %7966 = vmatpush1.bf16.msra.mxu1 %v7965_v12  ;;  %8009 = vmatpush1.bf16.msra.mxu0 %v8008_v43  ;;  %v4502_v12 = vld [vmem:[#allocation9 + $0x688] sm:$0xff]  ;;  %v4504_v43 = vld [vmem:[#allocation9 + $0x698] sm:$0xff] }
 0x44c   : > { %7968 = vmatprep.subr.bf16.mxu1 %v7967_v45  ;;  %8010 = vmatprep.subr.bf16.mxu0 %v9321_v5  ;;  %v7989_v45 = vpack.c.bf16 %v4500_v25, %v4497_v26  ;;  %v8026_v52 = vpack.c.bf16 %v4502_v12, %v4499_v37  ;;  %v7991_v31 = vpack.c.bf16 %v4507_v29, %v4504_v43  ;;  %v4705_v26 = vld [vmem:[#allocation9 + $0x788] sm:$0xff]  ;;  %v4704_v12 = vld [vmem:[#allocation9 + $0x780] sm:$0xff]  ;;  %v4707_v43 = vld [vmem:[#allocation9 + $0x798] sm:$0xff] }
 0x44d   : > { %v8045_v25 = vpack.c.bf16 %v4701_v46, %v4698_v55  ;;  %v4706_v29 = vld [vmem:[#allocation9 + $0x790] sm:$0xff]  ;;  %v4737_v46 = vld [vmem:[#allocation9 + $0x888] sm:$0xff] }
 0x44e   : > { %v4734_v55 = vld [vmem:[#allocation9 + $0x870] sm:$0xff] }
 0x44f   : > { %7970 = vmatpush1.bf16.msra.mxu1 %v7969_v21  ;;  %8012 = vmatpush1.bf16.msra.mxu0 %v8011_v51  ;;  %v4508_v21 = vld [vmem:[#allocation9 + $0x6b8] sm:$0xff]  ;;  %v4681_v51 = vld [vmem:[#allocation9 + $0x6c8] sm:$0xff] }
 0x450   : > { %7972 = vmatprep.subr.bf16.mxu1 %v7971_v63  ;;  %8013 = vmatprep.subr.bf16.mxu0 %v9321_v5  ;;  %v7993_v63 = vpack.c.bf16 %v4506_v16, %v4503_v57  ;;  %v8029_v17 = vpack.c.bf16 %v4508_v21, %v4505_v41  ;;  %v8031_v49 = vpack.c.bf16 %v4684_v6, %v4681_v51  ;;  %v4714_v57 = vld [vmem:[#allocation9 + $0x7d0] sm:$0xff]  ;;  %v4713_v51 = vld [vmem:[#allocation9 + $0x7c8] sm:$0xff]  ;;  %v4712_v6 = vld [vmem:[#allocation9 + $0x7c0] sm:$0xff] }
 0x451   : > { %v4710_v41 = vld [vmem:[#allocation9 + $0x7b0] sm:$0xff] }
 0x452   : > { %v8053_v35 = vpack.c.bf16 %v4713_v51, %v4710_v41  ;;  %v4746_v41 = vld [vmem:[#allocation9 + $0x8d0] sm:$0xff]  ;;  %v4749_v51 = vld [vmem:[#allocation9 + $0x8e8] sm:$0xff] }
 0x453   : > { %7974 = vmatpush1.bf16.msra.mxu1 %v7973_v27  ;;  %8015 = vmatpush1.bf16.msra.mxu0 %v8014_v2  ;;  %v4682_v27 = vld [vmem:[#allocation9 + $0x6d0] sm:$0xff]  ;;  %v4685_v2 = vld [vmem:[#allocation9 + $0x6e8] sm:$0xff] }
 0x454   : > { %7976 = vmatprep.subr.bf16.mxu1 %v7975_v47  ;;  %8016 = vmatprep.subr.bf16.mxu0 %v9321_v5  ;;  %v4690_v47 = vld [vmem:[#allocation9 + $0x710] sm:$0xff]  ;;  %v8080_v58 = vpack.c.bf16 %v4685_v2, %v4682_v27  ;;  %v4719_v2 = vld [vmem:[#allocation9 + $0x7f8] sm:$0xff] }
 0x457   : > { %7978 = vmatpush1.bf16.msra.mxu1 %v7977_v4  ;;  %8018 = vmatpush1.bf16.msra.mxu0 %v8017_v61  ;;  %v8035_v4 = vpack.c.bf16 %v4690_v47, %v4687_v44  ;;  %v4689_v61 = vld [vmem:[#allocation9 + $0x708] sm:$0xff]  ;;  %v4718_v44 = vld [vmem:[#allocation9 + $0x7f0] sm:$0xff] }
 0x458   : > { %7980 = vmatprep.subr.bf16.mxu1 %v7979_v7  ;;  %8019 = vmatprep.subr.bf16.mxu0 %v9321_v5  ;;  %v4691_v7 = vld [vmem:[#allocation9 + $0x718] sm:$0xff]  ;;  %v8037_v14 = vpack.c.bf16 %v4689_v61, %v4686_v34  ;;  %v4721_v47 = vld [vmem:[#allocation9 + $0x808] sm:$0xff] }
 0x459   : > { %v8083_v42 = vpack.c.bf16 %v4691_v7, %v4688_v13  ;;  %v8098_v34 = vpack.c.bf16 %v4721_v47, %v4718_v44  ;;  %v4725_v61 = vld [vmem:[#allocation9 + $0x828] sm:$0xff]  ;;  %v4724_v13 = vld [vmem:[#allocation9 + $0x820] sm:$0xff]  ;;  %v4727_v7 = vld [vmem:[#allocation9 + $0x838] sm:$0xff] }
 0x45a   : > { %v4926_v44 = vld [vmem:[#allocation9 + $0x918] sm:$0xff]  ;;  %v4925_v47 = vld [vmem:[#allocation9 + $0x910] sm:$0xff] }
 0x45b   : > { %7982 = vmatpush1.bf16.msra.mxu1 %v7981_v36  ;;  %8021 = vmatpush1.bf16.msra.mxu0 %v8020_v50  ;;  %v4695_v36 = vld [vmem:[#allocation9 + $0x738] sm:$0xff]  ;;  %v4694_v50 = vld [vmem:[#allocation9 + $0x730] sm:$0xff] }
 0x45c   : > { %7984 = vmatprep.subr.bf16.mxu1 %v7983_v32  ;;  %8022 = vmatprep.subr.bf16.mxu0 %v9321_v5  ;;  %v4699_v32 = vld [vmem:[#allocation9 + $0x758] sm:$0xff]  ;;  %v8086_v20 = vpack.c.bf16 %v4697_v30, %v4694_v50  ;;  %v4730_v50 = vld [vmem:[#allocation9 + $0x850] sm:$0xff]  ;;  %v4733_v30 = vld [vmem:[#allocation9 + $0x868] sm:$0xff] }
 0x45d   : > { %v8043_v28 = vpack.c.bf16 %v4702_v48, %v4699_v32  ;;  %v4735_v32 = vld [vmem:[#allocation9 + $0x878] sm:$0xff]  ;;  %v4738_v48 = vld [vmem:[#allocation9 + $0x890] sm:$0xff] }
 0x45f   : > { %7986 = vmatpush1.bf16.msra.mxu1 %v7985_v39  ;;  %8024 = vmatpush1.bf16.msra.mxu0 %v8023_v38  ;;  %v4700_v39 = vld [vmem:[#allocation9 + $0x760] sm:$0xff]  ;;  %v4703_v38 = vld [vmem:[#allocation9 + $0x778] sm:$0xff] }
 0x460   : > { %7988 = vmatprep.subr.bf16.mxu1 %v7987_v23  ;;  %8025 = vmatprep.subr.bf16.mxu0 %v9321_v5  ;;  %v4708_v23 = vld [vmem:[#allocation9 + $0x7a0] sm:$0xff]  ;;  %v8089_v37 = vpack.c.bf16 %v4703_v38, %v4700_v39  ;;  %v4739_v38 = vld [vmem:[#allocation9 + $0x898] sm:$0xff] }
 0x461   : > { %v4736_v39 = vld [vmem:[#allocation9 + $0x880] sm:$0xff] }
 0x463   : > { %7990 = vmatpush1.bf16.msra.mxu1 %v7989_v45  ;;  %8027 = vmatpush1.bf16.msra.mxu0 %v8026_v52  ;;  %v4709_v45 = vld [vmem:[#allocation9 + $0x7a8] sm:$0xff]  ;;  %v4711_v52 = vld [vmem:[#allocation9 + $0x7b8] sm:$0xff] }
 0x464   : > { %7992 = vmatprep.subr.bf16.mxu1 %v7991_v31  ;;  %8028 = vmatprep.subr.bf16.mxu0 %v9321_v5  ;;  %v8049_v31 = vpack.c.bf16 %v4707_v43, %v4704_v12  ;;  %v8092_v16 = vpack.c.bf16 %v4709_v45, %v4706_v29  ;;  %v8051_v21 = vpack.c.bf16 %v4714_v57, %v4711_v52  ;;  %v4740_v12 = vld [vmem:[#allocation9 + $0x8a0] sm:$0xff]  ;;  %v4743_v43 = vld [vmem:[#allocation9 + $0x8b8] sm:$0xff]  ;;  %v4742_v29 = vld [vmem:[#allocation9 + $0x8b0] sm:$0xff] }
 0x465   : > { %v4745_v45 = vld [vmem:[#allocation9 + $0x8c8] sm:$0xff]  ;;  %v4747_v52 = vld [vmem:[#allocation9 + $0x8d8] sm:$0xff]  ;;  %v4750_v57 = vld [vmem:[#allocation9 + $0x8f0] sm:$0xff] }
 0x467   : > { %7994 = vmatpush1.bf16.msra.mxu1 %v7993_v63  ;;  %8030 = vmatpush1.bf16.msra.mxu0 %v8029_v17  ;;  %v4715_v63 = vld [vmem:[#allocation9 + $0x7d8] sm:$0xff]  ;;  %v4717_v17 = vld [vmem:[#allocation9 + $0x7e8] sm:$0xff] }
 0x468   : > { %8032 = vmatprep.subr.bf16.mxu1 %v8031_v49  ;;  %8079 = vmatprep.subr.bf16.mxu0 %v9321_v5  ;;  %v4720_v49 = vld [vmem:[#allocation9 + $0x800] sm:$0xff] }
 0x469   : > { %v8055_v27 = vpack.c.bf16 %v4720_v49, %v4717_v17  ;;  %v4924_v17 = vld [vmem:[#allocation9 + $0x908] sm:$0xff]  ;;  %v4927_v49 = vld [vmem:[#allocation9 + $0x920] sm:$0xff] }
 0x46a   : > { %4586 = vmatmul.mubr.f32.vlgmr.msra.gmra.mrb[84].mxu1 %v4511_v3  ;;  %4663 = vmatmul.mubr.f32.vlgmr.msra.gmra.mrb[104].mxu0 %v4511_v3  ;;  %v4722_v3 = vld [vmem:[#allocation9 + $0x810] sm:$0xff] }
 0x46b   : > { %7095 = vmatprep.mubr.msk.f32.mxu1 %vm1119_vm7, %v10988_v9  ;;  %7097 = vmatprep.mubr.msk.f32.mxu0 %vm1119_vm7, %v10988_v9  ;;  %v8041_v9 = vpack.c.bf16 %v4695_v36, %v4692_v1  ;;  %v4728_v1 = vld [vmem:[#allocation9 + $0x840] sm:$0xff]  ;;  %v4731_v36 = vld [vmem:[#allocation9 + $0x858] sm:$0xff] }
 0x46c   : > { %8034 = vmatpush1.bf16.msra.mxu1 %v8033_v10  ;;  %8081 = vmatpush1.bf16.msra.mxu0 %v8080_v58  ;;  %v4726_v10 = vld [vmem:[#allocation9 + $0x830] sm:$0xff]  ;;  %v8057_v58 = vpack.c.bf16 %v4719_v2, %v4716_v22  ;;  %v8115_v22 = vpack.c.bf16 %v4927_v49, %v4924_v17  ;;  %v4753_v2 = vrot.slane %v10941_v11, 3  ;;  %v4958_v17 = vld [vmem:[#allocation9 + $0xa18] sm:$0xff]  ;;  %v4960_v49 = vld [vmem:[#allocation9 + $0xa28] sm:$0xff] }
 0x46d   : > { %8036 = vmatprep.subr.bf16.mxu1 %v8035_v4  ;;  %8082 = vmatprep.subr.bf16.mxu0 %v9321_v5  ;;  %v8059_v4 = vpack.c.bf16 %v4726_v10, %v4723_v33  ;;  %v4928_v33 = vld [vmem:[#allocation9 + $0x928] sm:$0xff]  ;;  %v4930_v10 = vld [vmem:[#allocation9 + $0x938] sm:$0xff] }
 0x46e   : > { %4592 = vmatmul.mubr.f32.gmra.mrb[86].mxu1 %v4510_v62  ;;  %4668 = vmatmul.mubr.f32.gmra.mrb[106].mxu0 %v4510_v62  ;;  %v8095_v62 = vpack.c.bf16 %v4715_v63, %v4712_v6  ;;  %v4748_v6 = vld [vmem:[#allocation9 + $0x8e0] sm:$0xff]  ;;  %v4751_v63 = vld [vmem:[#allocation9 + $0x8f8] sm:$0xff] }
 0x46f   : > { %7098 = vmatprep.mubr.msk.f32.mxu1 %vm1119_vm7, %v10961_v24  ;;  %7100 = vmatprep.mubr.msk.f32.mxu0 %vm1119_vm7, %v10961_v24  ;;  %v8047_v24 = vpack.c.bf16 %v4708_v23, %v4705_v26  ;;  %v4741_v26 = vld [vmem:[#allocation9 + $0x8a8] sm:$0xff]  ;;  %v4744_v23 = vld [vmem:[#allocation9 + $0x8c0] sm:$0xff] }
 0x470   : > { %8038 = vmatpush1.bf16.msra.mxu1 %v8037_v14  ;;  %8084 = vmatpush1.bf16.msra.mxu0 %v8083_v42  ;;  %v8061_v14 = vpack.c.bf16 %v4725_v61, %v4722_v3  ;;  %v8101_v42 = vpack.c.bf16 %v4727_v7, %v4724_v13  ;;  %v8164_v61 = vpack.c.bf16 %v4928_v33, %v4925_v47  ;;  %v4929_v13 = vld [vmem:[#allocation9 + $0x930] sm:$0xff]  ;;  %v4964_v33 = vld [vmem:[#allocation9 + $0xa48] sm:$0xff] }
 0x471   : > { %8040 = vmatprep.subr.bf16.mxu1 %v8039_v18  ;;  %8085 = vmatprep.subr.bf16.mxu0 %v9321_v5  ;;  %v8063_v18 = vpack.c.bf16 %v4732_v60, %v4729_v15  ;;  %v4932_v15 = vld [vmem:[#allocation9 + $0x948] sm:$0xff]  ;;  %v4931_v60 = vld [vmem:[#allocation9 + $0x940] sm:$0xff]  ;;  %v4961_v47 = vld [vmem:[#allocation9 + $0xa30] sm:$0xff] }
 0x474   : > { %8042 = vmatpush1.bf16.msra.mxu1 %v8041_v9  ;;  %8087 = vmatpush1.bf16.msra.mxu0 %v8086_v20  ;;  %v8065_v9 = vpack.c.bf16 %v4731_v36, %v4728_v1  ;;  %v8104_v20 = vpack.c.bf16 %v4733_v30, %v4730_v50  ;;  %v4939_v1 = vld [vmem:[#allocation9 + $0x980] sm:$0xff] }
 0x475   : > { %8044 = vmatprep.subr.bf16.mxu1 %v8043_v28  ;;  %8088 = vmatprep.subr.bf16.mxu0 %v9321_v5  ;;  %v8067_v28 = vpack.c.bf16 %v4738_v48, %v4735_v32  ;;  %v4935_v50 = vld [vmem:[#allocation9 + $0x960] sm:$0xff]  ;;  %v4938_v32 = vld [vmem:[#allocation9 + $0x978] sm:$0xff]  ;;  %v4937_v48 = vld [vmem:[#allocation9 + $0x970] sm:$0xff] }
 0x478   : > { %8046 = vmatpush1.bf16.msra.mxu1 %v8045_v25  ;;  %8090 = vmatpush1.bf16.msra.mxu0 %v8089_v37  ;;  %v8069_v25 = vpack.c.bf16 %v4737_v46, %v4734_v55  ;;  %v8107_v37 = vpack.c.bf16 %v4739_v38, %v4736_v39  ;;  %v4945_v55 = vld [vmem:[#allocation9 + $0x9b0] sm:$0xff]  ;;  %v4944_v38 = vld [vmem:[#allocation9 + $0x9a8] sm:$0xff] }
 0x479   : > { %8048 = vmatprep.subr.bf16.mxu1 %v8047_v24  ;;  %8091 = vmatprep.subr.bf16.mxu0 %v9321_v5  ;;  %v8071_v24 = vpack.c.bf16 %v4744_v23, %v4741_v26  ;;  %v4941_v46 = vld [vmem:[#allocation9 + $0x990] sm:$0xff]  ;;  %v4943_v26 = vld [vmem:[#allocation9 + $0x9a0] sm:$0xff]  ;;  %v4946_v23 = vld [vmem:[#allocation9 + $0x9b8] sm:$0xff] }
 0x47c   : > { %8050 = vmatpush1.bf16.msra.mxu1 %v8049_v31  ;;  %8093 = vmatpush1.bf16.msra.mxu0 %v8092_v16  ;;  %v8073_v31 = vpack.c.bf16 %v4743_v43, %v4740_v12  ;;  %v8110_v16 = vpack.c.bf16 %v4745_v45, %v4742_v29  ;;  %v8129_v12 = vpack.c.bf16 %v4944_v38, %v4941_v46  ;;  %v4947_v43 = vld [vmem:[#allocation9 + $0x9c0] sm:$0xff]  ;;  %v4950_v29 = vld [vmem:[#allocation9 + $0x9d8] sm:$0xff]  ;;  %v4949_v45 = vld [vmem:[#allocation9 + $0x9d0] sm:$0xff] }
 0x47d   : > { %8052 = vmatprep.subr.bf16.mxu1 %v8051_v21  ;;  %8094 = vmatprep.subr.bf16.mxu0 %v9321_v5  ;;  %v8075_v21 = vpack.c.bf16 %v4750_v57, %v4747_v52  ;;  %v4952_v52 = vld [vmem:[#allocation9 + $0x9e8] sm:$0xff]  ;;  %v4954_v57 = vld [vmem:[#allocation9 + $0x9f8] sm:$0xff] }
 0x47e   : > { %v4980_v46 = vld [vmem:[#allocation9 + $0xac8] sm:$0xff]  ;;  %v4982_v38 = vld [vmem:[#allocation9 + $0xad8] sm:$0xff] }
 0x480   : > { %8054 = vmatpush1.bf16.msra.mxu1 %v8053_v35  ;;  %8096 = vmatpush1.bf16.msra.mxu0 %v8095_v62  ;;  %v8077_v35 = vpack.c.bf16 %v4749_v51, %v4746_v41  ;;  %v8113_v62 = vpack.c.bf16 %v4751_v63, %v4748_v6  ;;  %v8176_v41 = vpack.c.bf16 %v4952_v52, %v4949_v45  ;;  %v4956_v6 = vld [vmem:[#allocation9 + $0xa08] sm:$0xff]  ;;  %v4955_v63 = vld [vmem:[#allocation9 + $0xa00] sm:$0xff]  ;;  %v4990_v45 = vld [vmem:[#allocation9 + $0xb18] sm:$0xff] }
 0x481   : > { %8056 = vmatprep.subr.bf16.mxu1 %v8055_v27  ;;  %8097 = vmatprep.subr.bf16.mxu0 %v9321_v5  ;;  %v4923_v27 = vld [vmem:[#allocation9 + $0x900] sm:$0xff]  ;;  %v4993_v52 = vld [vmem:[#allocation9 + $0xb30] sm:$0xff] }
 0x484   : > { %8058 = vmatpush1.bf16.msra.mxu1 %v8057_v58  ;;  %8099 = vmatpush1.bf16.msra.mxu0 %v8098_v34  ;;  %v4933_v58 = vld [vmem:[#allocation9 + $0x950] sm:$0xff]  ;;  %v11036_v34 = vld [vmem:[#allocation3] sm:$0xff] }
 0x485   : > { %8060 = vmatprep.subr.bf16.mxu1 %v8059_v4  ;;  %8100 = vmatprep.subr.bf16.mxu0 %v9321_v5  ;;  %v4752_v3 = vrot.slane %v11036_v34, 3  ;;  %v8117_v4 = vpack.c.bf16 %v4926_v44, %v4923_v27  ;;  %v8119_v11 = vpack.c.bf16 %v4933_v58, %v4930_v10  ;;  %v4959_v27 = vld [vmem:[#allocation9 + $0xa20] sm:$0xff]  ;;  %v4962_v44 = vld [vmem:[#allocation9 + $0xa38] sm:$0xff]  ;;  %v4969_v58 = vld [vmem:[#allocation9 + $0xa70] sm:$0xff] }
 0x486   : > { %v4966_v10 = vld [vmem:[#allocation9 + $0xa58] sm:$0xff] }
 0x487   : > { %v4754_v7 = vsel %vm2381_vm6, %v4752_v3, %v4753_v2  ;;  %v8141_v3 = vpack.c.bf16 %v4962_v44, %v4959_v27 }
 0x488   : > { %8062 = vmatpush1.bf16.msra.mxu1 %v8061_v14  ;;  %8102 = vmatpush1.bf16.msra.mxu0 %v8101_v42  ;;  %v4934_v14 = vld [vmem:[#allocation9 + $0x958] sm:$0xff]  ;;  %v4936_v42 = vld [vmem:[#allocation9 + $0x968] sm:$0xff] }
 0x489   : > { %8064 = vmatprep.subr.bf16.mxu1 %v8063_v18  ;;  %8103 = vmatprep.subr.bf16.mxu0 %v9321_v5  ;;  %v8121_v18 = vpack.c.bf16 %v4932_v15, %v4929_v13  ;;  %v8167_v36 = vpack.c.bf16 %v4934_v14, %v4931_v60  ;;  %v8123_v30 = vpack.c.bf16 %v4939_v1, %v4936_v42  ;;  %v4970_v15 = vld [vmem:[#allocation9 + $0xa78] sm:$0xff]  ;;  %v4972_v60 = vld [vmem:[#allocation9 + $0xa88] sm:$0xff]  ;;  %v4975_v14 = vld [vmem:[#allocation9 + $0xaa0] sm:$0xff] }
 0x48a   : > { %v8143_v13 = vpack.c.bf16 %v4969_v58, %v4966_v10 }
 0x48c   : > { %8066 = vmatpush1.bf16.msra.mxu1 %v8065_v9  ;;  %8105 = vmatpush1.bf16.msra.mxu0 %v8104_v20  ;;  %v4940_v9 = vld [vmem:[#allocation9 + $0x988] sm:$0xff]  ;;  %v4942_v20 = vld [vmem:[#allocation9 + $0x998] sm:$0xff] }
 0x48d   : > { %8068 = vmatprep.subr.bf16.mxu1 %v8067_v28  ;;  %8106 = vmatprep.subr.bf16.mxu0 %v9321_v5  ;;  %v8170_v28 = vpack.c.bf16 %v4940_v9, %v4937_v48  ;;  %v8127_v39 = vpack.c.bf16 %v4945_v55, %v4942_v20  ;;  %v4978_v48 = vld [vmem:[#allocation9 + $0xab8] sm:$0xff]  ;;  %v4981_v9 = vld [vmem:[#allocation9 + $0xad0] sm:$0xff] }
 0x490   : > { %8070 = vmatpush1.bf16.msra.mxu1 %v8069_v25  ;;  %8108 = vmatpush1.bf16.msra.mxu0 %v8107_v37  ;;  %v4948_v25 = vld [vmem:[#allocation9 + $0x9c8] sm:$0xff]  ;;  %v4951_v37 = vld [vmem:[#allocation9 + $0x9e0] sm:$0xff] }
 0x491   : > { %8072 = vmatprep.subr.bf16.mxu1 %v8071_v24  ;;  %8109 = vmatprep.subr.bf16.mxu0 %v9321_v5  ;;  %v8173_v24 = vpack.c.bf16 %v4946_v23, %v4943_v26  ;;  %v4984_v26 = vld [vmem:[#allocation9 + $0xae8] sm:$0xff]  ;;  %v4987_v23 = vld [vmem:[#allocation9 + $0xb00] sm:$0xff] }
 0x494   : > { %8074 = vmatpush1.bf16.msra.mxu1 %v8073_v31  ;;  %8111 = vmatpush1.bf16.msra.mxu0 %v8110_v16  ;;  %v4957_v31 = vld [vmem:[#allocation9 + $0xa10] sm:$0xff]  ;;  %v8133_v16 = vpack.c.bf16 %v4950_v29, %v4947_v43  ;;  %v4986_v43 = vld [vmem:[#allocation9 + $0xaf8] sm:$0xff]  ;;  %v4988_v29 = vld [vmem:[#allocation9 + $0xb08] sm:$0xff] }
 0x495   : > { %8076 = vmatprep.subr.bf16.mxu1 %v8075_v21  ;;  %8112 = vmatprep.subr.bf16.mxu0 %v9321_v5  ;;  %v4953_v21 = vld [vmem:[#allocation9 + $0x9f0] sm:$0xff]  ;;  %v8135_v51 = vpack.c.bf16 %v4957_v31, %v4954_v57 }
 0x498   : > { %8078 = vmatpush1.bf16.msra.mxu1 %v8077_v35  ;;  %8114 = vmatpush1.bf16.msra.mxu0 %v8113_v62  ;;  %v4963_v35 = vld [vmem:[#allocation9 + $0xa40] sm:$0xff]  ;;  %v8137_v62 = vpack.c.bf16 %v4956_v6, %v4953_v21  ;;  %v4992_v21 = vld [vmem:[#allocation9 + $0xb28] sm:$0xff]  ;;  %v4994_v6 = vld [vmem:[#allocation9 + $0xb38] sm:$0xff] }
 0x499   : > { %8116 = vmatprep.subr.bf16.mxu1 %v8115_v22  ;;  %8163 = vmatprep.subr.bf16.mxu0 %v9321_v5  ;;  %v8179_v22 = vpack.c.bf16 %v4958_v17, %v4955_v63 }
 0x49b   : > { %4829 = vmatmul.mubr.f32.vlgmr.msra.gmra.mrb[84].mxu1 %v4754_v7  ;;  %4906 = vmatmul.mubr.f32.vlgmr.msra.gmra.mrb[108].mxu0 %v4754_v7  ;;  %v4968_v7 = vld [vmem:[#allocation9 + $0xa68] sm:$0xff] }
 0x49c   : > { %7099 = vmatprep.mubr.msk.f32.mxu1 %vm1119_vm7, %v10949_v54  ;;  %7101 = vmatprep.mubr.msk.f32.mxu0 %vm1119_vm7, %v10949_v54  ;;  %v8125_v54 = vpack.c.bf16 %v4938_v32, %v4935_v50  ;;  %v4974_v50 = vld [vmem:[#allocation9 + $0xa98] sm:$0xff]  ;;  %v4976_v32 = vld [vmem:[#allocation9 + $0xaa8] sm:$0xff] }
 0x49d   : > { %8118 = vmatpush1.bf16.msra.mxu1 %v8117_v4  ;;  %8165 = vmatpush1.bf16.msra.mxu0 %v8164_v61  ;;  %v8182_v4 = vpack.c.bf16 %v4964_v33, %v4961_v47  ;;  %v4965_v61 = vld [vmem:[#allocation9 + $0xa50] sm:$0xff] }
 0x49e   : > { %8120 = vmatprep.subr.bf16.mxu1 %v8119_v11  ;;  %8166 = vmatprep.subr.bf16.mxu0 %v9321_v5  ;;  %v4967_v11 = vld [vmem:[#allocation9 + $0xa60] sm:$0xff]  ;;  %v8145_v42 = vpack.c.bf16 %v4968_v7, %v4965_v61  ;;  %v5302_v61 = vld [vmem:[#allocation12 + $0x8] sm:$0xff] }
 0x49f   : > { %4835 = vmatmul.mubr.f32.gmra.mrb[86].mxu1 %v4753_v2  ;;  %4911 = vmatmul.mubr.f32.gmra.mrb[110].mxu0 %v4753_v2  ;;  %v8139_v2 = vpack.c.bf16 %v4963_v35, %v4960_v49  ;;  %v8185_v1 = vpack.c.bf16 %v4970_v15, %v4967_v11  ;;  %v8869_v49 = vld [vmem:[#allocation3 + $0x10] sm:$0xff] }
 0x4a0   : > { %7102 = vmatprep.mubr.msk.f32.mxu1 %vm1119_vm7, %v10965_v53  ;;  %7104 = vmatprep.mubr.msk.f32.mxu0 %vm1119_vm7, %v10965_v53  ;;  %v8131_v53 = vpack.c.bf16 %v4951_v37, %v4948_v25  ;;  %v4996_v35 = vrot.slane %v8869_v49, 4  ;;  %v5301_v7 = vld [vmem:[#allocation12] sm:$0xff] }
 0x4a1   : > { %8122 = vmatpush1.bf16.msra.mxu1 %v8121_v18  ;;  %8168 = vmatpush1.bf16.msra.mxu0 %v8167_v36  ;;  %v4971_v18 = vld [vmem:[#allocation9 + $0xa80] sm:$0xff]  ;;  %v8147_v36 = vpack.c.bf16 %v4975_v14, %v4972_v60  ;;  %v5310_v60 = vld [vmem:[#allocation12 + $0x48] sm:$0xff] }
 0x4a2   : > { %8124 = vmatprep.subr.bf16.mxu1 %v8123_v30  ;;  %8169 = vmatprep.subr.bf16.mxu0 %v9321_v5  ;;  %v4973_v30 = vld [vmem:[#allocation9 + $0xa90] sm:$0xff]  ;;  %v8149_v20 = vpack.c.bf16 %v4974_v50, %v4971_v18  ;;  %v5305_v15 = vld [vmem:[#allocation12 + $0x20] sm:$0xff] }
 0x4a3   : > { %v8188_v55 = vpack.c.bf16 %v4976_v32, %v4973_v30  ;;  %v5314_v14 = vld [vmem:[#allocation12 + $0x68] sm:$0xff]  ;;  %v5313_v18 = vld [vmem:[#allocation12 + $0x60] sm:$0xff] }
 0x4a4   : > { %v5322_v50 = vld [vmem:[#allocation12 + $0xa8] sm:$0xff] }
 0x4a5   : > { %8126 = vmatpush1.bf16.msra.mxu1 %v8125_v54  ;;  %8171 = vmatpush1.bf16.msra.mxu0 %v8170_v28  ;;  %v4977_v54 = vld [vmem:[#allocation9 + $0xab0] sm:$0xff]  ;;  %v8151_v28 = vpack.c.bf16 %v4981_v9, %v4978_v48  ;;  %v5317_v48 = vld [vmem:[#allocation12 + $0x80] sm:$0xff] }
 0x4a6   : > { %8128 = vmatprep.subr.bf16.mxu1 %v8127_v39  ;;  %8172 = vmatprep.subr.bf16.mxu0 %v9321_v5  ;;  %v4979_v39 = vld [vmem:[#allocation9 + $0xac0] sm:$0xff]  ;;  %v8153_v25 = vpack.c.bf16 %v4980_v46, %v4977_v54 }
 0x4a7   : > { %v8191_v37 = vpack.c.bf16 %v4982_v38, %v4979_v39  ;;  %v5321_v9 = vld [vmem:[#allocation12 + $0xa0] sm:$0xff] }
 0x4a9   : > { %8130 = vmatpush1.bf16.msra.mxu1 %v8129_v12  ;;  %8174 = vmatpush1.bf16.msra.mxu0 %v8173_v24  ;;  %v4983_v12 = vld [vmem:[#allocation9 + $0xae0] sm:$0xff]  ;;  %v8155_v24 = vpack.c.bf16 %v4987_v23, %v4984_v26 }
 0x4aa   : > { %8132 = vmatprep.subr.bf16.mxu1 %v8131_v53  ;;  %8175 = vmatprep.subr.bf16.mxu0 %v9321_v5  ;;  %v4985_v53 = vld [vmem:[#allocation9 + $0xaf0] sm:$0xff]  ;;  %v8157_v57 = vpack.c.bf16 %v4986_v43, %v4983_v12 }
 0x4ab   : > { %v8194_v31 = vpack.c.bf16 %v4988_v29, %v4985_v53  ;;  %v5326_v43 = vld [vmem:[#allocation12 + $0xc8] sm:$0xff] }
 0x4ac   : > { %v5330_v53 = vld [vmem:[#allocation12 + $0xe8] sm:$0xff] }
 0x4ad   : > { %8134 = vmatpush1.bf16.msra.mxu1 %v8133_v16  ;;  %8177 = vmatpush1.bf16.msra.mxu0 %v8176_v41  ;;  %v4989_v16 = vld [vmem:[#allocation9 + $0xb10] sm:$0xff]  ;;  %v8159_v41 = vpack.c.bf16 %v4993_v52, %v4990_v45  ;;  %v8211_v29 = vpack.c.bf16 %v5330_v53, %v5326_v43  ;;  %v5325_v45 = vld [vmem:[#allocation12 + $0xc0] sm:$0xff] }
 0x4ae   : > { %8136 = vmatprep.subr.bf16.mxu1 %v8135_v51  ;;  %8178 = vmatprep.subr.bf16.mxu0 %v9321_v5  ;;  %v4991_v51 = vld [vmem:[#allocation9 + $0xb20] sm:$0xff]  ;;  %v8161_v63 = vpack.c.bf16 %v4992_v21, %v4989_v16  ;;  %v5334_v16 = vld [vmem:[#allocation12 + $0x108] sm:$0xff]  ;;  %v5303_v53 = vld [vmem:[#allocation12 + $0x10] sm:$0xff] }
 0x4af   : > { %v8197_v17 = vpack.c.bf16 %v4994_v6, %v4991_v51  ;;  %v5329_v52 = vld [vmem:[#allocation12 + $0xe0] sm:$0xff] }
 0x4b0   : > { %v5333_v51 = vld [vmem:[#allocation12 + $0x100] sm:$0xff] }
 0x4b1   : > { %8138 = vmatpush1.bf16.msra.mxu1 %v8137_v62  ;;  %8180 = vmatpush1.bf16.msra.mxu0 %v8179_v22  ;;  %v4995_v62 = vrot.slane %v11036_v34, 4  ;;  %v5337_v6 = vld [vmem:[#allocation12 + $0x120] sm:$0xff] }
 0x4b2   : > { %8140 = vmatprep.subr.bf16.mxu1 %v8139_v2  ;;  %8181 = vmatprep.subr.bf16.mxu0 %v9321_v5 }
 0x4b3   : > { %v4997_v22 = vsel %vm802_vm1, %v4995_v62, %v4996_v35  ;;  %v5346_v62 = vld [vmem:[#allocation12 + $0x168] sm:$0xff] }
 0x4b5   : > { %8142 = vmatpush1.bf16.msra.mxu1 %v8141_v3  ;;  %8183 = vmatpush1.bf16.msra.mxu0 %v8182_v4 }
 0x4b6   : > { %8144 = vmatprep.subr.bf16.mxu1 %v8143_v13  ;;  %8184 = vmatprep.subr.bf16.mxu0 %v9321_v5  ;;  %v5306_v13 = vld [vmem:[#allocation12 + $0x28] sm:$0xff] }
 0x4b7   : > { %v8199_v11 = vpack.c.bf16 %v5306_v13, %v5302_v61  ;;  %v5304_v13 = vld [vmem:[#allocation12 + $0x18] sm:$0xff] }
 0x4b9   : > { %8146 = vmatpush1.bf16.msra.mxu1 %v8145_v42  ;;  %8186 = vmatpush1.bf16.msra.mxu0 %v8185_v1  ;;  %v8203_v42 = vpack.c.bf16 %v5314_v14, %v5310_v60  ;;  %v5309_v1 = vld [vmem:[#allocation12 + $0x40] sm:$0xff] }
 0x4ba   : > { %8148 = vmatprep.subr.bf16.mxu1 %v8147_v36  ;;  %8187 = vmatprep.subr.bf16.mxu0 %v9321_v5  ;;  %v5318_v36 = vld [vmem:[#allocation12 + $0x88] sm:$0xff]  ;;  %v8205_v30 = vpack.c.bf16 %v5313_v18, %v5309_v1 }
 0x4bb   : > { %v8207_v32 = vpack.c.bf16 %v5322_v50, %v5318_v36  ;;  %v9325_v50 = vmov 0.0  }
 0x4bd   : > { %8150 = vmatpush1.bf16.msra.mxu1 %v8149_v20  ;;  %8189 = vmatpush1.bf16.msra.mxu0 %v8188_v55  ;;  %v8209_v20 = vpack.c.bf16 %v5321_v9, %v5317_v48 }
 0x4be   : > { %8152 = vmatprep.subr.bf16.mxu1 %v8151_v28  ;;  %8190 = vmatprep.subr.bf16.mxu0 %v9321_v5 }
 0x4c1   : > { %8154 = vmatpush1.bf16.msra.mxu1 %v8153_v25  ;;  %8192 = vmatpush1.bf16.msra.mxu0 %v8191_v37 }
 0x4c2   : > { %8156 = vmatprep.subr.bf16.mxu1 %v8155_v24  ;;  %8193 = vmatprep.subr.bf16.mxu0 %v9321_v5 }
 0x4c5   : > { %8158 = vmatpush1.bf16.msra.mxu1 %v8157_v57  ;;  %8195 = vmatpush1.bf16.msra.mxu0 %v8194_v31  ;;  %v8213_v57 = vpack.c.bf16 %v5329_v52, %v5325_v45  ;;  %v5165_v31 = vld [vmem:[#allocation10] sm:$0x7] }
 0x4c6   : > { %8160 = vmatprep.subr.bf16.mxu1 %v8159_v41  ;;  %8196 = vmatprep.subr.bf16.mxu0 %v9321_v5  ;;  %v5338_v41 = vld [vmem:[#allocation12 + $0x128] sm:$0xff]  ;;  %v5174_v49 = vrot.slane %v5165_v31, %v10658_v56  ;;  %v5312_v52 = vld [vmem:[#allocation12 + $0x58] sm:$0xff] }
 0x4c7   : > { %v8215_v21 = vpack.c.bf16 %v5338_v41, %v5334_v16 }
 0x4c9   : > { %8162 = vmatpush1.bf16.msra.mxu1 %v8161_v63  ;;  %8198 = vmatpush1.bf16.msra.mxu0 %v8197_v17  ;;  %v8217_v63 = vpack.c.bf16 %v5337_v6, %v5333_v51  ;;  %v5170_v17 = vrot.slane %v5165_v31, %v10652_v8 }
 0x4ca   : > { %8200 = vmatprep.subr.bf16.mxu1 %v8199_v11 }
 0x4cc   : > { %5072 = vmatmul.mubr.f32.vlgmr.msra.gmra.mrb[84].mxu1 %v4997_v22  ;;  %5149 = vmatmul.mubr.f32.vlgmr.msra.gmra.mrb[112].mxu0 %v4997_v22 }
 0x4cd   : > { %7103 = vmatprep.mubr.msk.f32.mxu1 %vm1119_vm7, %v10952_v40  ;;  %7105 = vmatprep.mubr.msk.f32.mxu0 %vm1119_vm7, %v10952_v40  ;;  %v8201_v40 = vpack.c.bf16 %v5305_v15, %v5301_v7  ;;  %v5308_v7 = vld [vmem:[#allocation12 + $0x38] sm:$0xff] }
 0x4ce   : > { %v8223_v15 = vpack.c.bf16 %v5308_v7, %v5304_v13  ;;  %v5327_v7 = vld [vmem:[#allocation12 + $0xd0] sm:$0xff] }
 0x4cf   : > { %8202 = vmatpush1.bf16.msra.mxu1 %v8201_v40 }
 0x4d0   : > { %5078 = vmatmul.mubr.f32.gmra.mrb[86].mxu1 %v4996_v35  ;;  %5154 = vmatmul.mubr.f32.gmra.mrb[114].mxu0 %v4996_v35  ;;  %v5342_v35 = vld [vmem:[#allocation12 + $0x148] sm:$0xff] }
 0x4d1   : > { %8204 = vmatprep.subr.bf16.mxu1 %v8203_v42  ;;  %v8219_v22 = vpack.c.bf16 %v5346_v62, %v5342_v35  ;;  %5417 = vmatprep.mubr.f32.mxu1 %v9325_v50  ;;  %v5315_v35 = vld [vmem:[#allocation12 + $0x70] sm:$0xff] }
 0x4d3   : > { %8206 = vmatpush1.bf16.msra.mxu1 %v8205_v30 }
 0x4d4   : > { %8208 = vmatprep.subr.bf16.mxu1 %v8207_v32 }
 0x4d7   : > { %8210 = vmatpush1.bf16.msra.mxu1 %v8209_v20 }
 0x4d8   : > { %8212 = vmatprep.subr.bf16.mxu1 %v8211_v29  ;;  %v5307_v29 = vld [vmem:[#allocation12 + $0x30] sm:$0xff] }
 0x4db   : > { %8214 = vmatpush1.bf16.msra.mxu1 %v8213_v57  ;;  %v5316_v57 = vld [vmem:[#allocation12 + $0x78] sm:$0xff] }
 0x4dc   : > { %v4271_v27 = vpop.f32.mrb[96].mxu0  ;;  %8216 = vmatprep.subr.bf16.mxu1 %v8215_v21  ;;  %v8225_v21 = vpack.c.bf16 %v5307_v29, %v5303_v53 }
 0x4dd   : > { %v4273_v2 = vpop.f32.mrb[97].mxu0 }
 0x4de   : > { %v5345_v2 = vld [vmem:[#allocation12 + $0x160] sm:$0xff] }
 0x4df   : > { %8218 = vmatpush1.bf16.msra.mxu1 %v8217_v63 }
 0x4e0   : > { %v4276_v44 = vpop.f32.mrb[98].mxu0  ;;  %8220 = vmatprep.subr.bf16.mxu1 %v8219_v22  ;;  %v5320_v22 = vld [vmem:[#allocation12 + $0x98] sm:$0xff] }
 0x4e1   : > { %v4278_v47 = vpop.f32.mrb[99].mxu0 }
 0x50c   : > { %v4427_v33 = vpop.f32.mrb[100].mxu0 }
 0x50d   : > { %v4428_v10 = vadd.f32 %v4427_v33, %v4271_v27  ;;  %v4429_v58 = vpop.f32.mrb[101].mxu0  ;;  %v5341_v27 = vld [vmem:[#allocation12 + $0x140] sm:$0xff]  ;;  %v5178_v33 = vrot.slane %v5165_v31, %v10655_v0 }
 0x510   : > { %v4432_v34 = vpop.f32.mrb[102].mxu0 }
 0x511   : > { %v4433_v3 = vadd.f32 %v4432_v34, %v4276_v44  ;;  %v4434_v4 = vpop.f32.mrb[103].mxu0 }
 0x53d   : > { %v4664_v55 = vpop.f32.mrb[104].mxu0 }
 0x53e   : > { %v4675_v54 = vadd.f32 %v4664_v55, %v4428_v10  ;;  %v4666_v28 = vpop.f32.mrb[105].mxu0  ;;  %v8221_v10 = vpack.c.bf16 %v5345_v2, %v5341_v27  ;;  %v5324_v27 = vld [vmem:[#allocation12 + $0xb8] sm:$0xff] }
 0x540   : > { %8222 = vmatpush1.bf16.msra.mxu1 %v8221_v10  ;;  %v5319_v10 = vld [vmem:[#allocation12 + $0x90] sm:$0xff] }
 0x541   : > { %v4669_v46 = vpop.f32.mrb[106].mxu0  ;;  %8224 = vmatprep.subr.bf16.mxu1 %v8223_v15  ;;  %v5336_v15 = vld [vmem:[#allocation12 + $0x118] sm:$0xff] }
 0x542   : > { %v4678_v39 = vadd.f32 %v4669_v46, %v4433_v3  ;;  %v4671_v38 = vpop.f32.mrb[107].mxu0 }
 0x56e   : > { %v4907_v26 = vpop.f32.mrb[108].mxu0 }
 0x56f   : > { %v4918_v23 = vadd.f32 %v4907_v26, %v4675_v54  ;;  %v4909_v25 = vpop.f32.mrb[109].mxu0 }
 0x572   : > { %v4912_v37 = vpop.f32.mrb[110].mxu0 }
 0x573   : > { %v4921_v12 = vadd.f32 %v4912_v37, %v4678_v39  ;;  %v4914_v24 = vpop.f32.mrb[111].mxu0 }
 0x59f   : > { %v5073_v44 = vpop.f32.mrb[84].mxu1  ;;  %v5150_v47 = vpop.f32.mrb[112].mxu0 }
 0x5a0   : > { %v5182_v58 = vadd.f32 %v5170_v17, %v5073_v44  ;;  %v5161_v34 = vadd.f32 %v5150_v47, %v4918_v23  ;;  %v5075_v3 = vpop.f32.mrb[85].mxu1  ;;  %v5152_v4 = vpop.f32.mrb[113].mxu0 }
 0x5a1   : > { %v5183_v61 = vadd.f32 %v5174_v49, %v5075_v3  ;;  %v5332_v3 = vld [vmem:[#allocation12 + $0xf8] sm:$0xff] }
 0x5a2   : > { %v5188_v11 = vmax.f32 %v5182_v58, 0.0  ;;  %v5184_v60 = vadd.f32 %v5178_v33, %v5161_v34  ;;  %v5323_v58 = vld [vmem:[#allocation12 + $0xb0] sm:$0xff]  ;;  %v5328_v34 = vld [vmem:[#allocation12 + $0xd8] sm:$0xff] }
 0x5a3   : > { %v5189_v14 = vmax.f32 %v5183_v61, 0.0  ;;  %v5079_v40 = vpop.f32.mrb[86].mxu1  ;;  %v5155_v42 = vpop.f32.mrb[114].mxu0  ;;  %v8233_v61 = vpack.c.bf16 %v5323_v58, %v5319_v10  ;;  %v8235_v13 = vpack.c.bf16 %v5332_v3, %v5328_v34  ;;  %v5270_v58 = vld [vmem:[#allocation13 + $0x140] sm:$0xff]  ;;  %v5279_v3 = vld [vmem:[#allocation13 + $0x188] sm:$0xff] }
 0x5a4   : > { %v5164_v1 = vadd.f32 %v5155_v42, %v4921_v12  ;;  %v5157_v18 = vpop.f32.mrb[115].mxu0  ;;  %5198 = vrot.lane.b32.xlu0 %v5188_v11, %s9324_s20  ;;  %v5081_v36 = vpop.f32.mrb[87].mxu1  ;;  %v5185_v30 = vadd.f32 %v5170_v17, %v5079_v40  ;;  %v5190_v32 = vmax.f32 %v5184_v60, 0.0  ;;  %v8227_v17 = vpack.c.bf16 %v5316_v57, %v5312_v52  ;;  %v5340_v60 = vld [vmem:[#allocation12 + $0x138] sm:$0xff]  ;;  %v5335_v42 = vld [vmem:[#allocation12 + $0x110] sm:$0xff]  ;;  %v5250_v52 = vld [vmem:[#allocation13 + $0xa0] sm:$0xff] }
 0x5a5   : > { %5200 = vrot.lane.b32.xlu1 %v5189_v14, %s9324_s20  ;;  %v5186_v48 = vadd.f32 %v5174_v49, %v5081_v36  ;;  %v5311_v49 = vld [vmem:[#allocation12 + $0x50] sm:$0xff]  ;;  %v8239_v40 = vpack.c.bf16 %v5340_v60, %v5336_v15  ;;  %v5344_v18 = vld [vmem:[#allocation12 + $0x158] sm:$0xff]  ;;  %v5255_v57 = vld [vmem:[#allocation13 + $0xc8] sm:$0xff] }
 0x5a6   : > { %v5191_v9 = vmax.f32 %v5185_v30, 0.0  ;;  %v5187_v20 = vadd.f32 %v5178_v33, %v5164_v1  ;;  %v8229_v44 = vpack.c.bf16 %v5315_v35, %v5311_v49  ;;  %v8231_v33 = vpack.c.bf16 %v5324_v27, %v5320_v22  ;;  %v5339_v1 = vld [vmem:[#allocation12 + $0x130] sm:$0xff]  ;;  %v5348_v36 = vld [vmem:[#allocation12 + $0x178] sm:$0xff]  ;;  %v5266_v22 = vld [vmem:[#allocation13 + $0x120] sm:$0xff] }
 0x5a7   : > { %v5192_v55 = vmax.f32 %v5186_v48, 0.0  ;;  %v8241_v30 = vpack.c.bf16 %v5339_v1, %v5335_v42  ;;  %v5343_v48 = vld [vmem:[#allocation12 + $0x150] sm:$0xff]  ;;  %v5271_v27 = vld [vmem:[#allocation13 + $0x148] sm:$0xff]  ;;  %v5274_v34 = vld [vmem:[#allocation13 + $0x160] sm:$0xff] }
 0x5a8   : > { %5215 = vrot.lane.b32.xlu0 %v5189_v14, %s9322_s19  ;;  %v5193_v54 = vmax.f32 %v5187_v20, 0.0  ;;  %v5231_v20 = vld [vmem:[#allocation13 + $0x8] sm:$0xff]  ;;  %v5282_v15 = vld [vmem:[#allocation13 + $0x1a0] sm:$0xff] }
 0x5a9   : > { %5217 = vrot.lane.b32.xlu1 %v5190_v32, %s9322_s19  ;;  %v8243_v32 = vpack.c.bf16 %v5348_v36, %v5344_v18  ;;  %v5287_v60 = vld [vmem:[#allocation13 + $0x1c8] sm:$0xff]  ;;  %v5286_v1 = vld [vmem:[#allocation13 + $0x1c0] sm:$0xff]  ;;  %v5233_v36 = vld [vmem:[#allocation13 + $0x18] sm:$0xff] }
 0x5aa   : > { %v5290_v18 = vld [vmem:[#allocation13 + $0x1e0] sm:$0xff] }
 0x5ac   : > { %5202 = vrot.lane.b32.xlu0 %v5191_v9, %s9324_s20 }
 0x5ad   : > { %5204 = vrot.lane.b32.xlu1 %v5192_v55, %s9324_s20  ;;  %s659_s20 = sand.u32 1, %s11310_s30  }
 0x5ae   : > { %s660_s16 = scalar_lea.vmem [#allocation24], %s659_s20  ;;  %s6749_s7 = scalar_lea.sflag [#allocation6], %s659_s20 }
 0x5b0   : > { %5219 = vrot.lane.b32.xlu0 %v5192_v55, %s9322_s19  ;;  %v5235_v55 = vld [vmem:[#allocation13 + $0x28] sm:$0xff] }
 0x5b1   : > { %5221 = vrot.lane.b32.xlu1 %v5193_v54, %s9322_s19  ;;  %s11311_s19 = sld [smem:[#allocation39_spill]] }
 0x5b7   : > { %p11313_p6 = scmp.ne.s32.totalorder %s11311_s19, 0 }
 0x616   : > { %v5199_v28 = vpop.permute.xlu0 %5198 }
 0x617   : > { %v5201_v46 = vpop.permute.xlu1 %5200 }
 0x618   : > { %v5207_v39 = vsel %vm5206_vm9, %v5199_v28, %v5201_v46  ;;  %v8247_v28 = vpack.c.bf16 %v5235_v55, %v5231_v20  ;;  %v5230_v46 = vld [vmem:[#allocation13] sm:$0xff]  ;;  %v5236_v20 = vld [vmem:[#allocation13 + $0x30] sm:$0xff]  ;;  %v5241_v55 = vld [vmem:[#allocation13 + $0x58] sm:$0xff] }
 0x619   : > { %v5211_v26 = vmax.f32 %v5188_v11, %v5207_v39  ;;  %v5331_v11 = vld [vmem:[#allocation12 + $0xf0] sm:$0xff]  ;;  %v5234_v39 = vld [vmem:[#allocation13 + $0x20] sm:$0xff] }
 0x61a   : > { %v5216_v38 = vpop.permute.xlu0 %5215  ;;  %v8237_v14 = vpack.c.bf16 %v5331_v11, %v5327_v7  ;;  %v5278_v11 = vld [vmem:[#allocation13 + $0x180] sm:$0xff] }
 0x61b   : > { %v5218_v23 = vpop.permute.xlu1 %5217 }
 0x61c   : > { %v5223_v25 = vsel %vm1119_vm7, %v5216_v38, %v5218_v23  ;;  %v5239_v38 = vld [vmem:[#allocation13 + $0x48] sm:$0xff]  ;;  %v8249_v23 = vpack.c.bf16 %v5234_v39, %v5230_v46 }
 0x61d   : > { %v5227_v37 = vmax.f32 %v5211_v26, %v5223_v25  ;;  %v5243_v26 = vld [vmem:[#allocation13 + $0x68] sm:$0xff] }
 0x61e   : > { %v5203_v12 = vpop.permute.xlu0 %5202  ;;  %v8251_v25 = vpack.c.bf16 %v5243_v26, %v5239_v38  ;;  %v5240_v38 = vld [vmem:[#allocation13 + $0x50] sm:$0xff] }
 0x61f   : > { %v5295_v24 = vrot.slane %v5227_v37, 1  ;;  %v5205_v43 = vpop.permute.xlu1 %5204  ;;  %v5298_v16 = vrot.slane %v5227_v37, 2  ;;  %v5244_v26 = vld [vmem:[#allocation13 + $0x70] sm:$0xff] }
 0x620   : > { %v5208_v45 = vsel %vm5206_vm9, %v5203_v12, %v5205_v43  ;;  %v5242_v12 = vld [vmem:[#allocation13 + $0x60] sm:$0xff]  ;;  %v5251_v43 = vld [vmem:[#allocation13 + $0xa8] sm:$0xff] }
 0x621   : > { %v5297_v31 = vmax.f32 %v5227_v37, %v5295_v24  ;;  %v5212_v6 = vmax.f32 %v5191_v9, %v5208_v45  ;;  %v5347_v9 = vld [vmem:[#allocation12 + $0x170] sm:$0xff]  ;;  %v5238_v37 = vld [vmem:[#allocation13 + $0x40] sm:$0xff]  ;;  %v5247_v24 = vld [vmem:[#allocation13 + $0x88] sm:$0xff] }
 0x622   : > { %v5220_v41 = vpop.permute.xlu0 %5219  ;;  %v8245_v54 = vpack.c.bf16 %v5347_v9, %v5343_v48  ;;  %v8253_v53 = vpack.c.bf16 %v5242_v12, %v5238_v37  ;;  %v8255_v29 = vpack.c.bf16 %v5251_v43, %v5247_v24  ;;  %v5246_v45 = vld [vmem:[#allocation13 + $0x80] sm:$0xff]  ;;  %v5232_v9 = vld [vmem:[#allocation13 + $0x10] sm:$0xff]  ;;  %v8285_v37 = vpack.c.bf16 %v5244_v26, %v5240_v38 }
 0x623   : > { %v11075_v51 = vmax.f32 %v5297_v31, %v5298_v16  ;;  %v5222_v63 = vpop.permute.xlu1 %5221  ;;  %v8257_v16 = vpack.c.bf16 %v5250_v52, %v5246_v45  ;;  %v8281_v46 = vpack.c.bf16 %v5236_v20, %v5232_v9  ;;  %v5248_v24 = vld [vmem:[#allocation13 + $0x90] sm:$0xff] }
 0x624   : > { %v5224_v62 = vsel %vm1119_vm7, %v5220_v41, %v5222_v63  ;;  %v5263_v63 = vld [vmem:[#allocation13 + $0x108] sm:$0xff]  ;;  %v5252_v43 = vld [vmem:[#allocation13 + $0xb0] sm:$0xff] }
 0x625   : > { %v11078_v2 = vmax.f32 %v5212_v6, %v5224_v62  ;;  %7106 = vmatmul.mubr.msk.f32.vlgmr.msra.gmra.mrb[88].mxu1 %vm5349_vm10, %v11075_v51  ;;  %v5258_v6 = vld [vmem:[#allocation13 + $0xe0] sm:$0xff]  ;;  %v8289_v45 = vpack.c.bf16 %v5252_v43, %v5248_v24 }
 0x626   : > { %8226 = vmatpush1.bf16.msra.mxu1 %v8225_v21  ;;  %5488 = vmatprep.mubr.f32.mxu1 %v9325_v50  ;;  %v5254_v21 = vld [vmem:[#allocation13 + $0xc0] sm:$0xff] }
 0x627   : > { %v5836_v47 = vrot.slane %v11078_v2, 2  ;;  %8228 = vmatprep.subr.bf16.mxu1 %v8227_v17  ;;  %v5267_v17 = vld [vmem:[#allocation13 + $0x128] sm:$0xff]  ;;  %v8261_v49 = vpack.c.bf16 %v5258_v6, %v5254_v21  ;;  %v5262_v62 = vld [vmem:[#allocation13 + $0x100] sm:$0xff] }
 0x628   : > { %v8263_v35 = vpack.c.bf16 %v5267_v17, %v5263_v63  ;;  %v5264_v63 = vld [vmem:[#allocation13 + $0x110] sm:$0xff] }
 0x629   : > { %v11086_v4 = vmax.f32 %v5297_v31, %v5836_v47  ;;  %v5259_v31 = vld [vmem:[#allocation13 + $0xe8] sm:$0xff]  ;;  %v5268_v17 = vld [vmem:[#allocation13 + $0x130] sm:$0xff] }
 0x62a   : > { %8230 = vmatpush1.bf16.msra.mxu1 %v8229_v44  ;;  %v8259_v41 = vpack.c.bf16 %v5259_v31, %v5255_v57  ;;  %v5275_v44 = vld [vmem:[#allocation13 + $0x168] sm:$0xff]  ;;  %v5256_v57 = vld [vmem:[#allocation13 + $0xd0] sm:$0xff] }
 0x62b   : > { %8232 = vmatprep.subr.bf16.mxu1 %v8231_v33  ;;  %v8265_v33 = vpack.c.bf16 %v5266_v22, %v5262_v62  ;;  %v8267_v10 = vpack.c.bf16 %v5275_v44, %v5271_v27  ;;  %v5260_v31 = vld [vmem:[#allocation13 + $0xf0] sm:$0xff]  ;;  %v8297_v62 = vpack.c.bf16 %v5268_v17, %v5264_v63  ;;  %v5678_v17 = vld [vmem:[#allocation12 + $0x2c0] sm:$0xff] }
 0x62c   : > { %v8293_v21 = vpack.c.bf16 %v5260_v31, %v5256_v57  ;;  %v5272_v27 = vld [vmem:[#allocation13 + $0x150] sm:$0xff]  ;;  %v5670_v31 = vld [vmem:[#allocation12 + $0x280] sm:$0xff] }
 0x62d   : > { %v5276_v44 = vld [vmem:[#allocation13 + $0x170] sm:$0xff] }
 0x62e   : > { %8234 = vmatpush1.bf16.msra.mxu1 %v8233_v61  ;;  %v5283_v61 = vld [vmem:[#allocation13 + $0x1a8] sm:$0xff] }
 0x62f   : > { %8236 = vmatprep.subr.bf16.mxu1 %v8235_v13  ;;  %v8269_v13 = vpack.c.bf16 %v5274_v34, %v5270_v58  ;;  %v8271_v7 = vpack.c.bf16 %v5283_v61, %v5279_v3  ;;  %v8301_v58 = vpack.c.bf16 %v5276_v44, %v5272_v27  ;;  %v5280_v3 = vld [vmem:[#allocation13 + $0x190] sm:$0xff] }
 0x630   : > { %v5284_v61 = vld [vmem:[#allocation13 + $0x1b0] sm:$0xff] }
 0x631   : > { %v5644_v27 = vld [vmem:[#allocation12 + $0x1b0] sm:$0xff] }
 0x632   : > { %8238 = vmatpush1.bf16.msra.mxu1 %v8237_v14  ;;  %v5291_v14 = vld [vmem:[#allocation13 + $0x1e8] sm:$0xff] }
 0x633   : > { %8240 = vmatprep.subr.bf16.mxu1 %v8239_v40  ;;  %v8273_v40 = vpack.c.bf16 %v5282_v15, %v5278_v11  ;;  %v8275_v42 = vpack.c.bf16 %v5291_v14, %v5287_v60  ;;  %v8305_v11 = vpack.c.bf16 %v5284_v61, %v5280_v3  ;;  %v5288_v60 = vld [vmem:[#allocation13 + $0x1d0] sm:$0xff] }
 0x634   : > { %v5292_v14 = vld [vmem:[#allocation13 + $0x1f0] sm:$0xff] }
 0x635   : > { %v6272_v44 = vld [vmem:[#allocation16 + $0x8] sm:$0xff]  ;;  %v6273_v3 = vld [vmem:[#allocation16 + $0x10] sm:$0xff] }
 0x636   : > { %8242 = vmatpush1.bf16.msra.mxu1 %v8241_v30  ;;  %v5237_v30 = vld [vmem:[#allocation13 + $0x38] sm:$0xff]  ;;  %v6276_v61 = vld [vmem:[#allocation16 + $0x28] sm:$0xff] }
 0x637   : > { %8244 = vmatprep.subr.bf16.mxu1 %v8243_v32  ;;  %v8277_v32 = vpack.c.bf16 %v5290_v18, %v5286_v1  ;;  %v8279_v48 = vpack.c.bf16 %v5237_v30, %v5233_v36  ;;  %v8309_v1 = vpack.c.bf16 %v5292_v14, %v5288_v60  ;;  %v5638_v36 = vld [vmem:[#allocation12 + $0x180] sm:$0xff] }
 0x638   : > { %v5642_v30 = vld [vmem:[#allocation12 + $0x1a0] sm:$0xff] }
 0x639   : > { %v8313_v9 = vpack.c.bf16 %v5642_v30, %v5638_v36  ;;  %v6275_v14 = vld [vmem:[#allocation16 + $0x20] sm:$0xff] }
 0x63a   : > { %8246 = vmatpush1.bf16.msra.mxu1 %v8245_v54  ;;  %v5245_v54 = vld [vmem:[#allocation13 + $0x78] sm:$0xff] }
 0x63b   : > { %8248 = vmatprep.subr.bf16.mxu1 %v8247_v28  ;;  %v11095_v28 = vld [vmem:[%s668_s27] sm:$0x1]  ;;  %v8283_v39 = vpack.c.bf16 %v5245_v54, %v5241_v55  ;;  %s6761_s27 = sshll.u32 %s660_s16, 4  ;;  %s11196_s27 = int_to_ptr.vmem [resolvable:$true] %s6761_s27 }
 0x63c   : > { %v5646_v55 = vld [vmem:[#allocation12 + $0x1c0] sm:$0xff]  ;;  %s9206_s2 = scalar_lea.vmem %s11196_s27, 16  ;;  %p9213_p12 = scmp.lt.s32.totalorder %s11196_s27, %s9211_s25 }
 0x63d   : > { %7107 = vmatmul.mubr.msk.f32.vlgmr.msra.gmra.mrb[90].mxu1 %vm5349_vm10, %v11075_v51  ;;  %v5650_v54 = vld [vmem:[#allocation12 + $0x1e0] sm:$0xff]  ;;  %p9207_p0 = scmp.ne.s32.totalorder %s11196_s27, %s9206_s2  ;;  %p9214_p10 = scmp.lt.s32.totalorder %s9212_s28, %s9206_s2 }
 0x63e   : > { %8250 = vmatpush1.bf16.msra.mxu1 %v8249_v23  ;;  %5559 = vmatprep.mubr.f32.mxu1 %v9325_v50  ;;  %v5249_v23 = vld [vmem:[#allocation13 + $0x98] sm:$0xff]  ;;  %v8317_v38 = vpack.c.bf16 %v5650_v54, %v5646_v55  ;;  %v5652_v54 = vld [vmem:[#allocation12 + $0x1f0] sm:$0xff] }
 0x63f   : > { %8252 = vmatprep.subr.bf16.mxu1 %v8251_v25  ;;  %v5253_v25 = vld [vmem:[#allocation13 + $0xb8] sm:$0xff]  ;;  %p9208_p5 = pnand %p9207_p0, %p11313_p6  ;;  %p9215_p2 = por %p9214_p10, %p9213_p12 }
 0x640   : > { %v8287_v12 = vpack.c.bf16 %v5253_v25, %v5249_v23  ;;  %v5654_v23 = vld [vmem:[#allocation12 + $0x200] sm:$0xff] }
 0x641   : > { %v5658_v25 = vld [vmem:[#allocation12 + $0x220] sm:$0xff]  ;;  %p9209_p9 = pneg %p9208_p5 }
 0x642   : > { %8254 = vmatpush1.bf16.msra.mxu1 %v8253_v53  ;;  %v5257_v53 = vld [vmem:[#allocation13 + $0xd8] sm:$0xff]  ;;  %v8321_v24 = vpack.c.bf16 %v5658_v25, %v5654_v23 }
 0x643   : > { %8256 = vmatprep.subr.bf16.mxu1 %v8255_v29  ;;  %v5261_v29 = vld [vmem:[#allocation13 + $0xf8] sm:$0xff]  ;;  %p9216_p3 = pnand %p9215_p2, %p9209_p9 }
 0x644   : > { %v8291_v52 = vpack.c.bf16 %v5261_v29, %v5257_v53  ;;  %v5662_v53 = vld [vmem:[#allocation12 + $0x240] sm:$0xff]  ;;  %v5661_v23 = vld [vmem:[#allocation12 + $0x238] sm:$0xff] }
 0x645   : > { %v5666_v29 = vld [vmem:[#allocation12 + $0x260] sm:$0xff] }
 0x646   : > { %8258 = vmatpush1.bf16.msra.mxu1 %v8257_v16  ;;  %v5265_v16 = vld [vmem:[#allocation13 + $0x118] sm:$0xff] }
 0x647   : > { %8260 = vmatprep.subr.bf16.mxu1 %v8259_v41  ;;  %v5269_v41 = vld [vmem:[#allocation13 + $0x138] sm:$0xff] }
 0x648   : > { %v8295_v6 = vpack.c.bf16 %v5269_v41, %v5265_v16  ;;  %v5674_v16 = vld [vmem:[#allocation12 + $0x2a0] sm:$0xff]  ;;  %v5679_v41 = vld [vmem:[#allocation12 + $0x2c8] sm:$0xff] }
 0x64a   : > { %8262 = vmatpush1.bf16.msra.mxu1 %v8261_v49  ;;  %v5273_v49 = vld [vmem:[#allocation13 + $0x158] sm:$0xff] }
 0x64b   : > { %8264 = vmatprep.subr.bf16.mxu1 %v8263_v35  ;;  %v5277_v35 = vld [vmem:[#allocation13 + $0x178] sm:$0xff] }
 0x64c   : > { %v8299_v22 = vpack.c.bf16 %v5277_v35, %v5273_v49  ;;  %v5682_v49 = vld [vmem:[#allocation12 + $0x2e0] sm:$0xff]  ;;  %v5641_v35 = vld [vmem:[#allocation12 + $0x198] sm:$0xff] }
 0x64e   : > { %8266 = vmatpush1.bf16.msra.mxu1 %v8265_v33  ;;  %v5281_v33 = vld [vmem:[#allocation13 + $0x198] sm:$0xff] }
 0x64f   : > { %8268 = vmatprep.subr.bf16.mxu1 %v8267_v10  ;;  %v5285_v10 = vld [vmem:[#allocation13 + $0x1b8] sm:$0xff] }
 0x650   : > { %v8303_v34 = vpack.c.bf16 %v5285_v10, %v5281_v33  ;;  %v6274_v33 = vld [vmem:[#allocation16 + $0x18] sm:$0xff]  ;;  %v6271_v10 = vld [vmem:[#allocation16] sm:$0xff] }
 0x652   : > { %8270 = vmatpush1.bf16.msra.mxu1 %v8269_v13  ;;  %v5289_v13 = vld [vmem:[#allocation13 + $0x1d8] sm:$0xff] }
 0x653   : > { %8272 = vmatprep.subr.bf16.mxu1 %v8271_v7  ;;  %v5293_v7 = vld [vmem:[#allocation13 + $0x1f8] sm:$0xff] }
 0x654   : > { %v8307_v15 = vpack.c.bf16 %v5293_v7, %v5289_v13  ;;  %v6278_v13 = vld [vmem:[#allocation16 + $0x38] sm:$0xff] }
 0x655   : > { %v8459_v60 = vpack.c.bf16 %v6278_v13, %v6276_v61  ;;  %v6293_v61 = vld [vmem:[#allocation16 + $0xb0] sm:$0xff] }
 0x656   : > { %8274 = vmatpush1.bf16.msra.mxu1 %v8273_v40  ;;  %v5639_v40 = vld [vmem:[#allocation12 + $0x188] sm:$0xff] }
 0x657   : > { %8276 = vmatprep.subr.bf16.mxu1 %v8275_v42  ;;  %v5643_v42 = vld [vmem:[#allocation12 + $0x1a8] sm:$0xff] }
 0x658   : > { %v8311_v18 = vpack.c.bf16 %v5643_v42, %v5639_v40  ;;  %v6277_v40 = vld [vmem:[#allocation16 + $0x30] sm:$0xff] }
 0x659   : > { %v5653_v42 = vld [vmem:[#allocation12 + $0x1f8] sm:$0xff]  ;;  %v8461_v36 = vpack.c.bf16 %v6277_v40, %v6275_v14 }
 0x65a   : > { %8278 = vmatpush1.bf16.msra.mxu1 %v8277_v32  ;;  %v5647_v32 = vld [vmem:[#allocation12 + $0x1c8] sm:$0xff]  ;;  %v5685_v14 = vld [vmem:[#allocation12 + $0x2f8] sm:$0xff] }
 0x65b   : > { %8280 = vmatprep.subr.bf16.mxu1 %v8279_v48  ;;  %v5651_v48 = vld [vmem:[#allocation12 + $0x1e8] sm:$0xff] }
 0x65c   : > { %v8315_v20 = vpack.c.bf16 %v5651_v48, %v5647_v32  ;;  %v5648_v32 = vld [vmem:[#allocation12 + $0x1d0] sm:$0xff]  ;;  %v6279_v48 = vld [vmem:[#allocation16 + $0x40] sm:$0xff] }
 0x65d   : > { %5560 = vmatmul.mubr.f32.vlgmr.msra.gmra.mrb[88].mxu1 %v11095_v28 }
 0x65e   : > { %8282 = vmatpush1.bf16.msra.mxu1 %v8281_v46  ;;  %5630 = vmatprep.mubr.f32.mxu1 %v9325_v50  ;;  %v5655_v46 = vld [vmem:[#allocation12 + $0x208] sm:$0xff] }
 0x65f   : > { %8284 = vmatprep.subr.bf16.mxu1 %v8283_v39  ;;  %v5659_v39 = vld [vmem:[#allocation12 + $0x228] sm:$0xff] }
 0x660   : > { %v8319_v26 = vpack.c.bf16 %v5659_v39, %v5655_v46  ;;  %v6284_v39 = vld [vmem:[#allocation16 + $0x68] sm:$0xff] }
 0x662   : > { %8286 = vmatpush1.bf16.msra.mxu1 %v8285_v37  ;;  %v5663_v37 = vld [vmem:[#allocation12 + $0x248] sm:$0xff] }
 0x663   : > { %8288 = vmatprep.subr.bf16.mxu1 %v8287_v12  ;;  %v5667_v12 = vld [vmem:[#allocation12 + $0x268] sm:$0xff] }
 0x664   : > { %v8323_v43 = vpack.c.bf16 %v5667_v12, %v5663_v37  ;;  %v8341_v37 = vpack.c.bf16 %v5652_v54, %v5648_v32  ;;  %v5656_v12 = vld [vmem:[#allocation12 + $0x210] sm:$0xff]  ;;  %v5841_v54 = vld [vmem:[#allocation12 + $0x308] sm:$0xff] }
 0x666   : > { %8290 = vmatpush1.bf16.msra.mxu1 %v8289_v45  ;;  %v5671_v45 = vld [vmem:[#allocation12 + $0x288] sm:$0xff] }
 0x667   : > { %8292 = vmatprep.subr.bf16.mxu1 %v8291_v52  ;;  %v5675_v52 = vld [vmem:[#allocation12 + $0x2a8] sm:$0xff] }
 0x668   : > { %v8327_v57 = vpack.c.bf16 %v5675_v52, %v5671_v45  ;;  %v5660_v45 = vld [vmem:[#allocation12 + $0x230] sm:$0xff] }
 0x669   : > { %v6288_v52 = vld [vmem:[#allocation16 + $0x88] sm:$0xff] }
 0x66a   : > { %8294 = vmatpush1.bf16.msra.mxu1 %v8293_v21  ;;  %v5683_v21 = vld [vmem:[#allocation12 + $0x2e8] sm:$0xff] }
 0x66b   : > { %8296 = vmatprep.subr.bf16.mxu1 %v8295_v6  ;;  %v8329_v6 = vpack.c.bf16 %v5674_v16, %v5670_v31  ;;  %v8331_v63 = vpack.c.bf16 %v5683_v21, %v5679_v41  ;;  %v5669_v31 = vld [vmem:[#allocation12 + $0x278] sm:$0xff]  ;;  %v8345_v41 = vpack.c.bf16 %v5660_v45, %v5656_v12  ;;  %v5664_v21 = vld [vmem:[#allocation12 + $0x250] sm:$0xff]  ;;  %v5840_v12 = vld [vmem:[#allocation12 + $0x300] sm:$0xff] }
 0x66c   : > { %v6306_v45 = vld [vmem:[#allocation16 + $0x118] sm:$0xff] }
 0x66e   : > { %8298 = vmatpush1.bf16.msra.mxu1 %v8297_v62  ;;  %v5645_v62 = vld [vmem:[#allocation12 + $0x1b8] sm:$0xff] }
 0x66f   : > { %8300 = vmatprep.subr.bf16.mxu1 %v8299_v22  ;;  %v5640_v22 = vld [vmem:[#allocation12 + $0x190] sm:$0xff]  ;;  %v8335_v7 = vpack.c.bf16 %v5645_v62, %v5641_v35 }
 0x670   : > { %v8337_v30 = vpack.c.bf16 %v5644_v27, %v5640_v22  ;;  %v5668_v35 = vld [vmem:[#allocation12 + $0x270] sm:$0xff]  ;;  %v6294_v22 = vld [vmem:[#allocation16 + $0xb8] sm:$0xff] }
 0x671   : > { %v6292_v62 = vld [vmem:[#allocation16 + $0xa8] sm:$0xff]  ;;  %v5673_v27 = vld [vmem:[#allocation12 + $0x298] sm:$0xff] }
 0x672   : > { %8302 = vmatpush1.bf16.msra.mxu1 %v8301_v58  ;;  %v8333_v58 = vpack.c.bf16 %v5682_v49, %v5678_v17  ;;  %v6289_v17 = vld [vmem:[#allocation16 + $0x90] sm:$0xff] }
 0x673   : > { %8304 = vmatprep.subr.bf16.mxu1 %v8303_v34  ;;  %v8455_v34 = vpack.c.bf16 %v6274_v33, %v6272_v44  ;;  %v5677_v44 = vld [vmem:[#allocation12 + $0x2b8] sm:$0xff] }
 0x674   : > { %v8351_v13 = vpack.c.bf16 %v5677_v44, %v5673_v27  ;;  %v5856_v27 = vld [vmem:[#allocation12 + $0x380] sm:$0xff] }
 0x675   : > { %8456 = vmatprep.subr.bf16.mxu0 %v8455_v34  ;;  %v8475_v34 = vpack.c.bf16 %v6294_v22, %v6292_v62 }
 0x676   : > { %8306 = vmatpush1.bf16.msra.mxu1 %v8305_v11  ;;  %v5649_v11 = vld [vmem:[#allocation12 + $0x1d8] sm:$0xff] }
 0x677   : > { %8308 = vmatprep.subr.bf16.mxu1 %v8307_v15  ;;  %v8457_v15 = vpack.c.bf16 %v6273_v3, %v6271_v10  ;;  %v8339_v55 = vpack.c.bf16 %v5653_v42, %v5649_v11  ;;  %v8349_v10 = vpack.c.bf16 %v5668_v35, %v5664_v21  ;;  %v6291_v3 = vld [vmem:[#allocation16 + $0xa0] sm:$0xff]  ;;  %v6296_v11 = vld [vmem:[#allocation16 + $0xc8] sm:$0xff] }
 0x678   : > { %v8477_v40 = vpack.c.bf16 %v6293_v61, %v6291_v3  ;;  %v5852_v21 = vld [vmem:[#allocation12 + $0x360] sm:$0xff]  ;;  %v5861_v35 = vld [vmem:[#allocation12 + $0x3a8] sm:$0xff] }
 0x679   : > { %8458 = vmatpush1.bf16.msra.mxu0 %v8457_v15  ;;  %v6298_v15 = vld [vmem:[#allocation16 + $0xd8] sm:$0xff]  ;;  %v6312_v3 = vld [vmem:[#allocation16 + $0x148] sm:$0xff] }
 0x67a   : > { %8310 = vmatpush1.bf16.msra.mxu1 %v8309_v1  ;;  %v6280_v1 = vld [vmem:[#allocation16 + $0x48] sm:$0xff]  ;;  %8460 = vmatprep.subr.bf16.mxu0 %v8459_v60  ;;  %v5681_v60 = vld [vmem:[#allocation12 + $0x2d8] sm:$0xff] }
 0x67b   : > { %8312 = vmatprep.subr.bf16.mxu1 %v8311_v18  ;;  %v6282_v18 = vld [vmem:[#allocation16 + $0x58] sm:$0xff]  ;;  %v8355_v32 = vpack.c.bf16 %v5685_v14, %v5681_v60  ;;  %v6311_v60 = vld [vmem:[#allocation16 + $0x140] sm:$0xff]  ;;  %v6313_v14 = vld [vmem:[#allocation16 + $0x150] sm:$0xff] }
 0x67c   : > { %v8463_v46 = vpack.c.bf16 %v6282_v18, %v6280_v1  ;;  %v5680_v1 = vld [vmem:[#allocation12 + $0x2d0] sm:$0xff]  ;;  %v8479_v18 = vpack.c.bf16 %v6298_v15, %v6296_v11  ;;  %v6314_v61 = vld [vmem:[#allocation16 + $0x158] sm:$0xff] }
 0x67d   : > { %5631 = vmatmul.mubr.f32.vlgmr.msra.gmra.mrb[90].mxu1 %v11095_v28  ;;  %v8325_v28 = vpack.c.bf16 %v5666_v29, %v5662_v53  ;;  %8462 = vmatpush1.bf16.msra.mxu0 %v8461_v36  ;;  %v6285_v53 = vld [vmem:[#allocation16 + $0x70] sm:$0xff]  ;;  %v6295_v36 = vld [vmem:[#allocation16 + $0xc0] sm:$0xff]  ;;  %v8495_v15 = vpack.c.bf16 %v6314_v61, %v6312_v3 }
 0x67e   : > { %8314 = vmatpush1.bf16.msra.mxu1 %v8313_v9  ;;  %5753 = vmatprep.mubr.f32.mxu1 %v9325_v50  ;;  %v6281_v9 = vld [vmem:[#allocation16 + $0x50] sm:$0xff]  ;;  %v5864_v11 = vld [vmem:[#allocation12 + $0x3c0] sm:$0xff] }
 0x67f   : > { %8316 = vmatprep.subr.bf16.mxu1 %v8315_v20  ;;  %v5686_v20 = vrot.slane %v11075_v51, 3  ;;  %v8465_v25 = vpack.c.bf16 %v6281_v9, %v6279_v48  ;;  %8464 = vmatprep.subr.bf16.mxu0 %v8463_v46  ;;  %v5684_v48 = vld [vmem:[#allocation12 + $0x2f0] sm:$0xff]  ;;  %v5845_v46 = vld [vmem:[#allocation12 + $0x328] sm:$0xff] }
 0x680   : > { %v6300_v9 = vld [vmem:[#allocation16 + $0xe8] sm:$0xff]  ;;  %v6327_v3 = vld [vmem:[#allocation16 + $0x1c0] sm:$0xff]  ;;  %v6329_v61 = vld [vmem:[#allocation16 + $0x1d0] sm:$0xff] }
 0x681   : > { %8466 = vmatpush1.bf16.msra.mxu0 %v8465_v25  ;;  %v6301_v25 = vld [vmem:[#allocation16 + $0xf0] sm:$0xff]  ;;  %v5869_v51 = vld [vmem:[#allocation12 + $0x3e8] sm:$0xff] }
 0x682   : > { %8318 = vmatpush1.bf16.msra.mxu1 %v8317_v38  ;;  %v6286_v38 = vld [vmem:[#allocation16 + $0x78] sm:$0xff] }
 0x683   : > { %8320 = vmatprep.subr.bf16.mxu1 %v8319_v26  ;;  %v5657_v26 = vld [vmem:[#allocation12 + $0x218] sm:$0xff] }
 0x684   : > { %v8343_v29 = vpack.c.bf16 %v5661_v23, %v5657_v26  ;;  %v6299_v23 = vld [vmem:[#allocation16 + $0xe0] sm:$0xff] }
 0x686   : > { %8322 = vmatpush1.bf16.msra.mxu1 %v8321_v24  ;;  %v8467_v24 = vpack.c.bf16 %v6286_v38, %v6284_v39  ;;  %v8357_v38 = vpack.c.bf16 %v5684_v48, %v5680_v1  ;;  %v6316_v1 = vld [vmem:[#allocation16 + $0x168] sm:$0xff] }
 0x687   : > { %8324 = vmatprep.subr.bf16.mxu1 %v8323_v43  ;;  %v6283_v43 = vld [vmem:[#allocation16 + $0x60] sm:$0xff] }
 0x688   : > { %v8469_v16 = vpack.c.bf16 %v6285_v53, %v6283_v43  ;;  %8468 = vmatprep.subr.bf16.mxu0 %v8467_v24  ;;  %v5844_v24 = vld [vmem:[#allocation12 + $0x320] sm:$0xff]  ;;  %v5849_v43 = vld [vmem:[#allocation12 + $0x348] sm:$0xff] }
 0x689   : > { %v5853_v53 = vld [vmem:[#allocation12 + $0x368] sm:$0xff] }
 0x68a   : > { %8326 = vmatpush1.bf16.msra.mxu1 %v8325_v28  ;;  %v6290_v28 = vld [vmem:[#allocation16 + $0x98] sm:$0xff]  ;;  %8470 = vmatpush1.bf16.msra.mxu0 %v8469_v16  ;;  %v6305_v16 = vld [vmem:[#allocation16 + $0x110] sm:$0xff] }
 0x68b   : > { %8328 = vmatprep.subr.bf16.mxu1 %v8327_v57  ;;  %v5665_v57 = vld [vmem:[#allocation12 + $0x258] sm:$0xff] }
 0x68c   : > { %v8347_v49 = vpack.c.bf16 %v5669_v31, %v5665_v57  ;;  %v5848_v57 = vld [vmem:[#allocation12 + $0x340] sm:$0xff] }
 0x68d   : > { %v6303_v31 = vld [vmem:[#allocation16 + $0x100] sm:$0xff]  ;;  %v8365_v22 = vpack.c.bf16 %v5852_v21, %v5848_v57  ;;  %v6324_v57 = vld [vmem:[#allocation16 + $0x1a8] sm:$0xff] }
 0x68e   : > { %8330 = vmatpush1.bf16.msra.mxu1 %v8329_v6  ;;  %v8471_v6 = vpack.c.bf16 %v6290_v28, %v6288_v52  ;;  %v8485_v52 = vpack.c.bf16 %v6301_v25, %v6299_v23  ;;  %v8361_v28 = vpack.c.bf16 %v5844_v24, %v5840_v12  ;;  %v8489_v62 = vpack.c.bf16 %v6305_v16, %v6303_v31  ;;  %v6322_v23 = vld [vmem:[#allocation16 + $0x198] sm:$0xff]  ;;  %v5881_v25 = vld [vmem:[#allocation12 + $0x448] sm:$0xff] }
 0x68f   : > { %8332 = vmatprep.subr.bf16.mxu1 %v8331_v63  ;;  %v6287_v63 = vld [vmem:[#allocation16 + $0x80] sm:$0xff]  ;;  %v6326_v31 = vld [vmem:[#allocation16 + $0x1b8] sm:$0xff] }
 0x690   : > { %v8473_v33 = vpack.c.bf16 %v6289_v17, %v6287_v63  ;;  %8472 = vmatprep.subr.bf16.mxu0 %v8471_v6  ;;  %v6308_v63 = vld [vmem:[#allocation16 + $0x128] sm:$0xff]  ;;  %v6310_v17 = vld [vmem:[#allocation16 + $0x138] sm:$0xff] }
 0x691   : > { %v8491_v44 = vpack.c.bf16 %v6310_v17, %v6308_v63  ;;  %v5843_v16 = vld [vmem:[#allocation12 + $0x318] sm:$0xff]  ;;  %v8507_v63 = vpack.c.bf16 %v6326_v31, %v6324_v57  ;;  %v6323_v17 = vld [vmem:[#allocation16 + $0x1a0] sm:$0xff] }
 0x692   : > { %8334 = vmatpush1.bf16.msra.mxu1 %v8333_v58  ;;  %v5672_v58 = vld [vmem:[#allocation12 + $0x290] sm:$0xff]  ;;  %8474 = vmatpush1.bf16.msra.mxu0 %v8473_v33  ;;  %v6307_v33 = vld [vmem:[#allocation16 + $0x120] sm:$0xff] }
 0x693   : > { %8336 = vmatprep.subr.bf16.mxu1 %v8335_v7  ;;  %v5676_v7 = vld [vmem:[#allocation12 + $0x2b0] sm:$0xff]  ;;  %8476 = vmatprep.subr.bf16.mxu0 %v8475_v34  ;;  %v5860_v34 = vld [vmem:[#allocation12 + $0x3a0] sm:$0xff]  ;;  %v6052_v31 = vld [vmem:[#allocation12 + $0x4c8] sm:$0xff] }
 0x694   : > { %v8353_v42 = vpack.c.bf16 %v5676_v7, %v5672_v58  ;;  %v8369_v7 = vpack.c.bf16 %v5860_v34, %v5856_v27  ;;  %v5851_v27 = vld [vmem:[#allocation12 + $0x358] sm:$0xff]  ;;  %v6047_v57 = vld [vmem:[#allocation12 + $0x4a0] sm:$0xff] }
 0x695   : > { %7108 = vmatmul.mubr.msk.f32.vlgmr.msra.gmra.mrb[88].mxu1 %vm5349_vm10, %v5686_v20 }
 0x696   : > { %8338 = vmatpush1.bf16.msra.mxu1 %v8337_v30  ;;  %5824 = vmatprep.mubr.f32.mxu1 %v9325_v50  ;;  %v6297_v30 = vld [vmem:[#allocation16 + $0xd0] sm:$0xff] }
 0x697   : > { %8340 = vmatprep.subr.bf16.mxu1 %v8339_v55  ;;  %v6302_v55 = vld [vmem:[#allocation16 + $0xf8] sm:$0xff]  ;;  %8478 = vmatpush1.bf16.msra.mxu0 %v8477_v40  ;;  %v8481_v39 = vpack.c.bf16 %v6297_v30, %v6295_v36  ;;  %v5873_v36 = vld [vmem:[#allocation12 + $0x408] sm:$0xff] }
 0x698   : > { %8480 = vmatprep.subr.bf16.mxu0 %v8479_v18  ;;  %v8483_v26 = vpack.c.bf16 %v6302_v55, %v6300_v9  ;;  %v6318_v18 = vld [vmem:[#allocation16 + $0x178] sm:$0xff]  ;;  %v5877_v30 = vld [vmem:[#allocation12 + $0x428] sm:$0xff] }
 0x699   : > { %v5872_v9 = vld [vmem:[#allocation12 + $0x400] sm:$0xff]  ;;  %v8499_v55 = vpack.c.bf16 %v6318_v18, %v6316_v1  ;;  %v5858_v1 = vld [vmem:[#allocation12 + $0x390] sm:$0xff] }
 0x69a   : > { %8342 = vmatpush1.bf16.msra.mxu1 %v8341_v37  ;;  %v8359_v37 = vpack.c.bf16 %v5845_v46, %v5841_v54  ;;  %v6315_v54 = vld [vmem:[#allocation16 + $0x160] sm:$0xff]  ;;  %v6317_v46 = vld [vmem:[#allocation16 + $0x170] sm:$0xff] }
 0x69b   : > { %8344 = vmatprep.subr.bf16.mxu1 %v8343_v29  ;;  %v6304_v29 = vld [vmem:[#allocation16 + $0x108] sm:$0xff]  ;;  %8482 = vmatpush1.bf16.msra.mxu0 %v8481_v39  ;;  %v8375_v39 = vpack.c.bf16 %v5877_v30, %v5873_v36  ;;  %v8501_v12 = vpack.c.bf16 %v6317_v46, %v6315_v54  ;;  %v5871_v36 = vld [vmem:[#allocation12 + $0x3f8] sm:$0xff] }
 0x69c   : > { %8484 = vmatprep.subr.bf16.mxu0 %v8483_v26  ;;  %v8487_v6 = vpack.c.bf16 %v6306_v45, %v6304_v29  ;;  %v6320_v26 = vld [vmem:[#allocation16 + $0x188] sm:$0xff]  ;;  %v6319_v29 = vld [vmem:[#allocation16 + $0x180] sm:$0xff]  ;;  %v6321_v45 = vld [vmem:[#allocation16 + $0x190] sm:$0xff] }
 0x69d   : > { %v8505_v21 = vpack.c.bf16 %v6321_v45, %v6319_v29  ;;  %v5862_v18 = vld [vmem:[#allocation12 + $0x3b0] sm:$0xff]  ;;  %v5879_v54 = vld [vmem:[#allocation12 + $0x438] sm:$0xff]  ;;  %v6048_v29 = vld [vmem:[#allocation12 + $0x4a8] sm:$0xff] }
 0x69e   : > { %8346 = vmatpush1.bf16.msra.mxu1 %v8345_v41  ;;  %v8363_v41 = vpack.c.bf16 %v5853_v53, %v5849_v43  ;;  %v5880_v43 = vld [vmem:[#allocation12 + $0x440] sm:$0xff]  ;;  %v8503_v53 = vpack.c.bf16 %v6322_v23, %v6320_v26  ;;  %v8393_v30 = vpack.c.bf16 %v5862_v18, %v5858_v1  ;;  %v5878_v26 = vld [vmem:[#allocation12 + $0x430] sm:$0xff]  ;;  %v5883_v23 = vld [vmem:[#allocation12 + $0x458] sm:$0xff] }
 0x69f   : > { %8348 = vmatprep.subr.bf16.mxu1 %v8347_v49  ;;  %v5857_v49 = vld [vmem:[#allocation12 + $0x388] sm:$0xff]  ;;  %8486 = vmatpush1.bf16.msra.mxu0 %v8485_v52  ;;  %v6083_v18 = vld [vmem:[#allocation12 + $0x5c0] sm:$0xff] }
 0x6a0   : > { %v8367_v58 = vpack.c.bf16 %v5861_v35, %v5857_v49  ;;  %8488 = vmatprep.subr.bf16.mxu0 %v8487_v6  ;;  %v6325_v49 = vld [vmem:[#allocation16 + $0x1b0] sm:$0xff] }
 0x6a2   : > { %8350 = vmatpush1.bf16.msra.mxu1 %v8349_v10  ;;  %v6309_v10 = vld [vmem:[#allocation16 + $0x130] sm:$0xff] }
 0x6a3   : > { %8352 = vmatprep.subr.bf16.mxu1 %v8351_v13  ;;  %v5865_v13 = vld [vmem:[#allocation12 + $0x3c8] sm:$0xff]  ;;  %8490 = vmatpush1.bf16.msra.mxu0 %v8489_v62  ;;  %v5842_v62 = vld [vmem:[#allocation12 + $0x310] sm:$0xff] }
 0x6a4   : > { %8492 = vmatprep.subr.bf16.mxu0 %v8491_v44  ;;  %v8371_v40 = vpack.c.bf16 %v5869_v51, %v5865_v13  ;;  %v5855_v44 = vld [vmem:[#allocation12 + $0x378] sm:$0xff]  ;;  %v5889_v13 = vrot.slane %v11086_v4, 6 }
 0x6a5   : > { %v8387_v51 = vpack.c.bf16 %v5855_v44, %v5851_v27  ;;  %v5867_v4 = vld [vmem:[#allocation12 + $0x3d8] sm:$0xff]  ;;  %v6063_v27 = vld [vmem:[#allocation12 + $0x520] sm:$0xff]  ;;  %v6068_v44 = vld [vmem:[#allocation12 + $0x548] sm:$0xff] }
 0x6a6   : > { %8354 = vmatpush1.bf16.msra.mxu1 %v8353_v42  ;;  %v5868_v42 = vld [vmem:[#allocation12 + $0x3e0] sm:$0xff] }
 0x6a7   : > { %8356 = vmatprep.subr.bf16.mxu1 %v8355_v32  ;;  %v8497_v32 = vpack.c.bf16 %v6313_v14, %v6311_v60  ;;  %v8373_v48 = vpack.c.bf16 %v5868_v42, %v5864_v11  ;;  %v5863_v60 = vld [vmem:[#allocation12 + $0x3b8] sm:$0xff]  ;;  %v8513_v14 = vpack.c.bf16 %v6329_v61, %v6327_v3  ;;  %v6071_v3 = vld [vmem:[#allocation12 + $0x560] sm:$0xff]  ;;  %v6076_v61 = vld [vmem:[#allocation12 + $0x588] sm:$0xff] }
 0x6aa   : > { %8358 = vmatpush1.bf16.msra.mxu1 %v8357_v38  ;;  %v5876_v38 = vld [vmem:[#allocation12 + $0x420] sm:$0xff] }
 0x6ab   : > { %8360 = vmatprep.subr.bf16.mxu1 %v8359_v37  ;;  %v5885_v37 = vld [vmem:[#allocation12 + $0x468] sm:$0xff]  ;;  %v8377_v24 = vpack.c.bf16 %v5876_v38, %v5872_v9  ;;  %v5870_v9 = vld [vmem:[#allocation12 + $0x3f0] sm:$0xff] }
 0x6ac   : > { %v8379_v52 = vpack.c.bf16 %v5885_v37, %v5881_v25  ;;  %v5874_v38 = vld [vmem:[#allocation12 + $0x410] sm:$0xff]  ;;  %v5887_v25 = vld [vmem:[#allocation12 + $0x478] sm:$0xff] }
 0x6ad   : > { %7109 = vmatmul.mubr.msk.f32.vlgmr.msra.gmra.mrb[90].mxu1 %vm5349_vm10, %v5686_v20  ;;  %v8493_v20 = vpack.c.bf16 %v6309_v10, %v6307_v33  ;;  %v6328_v33 = vld [vmem:[#allocation16 + $0x1c8] sm:$0xff]  ;;  %v6330_v10 = vld [vmem:[#allocation16 + $0x1d8] sm:$0xff]  ;;  %v8401_v37 = vpack.c.bf16 %v5878_v26, %v5874_v38 }
 0x6ae   : > { %8362 = vmatpush1.bf16.msra.mxu1 %v8361_v28  ;;  %5956 = vmatprep.mubr.f32.mxu1 %v9325_v50  ;;  %v5884_v28 = vld [vmem:[#allocation12 + $0x460] sm:$0xff]  ;;  %v8511_v11 = vpack.c.bf16 %v6330_v10, %v6328_v33  ;;  %v6072_v33 = vld [vmem:[#allocation12 + $0x568] sm:$0xff] }
 0x6af   : > { %8364 = vmatprep.subr.bf16.mxu1 %v8363_v41  ;;  %8494 = vmatpush1.bf16.msra.mxu0 %v8493_v20  ;;  %v5847_v41 = vld [vmem:[#allocation12 + $0x338] sm:$0xff]  ;;  %v8381_v6 = vpack.c.bf16 %v5884_v28, %v5880_v43  ;;  %v5850_v20 = vld [vmem:[#allocation12 + $0x350] sm:$0xff]  ;;  %v6043_v28 = vld [vmem:[#allocation12 + $0x480] sm:$0xff] }
 0x6b0   : > { %8496 = vmatprep.subr.bf16.mxu0 %v8495_v15  ;;  %v8383_v35 = vpack.c.bf16 %v5847_v41, %v5843_v16  ;;  %v5859_v15 = vld [vmem:[#allocation12 + $0x398] sm:$0xff]  ;;  %v5886_v43 = vld [vmem:[#allocation12 + $0x470] sm:$0xff]  ;;  %v6056_v16 = vld [vmem:[#allocation12 + $0x4e8] sm:$0xff]  ;;  %v8409_v41 = vpack.c.bf16 %v6047_v57, %v6043_v28 }
 0x6b1   : > { %v8391_v42 = vpack.c.bf16 %v5863_v60, %v5859_v15  ;;  %v6079_v15 = vld [vmem:[#allocation12 + $0x5a0] sm:$0xff]  ;;  %v6084_v60 = vld [vmem:[#allocation12 + $0x5c8] sm:$0xff]  ;;  %v6069_v57 = vld [vmem:[#allocation12 + $0x550] sm:$0xff] }
 0x6b2   : > { %8366 = vmatpush1.bf16.msra.mxu1 %v8365_v22  ;;  %v5846_v22 = vld [vmem:[#allocation12 + $0x330] sm:$0xff] }
 0x6b3   : > { %8368 = vmatprep.subr.bf16.mxu1 %v8367_v58  ;;  %8498 = vmatpush1.bf16.msra.mxu0 %v8497_v32  ;;  %v8509_v58 = vpack.c.bf16 %v6325_v49, %v6323_v17  ;;  %v8385_v34 = vpack.c.bf16 %v5846_v22, %v5842_v62  ;;  %v8395_v32 = vpack.c.bf16 %v5871_v36, %v5867_v4  ;;  %v6060_v17 = vld [vmem:[#allocation12 + $0x508] sm:$0xff]  ;;  %v6059_v22 = vld [vmem:[#allocation12 + $0x500] sm:$0xff]  ;;  %v6046_v36 = vld [vmem:[#allocation12 + $0x498] sm:$0xff] }
 0x6b4   : > { %8500 = vmatprep.subr.bf16.mxu0 %v8499_v55  ;;  %v5875_v55 = vld [vmem:[#allocation12 + $0x418] sm:$0xff]  ;;  %v6064_v49 = vld [vmem:[#allocation12 + $0x528] sm:$0xff]  ;;  %v8417_v10 = vpack.c.bf16 %v6063_v27, %v6059_v22  ;;  %v6087_v4 = vld [vmem:[#allocation12 + $0x5e0] sm:$0xff] }
 0x6b5   : > { %v8415_v62 = vpack.c.bf16 %v6064_v49, %v6060_v17  ;;  %v6081_v17 = vld [vmem:[#allocation12 + $0x5b0] sm:$0xff]  ;;  %v6086_v49 = vld [vmem:[#allocation12 + $0x5d8] sm:$0xff] }
 0x6b6   : > { %8370 = vmatpush1.bf16.msra.mxu1 %v8369_v7  ;;  %v5854_v7 = vld [vmem:[#allocation12 + $0x370] sm:$0xff] }
 0x6b7   : > { %8372 = vmatprep.subr.bf16.mxu1 %v8371_v40  ;;  %8502 = vmatpush1.bf16.msra.mxu0 %v8501_v12  ;;  %v8389_v40 = vpack.c.bf16 %v5854_v7, %v5850_v20  ;;  %v8403_v12 = vpack.c.bf16 %v5887_v25, %v5883_v23  ;;  %v6038_v20 = vrot.slane %v11078_v2, 1  ;;  %v6053_v25 = vld [vmem:[#allocation12 + $0x4d0] sm:$0xff] }
 0x6b8   : > { %8504 = vmatprep.subr.bf16.mxu0 %v8503_v53  ;;  %v6044_v53 = vld [vmem:[#allocation12 + $0x488] sm:$0xff]  ;;  %v6085_v27 = vld [vmem:[#allocation12 + $0x5d0] sm:$0xff] }
 0x6ba   : > { %8374 = vmatpush1.bf16.msra.mxu1 %v8373_v48  ;;  %v5866_v48 = vld [vmem:[#allocation12 + $0x3d0] sm:$0xff] }
 0x6bb   : > { %8376 = vmatprep.subr.bf16.mxu1 %v8375_v39  ;;  %8506 = vmatpush1.bf16.msra.mxu0 %v8505_v21  ;;  %v8397_v46 = vpack.c.bf16 %v5870_v9, %v5866_v48  ;;  %v8399_v39 = vpack.c.bf16 %v5879_v54, %v5875_v55  ;;  %v8411_v21 = vpack.c.bf16 %v6056_v16, %v6052_v31  ;;  %v6045_v55 = vld [vmem:[#allocation12 + $0x490] sm:$0xff]  ;;  %v6078_v16 = vld [vmem:[#allocation12 + $0x598] sm:$0xff] }
 0x6bc   : > { %8508 = vmatprep.subr.bf16.mxu0 %v8507_v63  ;;  %v6055_v63 = vld [vmem:[#allocation12 + $0x4e0] sm:$0xff]  ;;  %v6049_v54 = vld [vmem:[#allocation12 + $0x4b0] sm:$0xff] }
 0x6bd   : > { %v8433_v38 = vpack.c.bf16 %v6049_v54, %v6045_v55  ;;  %v6073_v31 = vld [vmem:[#allocation12 + $0x570] sm:$0xff]  ;;  %v6339_v54 = vld [vmem:[#allocation16 + $0x220] sm:$0xff] }
 0x6be   : > { %8378 = vmatpush1.bf16.msra.mxu1 %v8377_v24  ;;  %v5882_v24 = vld [vmem:[#allocation12 + $0x450] sm:$0xff] }
 0x6bf   : > { %8380 = vmatprep.subr.bf16.mxu1 %v8379_v52  ;;  %8510 = vmatpush1.bf16.msra.mxu0 %v8509_v58  ;;  %v8405_v45 = vpack.c.bf16 %v5886_v43, %v5882_v24  ;;  %v8407_v52 = vpack.c.bf16 %v6048_v29, %v6044_v53  ;;  %v8419_v58 = vpack.c.bf16 %v6072_v33, %v6068_v44  ;;  %v6066_v24 = vld [vmem:[#allocation12 + $0x538] sm:$0xff]  ;;  %v6061_v43 = vld [vmem:[#allocation12 + $0x510] sm:$0xff] }
 0x6c0   : > { %8512 = vmatprep.subr.bf16.mxu0 %v8511_v11  ;;  %v6075_v11 = vld [vmem:[#allocation12 + $0x580] sm:$0xff]  ;;  %v6065_v53 = vld [vmem:[#allocation12 + $0x530] sm:$0xff]  ;;  %v6070_v29 = vld [vmem:[#allocation12 + $0x558] sm:$0xff] }
 0x6c1   : > { %v6089_v44 = vld [vmem:[#allocation12 + $0x5f0] sm:$0xff] }
 0x6c2   : > { %8382 = vmatpush1.bf16.msra.mxu1 %v8381_v6  ;;  %v6051_v6 = vld [vmem:[#allocation12 + $0x4c0] sm:$0xff]  ;;  %v8453_v33 = vpack.c.bf16 %v6089_v44, %v6085_v27 }
 0x6c3   : > { %8384 = vmatprep.subr.bf16.mxu1 %v8383_v35  ;;  %8514 = vmatpush1.bf16.msra.mxu0 %v8513_v14  ;;  %v8413_v35 = vpack.c.bf16 %v6055_v63, %v6051_v6  ;;  %v6088_v14 = vld [vmem:[#allocation12 + $0x5e8] sm:$0xff]  ;;  %v6077_v63 = vld [vmem:[#allocation12 + $0x590] sm:$0xff] }
 0x6c4   : > { %v8427_v1 = vpack.c.bf16 %v6088_v14, %v6084_v60 }
 0x6c5   : > { %7110 = vmatmul.mubr.msk.f32.vlgmr.msra.gmra.mrb[88].mxu1 %vm5349_vm10, %v5889_v13 }
 0x6c6   : > { %8386 = vmatpush1.bf16.msra.mxu1 %v8385_v34  ;;  %6027 = vmatprep.mubr.f32.mxu1 %v9325_v50  ;;  %v6067_v34 = vld [vmem:[#allocation12 + $0x540] sm:$0xff] }
 0x6c7   : > { %8388 = vmatprep.subr.bf16.mxu1 %v8387_v51  ;;  %v6080_v51 = vld [vmem:[#allocation12 + $0x5a8] sm:$0xff] }
 0x6c8   : > { %v8423_v7 = vpack.c.bf16 %v6080_v51, %v6076_v61  ;;  %v6333_v61 = vld [vmem:[#allocation16 + $0x1f0] sm:$0xff] }
 0x6ca   : > { %8390 = vmatpush1.bf16.msra.mxu1 %v8389_v40  ;;  %v8425_v40 = vpack.c.bf16 %v6079_v15, %v6075_v11  ;;  %v6241_v11 = vld [vmem:[#allocation15] sm:$0xf] }
 0x6cb   : > { %8392 = vmatprep.subr.bf16.mxu1 %v8391_v42  ;;  %v6040_v42 = vmax.f32 %v11078_v2, %v6038_v20  ;;  %v6338_v20 = vld [vmem:[#allocation16 + $0x218] sm:$0xff]  ;;  %v6246_v15 = vrot.slane %v6241_v11, %v10652_v8  ;;  %v6250_v60 = vrot.slane %v6241_v11, %v10658_v56 }
 0x6cd   : > { %v6041_v48 = vmax.f32 %v6040_v42, %v5836_v47 }
 0x6ce   : > { %8394 = vmatpush1.bf16.msra.mxu1 %v8393_v30  ;;  %v6050_v30 = vld [vmem:[#allocation12 + $0x4b8] sm:$0xff] }
 0x6cf   : > { %8396 = vmatprep.subr.bf16.mxu1 %v8395_v32  ;;  %v8429_v32 = vpack.c.bf16 %v6087_v4, %v6083_v18  ;;  %v8431_v9 = vpack.c.bf16 %v6050_v30, %v6046_v36  ;;  %v6092_v26 = vrot.slane %v6041_v48, 1  ;;  %v6337_v18 = vld [vmem:[#allocation16 + $0x210] sm:$0xff]  ;;  %v6340_v36 = vld [vmem:[#allocation16 + $0x228] sm:$0xff]  ;;  %v6342_v30 = vld [vmem:[#allocation16 + $0x238] sm:$0xff] }
 0x6d0   : > { %v8523_v55 = vpack.c.bf16 %v6342_v30, %v6340_v36  ;;  %v6371_v30 = vld [vmem:[#allocation16 + $0x320] sm:$0xff] }
 0x6d2   : > { %8398 = vmatpush1.bf16.msra.mxu1 %v8397_v46  ;;  %v6054_v46 = vld [vmem:[#allocation12 + $0x4d8] sm:$0xff] }
 0x6d3   : > { %8400 = vmatprep.subr.bf16.mxu1 %v8399_v39  ;;  %v6058_v39 = vld [vmem:[#allocation12 + $0x4f8] sm:$0xff] }
 0x6d4   : > { %v8435_v23 = vpack.c.bf16 %v6058_v39, %v6054_v46  ;;  %v6341_v46 = vld [vmem:[#allocation16 + $0x230] sm:$0xff]  ;;  %v6344_v39 = vld [vmem:[#allocation16 + $0x248] sm:$0xff] }
 0x6d6   : > { %8402 = vmatpush1.bf16.msra.mxu1 %v8401_v37  ;;  %v6057_v37 = vld [vmem:[#allocation12 + $0x4f0] sm:$0xff] }
 0x6d7   : > { %8404 = vmatprep.subr.bf16.mxu1 %v8403_v12  ;;  %v6062_v12 = vld [vmem:[#allocation12 + $0x518] sm:$0xff]  ;;  %v8437_v2 = vpack.c.bf16 %v6057_v37, %v6053_v25  ;;  %v6343_v25 = vld [vmem:[#allocation16 + $0x240] sm:$0xff] }
 0x6d8   : > { %v8439_v47 = vpack.c.bf16 %v6066_v24, %v6062_v12  ;;  %v6345_v37 = vld [vmem:[#allocation16 + $0x250] sm:$0xff]  ;;  %v6348_v12 = vld [vmem:[#allocation16 + $0x268] sm:$0xff]  ;;  %v6350_v24 = vld [vmem:[#allocation16 + $0x278] sm:$0xff] }
 0x6da   : > { %8406 = vmatpush1.bf16.msra.mxu1 %v8405_v45  ;;  %v6074_v45 = vld [vmem:[#allocation12 + $0x578] sm:$0xff] }
 0x6db   : > { %8408 = vmatprep.subr.bf16.mxu1 %v8407_v52  ;;  %v8441_v52 = vpack.c.bf16 %v6065_v53, %v6061_v43  ;;  %v8443_v28 = vpack.c.bf16 %v6074_v45, %v6070_v29  ;;  %v6347_v43 = vld [vmem:[#allocation16 + $0x260] sm:$0xff]  ;;  %v6349_v53 = vld [vmem:[#allocation16 + $0x270] sm:$0xff]  ;;  %v6352_v29 = vld [vmem:[#allocation16 + $0x288] sm:$0xff] }
 0x6dc   : > { %v6354_v45 = vld [vmem:[#allocation16 + $0x298] sm:$0xff] }
 0x6dd   : > { %7111 = vmatmul.mubr.msk.f32.vlgmr.msra.gmra.mrb[90].mxu1 %vm5349_vm10, %v5889_v13  ;;  %v8421_v13 = vpack.c.bf16 %v6071_v3, %v6067_v34  ;;  %v6331_v3 = vld [vmem:[#allocation16 + $0x1e0] sm:$0xff] }
 0x6de   : > { %8410 = vmatpush1.bf16.msra.mxu1 %v8409_v41  ;;  %6159 = vmatprep.mubr.f32.mxu1 %v9325_v50  ;;  %v6082_v41 = vld [vmem:[#allocation12 + $0x5b8] sm:$0xff]  ;;  %v8517_v51 = vpack.c.bf16 %v6333_v61, %v6331_v3 }
 0x6df   : > { %8412 = vmatprep.subr.bf16.mxu1 %v8411_v21  ;;  %v8445_v21 = vpack.c.bf16 %v6073_v31, %v6069_v57  ;;  %v8447_v6 = vpack.c.bf16 %v6082_v41, %v6078_v16  ;;  %v6351_v57 = vld [vmem:[#allocation16 + $0x280] sm:$0xff]  ;;  %v6353_v31 = vld [vmem:[#allocation16 + $0x290] sm:$0xff]  ;;  %v6356_v16 = vld [vmem:[#allocation16 + $0x2a8] sm:$0xff] }
 0x6e0   : > { %v6358_v41 = vld [vmem:[#allocation16 + $0x2b8] sm:$0xff]  ;;  %v6361_v3 = vld [vmem:[#allocation16 + $0x2d0] sm:$0xff] }
 0x6e2   : > { %8414 = vmatpush1.bf16.msra.mxu1 %v8413_v35  ;;  %v6090_v35 = vld [vmem:[#allocation12 + $0x5f8] sm:$0xff] }
 0x6e3   : > { %8416 = vmatprep.subr.bf16.mxu1 %v8415_v62  ;;  %v8449_v62 = vpack.c.bf16 %v6081_v17, %v6077_v63  ;;  %v8451_v22 = vpack.c.bf16 %v6090_v35, %v6086_v49  ;;  %v8539_v63 = vpack.c.bf16 %v6358_v41, %v6356_v16  ;;  %v6355_v17 = vld [vmem:[#allocation16 + $0x2a0] sm:$0xff]  ;;  %v6357_v49 = vld [vmem:[#allocation16 + $0x2b0] sm:$0xff]  ;;  %v6258_v35 = vrot.slane %v6241_v11, %v3391_v19  ;;  %v6392_v41 = vld [vmem:[#allocation16 + $0x3c8] sm:$0xff] }
 0x6e4   : > { %v8541_v44 = vpack.c.bf16 %v6357_v49, %v6355_v17  ;;  %v6363_v19 = vld [vmem:[#allocation16 + $0x2e0] sm:$0xff]  ;;  %v6389_v16 = vld [vmem:[#allocation16 + $0x3b0] sm:$0xff] }
 0x6e5   : > { %v6391_v17 = vld [vmem:[#allocation16 + $0x3c0] sm:$0xff]  ;;  %v6393_v49 = vld [vmem:[#allocation16 + $0x3d0] sm:$0xff] }
 0x6e6   : > { %8418 = vmatpush1.bf16.msra.mxu1 %v8417_v10  ;;  %v6332_v10 = vld [vmem:[#allocation16 + $0x1e8] sm:$0xff] }
 0x6e7   : > { %8420 = vmatprep.subr.bf16.mxu1 %v8419_v58  ;;  %v6334_v58 = vld [vmem:[#allocation16 + $0x1f8] sm:$0xff] }
 0x6e8   : > { %v8515_v34 = vpack.c.bf16 %v6334_v58, %v6332_v10 }
 0x6ea   : > { %8422 = vmatpush1.bf16.msra.mxu1 %v8421_v13  ;;  %8516 = vmatprep.subr.bf16.mxu0 %v8515_v34  ;;  %v6336_v13 = vld [vmem:[#allocation16 + $0x208] sm:$0xff]  ;;  %v6359_v34 = vld [vmem:[#allocation16 + $0x2c0] sm:$0xff] }
 0x6eb   : > { %8424 = vmatprep.subr.bf16.mxu1 %v8423_v7  ;;  %8518 = vmatpush1.bf16.msra.mxu0 %v8517_v51  ;;  %v8519_v7 = vpack.c.bf16 %v6338_v20, %v6336_v13  ;;  %v6366_v51 = vld [vmem:[#allocation16 + $0x2f8] sm:$0xff]  ;;  %v8545_v20 = vpack.c.bf16 %v6361_v3, %v6359_v34  ;;  %v6572_v34 = vld [vmem:[#allocation19 + $0x88] sm:$0xff] }
 0x6ed   : > { %8520 = vmatprep.subr.bf16.mxu0 %v8519_v7  ;;  %v6365_v7 = vld [vmem:[#allocation16 + $0x2f0] sm:$0xff] }
 0x6ee   : > { %8426 = vmatpush1.bf16.msra.mxu1 %v8425_v40 }
 0x6ef   : > { %8428 = vmatprep.subr.bf16.mxu1 %v8427_v1  ;;  %v6335_v1 = vld [vmem:[#allocation16 + $0x200] sm:$0xff] }
 0x6f0   : > { %v8521_v48 = vpack.c.bf16 %v6337_v18, %v6335_v1  ;;  %v6372_v1 = vld [vmem:[#allocation16 + $0x328] sm:$0xff]  ;;  %v6374_v18 = vld [vmem:[#allocation16 + $0x338] sm:$0xff] }
 0x6f1   : > { %v8555_v36 = vpack.c.bf16 %v6374_v18, %v6372_v1  ;;  %v6559_v1 = vld [vmem:[#allocation19 + $0x20] sm:$0xff]  ;;  %v6560_v18 = vld [vmem:[#allocation19 + $0x28] sm:$0xff] }
 0x6f2   : > { %8430 = vmatpush1.bf16.msra.mxu1 %v8429_v32 }
 0x6f3   : > { %8432 = vmatprep.subr.bf16.mxu1 %v8431_v9 }
 0x6f5   : > { %7112 = vmatmul.mubr.msk.f32.vlgmr.msra.gmra.mrb[88].mxu1 %vm5349_vm10, %v6092_v26 }
 0x6f6   : > { %8434 = vmatpush1.bf16.msra.mxu1 %v8433_v38  ;;  %6230 = vmatprep.mubr.f32.mxu1 %v9325_v50  ;;  %v6346_v38 = vld [vmem:[#allocation16 + $0x258] sm:$0xff] }
 0x6f7   : > { %8436 = vmatprep.subr.bf16.mxu1 %v8435_v23  ;;  %v8527_v23 = vpack.c.bf16 %v6346_v38, %v6344_v39  ;;  %v6377_v39 = vld [vmem:[#allocation16 + $0x350] sm:$0xff]  ;;  %v6380_v38 = vld [vmem:[#allocation16 + $0x368] sm:$0xff] }
 0x6fa   : > { %8438 = vmatpush1.bf16.msra.mxu1 %v8437_v2  ;;  %v8529_v2 = vpack.c.bf16 %v6345_v37, %v6343_v25  ;;  %v6379_v37 = vld [vmem:[#allocation16 + $0x360] sm:$0xff] }
 0x6fb   : > { %8440 = vmatprep.subr.bf16.mxu1 %v8439_v47  ;;  %v8531_v47 = vpack.c.bf16 %v6350_v24, %v6348_v12  ;;  %v6381_v12 = vld [vmem:[#allocation16 + $0x370] sm:$0xff]  ;;  %v6384_v24 = vld [vmem:[#allocation16 + $0x388] sm:$0xff] }
 0x6fe   : > { %8442 = vmatpush1.bf16.msra.mxu1 %v8441_v52  ;;  %v8533_v52 = vpack.c.bf16 %v6349_v53, %v6347_v43  ;;  %v6383_v53 = vld [vmem:[#allocation16 + $0x380] sm:$0xff] }
 0x6ff   : > { %8444 = vmatprep.subr.bf16.mxu1 %v8443_v28  ;;  %v8535_v28 = vpack.c.bf16 %v6354_v45, %v6352_v29  ;;  %v6385_v29 = vld [vmem:[#allocation16 + $0x390] sm:$0xff]  ;;  %v6388_v45 = vld [vmem:[#allocation16 + $0x3a8] sm:$0xff] }
 0x702   : > { %8446 = vmatpush1.bf16.msra.mxu1 %v8445_v21  ;;  %v8537_v21 = vpack.c.bf16 %v6353_v31, %v6351_v57  ;;  %v6387_v31 = vld [vmem:[#allocation16 + $0x3a0] sm:$0xff] }
 0x703   : > { %8448 = vmatprep.subr.bf16.mxu1 %v8447_v6  ;;  %v6254_v6 = vrot.slane %v6241_v11, %v10655_v0  ;;  %v6364_v0 = vld [vmem:[#allocation16 + $0x2e8] sm:$0xff] }
 0x704   : > { %v8547_v59 = vpack.c.bf16 %v6366_v51, %v6364_v0  ;;  %v6368_v11 = vld [vmem:[#allocation16 + $0x308] sm:$0xff] }
 0x705   : > { %v6555_v0 = vld [vmem:[#allocation19] sm:$0xff]  ;;  %v6556_v51 = vld [vmem:[#allocation19 + $0x8] sm:$0xff] }
 0x706   : > { %8450 = vmatpush1.bf16.msra.mxu1 %v8449_v62  ;;  %v6360_v62 = vld [vmem:[#allocation16 + $0x2c8] sm:$0xff] }
 0x707   : > { %8452 = vmatprep.subr.bf16.mxu1 %v8451_v22  ;;  %v6362_v22 = vld [vmem:[#allocation16 + $0x2d8] sm:$0xff] }
 0x708   : > { %v8543_v58 = vpack.c.bf16 %v6362_v22, %v6360_v62  ;;  %v6398_v62 = vld [vmem:[#allocation16 + $0x3f8] sm:$0xff]  ;;  %v8577_v22 = vpack.c.bf16 %v6393_v49, %v6391_v17 }
 0x70a   : > { %8454 = vmatpush1.bf16.msra.mxu1 %v8453_v33 }
 0x70d   : > { %7113 = vmatmul.mubr.msk.f32.vlgmr.msra.gmra.mrb[90].mxu1 %vm5349_vm10, %v6092_v26  ;;  %v8525_v26 = vpack.c.bf16 %v6341_v46, %v6339_v54  ;;  %v6375_v46 = vld [vmem:[#allocation16 + $0x340] sm:$0xff] }
 0x7c8   : > { %v6161_v14 = vpop.f32.mrb[88].mxu1 }
 0x7c9   : > { %v6263_v40 = vadd.f32 %v6246_v15, %v6161_v14  ;;  %v6163_v42 = vpop.f32.mrb[89].mxu1  ;;  %v6370_v15 = vld [vmem:[#allocation16 + $0x318] sm:$0xff] }
 0x7ca   : > { %v6264_v4 = vadd.f32 %v6250_v60, %v6163_v42  ;;  %v8549_v60 = vpack.c.bf16 %v6365_v7, %v6363_v19  ;;  %v8551_v14 = vpack.c.bf16 %v6370_v15, %v6368_v11  ;;  %v6369_v42 = vld [vmem:[#allocation16 + $0x310] sm:$0xff]  ;;  %v6558_v15 = vld [vmem:[#allocation19 + $0x18] sm:$0xff] }
 0x7cb   : > { %v6267_v9 = vmax.f32 %v6263_v40, 0.0  ;;  %v6367_v40 = vld [vmem:[#allocation16 + $0x300] sm:$0xff]  ;;  %v6557_v11 = vld [vmem:[#allocation19 + $0x10] sm:$0xff] }
 0x7cc   : > { %v6268_v32 = vmax.f32 %v6264_v4, 0.0  ;;  %v8553_v4 = vpack.c.bf16 %v6369_v42, %v6367_v40  ;;  %v8589_v40 = vpack.c.bf16 %v6558_v15, %v6557_v11  ;;  %v6669_v15 = vld [vmem:[%s11249_s13 + $0x50] sm:$0xff] }
 0x7ce   : > { %6475 = vmatprep.mubr.f32.mxu0 %v6268_v32  ;;  %v6373_v32 = vld [vmem:[#allocation16 + $0x330] sm:$0xff] }
 0x7cf   : > { %6476 = vmatmul.mubr.f32.vlgmr.msra.gmra.mrb[116].mxu0 %v6267_v9  ;;  %v6378_v9 = vld [vmem:[#allocation16 + $0x358] sm:$0xff] }
 0x7d0   : > { %8522 = vmatpush1.bf16.msra.mxu0 %v8521_v48  ;;  %v6376_v48 = vld [vmem:[#allocation16 + $0x348] sm:$0xff] }
 0x7d1   : > { %8524 = vmatprep.subr.bf16.mxu0 %v8523_v55  ;;  %v8557_v55 = vpack.c.bf16 %v6373_v32, %v6371_v30  ;;  %v8559_v54 = vpack.c.bf16 %v6378_v9, %v6376_v48  ;;  %v8593_v30 = vpack.c.bf16 %v6560_v18, %v6559_v1  ;;  %v6562_v48 = vld [vmem:[#allocation19 + $0x38] sm:$0xff]  ;;  %v6579_v9 = vld [vmem:[#allocation19 + $0xc0] sm:$0xff]  ;;  %v6673_v18 = vld [vmem:[%s11249_s13 + $0x70] sm:$0xff] }
 0x7d4   : > { %8526 = vmatpush1.bf16.msra.mxu0 %v8525_v26  ;;  %v6382_v26 = vld [vmem:[#allocation16 + $0x378] sm:$0xff] }
 0x7d5   : > { %8528 = vmatprep.subr.bf16.mxu0 %v8527_v23  ;;  %v8561_v23 = vpack.c.bf16 %v6377_v39, %v6375_v46  ;;  %v8563_v25 = vpack.c.bf16 %v6382_v26, %v6380_v38  ;;  %v6563_v39 = vld [vmem:[#allocation19 + $0x40] sm:$0xff]  ;;  %v6564_v38 = vld [vmem:[#allocation19 + $0x48] sm:$0xff]  ;;  %v6581_v26 = vld [vmem:[#allocation19 + $0xd0] sm:$0xff] }
 0x7d8   : > { %8530 = vmatpush1.bf16.msra.mxu0 %v8529_v2  ;;  %v6386_v2 = vld [vmem:[#allocation16 + $0x398] sm:$0xff] }
 0x7d9   : > { %8532 = vmatprep.subr.bf16.mxu0 %v8531_v47  ;;  %v8565_v47 = vpack.c.bf16 %v6381_v12, %v6379_v37  ;;  %v8567_v43 = vpack.c.bf16 %v6386_v2, %v6384_v24  ;;  %v6565_v12 = vld [vmem:[#allocation19 + $0x50] sm:$0xff]  ;;  %v6566_v24 = vld [vmem:[#allocation19 + $0x58] sm:$0xff]  ;;  %v6583_v2 = vld [vmem:[#allocation19 + $0xe0] sm:$0xff] }
 0x7dc   : > { %8534 = vmatpush1.bf16.msra.mxu0 %v8533_v52  ;;  %v6390_v52 = vld [vmem:[#allocation16 + $0x3b8] sm:$0xff] }
 0x7dd   : > { %8536 = vmatprep.subr.bf16.mxu0 %v8535_v28  ;;  %v8569_v28 = vpack.c.bf16 %v6385_v29, %v6383_v53  ;;  %v8571_v57 = vpack.c.bf16 %v6390_v52, %v6388_v45  ;;  %v6567_v29 = vld [vmem:[#allocation19 + $0x60] sm:$0xff]  ;;  %v6568_v45 = vld [vmem:[#allocation19 + $0x68] sm:$0xff] }
 0x7de   : > { %v8609_v52 = vpack.c.bf16 %v6568_v45, %v6567_v29 }
 0x7e0   : > { %8538 = vmatpush1.bf16.msra.mxu0 %v8537_v21  ;;  %v6232_v27 = vpop.f32.mrb[90].mxu1  ;;  %v6394_v21 = vld [vmem:[#allocation16 + $0x3d8] sm:$0xff] }
 0x7e1   : > { %v11127_v33 = vadd.f32 %v6254_v6, %v6232_v27  ;;  %v6234_v10 = vpop.f32.mrb[91].mxu1  ;;  %8540 = vmatprep.subr.bf16.mxu0 %v8539_v63  ;;  %v8573_v6 = vpack.c.bf16 %v6389_v16, %v6387_v31  ;;  %v8575_v63 = vpack.c.bf16 %v6394_v21, %v6392_v41  ;;  %v6569_v16 = vld [vmem:[#allocation19 + $0x70] sm:$0xff]  ;;  %v6570_v41 = vld [vmem:[#allocation19 + $0x78] sm:$0xff] }
 0x7e2   : > { %v6266_v61 = vadd.f32 %v6258_v35, %v6234_v10  ;;  %v6396_v35 = vld [vmem:[#allocation16 + $0x3e8] sm:$0xff]  ;;  %v6397_v10 = vld [vmem:[#allocation16 + $0x3f0] sm:$0xff]  ;;  %v8613_v21 = vpack.c.bf16 %v6570_v41, %v6569_v16 }
 0x7e3   : > { %v8579_v27 = vpack.c.bf16 %v6398_v62, %v6396_v35  ;;  %v6269_v19 = vmax.f32 %v11127_v33, 0.0  ;;  %v6561_v33 = vld [vmem:[#allocation19 + $0x30] sm:$0xff] }
 0x7e4   : > { %v6270_v13 = vmax.f32 %v6266_v61, 0.0  ;;  %8542 = vmatpush1.bf16.msra.mxu0 %v8541_v44  ;;  %v6395_v44 = vld [vmem:[#allocation16 + $0x3e0] sm:$0xff] }
 0x7e5   : > { %8544 = vmatprep.subr.bf16.mxu0 %v8543_v58  ;;  %v6571_v58 = vld [vmem:[#allocation19 + $0x80] sm:$0xff]  ;;  %v8581_v3 = vpack.c.bf16 %v6397_v10, %v6395_v44 }
 0x7e6   : > { %6546 = vmatprep.mubr.f32.mxu0 %v6270_v13  ;;  %v8583_v61 = vpack.c.bf16 %v6572_v34, %v6571_v58  ;;  %v6573_v13 = vld [vmem:[#allocation19 + $0x90] sm:$0xff] }
 0x7e8   : > { %8546 = vmatpush1.bf16.msra.mxu0 %v8545_v20  ;;  %v6574_v20 = vld [vmem:[#allocation19 + $0x98] sm:$0xff] }
 0x7e9   : > { %8548 = vmatprep.subr.bf16.mxu0 %v8547_v59  ;;  %v8585_v59 = vpack.c.bf16 %v6556_v51, %v6555_v0  ;;  %v8587_v7 = vpack.c.bf16 %v6574_v20, %v6573_v13  ;;  %v6664_v0 = vld [vmem:[%s11249_s13 + $0x28] sm:$0xff]  ;;  %v6665_v13 = vld [vmem:[%s11249_s13 + $0x30] sm:$0xff]  ;;  %v6666_v20 = vld [vmem:[%s11249_s13 + $0x38] sm:$0xff] }
 0x7ec   : > { %8550 = vmatpush1.bf16.msra.mxu0 %v8549_v60  ;;  %v6575_v60 = vld [vmem:[#allocation19 + $0xa0] sm:$0xff] }
 0x7ed   : > { %8552 = vmatprep.subr.bf16.mxu0 %v8551_v14  ;;  %v6576_v14 = vld [vmem:[#allocation19 + $0xa8] sm:$0xff] }
 0x7ee   : > { %v8591_v42 = vpack.c.bf16 %v6576_v14, %v6575_v60  ;;  %v6670_v60 = vld [vmem:[%s11249_s13 + $0x58] sm:$0xff] }
 0x7ef   : > { %v8631_v14 = vpack.c.bf16 %v6670_v60, %v6669_v15 }
 0x7f0   : > { %8554 = vmatpush1.bf16.msra.mxu0 %v8553_v4  ;;  %v6577_v4 = vld [vmem:[#allocation19 + $0xb0] sm:$0xff] }
 0x7f1   : > { %8556 = vmatprep.subr.bf16.mxu0 %v8555_v36  ;;  %v6578_v36 = vld [vmem:[#allocation19 + $0xb8] sm:$0xff] }
 0x7f2   : > { %v8595_v32 = vpack.c.bf16 %v6578_v36, %v6577_v4  ;;  %v6674_v4 = vld [vmem:[%s11249_s13 + $0x78] sm:$0xff] }
 0x7f3   : > { %v8637_v36 = vpack.c.bf16 %v6674_v4, %v6673_v18 }
 0x7f4   : > { %8558 = vmatpush1.bf16.msra.mxu0 %v8557_v55  ;;  %v6580_v55 = vld [vmem:[#allocation19 + $0xc8] sm:$0xff] }
 0x7f5   : > { %8560 = vmatprep.subr.bf16.mxu0 %v8559_v54  ;;  %v8597_v54 = vpack.c.bf16 %v6562_v48, %v6561_v33  ;;  %v8599_v46 = vpack.c.bf16 %v6580_v55, %v6579_v9  ;;  %v6675_v55 = vld [vmem:[#allocation22] sm:$0x1] }
 0x7f8   : > { %8562 = vmatpush1.bf16.msra.mxu0 %v8561_v23  ;;  %v6582_v23 = vld [vmem:[#allocation19 + $0xd8] sm:$0xff] }
 0x7f9   : > { %8564 = vmatprep.subr.bf16.mxu0 %v8563_v25  ;;  %v8601_v25 = vpack.c.bf16 %v6564_v38, %v6563_v39  ;;  %v8603_v37 = vpack.c.bf16 %v6582_v23, %v6581_v26 }
 0x7fc   : > { %8566 = vmatpush1.bf16.msra.mxu0 %v8565_v47  ;;  %v6584_v47 = vld [vmem:[#allocation19 + $0xe8] sm:$0xff] }
 0x7fd   : > { %8568 = vmatprep.subr.bf16.mxu0 %v8567_v43  ;;  %v8605_v43 = vpack.c.bf16 %v6566_v24, %v6565_v12  ;;  %v8607_v53 = vpack.c.bf16 %v6584_v47, %v6583_v2 }
 0x800   : > { %8570 = vmatpush1.bf16.msra.mxu0 %v8569_v28  ;;  %v6585_v28 = vld [vmem:[#allocation19 + $0xf0] sm:$0xff] }
 0x801   : > { %8572 = vmatprep.subr.bf16.mxu0 %v8571_v57  ;;  %v6586_v57 = vld [vmem:[#allocation19 + $0xf8] sm:$0xff] }
 0x802   : > { %v8611_v31 = vpack.c.bf16 %v6586_v57, %v6585_v28 }
 0x804   : > { %8574 = vmatpush1.bf16.msra.mxu0 %v8573_v6  ;;  %v6399_v6 = vld [vmem:[#allocation18] sm:$0x3] }
 0x805   : > { %8576 = vmatprep.subr.bf16.mxu0 %v8575_v63  ;;  %v6404_v63 = vrot.slane %v6399_v6, %v10652_v8  ;;  %v6408_v17 = vrot.slane %v6399_v6, %v10658_v56  ;;  %v6661_v8 = vld [vmem:[%s11249_s13 + $0x10] sm:$0xff]  ;;  %v6662_v56 = vld [vmem:[%s11249_s13 + $0x18] sm:$0xff] }
 0x808   : > { %8578 = vmatpush1.bf16.msra.mxu0 %v8577_v22  ;;  %v6659_v22 = vld [vmem:[%s11249_s13] sm:$0xff] }
 0x809   : > { %8580 = vmatprep.subr.bf16.mxu0 %v8579_v27  ;;  %v6660_v27 = vld [vmem:[%s11249_s13 + $0x8] sm:$0xff] }
 0x80a   : > { %v8616_v58 = vpack.c.bf16 %v6660_v27, %v6659_v22 }
 0x80c   : > { %8582 = vmatpush1.bf16.msra.mxu0 %v8581_v3  ;;  %v8619_v3 = vpack.c.bf16 %v6662_v56, %v6661_v8 }
 0x80d   : > { %8584 = vmatprep.subr.bf16.mxu0 %v8583_v61  ;;  %v6663_v61 = vld [vmem:[%s11249_s13 + $0x20] sm:$0xff] }
 0x80e   : > { %v8622_v51 = vpack.c.bf16 %v6664_v0, %v6663_v61 }
 0x80f   : > { %6547 = vmatmul.mubr.f32.vlgmr.msra.gmra.mrb[116].mxu0 %v6269_v19  ;;  %v6667_v19 = vld [vmem:[%s11249_s13 + $0x40] sm:$0xff] }
 0x810   : > { %8586 = vmatpush3.bf16.msra.mxu0 %v8585_v59  ;;  %v8625_v59 = vpack.c.bf16 %v6666_v20, %v6665_v13 }
 0x811   : > { %8588 = vmatprep.subr.bf16.mxu0 %v8587_v7  ;;  %v6668_v7 = vld [vmem:[%s11249_s13 + $0x48] sm:$0xff] }
 0x812   : > { %v8628_v11 = vpack.c.bf16 %v6668_v7, %v6667_v19 }
 0x814   : > { %8590 = vmatpush3.bf16.msra.mxu0 %v8589_v40  ;;  %v6671_v40 = vld [vmem:[%s11249_s13 + $0x60] sm:$0xff] }
 0x815   : > { %8592 = vmatprep.subr.bf16.mxu0 %v8591_v42  ;;  %v6672_v42 = vld [vmem:[%s11249_s13 + $0x68] sm:$0xff] }
 0x816   : > { %v8634_v1 = vpack.c.bf16 %v6672_v42, %v6671_v40 }
 0x818   : > { %8594 = vmatpush3.bf16.msra.mxu0 %v8593_v30 }
 0x819   : > { %8596 = vmatprep.subr.bf16.mxu0 %v8595_v32  ;;  %v6587_v32 = vld [vmem:[#allocation21] sm:$0x1] }
 0x81c   : > { %8598 = vmatpush3.bf16.msra.mxu0 %v8597_v54 }
 0x81d   : > { %8600 = vmatprep.subr.bf16.mxu0 %v8599_v46 }
 0x820   : > { %8602 = vmatpush3.bf16.msra.mxu0 %v8601_v25 }
 0x821   : > { %8604 = vmatprep.subr.bf16.mxu0 %v8603_v37 }
 0x824   : > { %8606 = vmatpush3.bf16.msra.mxu0 %v8605_v43 }
 0x825   : > { %8608 = vmatprep.subr.bf16.mxu0 %v8607_v53 }
 0x828   : > { %8610 = vmatpush3.bf16.msra.mxu0 %v8609_v52 }
 0x829   : > { %8612 = vmatprep.subr.bf16.mxu0 %v8611_v31 }
 0x82c   : > { %8614 = vmatpush3.bf16.msra.mxu0 %v8613_v21 }
 0x82d   : > { %8615 = vmatprep.subr.bf16.mxu0 %v9321_v5 }
 0x8e2   : > { %v6548_v49 = vpop.f32.mrb[116].mxu0 }
 0x8e3   : > { %v8639_v35 = vadd.f32 %v6548_v49, %v6404_v63  ;;  %v6550_v62 = vpop.f32.mrb[117].mxu0 }
 0x8e4   : > { %v8640_v44 = vadd.f32 %v6550_v62, %v6408_v17 }
 0x8e5   : > { %v6553_v34 = vmax.f32 %v8639_v35, 0.0 }
 0x8e6   : > { %v6554_v10 = vmax.f32 %v8640_v44, 0.0 }
 0x8e8   : > { %6652 = vmatprep.mubr.f32.mxu0 %v6554_v10 }
 0x8e9   : > { %6653 = vmatmul.mubr.f32.vlgmr.msra.gmra.mrb[118].mxu0 %v6553_v34 }
 0x8ea   : > { %8617 = vmatpush3.bf16.msra.mxu0 %v8616_v58  ;;  %7201 = vmatprep.mubr.msk.f32.mxu0 %vm9326_vm11, %v9325_v50 }
 0x8eb   : > { %8618 = vmatprep.subr.bf16.mxu0 %v9321_v5 }
 0x8ee   : > { %8620 = vmatpush3.bf16.msra.mxu0 %v8619_v3 }
 0x8ef   : > { %8621 = vmatprep.subr.bf16.mxu0 %v9321_v5 }
 0x8f2   : > { %8623 = vmatpush3.bf16.msra.mxu0 %v8622_v51 }
 0x8f3   : > { %8624 = vmatprep.subr.bf16.mxu0 %v9321_v5 }
 0x8f6   : > { %8626 = vmatpush3.bf16.msra.mxu0 %v8625_v59 }
 0x8f7   : > { %8627 = vmatprep.subr.bf16.mxu0 %v9321_v5 }
 0x8fa   : > { %8629 = vmatpush3.bf16.msra.mxu0 %v8628_v11 }
 0x8fb   : > { %8630 = vmatprep.subr.bf16.mxu0 %v9321_v5 }
 0x8fe   : > { %8632 = vmatpush3.bf16.msra.mxu0 %v8631_v14 }
 0x8ff   : > { %8633 = vmatprep.subr.bf16.mxu0 %v9321_v5 }
 0x902   : > { %8635 = vmatpush3.bf16.msra.mxu0 %v8634_v1 }
 0x903   : > { %8636 = vmatprep.subr.bf16.mxu0 %v9321_v5 }
 0x906   : > { %8638 = vmatpush3.bf16.msra.mxu0 %v8637_v36 }
 0x9bc   : > { %v7149_v30 = vpop.f32.mrb[118].mxu0 }
 0x9bd   : > { %v7150_v33 = vpop.f32.mrb[119].mxu0 }
 0x9be   : > { %v7151_v48 = vadd.f32 %v7150_v33, %v7149_v30 }
 0x9c0   : > { %v6655_v9 = vadd.f32 %v7151_v48, %v6587_v32 }
 0x9c2   : > { %v6658_v5 = vmax.f32 %v6655_v9, 0.0 }
 0x9c4   : > { %7202 = vmatmul.mubr.f32.vlgmr.msra.gmra.mrb[120].mxu0 %v6658_v5 }
 0xa97   : > { %v6742_v54 = vpop.f32.mrb[120].mxu0 }
 0xa98   : > { %v6743_v46 = vadd.f32 %v6742_v54, %v6675_v55  ;;  %v7203_v39 = vpop.f32.mrb[121].mxu0 }
 0xa9a   : > { %6747 = vst.msk [vmem:[%s660_s16] sm:$0x1] %vm6746_vm12, %v6743_v46 }
 0xa9b   : > { %9219 = shalt.err (!%p9216_p3)
}
 0xa9c   : > { %s9220_s3 = scalar_lea.hbm %s11194_s29, 16  ;;  %s9224_s23 = scalar_lea.hbm %s11312_s15, 32 }
 0xa9d   : > { %p9221_p4 = scmp.ne.s32.totalorder %s11194_s29, %s9220_s3  ;;  %p9225_p11 = scmp.lt.u32.totalorder %s11194_s29, %s11312_s15 }
 0xa9e   : > { %p9226_p13 = scmp.lt.u32.totalorder %s9224_s23, %s9220_s3  ;;  %p9228_p0 = scmp.lt.u32.totalorder %s9220_s3, %s11194_s29 }
 0xa9f   : > { %p9222_p7 = pnand %p9221_p4, %p11313_p6 }
 0xaa0   : > { %p9227_p1 = por %p9226_p13, %p9225_p11 }
 0xaa1   : > { %p9223_p8 = pneg %p9222_p7 }
 0xaa2   : > { %p9229_p5 = por %p9228_p0, %p9227_p1 }
 0xaa4   : > { %p9230_p9 = pnand %p9229_p5, %p9223_p8 }
 0xaa6   : > { %9233 = shalt.err (!%p9230_p9)
}
 0xaa7   : > { %8724 = dma.vmem_to_hbm [thread:$0]  (%p11313_p6), %s11196_s27, 16, %s11194_s29, %s6749_s7  }
 0xaa8 PF: > { %s11314_s20 = sld [smem:[#allocation36_spill]]  ;;  %s11315_s17 = sld [smem:[#allocation33_spill]] }
 0xaa9   : > { %s11316_s16 = sld [smem:[#allocation40_spill]] }
 0xaae   : > { %p8791_p12 = scmp.ge.s32.totalorder %s11314_s20, 2  ;;  %s6773_s24 = sand.u32 1, %s11315_s17  }
 0xaaf   : > { %p11317_p10 = scmp.ne.s32.totalorder %s11316_s16, 0  ;;  %s6774_s5 = scalar_lea.sflag [#allocation6], %s6773_s24 }
 0xab1   : > { %p8764_p2 = pnand %p8791_p12, %p11317_p10 }
 0xab3   : > { %9279 = dma.done.wait (!%p8764_p2), %s6774_s5, 16  }
 0xab4   : > { %9281 = vsyncadd (!%p8764_p2), %s6774_s5, 4294967280  ;;  %s11318_s21 = sld [smem:[#allocation37_spill]]  ;;  %s11319_s18 = sld [smem:[#allocation34_spill]] }
 0xab5   : > { %s11320_s19 = sld [smem:[#allocation35_spill]]  ;;  %s11321_s20 = sld [smem:[#allocation38_spill]] }
 0xaba   : > { %p32_p3 = scmp.ge.s32.totalorder %s11318_s21, 4  }
 0xabc   :  { %34 = sbr.rel (!%p32_p3) target bundleno = 16 (0x10), region = 193 }
 0xac3   :  { %6778 = vsyncpa [#allocation5], 1 }
 0xac4   :  { %6780 = vsyncpa [#allocation5 + $0x1], 1 }
 0xac5   :  { %6781 = vsyncpa [#allocation8], 1 }
 0xac6   :  { %6782 = vsyncpa [#allocation11], 1 }
 0xac7   :  { %6783 = vsyncpa [#allocation14], 1 }
 0xac8   :  { %6784 = vsyncpa [#allocation17], 1 }
 0xac9   :  { %6785 = vsyncpa [#allocation20], 1 }
 0xaca   :  { %6786 = vsyncpa [#allocation23], 1 }
 0xacb   :  { %6787 = vsyncpa [#allocation6], 1 }
 0xacc   :  { %6789 = vsyncpa [#allocation6 + $0x1], 1 }

</bundles_post_ra>
